<compile_context>
chip_gen: v6e
topology: v6e:2x2x1
jax: 0.10.0
libtpu: 0.0.40
codegen_flags: <defaults>
</compile_context>

<pallas_src>
import numpy as np
import jax
import jax.numpy as jnp
from jax.experimental import pallas as pl
from jax.experimental.pallas import tpu as pltpu

# ---------------------------------------------------------------------------
# Static network geometry (from NeuralNet.__init__ / forward)
# ---------------------------------------------------------------------------
C0, H0, W0 = 3, 32, 32                 # input image (NCHW)
C1, K1 = 16, 5                         # conv1: 3 -> 16, 5x5, VALID
H1, W1 = H0 - K1 + 1, W0 - K1 + 1      # 28, 28
HP1, WP1 = H1 // 2, W1 // 2            # 14, 14
C2, K2 = 32, 5                         # conv2: 16 -> 32, 5x5, VALID
H2, W2 = HP1 - K2 + 1, WP1 - K2 + 1    # 10, 10
HP2, WP2 = H2 // 2, W2 // 2            # 5, 5
FC1, FC2, FC3 = 120, 84, 2
FCPAD = 128                            # pad FC widths to one full lane tile

BLOCK_B = 8                            # images per grid step (multiple of 8)

L0 = W0 * C0                           # 96   conv1 input lanes per row
L1 = WP1 * C1                          # 224  pooled conv1 lanes per row
L2 = WP2 * C2                          # 160  pooled conv2 lanes per row


# ---------------------------------------------------------------------------
# Fused forward kernel (one grid step == BLOCK_B images)
# ---------------------------------------------------------------------------
def _fused_forward_kernel(x_ref, t1_ref, b1_ref, sw1_ref, sh1_ref,
                          t2_ref, b2_ref, sw2_ref, sh2_ref,
                          wf1_ref, bf1_ref, wf2_ref, bf2_ref, wf3_ref, bf3_ref,
                          o_ref, lhs1_ref, lhs2_ref, fcin_ref):
    f32, bf16 = jnp.float32, jnp.bfloat16
    dot = lambda a, b: jnp.dot(a, b, preferred_element_type=f32)
    B = BLOCK_B

    # ---- assemble batched, K-stacked conv1 LHS: (B*28, 5*96) = (224, 480) ----
    for b in range(B):
        for dy in range(K1):
            lhs1_ref[b * H1:(b + 1) * H1, dy * L0:(dy + 1) * L0] = \
                x_ref[b, dy:dy + H1, :]

    # ---- conv1 (single MXU matmul) + bias + ReLU -> (B*28, 448) f32 ----
    a1 = jnp.maximum(dot(lhs1_ref[...].astype(bf16), t1_ref[...]) + b1_ref[...], 0.0)
    a1 = a1.astype(bf16)

    # ---- maxpool 2x2 #1: exact 0/1 selection matmuls (W then batched H) ----
    px1 = jnp.maximum(dot(a1, sw1_ref[0]), dot(a1, sw1_ref[1])).astype(bf16)  # (B*28, 224)
    p1 = jnp.maximum(dot(sh1_ref[0], px1), dot(sh1_ref[1], px1))              # (B*14, 224) f32

    # ---- assemble batched, K-stacked conv2 LHS: (B*10, 5*224) = (80, 1120) ----
    for b in range(B):
        for dy in range(K2):
            lhs2_ref[b * H2:(b + 1) * H2, dy * L1:(dy + 1) * L1] = \
                p1[b * HP1 + dy: b * HP1 + dy + H2, :]

    # ---- conv2 (single MXU matmul) + bias + ReLU -> (B*10, 320) f32 ----
    a2 = jnp.maximum(dot(lhs2_ref[...].astype(bf16), t2_ref[...]) + b2_ref[...], 0.0)
    a2 = a2.astype(bf16)

    # ---- maxpool 2x2 #2 ----
    px2 = jnp.maximum(dot(a2, sw2_ref[0]), dot(a2, sw2_ref[1])).astype(bf16)  # (B*10, 160)
    p2 = jnp.maximum(dot(sh2_ref[0], px2), dot(sh2_ref[1], px2))              # (B*5, 160) f32

    # ---- NCHW-flatten into (B, 800) rows (fc1 weight rows permuted to match) ----
    for b in range(B):
        for r in range(HP2):
            fcin_ref[b:b + 1, r * L2:(r + 1) * L2] = p2[b * HP2 + r: b * HP2 + r + 1, :]

    # ---- fc1 / fc2 / fc3 (batched, lane-dense, FC widths padded to 128) ----
    h1 = jnp.maximum(dot(fcin_ref[...].astype(bf16), wf1_ref[...]) + bf1_ref[...], 0.0)
    h2 = jnp.maximum(dot(h1.astype(bf16), wf2_ref[...]) + bf2_ref[...], 0.0)
    o_ref[...] = dot(h2.astype(bf16), wf3_ref[...]) + bf3_ref[...]            # (B, 128) f32


# ---------------------------------------------------------------------------
# Host-side weight preparation (done once; plain numpy on tiny weights)
# ---------------------------------------------------------------------------
def _conv_toeplitz_interleaved(w, w_in, w_out):
    """w: (OC, IC, KH, KW) -> t[dy*w_in*IC + wi*IC + ic, xo*OC + oc] = w[oc, ic, dy, wi-xo]."""
    oc_n, ic_n, kh, kw = w.shape
    t = np.zeros((kh, w_in * ic_n, w_out * oc_n), np.float32)
    for dy in range(kh):
        for dx in range(kw):
            for xo in range(w_out):
                wi = xo + dx
                t[dy, wi * ic_n:(wi + 1) * ic_n, xo * oc_n:(xo + 1) * oc_n] = \
                    w[:, :, dy, dx].T
    return t.reshape(kh * w_in * ic_n, w_out * oc_n)


def _pool_w_selectors(w_out, oc_n):
    """0/1 matrices: 2x2 pool along W == max of two exact selection matmuls on lanes."""
    sw = np.zeros((2, 2 * w_out * oc_n, w_out * oc_n), np.float32)
    for xp in range(w_out):
        for oc in range(oc_n):
            sw[0, (2 * xp) * oc_n + oc, xp * oc_n + oc] = 1.0
            sw[1, (2 * xp + 1) * oc_n + oc, xp * oc_n + oc] = 1.0
    return sw


def _pool_h_selectors(nb, h_in, h_out):
    """Block-diagonal (over the batch block) even/odd row selectors for pool along H."""
    sh = np.zeros((2, nb * h_out, nb * h_in), np.float32)
    for b in range(nb):
        for ho in range(h_out):
            sh[0, b * h_out + ho, b * h_in + 2 * ho] = 1.0
            sh[1, b * h_out + ho, b * h_in + 2 * ho + 1] = 1.0
    return sh


def prepare_params(p):
    """Convert PyTorch-layout params into the fused kernel's operand layouts (bf16 MXU operands)."""
    B = BLOCK_B
    w1 = np.asarray(p["conv1_w"], np.float32)            # (16, 3, 5, 5)
    w2 = np.asarray(p["conv2_w"], np.float32)            # (32, 16, 5, 5)

    t1 = _conv_toeplitz_interleaved(w1, W0, W1)          # (480, 448) K-stacked
    b1 = np.tile(np.asarray(p["conv1_b"], np.float32), W1)[None, :]     # (1, 448)
    t2 = _conv_toeplitz_interleaved(w2, WP1, W2)         # (1120, 320) K-stacked
    b2 = np.tile(np.asarray(p["conv2_b"], np.float32), W2)[None, :]     # (1, 320)

    sw1 = _pool_w_selectors(WP1, C1)                     # (2, 448, 224)
    sw2 = _pool_w_selectors(WP2, C2)                     # (2, 320, 160)
    sh1 = _pool_h_selectors(B, H1, HP1)                  # (2, B*14, B*28)
    sh2 = _pool_h_selectors(B, H2, HP2)                  # (2, B*5,  B*10)

    # fc1: torch flatten order is NCHW (c*25 + h*5 + w); kernel fc-input lane index is
    # h*160 + w*32 + c, so permute weight rows accordingly; pad N to 128.
    f1 = np.asarray(p["fc1_w"], np.float32).reshape(FC1, C2, HP2, WP2)
    f1 = f1.transpose(2, 3, 1, 0).reshape(HP2 * WP2 * C2, FC1)          # (800, 120)
    wf1 = np.zeros((HP2 * WP2 * C2, FCPAD), np.float32); wf1[:, :FC1] = f1
    bf1 = np.zeros((1, FCPAD), np.float32); bf1[0, :FC1] = np.asarray(p["fc1_b"], np.float32)

    wf2 = np.zeros((FCPAD, FCPAD), np.float32)
    wf2[:FC1, :FC2] = np.asarray(p["fc2_w"], np.float32).T
    bf2 = np.zeros((1, FCPAD), np.float32); bf2[0, :FC2] = np.asarray(p["fc2_b"], np.float32)

    wf3 = np.zeros((FCPAD, FCPAD), np.float32)
    wf3[:FC2, :FC3] = np.asarray(p["fc3_w"], np.float32).T
    bf3 = np.zeros((1, FCPAD), np.float32); bf3[0, :FC3] = np.asarray(p["fc3_b"], np.float32)

    bfc = lambda a: jnp.asarray(a, jnp.bfloat16)   # MXU operands (weights / selectors)
    flt = lambda a: jnp.asarray(a, jnp.float32)    # biases (VPU adds stay f32)
    return {"t1": bfc(t1), "b1": flt(b1), "sw1": bfc(sw1), "sh1": bfc(sh1),
            "t2": bfc(t2), "b2": flt(b2), "sw2": bfc(sw2), "sh2": bfc(sh2),
            "wf1": bfc(wf1), "bf1": flt(bf1), "wf2": bfc(wf2), "bf2": flt(bf2),
            "wf3": bfc(wf3), "bf3": flt(bf3)}


# ---------------------------------------------------------------------------
# Forward pass (mirrors NeuralNet.forward)
# ---------------------------------------------------------------------------
def forward(x, prep):
    """x: (N, 3*32*32) float32 -> logits (N, 2)."""
    n = x.shape[0]
    B = BLOCK_B
    n_pad = ((n + B - 1) // B) * B

    # x.view(-1, 3, 32, 32) -> channel-interleaved lanes: (N, 32, 96) with lane = w*3 + c
    ximg = x.reshape(n, C0, H0, W0).astype(jnp.float32)
    ximg = ximg.transpose(0, 2, 3, 1).reshape(n, H0, L0)
    if n_pad != n:
        ximg = jnp.concatenate(
            [ximg, jnp.zeros((n_pad - n, H0, L0), jnp.float32)], axis=0)

    const2 = lambda i: (0, 0)
    const3 = lambda i: (0, 0, 0)

    out = pl.pallas_call(
        _fused_forward_kernel,
        out_shape=jax.ShapeDtypeStruct((n_pad, FCPAD), jnp.float32),
        grid=(n_pad // B,),
        in_specs=[
            pl.BlockSpec((B, H0, L0), lambda i: (i, 0, 0)),       # image block
            pl.BlockSpec((K1 * L0, W1 * C1), const2),             # conv1 Toeplitz (K-stacked)
            pl.BlockSpec((1, W1 * C1), const2),                   # conv1 bias row
            pl.BlockSpec((2, W1 * C1, L1), const3),               # pool1 W selectors
            pl.BlockSpec((2, B * HP1, B * H1), const3),           # pool1 H selectors (block-diag)
            pl.BlockSpec((K2 * L1, W2 * C2), const2),             # conv2 Toeplitz (K-stacked)
            pl.BlockSpec((1, W2 * C2), const2),                   # conv2 bias row
            pl.BlockSpec((2, W2 * C2, L2), const3),               # pool2 W selectors
            pl.BlockSpec((2, B * HP2, B * H2), const3),           # pool2 H selectors (block-diag)
            pl.BlockSpec((HP2 * L2, FCPAD), const2),              # fc1 weight (800, 128)
            pl.BlockSpec((1, FCPAD), const2),                     # fc1 bias
            pl.BlockSpec((FCPAD, FCPAD), const2),                 # fc2 weight
            pl.BlockSpec((1, FCPAD), const2),                     # fc2 bias
            pl.BlockSpec((FCPAD, FCPAD), const2),                 # fc3 weight
            pl.BlockSpec((1, FCPAD), const2),                     # fc3 bias
        ],
        out_specs=pl.BlockSpec((B, FCPAD), lambda i: (i, 0)),
        scratch_shapes=[
            pltpu.VMEM((B * H1, K1 * L0), jnp.float32),           # conv1 LHS (224, 480)
            pltpu.VMEM((B * H2, K2 * L1), jnp.float32),           # conv2 LHS (80, 1120)
            pltpu.VMEM((B, HP2 * L2), jnp.float32),               # fc input (8, 800)
        ],
        compiler_params=pltpu.CompilerParams(
            dimension_semantics=("parallel",),
            vmem_limit_bytes=32 * 1024 * 1024,
        ),
    )(ximg, prep["t1"], prep["b1"], prep["sw1"], prep["sh1"],
      prep["t2"], prep["b2"], prep["sw2"], prep["sh2"],
      prep["wf1"], prep["bf1"], prep["wf2"], prep["bf2"],
      prep["wf3"], prep["bf3"])
    return out[:n, :FC3]


# ---------------------------------------------------------------------------
# Parameters (deterministic synthetic init, PyTorch layouts) and XLA reference
# ---------------------------------------------------------------------------
def init_params(seed=0):
    key = jax.random.PRNGKey(seed)
    ks = jax.random.split(key, 10)

    def uinit(k, shape, fan_in):
        bound = 1.0 / np.sqrt(fan_in)
        return jax.random.uniform(k, shape, jnp.float32, -bound, bound)

    return {
        "conv1_w": uinit(ks[0], (C1, C0, K1, K1), C0 * K1 * K1),
        "conv1_b": uinit(ks[1], (C1,), C0 * K1 * K1),
        "conv2_w": uinit(ks[2], (C2, C1, K2, K2), C1 * K2 * K2),
        "conv2_b": uinit(ks[3], (C2,), C1 * K2 * K2),
        "fc1_w": uinit(ks[4], (FC1, C2 * HP2 * WP2), C2 * HP2 * WP2),
        "fc1_b": uinit(ks[5], (FC1,), C2 * HP2 * WP2),
        "fc2_w": uinit(ks[6], (FC2, FC1), FC1),
        "fc2_b": uinit(ks[7], (FC2,), FC1),
        "fc3_w": uinit(ks[8], (FC3, FC2), FC2),
        "fc3_b": uinit(ks[9], (FC3,), FC2),
    }


def reference_forward(x, p):
    """Pure-XLA f32 reference of NeuralNet.forward (for correctness checking only)."""
    n = x.shape[0]
    hi = jax.lax.Precision.HIGHEST

    def conv(inp, w, b):
        out = jax.lax.conv_general_dilated(
            inp, w, window_strides=(1, 1), padding="VALID",
            dimension_numbers=("NCHW", "OIHW", "NCHW"), precision=hi)
        return out + b[None, :, None, None]

    def pool(v):
        nn, c, h, w = v.shape
        return v.reshape(nn, c, h // 2, 2, w // 2, 2).max(axis=(3, 5))

    h = x.reshape(n, C0, H0, W0)
    h = pool(jax.nn.relu(conv(h, p["conv1_w"], p["conv1_b"])))
    h = pool(jax.nn.relu(conv(h, p["conv2_w"], p["conv2_b"])))
    h = h.reshape(n, C2 * HP2 * WP2)
    h = jax.nn.relu(jnp.dot(h, p["fc1_w"].T, precision=hi) + p["fc1_b"])
    h = jax.nn.relu(jnp.dot(h, p["fc2_w"].T, precision=hi) + p["fc2_b"])
    return jnp.dot(h, p["fc3_w"].T, precision=hi) + p["fc3_b"]


if __name__ == "__main__":
    batch = 2
    in_size = C0 * H0 * W0     # 3072, as implied by x.view(-1, 3, 32, 32)
    out_size = FC3             # 2

    params = init_params(seed=0)
    prep = prepare_params(params)
    x = jax.random.normal(jax.random.PRNGKey(0), (batch, in_size), dtype=jnp.float32)

    y = jax.jit(forward)(x, prep)
    y = jax.block_until_ready(y)

    assert y.shape == (batch, out_size), y.shape
    assert y.dtype == jnp.float32
    assert bool(jnp.all(jnp.isfinite(y)))

    # Correctness check against the f32 XLA reference; kernel matmuls use bf16
    # operands (f32 accumulation), so allow a bf16-sized tolerance.
    y_ref = jax.block_until_ready(jax.jit(reference_forward)(x, params))
    assert bool(jnp.allclose(y, y_ref, atol=2e-2, rtol=2e-2)), (y, y_ref)

    print("KERNEL_OK")
</pallas_src>

<mosaic_0001>
module attributes {stable_mosaic.version = 11 : i64} {
  func.func @_fused_forward_kernel(%arg0: i32, %arg1: memref<8x32x96xf32, #tpu.memory_space<vmem>>, %arg2: memref<480x448xbf16, #tpu.memory_space<vmem>>, %arg3: memref<1x448xf32, #tpu.memory_space<vmem>>, %arg4: memref<2x448x224xbf16, #tpu.memory_space<vmem>>, %arg5: memref<2x112x224xbf16, #tpu.memory_space<vmem>>, %arg6: memref<1120x320xbf16, #tpu.memory_space<vmem>>, %arg7: memref<1x320xf32, #tpu.memory_space<vmem>>, %arg8: memref<2x320x160xbf16, #tpu.memory_space<vmem>>, %arg9: memref<2x40x80xbf16, #tpu.memory_space<vmem>>, %arg10: memref<800x128xbf16, #tpu.memory_space<vmem>>, %arg11: memref<1x128xf32, #tpu.memory_space<vmem>>, %arg12: memref<128x128xbf16, #tpu.memory_space<vmem>>, %arg13: memref<1x128xf32, #tpu.memory_space<vmem>>, %arg14: memref<128x128xbf16, #tpu.memory_space<vmem>>, %arg15: memref<1x128xf32, #tpu.memory_space<vmem>>, %arg16: memref<8x128xf32, #tpu.memory_space<vmem>>, %arg17: memref<224x480xf32, #tpu.memory_space<vmem>>, %arg18: memref<80x1120xf32, #tpu.memory_space<vmem>>, %arg19: memref<8x800xf32, #tpu.memory_space<vmem>>) attributes {dimension_semantics = [#tpu.dimension_semantics<parallel>], iteration_bounds = array<i64: 1>, scalar_prefetch = 0 : i64, scratch_operands = 3 : i64, tpu.core_type = #tpu.core_type<tc>, window_params = [{transform_indices = @transform_0, window_bounds = array<i64: 8, 32, 96>}, {pipeline_mode = #tpu.pipeline_mode<synchronous>, transform_indices = @transform_1, window_bounds = array<i64: 480, 448>}, {pipeline_mode = #tpu.pipeline_mode<synchronous>, transform_indices = @transform_2, window_bounds = array<i64: 1, 448>}, {pipeline_mode = #tpu.pipeline_mode<synchronous>, transform_indices = @transform_3, window_bounds = array<i64: 2, 448, 224>}, {pipeline_mode = #tpu.pipeline_mode<synchronous>, transform_indices = @transform_4, window_bounds = array<i64: 2, 112, 224>}, {pipeline_mode = #tpu.pipeline_mode<synchronous>, transform_indices = @transform_5, window_bounds = array<i64: 1120, 320>}, {pipeline_mode = #tpu.pipeline_mode<synchronous>, transform_indices = @transform_6, window_bounds = array<i64: 1, 320>}, {pipeline_mode = #tpu.pipeline_mode<synchronous>, transform_indices = @transform_7, window_bounds = array<i64: 2, 320, 160>}, {pipeline_mode = #tpu.pipeline_mode<synchronous>, transform_indices = @transform_8, window_bounds = array<i64: 2, 40, 80>}, {pipeline_mode = #tpu.pipeline_mode<synchronous>, transform_indices = @transform_9, window_bounds = array<i64: 800, 128>}, {pipeline_mode = #tpu.pipeline_mode<synchronous>, transform_indices = @transform_10, window_bounds = array<i64: 1, 128>}, {pipeline_mode = #tpu.pipeline_mode<synchronous>, transform_indices = @transform_11, window_bounds = array<i64: 128, 128>}, {pipeline_mode = #tpu.pipeline_mode<synchronous>, transform_indices = @transform_12, window_bounds = array<i64: 1, 128>}, {pipeline_mode = #tpu.pipeline_mode<synchronous>, transform_indices = @transform_13, window_bounds = array<i64: 128, 128>}, {pipeline_mode = #tpu.pipeline_mode<synchronous>, transform_indices = @transform_14, window_bounds = array<i64: 1, 128>}, {transform_indices = @transform_15, window_bounds = array<i64: 8, 128>}]} {
    %c0 = arith.constant 0 : index
    %c0_0 = arith.constant 0 : index
    %c0_1 = arith.constant 0 : index
    %0 = vector.load %arg1[%c0, %c0_0, %c0_1] : memref<8x32x96xf32, #tpu.memory_space<vmem>>, vector<1x28x96xf32>
    %1 = vector.shape_cast %0 : vector<1x28x96xf32> to vector<28x96xf32>
    %c0_2 = arith.constant 0 : index
    %c0_3 = arith.constant 0 : index
    %2 = vector.load %arg17[%c0_2, %c0_3] : memref<224x480xf32, #tpu.memory_space<vmem>>, vector<28x96xf32>
    tpu.vector_store %arg17[%c0_2, %c0_3], %1 {strides = array<i32>} : memref<224x480xf32, #tpu.memory_space<vmem>>, vector<28x96xf32>,
    %c0_4 = arith.constant 0 : index
    %c1 = arith.constant 1 : index
    %c0_5 = arith.constant 0 : index
    %3 = vector.load %arg1[%c0_4, %c1, %c0_5] : memref<8x32x96xf32, #tpu.memory_space<vmem>>, vector<1x28x96xf32>
    %4 = vector.shape_cast %3 : vector<1x28x96xf32> to vector<28x96xf32>
    %c0_6 = arith.constant 0 : index
    %c96 = arith.constant 96 : index
    %5 = vector.load %arg17[%c0_6, %c96] : memref<224x480xf32, #tpu.memory_space<vmem>>, vector<28x96xf32>
    tpu.vector_store %arg17[%c0_6, %c96], %4 {strides = array<i32>} : memref<224x480xf32, #tpu.memory_space<vmem>>, vector<28x96xf32>,
    %c0_7 = arith.constant 0 : index
    %c2 = arith.constant 2 : index
    %c0_8 = arith.constant 0 : index
    %6 = vector.load %arg1[%c0_7, %c2, %c0_8] : memref<8x32x96xf32, #tpu.memory_space<vmem>>, vector<1x28x96xf32>
    %7 = vector.shape_cast %6 : vector<1x28x96xf32> to vector<28x96xf32>
    %c0_9 = arith.constant 0 : index
    %c192 = arith.constant 192 : index
    %8 = vector.load %arg17[%c0_9, %c192] : memref<224x480xf32, #tpu.memory_space<vmem>>, vector<28x96xf32>
    tpu.vector_store %arg17[%c0_9, %c192], %7 {strides = array<i32>} : memref<224x480xf32, #tpu.memory_space<vmem>>, vector<28x96xf32>,
    %c0_10 = arith.constant 0 : index
    %c3 = arith.constant 3 : index
    %c0_11 = arith.constant 0 : index
    %9 = vector.load %arg1[%c0_10, %c3, %c0_11] : memref<8x32x96xf32, #tpu.memory_space<vmem>>, vector<1x28x96xf32>
    %10 = vector.shape_cast %9 : vector<1x28x96xf32> to vector<28x96xf32>
    %c0_12 = arith.constant 0 : index
    %c288 = arith.constant 288 : index
    %11 = vector.load %arg17[%c0_12, %c288] : memref<224x480xf32, #tpu.memory_space<vmem>>, vector<28x96xf32>
    tpu.vector_store %arg17[%c0_12, %c288], %10 {strides = array<i32>} : memref<224x480xf32, #tpu.memory_space<vmem>>, vector<28x96xf32>,
    %c0_13 = arith.constant 0 : index
    %c4 = arith.constant 4 : index
    %c0_14 = arith.constant 0 : index
    %12 = vector.load %arg1[%c0_13, %c4, %c0_14] : memref<8x32x96xf32, #tpu.memory_space<vmem>>, vector<1x28x96xf32>
    %13 = vector.shape_cast %12 : vector<1x28x96xf32> to vector<28x96xf32>
    %c0_15 = arith.constant 0 : index
    %c384 = arith.constant 384 : index
    %14 = vector.load %arg17[%c0_15, %c384] : memref<224x480xf32, #tpu.memory_space<vmem>>, vector<28x96xf32>
    tpu.vector_store %arg17[%c0_15, %c384], %13 {strides = array<i32>} : memref<224x480xf32, #tpu.memory_space<vmem>>, vector<28x96xf32>,
    %c1_16 = arith.constant 1 : index
    %c0_17 = arith.constant 0 : index
    %c0_18 = arith.constant 0 : index
    %15 = vector.load %arg1[%c1_16, %c0_17, %c0_18] : memref<8x32x96xf32, #tpu.memory_space<vmem>>, vector<1x28x96xf32>
    %16 = vector.shape_cast %15 : vector<1x28x96xf32> to vector<28x96xf32>
    %c28 = arith.constant 28 : index
    %c0_19 = arith.constant 0 : index
    %17 = vector.load %arg17[%c28, %c0_19] : memref<224x480xf32, #tpu.memory_space<vmem>>, vector<28x96xf32>
    tpu.vector_store %arg17[%c28, %c0_19], %16 {strides = array<i32>} : memref<224x480xf32, #tpu.memory_space<vmem>>, vector<28x96xf32>,
    %c1_20 = arith.constant 1 : index
    %c1_21 = arith.constant 1 : index
    %c0_22 = arith.constant 0 : index
    %18 = vector.load %arg1[%c1_20, %c1_21, %c0_22] : memref<8x32x96xf32, #tpu.memory_space<vmem>>, vector<1x28x96xf32>
    %19 = vector.shape_cast %18 : vector<1x28x96xf32> to vector<28x96xf32>
    %c28_23 = arith.constant 28 : index
    %c96_24 = arith.constant 96 : index
    %20 = vector.load %arg17[%c28_23, %c96_24] : memref<224x480xf32, #tpu.memory_space<vmem>>, vector<28x96xf32>
    tpu.vector_store %arg17[%c28_23, %c96_24], %19 {strides = array<i32>} : memref<224x480xf32, #tpu.memory_space<vmem>>, vector<28x96xf32>,
    %c1_25 = arith.constant 1 : index
    %c2_26 = arith.constant 2 : index
    %c0_27 = arith.constant 0 : index
    %21 = vector.load %arg1[%c1_25, %c2_26, %c0_27] : memref<8x32x96xf32, #tpu.memory_space<vmem>>, vector<1x28x96xf32>
    %22 = vector.shape_cast %21 : vector<1x28x96xf32> to vector<28x96xf32>
    %c28_28 = arith.constant 28 : index
    %c192_29 = arith.constant 192 : index
    %23 = vector.load %arg17[%c28_28, %c192_29] : memref<224x480xf32, #tpu.memory_space<vmem>>, vector<28x96xf32>
    tpu.vector_store %arg17[%c28_28, %c192_29], %22 {strides = array<i32>} : memref<224x480xf32, #tpu.memory_space<vmem>>, vector<28x96xf32>,
    %c1_30 = arith.constant 1 : index
    %c3_31 = arith.constant 3 : index
    %c0_32 = arith.constant 0 : index
    %24 = vector.load %arg1[%c1_30, %c3_31, %c0_32] : memref<8x32x96xf32, #tpu.memory_space<vmem>>, vector<1x28x96xf32>
    %25 = vector.shape_cast %24 : vector<1x28x96xf32> to vector<28x96xf32>
    %c28_33 = arith.constant 28 : index
    %c288_34 = arith.constant 288 : index
    %26 = vector.load %arg17[%c28_33, %c288_34] : memref<224x480xf32, #tpu.memory_space<vmem>>, vector<28x96xf32>
    tpu.vector_store %arg17[%c28_33, %c288_34], %25 {strides = array<i32>} : memref<224x480xf32, #tpu.memory_space<vmem>>, vector<28x96xf32>,
    %c1_35 = arith.constant 1 : index
    %c4_36 = arith.constant 4 : index
    %c0_37 = arith.constant 0 : index
    %27 = vector.load %arg1[%c1_35, %c4_36, %c0_37] : memref<8x32x96xf32, #tpu.memory_space<vmem>>, vector<1x28x96xf32>
    %28 = vector.shape_cast %27 : vector<1x28x96xf32> to vector<28x96xf32>
    %c28_38 = arith.constant 28 : index
    %c384_39 = arith.constant 384 : index
    %29 = vector.load %arg17[%c28_38, %c384_39] : memref<224x480xf32, #tpu.memory_space<vmem>>, vector<28x96xf32>
    tpu.vector_store %arg17[%c28_38, %c384_39], %28 {strides = array<i32>} : memref<224x480xf32, #tpu.memory_space<vmem>>, vector<28x96xf32>,
    %c2_40 = arith.constant 2 : index
    %c0_41 = arith.constant 0 : index
    %c0_42 = arith.constant 0 : index
    %30 = vector.load %arg1[%c2_40, %c0_41, %c0_42] : memref<8x32x96xf32, #tpu.memory_space<vmem>>, vector<1x28x96xf32>
    %31 = vector.shape_cast %30 : vector<1x28x96xf32> to vector<28x96xf32>
    %c56 = arith.constant 56 : index
    %c0_43 = arith.constant 0 : index
    %32 = vector.load %arg17[%c56, %c0_43] : memref<224x480xf32, #tpu.memory_space<vmem>>, vector<28x96xf32>
    tpu.vector_store %arg17[%c56, %c0_43], %31 {strides = array<i32>} : memref<224x480xf32, #tpu.memory_space<vmem>>, vector<28x96xf32>,
    %c2_44 = arith.constant 2 : index
    %c1_45 = arith.constant 1 : index
    %c0_46 = arith.constant 0 : index
    %33 = vector.load %arg1[%c2_44, %c1_45, %c0_46] : memref<8x32x96xf32, #tpu.memory_space<vmem>>, vector<1x28x96xf32>
    %34 = vector.shape_cast %33 : vector<1x28x96xf32> to vector<28x96xf32>
    %c56_47 = arith.constant 56 : index
    %c96_48 = arith.constant 96 : index
    %35 = vector.load %arg17[%c56_47, %c96_48] : memref<224x480xf32, #tpu.memory_space<vmem>>, vector<28x96xf32>
    tpu.vector_store %arg17[%c56_47, %c96_48], %34 {strides = array<i32>} : memref<224x480xf32, #tpu.memory_space<vmem>>, vector<28x96xf32>,
    %c2_49 = arith.constant 2 : index
    %c2_50 = arith.constant 2 : index
    %c0_51 = arith.constant 0 : index
    %36 = vector.load %arg1[%c2_49, %c2_50, %c0_51] : memref<8x32x96xf32, #tpu.memory_space<vmem>>, vector<1x28x96xf32>
    %37 = vector.shape_cast %36 : vector<1x28x96xf32> to vector<28x96xf32>
    %c56_52 = arith.constant 56 : index
    %c192_53 = arith.constant 192 : index
    %38 = vector.load %arg17[%c56_52, %c192_53] : memref<224x480xf32, #tpu.memory_space<vmem>>, vector<28x96xf32>
    tpu.vector_store %arg17[%c56_52, %c192_53], %37 {strides = array<i32>} : memref<224x480xf32, #tpu.memory_space<vmem>>, vector<28x96xf32>,
    %c2_54 = arith.constant 2 : index
    %c3_55 = arith.constant 3 : index
    %c0_56 = arith.constant 0 : index
    %39 = vector.load %arg1[%c2_54, %c3_55, %c0_56] : memref<8x32x96xf32, #tpu.memory_space<vmem>>, vector<1x28x96xf32>
    %40 = vector.shape_cast %39 : vector<1x28x96xf32> to vector<28x96xf32>
    %c56_57 = arith.constant 56 : index
    %c288_58 = arith.constant 288 : index
    %41 = vector.load %arg17[%c56_57, %c288_58] : memref<224x480xf32, #tpu.memory_space<vmem>>, vector<28x96xf32>
    tpu.vector_store %arg17[%c56_57, %c288_58], %40 {strides = array<i32>} : memref<224x480xf32, #tpu.memory_space<vmem>>, vector<28x96xf32>,
    %c2_59 = arith.constant 2 : index
    %c4_60 = arith.constant 4 : index
    %c0_61 = arith.constant 0 : index
    %42 = vector.load %arg1[%c2_59, %c4_60, %c0_61] : memref<8x32x96xf32, #tpu.memory_space<vmem>>, vector<1x28x96xf32>
    %43 = vector.shape_cast %42 : vector<1x28x96xf32> to vector<28x96xf32>
    %c56_62 = arith.constant 56 : index
    %c384_63 = arith.constant 384 : index
    %44 = vector.load %arg17[%c56_62, %c384_63] : memref<224x480xf32, #tpu.memory_space<vmem>>, vector<28x96xf32>
    tpu.vector_store %arg17[%c56_62, %c384_63], %43 {strides = array<i32>} : memref<224x480xf32, #tpu.memory_space<vmem>>, vector<28x96xf32>,
    %c3_64 = arith.constant 3 : index
    %c0_65 = arith.constant 0 : index
    %c0_66 = arith.constant 0 : index
    %45 = vector.load %arg1[%c3_64, %c0_65, %c0_66] : memref<8x32x96xf32, #tpu.memory_space<vmem>>, vector<1x28x96xf32>
    %46 = vector.shape_cast %45 : vector<1x28x96xf32> to vector<28x96xf32>
    %c84 = arith.constant 84 : index
    %c0_67 = arith.constant 0 : index
    %47 = vector.load %arg17[%c84, %c0_67] : memref<224x480xf32, #tpu.memory_space<vmem>>, vector<28x96xf32>
    tpu.vector_store %arg17[%c84, %c0_67], %46 {strides = array<i32>} : memref<224x480xf32, #tpu.memory_space<vmem>>, vector<28x96xf32>,
    %c3_68 = arith.constant 3 : index
    %c1_69 = arith.constant 1 : index
    %c0_70 = arith.constant 0 : index
    %48 = vector.load %arg1[%c3_68, %c1_69, %c0_70] : memref<8x32x96xf32, #tpu.memory_space<vmem>>, vector<1x28x96xf32>
    %49 = vector.shape_cast %48 : vector<1x28x96xf32> to vector<28x96xf32>
    %c84_71 = arith.constant 84 : index
    %c96_72 = arith.constant 96 : index
    %50 = vector.load %arg17[%c84_71, %c96_72] : memref<224x480xf32, #tpu.memory_space<vmem>>, vector<28x96xf32>
    tpu.vector_store %arg17[%c84_71, %c96_72], %49 {strides = array<i32>} : memref<224x480xf32, #tpu.memory_space<vmem>>, vector<28x96xf32>,
    %c3_73 = arith.constant 3 : index
    %c2_74 = arith.constant 2 : index
    %c0_75 = arith.constant 0 : index
    %51 = vector.load %arg1[%c3_73, %c2_74, %c0_75] : memref<8x32x96xf32, #tpu.memory_space<vmem>>, vector<1x28x96xf32>
    %52 = vector.shape_cast %51 : vector<1x28x96xf32> to vector<28x96xf32>
    %c84_76 = arith.constant 84 : index
    %c192_77 = arith.constant 192 : index
    %53 = vector.load %arg17[%c84_76, %c192_77] : memref<224x480xf32, #tpu.memory_space<vmem>>, vector<28x96xf32>
    tpu.vector_store %arg17[%c84_76, %c192_77], %52 {strides = array<i32>} : memref<224x480xf32, #tpu.memory_space<vmem>>, vector<28x96xf32>,
    %c3_78 = arith.constant 3 : index
    %c3_79 = arith.constant 3 : index
    %c0_80 = arith.constant 0 : index
    %54 = vector.load %arg1[%c3_78, %c3_79, %c0_80] : memref<8x32x96xf32, #tpu.memory_space<vmem>>, vector<1x28x96xf32>
    %55 = vector.shape_cast %54 : vector<1x28x96xf32> to vector<28x96xf32>
    %c84_81 = arith.constant 84 : index
    %c288_82 = arith.constant 288 : index
    %56 = vector.load %arg17[%c84_81, %c288_82] : memref<224x480xf32, #tpu.memory_space<vmem>>, vector<28x96xf32>
    tpu.vector_store %arg17[%c84_81, %c288_82], %55 {strides = array<i32>} : memref<224x480xf32, #tpu.memory_space<vmem>>, vector<28x96xf32>,
    %c3_83 = arith.constant 3 : index
    %c4_84 = arith.constant 4 : index
    %c0_85 = arith.constant 0 : index
    %57 = vector.load %arg1[%c3_83, %c4_84, %c0_85] : memref<8x32x96xf32, #tpu.memory_space<vmem>>, vector<1x28x96xf32>
    %58 = vector.shape_cast %57 : vector<1x28x96xf32> to vector<28x96xf32>
    %c84_86 = arith.constant 84 : index
    %c384_87 = arith.constant 384 : index
    %59 = vector.load %arg17[%c84_86, %c384_87] : memref<224x480xf32, #tpu.memory_space<vmem>>, vector<28x96xf32>
    tpu.vector_store %arg17[%c84_86, %c384_87], %58 {strides = array<i32>} : memref<224x480xf32, #tpu.memory_space<vmem>>, vector<28x96xf32>,
    %c4_88 = arith.constant 4 : index
    %c0_89 = arith.constant 0 : index
    %c0_90 = arith.constant 0 : index
    %60 = vector.load %arg1[%c4_88, %c0_89, %c0_90] : memref<8x32x96xf32, #tpu.memory_space<vmem>>, vector<1x28x96xf32>
    %61 = vector.shape_cast %60 : vector<1x28x96xf32> to vector<28x96xf32>
    %c112 = arith.constant 112 : index
    %c0_91 = arith.constant 0 : index
    %62 = vector.load %arg17[%c112, %c0_91] : memref<224x480xf32, #tpu.memory_space<vmem>>, vector<28x96xf32>
    tpu.vector_store %arg17[%c112, %c0_91], %61 {strides = array<i32>} : memref<224x480xf32, #tpu.memory_space<vmem>>, vector<28x96xf32>,
    %c4_92 = arith.constant 4 : index
    %c1_93 = arith.constant 1 : index
    %c0_94 = arith.constant 0 : index
    %63 = vector.load %arg1[%c4_92, %c1_93, %c0_94] : memref<8x32x96xf32, #tpu.memory_space<vmem>>, vector<1x28x96xf32>
    %64 = vector.shape_cast %63 : vector<1x28x96xf32> to vector<28x96xf32>
    %c112_95 = arith.constant 112 : index
    %c96_96 = arith.constant 96 : index
    %65 = vector.load %arg17[%c112_95, %c96_96] : memref<224x480xf32, #tpu.memory_space<vmem>>, vector<28x96xf32>
    tpu.vector_store %arg17[%c112_95, %c96_96], %64 {strides = array<i32>} : memref<224x480xf32, #tpu.memory_space<vmem>>, vector<28x96xf32>,
    %c4_97 = arith.constant 4 : index
    %c2_98 = arith.constant 2 : index
    %c0_99 = arith.constant 0 : index
    %66 = vector.load %arg1[%c4_97, %c2_98, %c0_99] : memref<8x32x96xf32, #tpu.memory_space<vmem>>, vector<1x28x96xf32>
    %67 = vector.shape_cast %66 : vector<1x28x96xf32> to vector<28x96xf32>
    %c112_100 = arith.constant 112 : index
    %c192_101 = arith.constant 192 : index
    %68 = vector.load %arg17[%c112_100, %c192_101] : memref<224x480xf32, #tpu.memory_space<vmem>>, vector<28x96xf32>
    tpu.vector_store %arg17[%c112_100, %c192_101], %67 {strides = array<i32>} : memref<224x480xf32, #tpu.memory_space<vmem>>, vector<28x96xf32>,
    %c4_102 = arith.constant 4 : index
    %c3_103 = arith.constant 3 : index
    %c0_104 = arith.constant 0 : index
    %69 = vector.load %arg1[%c4_102, %c3_103, %c0_104] : memref<8x32x96xf32, #tpu.memory_space<vmem>>, vector<1x28x96xf32>
    %70 = vector.shape_cast %69 : vector<1x28x96xf32> to vector<28x96xf32>
    %c112_105 = arith.constant 112 : index
    %c288_106 = arith.constant 288 : index
    %71 = vector.load %arg17[%c112_105, %c288_106] : memref<224x480xf32, #tpu.memory_space<vmem>>, vector<28x96xf32>
    tpu.vector_store %arg17[%c112_105, %c288_106], %70 {strides = array<i32>} : memref<224x480xf32, #tpu.memory_space<vmem>>, vector<28x96xf32>,
    %c4_107 = arith.constant 4 : index
    %c4_108 = arith.constant 4 : index
    %c0_109 = arith.constant 0 : index
    %72 = vector.load %arg1[%c4_107, %c4_108, %c0_109] : memref<8x32x96xf32, #tpu.memory_space<vmem>>, vector<1x28x96xf32>
    %73 = vector.shape_cast %72 : vector<1x28x96xf32> to vector<28x96xf32>
    %c112_110 = arith.constant 112 : index
    %c384_111 = arith.constant 384 : index
    %74 = vector.load %arg17[%c112_110, %c384_111] : memref<224x480xf32, #tpu.memory_space<vmem>>, vector<28x96xf32>
    tpu.vector_store %arg17[%c112_110, %c384_111], %73 {strides = array<i32>} : memref<224x480xf32, #tpu.memory_space<vmem>>, vector<28x96xf32>,
    %c5 = arith.constant 5 : index
    %c0_112 = arith.constant 0 : index
    %c0_113 = arith.constant 0 : index
    %75 = vector.load %arg1[%c5, %c0_112, %c0_113] : memref<8x32x96xf32, #tpu.memory_space<vmem>>, vector<1x28x96xf32>
    %76 = vector.shape_cast %75 : vector<1x28x96xf32> to vector<28x96xf32>
    %c140 = arith.constant 140 : index
    %c0_114 = arith.constant 0 : index
    %77 = vector.load %arg17[%c140, %c0_114] : memref<224x480xf32, #tpu.memory_space<vmem>>, vector<28x96xf32>
    tpu.vector_store %arg17[%c140, %c0_114], %76 {strides = array<i32>} : memref<224x480xf32, #tpu.memory_space<vmem>>, vector<28x96xf32>,
    %c5_115 = arith.constant 5 : index
    %c1_116 = arith.constant 1 : index
    %c0_117 = arith.constant 0 : index
    %78 = vector.load %arg1[%c5_115, %c1_116, %c0_117] : memref<8x32x96xf32, #tpu.memory_space<vmem>>, vector<1x28x96xf32>
    %79 = vector.shape_cast %78 : vector<1x28x96xf32> to vector<28x96xf32>
    %c140_118 = arith.constant 140 : index
    %c96_119 = arith.constant 96 : index
    %80 = vector.load %arg17[%c140_118, %c96_119] : memref<224x480xf32, #tpu.memory_space<vmem>>, vector<28x96xf32>
    tpu.vector_store %arg17[%c140_118, %c96_119], %79 {strides = array<i32>} : memref<224x480xf32, #tpu.memory_space<vmem>>, vector<28x96xf32>,
    %c5_120 = arith.constant 5 : index
    %c2_121 = arith.constant 2 : index
    %c0_122 = arith.constant 0 : index
    %81 = vector.load %arg1[%c5_120, %c2_121, %c0_122] : memref<8x32x96xf32, #tpu.memory_space<vmem>>, vector<1x28x96xf32>
    %82 = vector.shape_cast %81 : vector<1x28x96xf32> to vector<28x96xf32>
    %c140_123 = arith.constant 140 : index
    %c192_124 = arith.constant 192 : index
    %83 = vector.load %arg17[%c140_123, %c192_124] : memref<224x480xf32, #tpu.memory_space<vmem>>, vector<28x96xf32>
    tpu.vector_store %arg17[%c140_123, %c192_124], %82 {strides = array<i32>} : memref<224x480xf32, #tpu.memory_space<vmem>>, vector<28x96xf32>,
    %c5_125 = arith.constant 5 : index
    %c3_126 = arith.constant 3 : index
    %c0_127 = arith.constant 0 : index
    %84 = vector.load %arg1[%c5_125, %c3_126, %c0_127] : memref<8x32x96xf32, #tpu.memory_space<vmem>>, vector<1x28x96xf32>
    %85 = vector.shape_cast %84 : vector<1x28x96xf32> to vector<28x96xf32>
    %c140_128 = arith.constant 140 : index
    %c288_129 = arith.constant 288 : index
    %86 = vector.load %arg17[%c140_128, %c288_129] : memref<224x480xf32, #tpu.memory_space<vmem>>, vector<28x96xf32>
    tpu.vector_store %arg17[%c140_128, %c288_129], %85 {strides = array<i32>} : memref<224x480xf32, #tpu.memory_space<vmem>>, vector<28x96xf32>,
    %c5_130 = arith.constant 5 : index
    %c4_131 = arith.constant 4 : index
    %c0_132 = arith.constant 0 : index
    %87 = vector.load %arg1[%c5_130, %c4_131, %c0_132] : memref<8x32x96xf32, #tpu.memory_space<vmem>>, vector<1x28x96xf32>
    %88 = vector.shape_cast %87 : vector<1x28x96xf32> to vector<28x96xf32>
    %c140_133 = arith.constant 140 : index
    %c384_134 = arith.constant 384 : index
    %89 = vector.load %arg17[%c140_133, %c384_134] : memref<224x480xf32, #tpu.memory_space<vmem>>, vector<28x96xf32>
    tpu.vector_store %arg17[%c140_133, %c384_134], %88 {strides = array<i32>} : memref<224x480xf32, #tpu.memory_space<vmem>>, vector<28x96xf32>,
    %c6 = arith.constant 6 : index
    %c0_135 = arith.constant 0 : index
    %c0_136 = arith.constant 0 : index
    %90 = vector.load %arg1[%c6, %c0_135, %c0_136] : memref<8x32x96xf32, #tpu.memory_space<vmem>>, vector<1x28x96xf32>
    %91 = vector.shape_cast %90 : vector<1x28x96xf32> to vector<28x96xf32>
    %c168 = arith.constant 168 : index
    %c0_137 = arith.constant 0 : index
    %92 = vector.load %arg17[%c168, %c0_137] : memref<224x480xf32, #tpu.memory_space<vmem>>, vector<28x96xf32>
    tpu.vector_store %arg17[%c168, %c0_137], %91 {strides = array<i32>} : memref<224x480xf32, #tpu.memory_space<vmem>>, vector<28x96xf32>,
    %c6_138 = arith.constant 6 : index
    %c1_139 = arith.constant 1 : index
    %c0_140 = arith.constant 0 : index
    %93 = vector.load %arg1[%c6_138, %c1_139, %c0_140] : memref<8x32x96xf32, #tpu.memory_space<vmem>>, vector<1x28x96xf32>
    %94 = vector.shape_cast %93 : vector<1x28x96xf32> to vector<28x96xf32>
    %c168_141 = arith.constant 168 : index
    %c96_142 = arith.constant 96 : index
    %95 = vector.load %arg17[%c168_141, %c96_142] : memref<224x480xf32, #tpu.memory_space<vmem>>, vector<28x96xf32>
    tpu.vector_store %arg17[%c168_141, %c96_142], %94 {strides = array<i32>} : memref<224x480xf32, #tpu.memory_space<vmem>>, vector<28x96xf32>,
    %c6_143 = arith.constant 6 : index
    %c2_144 = arith.constant 2 : index
    %c0_145 = arith.constant 0 : index
    %96 = vector.load %arg1[%c6_143, %c2_144, %c0_145] : memref<8x32x96xf32, #tpu.memory_space<vmem>>, vector<1x28x96xf32>
    %97 = vector.shape_cast %96 : vector<1x28x96xf32> to vector<28x96xf32>
    %c168_146 = arith.constant 168 : index
    %c192_147 = arith.constant 192 : index
    %98 = vector.load %arg17[%c168_146, %c192_147] : memref<224x480xf32, #tpu.memory_space<vmem>>, vector<28x96xf32>
    tpu.vector_store %arg17[%c168_146, %c192_147], %97 {strides = array<i32>} : memref<224x480xf32, #tpu.memory_space<vmem>>, vector<28x96xf32>,
    %c6_148 = arith.constant 6 : index
    %c3_149 = arith.constant 3 : index
    %c0_150 = arith.constant 0 : index
    %99 = vector.load %arg1[%c6_148, %c3_149, %c0_150] : memref<8x32x96xf32, #tpu.memory_space<vmem>>, vector<1x28x96xf32>
    %100 = vector.shape_cast %99 : vector<1x28x96xf32> to vector<28x96xf32>
    %c168_151 = arith.constant 168 : index
    %c288_152 = arith.constant 288 : index
    %101 = vector.load %arg17[%c168_151, %c288_152] : memref<224x480xf32, #tpu.memory_space<vmem>>, vector<28x96xf32>
    tpu.vector_store %arg17[%c168_151, %c288_152], %100 {strides = array<i32>} : memref<224x480xf32, #tpu.memory_space<vmem>>, vector<28x96xf32>,
    %c6_153 = arith.constant 6 : index
    %c4_154 = arith.constant 4 : index
    %c0_155 = arith.constant 0 : index
    %102 = vector.load %arg1[%c6_153, %c4_154, %c0_155] : memref<8x32x96xf32, #tpu.memory_space<vmem>>, vector<1x28x96xf32>
    %103 = vector.shape_cast %102 : vector<1x28x96xf32> to vector<28x96xf32>
    %c168_156 = arith.constant 168 : index
    %c384_157 = arith.constant 384 : index
    %104 = vector.load %arg17[%c168_156, %c384_157] : memref<224x480xf32, #tpu.memory_space<vmem>>, vector<28x96xf32>
    tpu.vector_store %arg17[%c168_156, %c384_157], %103 {strides = array<i32>} : memref<224x480xf32, #tpu.memory_space<vmem>>, vector<28x96xf32>,
    %c7 = arith.constant 7 : index
    %c0_158 = arith.constant 0 : index
    %c0_159 = arith.constant 0 : index
    %105 = vector.load %arg1[%c7, %c0_158, %c0_159] : memref<8x32x96xf32, #tpu.memory_space<vmem>>, vector<1x28x96xf32>
    %106 = vector.shape_cast %105 : vector<1x28x96xf32> to vector<28x96xf32>
    %c196 = arith.constant 196 : index
    %c0_160 = arith.constant 0 : index
    %107 = vector.load %arg17[%c196, %c0_160] : memref<224x480xf32, #tpu.memory_space<vmem>>, vector<28x96xf32>
    tpu.vector_store %arg17[%c196, %c0_160], %106 {strides = array<i32>} : memref<224x480xf32, #tpu.memory_space<vmem>>, vector<28x96xf32>,
    %c7_161 = arith.constant 7 : index
    %c1_162 = arith.constant 1 : index
    %c0_163 = arith.constant 0 : index
    %108 = vector.load %arg1[%c7_161, %c1_162, %c0_163] : memref<8x32x96xf32, #tpu.memory_space<vmem>>, vector<1x28x96xf32>
    %109 = vector.shape_cast %108 : vector<1x28x96xf32> to vector<28x96xf32>
    %c196_164 = arith.constant 196 : index
    %c96_165 = arith.constant 96 : index
    %110 = vector.load %arg17[%c196_164, %c96_165] : memref<224x480xf32, #tpu.memory_space<vmem>>, vector<28x96xf32>
    tpu.vector_store %arg17[%c196_164, %c96_165], %109 {strides = array<i32>} : memref<224x480xf32, #tpu.memory_space<vmem>>, vector<28x96xf32>,
    %c7_166 = arith.constant 7 : index
    %c2_167 = arith.constant 2 : index
    %c0_168 = arith.constant 0 : index
    %111 = vector.load %arg1[%c7_166, %c2_167, %c0_168] : memref<8x32x96xf32, #tpu.memory_space<vmem>>, vector<1x28x96xf32>
    %112 = vector.shape_cast %111 : vector<1x28x96xf32> to vector<28x96xf32>
    %c196_169 = arith.constant 196 : index
    %c192_170 = arith.constant 192 : index
    %113 = vector.load %arg17[%c196_169, %c192_170] : memref<224x480xf32, #tpu.memory_space<vmem>>, vector<28x96xf32>
    tpu.vector_store %arg17[%c196_169, %c192_170], %112 {strides = array<i32>} : memref<224x480xf32, #tpu.memory_space<vmem>>, vector<28x96xf32>,
    %c7_171 = arith.constant 7 : index
    %c3_172 = arith.constant 3 : index
    %c0_173 = arith.constant 0 : index
    %114 = vector.load %arg1[%c7_171, %c3_172, %c0_173] : memref<8x32x96xf32, #tpu.memory_space<vmem>>, vector<1x28x96xf32>
    %115 = vector.shape_cast %114 : vector<1x28x96xf32> to vector<28x96xf32>
    %c196_174 = arith.constant 196 : index
    %c288_175 = arith.constant 288 : index
    %116 = vector.load %arg17[%c196_174, %c288_175] : memref<224x480xf32, #tpu.memory_space<vmem>>, vector<28x96xf32>
    tpu.vector_store %arg17[%c196_174, %c288_175], %115 {strides = array<i32>} : memref<224x480xf32, #tpu.memory_space<vmem>>, vector<28x96xf32>,
    %c7_176 = arith.constant 7 : index
    %c4_177 = arith.constant 4 : index
    %c0_178 = arith.constant 0 : index
    %117 = vector.load %arg1[%c7_176, %c4_177, %c0_178] : memref<8x32x96xf32, #tpu.memory_space<vmem>>, vector<1x28x96xf32>
    %118 = vector.shape_cast %117 : vector<1x28x96xf32> to vector<28x96xf32>
    %c196_179 = arith.constant 196 : index
    %c384_180 = arith.constant 384 : index
    %119 = vector.load %arg17[%c196_179, %c384_180] : memref<224x480xf32, #tpu.memory_space<vmem>>, vector<28x96xf32>
    tpu.vector_store %arg17[%c196_179, %c384_180], %118 {strides = array<i32>} : memref<224x480xf32, #tpu.memory_space<vmem>>, vector<28x96xf32>,
    %c0_181 = arith.constant 0 : index
    %c0_182 = arith.constant 0 : index
    %120 = vector.load %arg17[%c0_181, %c0_182] : memref<224x480xf32, #tpu.memory_space<vmem>>, vector<224x480xf32>
    %121 = arith.truncf %120 : vector<224x480xf32> to vector<224x480xbf16>
    %c0_183 = arith.constant 0 : index
    %c0_184 = arith.constant 0 : index
    %122 = vector.load %arg2[%c0_183, %c0_184] : memref<480x448xbf16, #tpu.memory_space<vmem>>, vector<480x448xbf16>
    %cst = arith.constant dense<0.000000e+00> : vector<224x448xf32>
    %123 = tpu.matmul %121, %122, %cst {dimension_numbers = #tpu.dot_dimension_numbers<[1], [0], [0], [1], [0, 0, 1, 1], [], []>} : vector<224x480xbf16>, vector<480x448xbf16>, vector<224x448xf32> -> vector<224x448xf32>
    %c0_185 = arith.constant 0 : index
    %c0_186 = arith.constant 0 : index
    %124 = vector.load %arg3[%c0_185, %c0_186] : memref<1x448xf32, #tpu.memory_space<vmem>>, vector<1x448xf32>
    %125 = vector.broadcast %124 : vector<1x448xf32> to vector<224x448xf32>
    %126 = arith.addf %123, %125 : vector<224x448xf32>
    %cst_187 = arith.constant 0.000000e+00 : f32
    %127 = vector.broadcast %cst_187 : f32 to vector<224x448xf32>
    %128 = arith.maximumf %126, %127 : vector<224x448xf32>
    %129 = arith.truncf %128 : vector<224x448xf32> to vector<224x448xbf16>
    %c0_188 = arith.constant 0 : index
    %c0_189 = arith.constant 0 : index
    %c0_190 = arith.constant 0 : index
    %130 = vector.load %arg4[%c0_188, %c0_189, %c0_190] : memref<2x448x224xbf16, #tpu.memory_space<vmem>>, vector<1x448x224xbf16>
    %131 = vector.shape_cast %130 : vector<1x448x224xbf16> to vector<448x224xbf16>
    %cst_191 = arith.constant dense<0.000000e+00> : vector<224x224xf32>
    %132 = tpu.matmul %129, %131, %cst_191 {dimension_numbers = #tpu.dot_dimension_numbers<[1], [0], [0], [1], [0, 0, 1, 1], [], []>} : vector<224x448xbf16>, vector<448x224xbf16>, vector<224x224xf32> -> vector<224x224xf32>
    %c1_192 = arith.constant 1 : index
    %c0_193 = arith.constant 0 : index
    %c0_194 = arith.constant 0 : index
    %133 = vector.load %arg4[%c1_192, %c0_193, %c0_194] : memref<2x448x224xbf16, #tpu.memory_space<vmem>>, vector<1x448x224xbf16>
    %134 = vector.shape_cast %133 : vector<1x448x224xbf16> to vector<448x224xbf16>
    %cst_195 = arith.constant dense<0.000000e+00> : vector<224x224xf32>
    %135 = tpu.matmul %129, %134, %cst_195 {dimension_numbers = #tpu.dot_dimension_numbers<[1], [0], [0], [1], [0, 0, 1, 1], [], []>} : vector<224x448xbf16>, vector<448x224xbf16>, vector<224x224xf32> -> vector<224x224xf32>
    %136 = arith.maximumf %132, %135 : vector<224x224xf32>
    %137 = arith.truncf %136 : vector<224x224xf32> to vector<224x224xbf16>
    %c0_196 = arith.constant 0 : index
    %c0_197 = arith.constant 0 : index
    %c0_198 = arith.constant 0 : index
    %138 = vector.load %arg5[%c0_196, %c0_197, %c0_198] : memref<2x112x224xbf16, #tpu.memory_space<vmem>>, vector<1x112x224xbf16>
    %139 = vector.shape_cast %138 : vector<1x112x224xbf16> to vector<112x224xbf16>
    %cst_199 = arith.constant dense<0.000000e+00> : vector<112x224xf32>
    %140 = tpu.matmul %139, %137, %cst_199 {dimension_numbers = #tpu.dot_dimension_numbers<[1], [0], [0], [1], [0, 0, 1, 1], [], []>} : vector<112x224xbf16>, vector<224x224xbf16>, vector<112x224xf32> -> vector<112x224xf32>
    %c1_200 = arith.constant 1 : index
    %c0_201 = arith.constant 0 : index
    %c0_202 = arith.constant 0 : index
    %141 = vector.load %arg5[%c1_200, %c0_201, %c0_202] : memref<2x112x224xbf16, #tpu.memory_space<vmem>>, vector<1x112x224xbf16>
    %142 = vector.shape_cast %141 : vector<1x112x224xbf16> to vector<112x224xbf16>
    %cst_203 = arith.constant dense<0.000000e+00> : vector<112x224xf32>
    %143 = tpu.matmul %142, %137, %cst_203 {dimension_numbers = #tpu.dot_dimension_numbers<[1], [0], [0], [1], [0, 0, 1, 1], [], []>} : vector<112x224xbf16>, vector<224x224xbf16>, vector<112x224xf32> -> vector<112x224xf32>
    %144 = arith.maximumf %140, %143 : vector<112x224xf32>
    %145 = vector.extract_strided_slice %144 {offsets = [0, 0], sizes = [10, 224], strides = [1, 1]} : vector<112x224xf32> to vector<10x224xf32>
    %c0_204 = arith.constant 0 : index
    %c0_205 = arith.constant 0 : index
    %146 = vector.load %arg18[%c0_204, %c0_205] : memref<80x1120xf32, #tpu.memory_space<vmem>>, vector<10x224xf32>
    tpu.vector_store %arg18[%c0_204, %c0_205], %145 {strides = array<i32>} : memref<80x1120xf32, #tpu.memory_space<vmem>>, vector<10x224xf32>,
    %147 = vector.extract_strided_slice %144 {offsets = [1, 0], sizes = [10, 224], strides = [1, 1]} : vector<112x224xf32> to vector<10x224xf32>
    %c0_206 = arith.constant 0 : index
    %c224 = arith.constant 224 : index
    %148 = vector.load %arg18[%c0_206, %c224] : memref<80x1120xf32, #tpu.memory_space<vmem>>, vector<10x224xf32>
    tpu.vector_store %arg18[%c0_206, %c224], %147 {strides = array<i32>} : memref<80x1120xf32, #tpu.memory_space<vmem>>, vector<10x224xf32>,
    %149 = vector.extract_strided_slice %144 {offsets = [2, 0], sizes = [10, 224], strides = [1, 1]} : vector<112x224xf32> to vector<10x224xf32>
    %c0_207 = arith.constant 0 : index
    %c448 = arith.constant 448 : index
    %150 = vector.load %arg18[%c0_207, %c448] : memref<80x1120xf32, #tpu.memory_space<vmem>>, vector<10x224xf32>
    tpu.vector_store %arg18[%c0_207, %c448], %149 {strides = array<i32>} : memref<80x1120xf32, #tpu.memory_space<vmem>>, vector<10x224xf32>,
    %151 = vector.extract_strided_slice %144 {offsets = [3, 0], sizes = [10, 224], strides = [1, 1]} : vector<112x224xf32> to vector<10x224xf32>
    %c0_208 = arith.constant 0 : index
    %c672 = arith.constant 672 : index
    %152 = vector.load %arg18[%c0_208, %c672] : memref<80x1120xf32, #tpu.memory_space<vmem>>, vector<10x224xf32>
    tpu.vector_store %arg18[%c0_208, %c672], %151 {strides = array<i32>} : memref<80x1120xf32, #tpu.memory_space<vmem>>, vector<10x224xf32>,
    %153 = vector.extract_strided_slice %144 {offsets = [4, 0], sizes = [10, 224], strides = [1, 1]} : vector<112x224xf32> to vector<10x224xf32>
    %c0_209 = arith.constant 0 : index
    %c896 = arith.constant 896 : index
    %154 = vector.load %arg18[%c0_209, %c896] : memref<80x1120xf32, #tpu.memory_space<vmem>>, vector<10x224xf32>
    tpu.vector_store %arg18[%c0_209, %c896], %153 {strides = array<i32>} : memref<80x1120xf32, #tpu.memory_space<vmem>>, vector<10x224xf32>,
    %155 = vector.extract_strided_slice %144 {offsets = [14, 0], sizes = [10, 224], strides = [1, 1]} : vector<112x224xf32> to vector<10x224xf32>
    %c10 = arith.constant 10 : index
    %c0_210 = arith.constant 0 : index
    %156 = vector.load %arg18[%c10, %c0_210] : memref<80x1120xf32, #tpu.memory_space<vmem>>, vector<10x224xf32>
    tpu.vector_store %arg18[%c10, %c0_210], %155 {strides = array<i32>} : memref<80x1120xf32, #tpu.memory_space<vmem>>, vector<10x224xf32>,
    %157 = vector.extract_strided_slice %144 {offsets = [15, 0], sizes = [10, 224], strides = [1, 1]} : vector<112x224xf32> to vector<10x224xf32>
    %c10_211 = arith.constant 10 : index
    %c224_212 = arith.constant 224 : index
    %158 = vector.load %arg18[%c10_211, %c224_212] : memref<80x1120xf32, #tpu.memory_space<vmem>>, vector<10x224xf32>
    tpu.vector_store %arg18[%c10_211, %c224_212], %157 {strides = array<i32>} : memref<80x1120xf32, #tpu.memory_space<vmem>>, vector<10x224xf32>,
    %159 = vector.extract_strided_slice %144 {offsets = [16, 0], sizes = [10, 224], strides = [1, 1]} : vector<112x224xf32> to vector<10x224xf32>
    %c10_213 = arith.constant 10 : index
    %c448_214 = arith.constant 448 : index
    %160 = vector.load %arg18[%c10_213, %c448_214] : memref<80x1120xf32, #tpu.memory_space<vmem>>, vector<10x224xf32>
    tpu.vector_store %arg18[%c10_213, %c448_214], %159 {strides = array<i32>} : memref<80x1120xf32, #tpu.memory_space<vmem>>, vector<10x224xf32>,
    %161 = vector.extract_strided_slice %144 {offsets = [17, 0], sizes = [10, 224], strides = [1, 1]} : vector<112x224xf32> to vector<10x224xf32>
    %c10_215 = arith.constant 10 : index
    %c672_216 = arith.constant 672 : index
    %162 = vector.load %arg18[%c10_215, %c672_216] : memref<80x1120xf32, #tpu.memory_space<vmem>>, vector<10x224xf32>
    tpu.vector_store %arg18[%c10_215, %c672_216], %161 {strides = array<i32>} : memref<80x1120xf32, #tpu.memory_space<vmem>>, vector<10x224xf32>,
    %163 = vector.extract_strided_slice %144 {offsets = [18, 0], sizes = [10, 224], strides = [1, 1]} : vector<112x224xf32> to vector<10x224xf32>
    %c10_217 = arith.constant 10 : index
    %c896_218 = arith.constant 896 : index
    %164 = vector.load %arg18[%c10_217, %c896_218] : memref<80x1120xf32, #tpu.memory_space<vmem>>, vector<10x224xf32>
    tpu.vector_store %arg18[%c10_217, %c896_218], %163 {strides = array<i32>} : memref<80x1120xf32, #tpu.memory_space<vmem>>, vector<10x224xf32>,
    %165 = vector.extract_strided_slice %144 {offsets = [28, 0], sizes = [10, 224], strides = [1, 1]} : vector<112x224xf32> to vector<10x224xf32>
    %c20 = arith.constant 20 : index
    %c0_219 = arith.constant 0 : index
    %166 = vector.load %arg18[%c20, %c0_219] : memref<80x1120xf32, #tpu.memory_space<vmem>>, vector<10x224xf32>
    tpu.vector_store %arg18[%c20, %c0_219], %165 {strides = array<i32>} : memref<80x1120xf32, #tpu.memory_space<vmem>>, vector<10x224xf32>,
    %167 = vector.extract_strided_slice %144 {offsets = [29, 0], sizes = [10, 224], strides = [1, 1]} : vector<112x224xf32> to vector<10x224xf32>
    %c20_220 = arith.constant 20 : index
    %c224_221 = arith.constant 224 : index
    %168 = vector.load %arg18[%c20_220, %c224_221] : memref<80x1120xf32, #tpu.memory_space<vmem>>, vector<10x224xf32>
    tpu.vector_store %arg18[%c20_220, %c224_221], %167 {strides = array<i32>} : memref<80x1120xf32, #tpu.memory_space<vmem>>, vector<10x224xf32>,
    %169 = vector.extract_strided_slice %144 {offsets = [30, 0], sizes = [10, 224], strides = [1, 1]} : vector<112x224xf32> to vector<10x224xf32>
    %c20_222 = arith.constant 20 : index
    %c448_223 = arith.constant 448 : index
    %170 = vector.load %arg18[%c20_222, %c448_223] : memref<80x1120xf32, #tpu.memory_space<vmem>>, vector<10x224xf32>
    tpu.vector_store %arg18[%c20_222, %c448_223], %169 {strides = array<i32>} : memref<80x1120xf32, #tpu.memory_space<vmem>>, vector<10x224xf32>,
    %171 = vector.extract_strided_slice %144 {offsets = [31, 0], sizes = [10, 224], strides = [1, 1]} : vector<112x224xf32> to vector<10x224xf32>
    %c20_224 = arith.constant 20 : index
    %c672_225 = arith.constant 672 : index
    %172 = vector.load %arg18[%c20_224, %c672_225] : memref<80x1120xf32, #tpu.memory_space<vmem>>, vector<10x224xf32>
    tpu.vector_store %arg18[%c20_224, %c672_225], %171 {strides = array<i32>} : memref<80x1120xf32, #tpu.memory_space<vmem>>, vector<10x224xf32>,
    %173 = vector.extract_strided_slice %144 {offsets = [32, 0], sizes = [10, 224], strides = [1, 1]} : vector<112x224xf32> to vector<10x224xf32>
    %c20_226 = arith.constant 20 : index
    %c896_227 = arith.constant 896 : index
    %174 = vector.load %arg18[%c20_226, %c896_227] : memref<80x1120xf32, #tpu.memory_space<vmem>>, vector<10x224xf32>
    tpu.vector_store %arg18[%c20_226, %c896_227], %173 {strides = array<i32>} : memref<80x1120xf32, #tpu.memory_space<vmem>>, vector<10x224xf32>,
    %175 = vector.extract_strided_slice %144 {offsets = [42, 0], sizes = [10, 224], strides = [1, 1]} : vector<112x224xf32> to vector<10x224xf32>
    %c30 = arith.constant 30 : index
    %c0_228 = arith.constant 0 : index
    %176 = vector.load %arg18[%c30, %c0_228] : memref<80x1120xf32, #tpu.memory_space<vmem>>, vector<10x224xf32>
    tpu.vector_store %arg18[%c30, %c0_228], %175 {strides = array<i32>} : memref<80x1120xf32, #tpu.memory_space<vmem>>, vector<10x224xf32>,
    %177 = vector.extract_strided_slice %144 {offsets = [43, 0], sizes = [10, 224], strides = [1, 1]} : vector<112x224xf32> to vector<10x224xf32>
    %c30_229 = arith.constant 30 : index
    %c224_230 = arith.constant 224 : index
    %178 = vector.load %arg18[%c30_229, %c224_230] : memref<80x1120xf32, #tpu.memory_space<vmem>>, vector<10x224xf32>
    tpu.vector_store %arg18[%c30_229, %c224_230], %177 {strides = array<i32>} : memref<80x1120xf32, #tpu.memory_space<vmem>>, vector<10x224xf32>,
    %179 = vector.extract_strided_slice %144 {offsets = [44, 0], sizes = [10, 224], strides = [1, 1]} : vector<112x224xf32> to vector<10x224xf32>
    %c30_231 = arith.constant 30 : index
    %c448_232 = arith.constant 448 : index
    %180 = vector.load %arg18[%c30_231, %c448_232] : memref<80x1120xf32, #tpu.memory_space<vmem>>, vector<10x224xf32>
    tpu.vector_store %arg18[%c30_231, %c448_232], %179 {strides = array<i32>} : memref<80x1120xf32, #tpu.memory_space<vmem>>, vector<10x224xf32>,
    %181 = vector.extract_strided_slice %144 {offsets = [45, 0], sizes = [10, 224], strides = [1, 1]} : vector<112x224xf32> to vector<10x224xf32>
    %c30_233 = arith.constant 30 : index
    %c672_234 = arith.constant 672 : index
    %182 = vector.load %arg18[%c30_233, %c672_234] : memref<80x1120xf32, #tpu.memory_space<vmem>>, vector<10x224xf32>
    tpu.vector_store %arg18[%c30_233, %c672_234], %181 {strides = array<i32>} : memref<80x1120xf32, #tpu.memory_space<vmem>>, vector<10x224xf32>,
    %183 = vector.extract_strided_slice %144 {offsets = [46, 0], sizes = [10, 224], strides = [1, 1]} : vector<112x224xf32> to vector<10x224xf32>
    %c30_235 = arith.constant 30 : index
    %c896_236 = arith.constant 896 : index
    %184 = vector.load %arg18[%c30_235, %c896_236] : memref<80x1120xf32, #tpu.memory_space<vmem>>, vector<10x224xf32>
    tpu.vector_store %arg18[%c30_235, %c896_236], %183 {strides = array<i32>} : memref<80x1120xf32, #tpu.memory_space<vmem>>, vector<10x224xf32>,
    %185 = vector.extract_strided_slice %144 {offsets = [56, 0], sizes = [10, 224], strides = [1, 1]} : vector<112x224xf32> to vector<10x224xf32>
    %c40 = arith.constant 40 : index
    %c0_237 = arith.constant 0 : index
    %186 = vector.load %arg18[%c40, %c0_237] : memref<80x1120xf32, #tpu.memory_space<vmem>>, vector<10x224xf32>
    tpu.vector_store %arg18[%c40, %c0_237], %185 {strides = array<i32>} : memref<80x1120xf32, #tpu.memory_space<vmem>>, vector<10x224xf32>,
    %187 = vector.extract_strided_slice %144 {offsets = [57, 0], sizes = [10, 224], strides = [1, 1]} : vector<112x224xf32> to vector<10x224xf32>
    %c40_238 = arith.constant 40 : index
    %c224_239 = arith.constant 224 : index
    %188 = vector.load %arg18[%c40_238, %c224_239] : memref<80x1120xf32, #tpu.memory_space<vmem>>, vector<10x224xf32>
    tpu.vector_store %arg18[%c40_238, %c224_239], %187 {strides = array<i32>} : memref<80x1120xf32, #tpu.memory_space<vmem>>, vector<10x224xf32>,
    %189 = vector.extract_strided_slice %144 {offsets = [58, 0], sizes = [10, 224], strides = [1, 1]} : vector<112x224xf32> to vector<10x224xf32>
    %c40_240 = arith.constant 40 : index
    %c448_241 = arith.constant 448 : index
    %190 = vector.load %arg18[%c40_240, %c448_241] : memref<80x1120xf32, #tpu.memory_space<vmem>>, vector<10x224xf32>
    tpu.vector_store %arg18[%c40_240, %c448_241], %189 {strides = array<i32>} : memref<80x1120xf32, #tpu.memory_space<vmem>>, vector<10x224xf32>,
    %191 = vector.extract_strided_slice %144 {offsets = [59, 0], sizes = [10, 224], strides = [1, 1]} : vector<112x224xf32> to vector<10x224xf32>
    %c40_242 = arith.constant 40 : index
    %c672_243 = arith.constant 672 : index
    %192 = vector.load %arg18[%c40_242, %c672_243] : memref<80x1120xf32, #tpu.memory_space<vmem>>, vector<10x224xf32>
    tpu.vector_store %arg18[%c40_242, %c672_243], %191 {strides = array<i32>} : memref<80x1120xf32, #tpu.memory_space<vmem>>, vector<10x224xf32>,
    %193 = vector.extract_strided_slice %144 {offsets = [60, 0], sizes = [10, 224], strides = [1, 1]} : vector<112x224xf32> to vector<10x224xf32>
    %c40_244 = arith.constant 40 : index
    %c896_245 = arith.constant 896 : index
    %194 = vector.load %arg18[%c40_244, %c896_245] : memref<80x1120xf32, #tpu.memory_space<vmem>>, vector<10x224xf32>
    tpu.vector_store %arg18[%c40_244, %c896_245], %193 {strides = array<i32>} : memref<80x1120xf32, #tpu.memory_space<vmem>>, vector<10x224xf32>,
    %195 = vector.extract_strided_slice %144 {offsets = [70, 0], sizes = [10, 224], strides = [1, 1]} : vector<112x224xf32> to vector<10x224xf32>
    %c50 = arith.constant 50 : index
    %c0_246 = arith.constant 0 : index
    %196 = vector.load %arg18[%c50, %c0_246] : memref<80x1120xf32, #tpu.memory_space<vmem>>, vector<10x224xf32>
    tpu.vector_store %arg18[%c50, %c0_246], %195 {strides = array<i32>} : memref<80x1120xf32, #tpu.memory_space<vmem>>, vector<10x224xf32>,
    %197 = vector.extract_strided_slice %144 {offsets = [71, 0], sizes = [10, 224], strides = [1, 1]} : vector<112x224xf32> to vector<10x224xf32>
    %c50_247 = arith.constant 50 : index
    %c224_248 = arith.constant 224 : index
    %198 = vector.load %arg18[%c50_247, %c224_248] : memref<80x1120xf32, #tpu.memory_space<vmem>>, vector<10x224xf32>
    tpu.vector_store %arg18[%c50_247, %c224_248], %197 {strides = array<i32>} : memref<80x1120xf32, #tpu.memory_space<vmem>>, vector<10x224xf32>,
    %199 = vector.extract_strided_slice %144 {offsets = [72, 0], sizes = [10, 224], strides = [1, 1]} : vector<112x224xf32> to vector<10x224xf32>
    %c50_249 = arith.constant 50 : index
    %c448_250 = arith.constant 448 : index
    %200 = vector.load %arg18[%c50_249, %c448_250] : memref<80x1120xf32, #tpu.memory_space<vmem>>, vector<10x224xf32>
    tpu.vector_store %arg18[%c50_249, %c448_250], %199 {strides = array<i32>} : memref<80x1120xf32, #tpu.memory_space<vmem>>, vector<10x224xf32>,
    %201 = vector.extract_strided_slice %144 {offsets = [73, 0], sizes = [10, 224], strides = [1, 1]} : vector<112x224xf32> to vector<10x224xf32>
    %c50_251 = arith.constant 50 : index
    %c672_252 = arith.constant 672 : index
    %202 = vector.load %arg18[%c50_251, %c672_252] : memref<80x1120xf32, #tpu.memory_space<vmem>>, vector<10x224xf32>
    tpu.vector_store %arg18[%c50_251, %c672_252], %201 {strides = array<i32>} : memref<80x1120xf32, #tpu.memory_space<vmem>>, vector<10x224xf32>,
    %203 = vector.extract_strided_slice %144 {offsets = [74, 0], sizes = [10, 224], strides = [1, 1]} : vector<112x224xf32> to vector<10x224xf32>
    %c50_253 = arith.constant 50 : index
    %c896_254 = arith.constant 896 : index
    %204 = vector.load %arg18[%c50_253, %c896_254] : memref<80x1120xf32, #tpu.memory_space<vmem>>, vector<10x224xf32>
    tpu.vector_store %arg18[%c50_253, %c896_254], %203 {strides = array<i32>} : memref<80x1120xf32, #tpu.memory_space<vmem>>, vector<10x224xf32>,
    %205 = vector.extract_strided_slice %144 {offsets = [84, 0], sizes = [10, 224], strides = [1, 1]} : vector<112x224xf32> to vector<10x224xf32>
    %c60 = arith.constant 60 : index
    %c0_255 = arith.constant 0 : index
    %206 = vector.load %arg18[%c60, %c0_255] : memref<80x1120xf32, #tpu.memory_space<vmem>>, vector<10x224xf32>
    tpu.vector_store %arg18[%c60, %c0_255], %205 {strides = array<i32>} : memref<80x1120xf32, #tpu.memory_space<vmem>>, vector<10x224xf32>,
    %207 = vector.extract_strided_slice %144 {offsets = [85, 0], sizes = [10, 224], strides = [1, 1]} : vector<112x224xf32> to vector<10x224xf32>
    %c60_256 = arith.constant 60 : index
    %c224_257 = arith.constant 224 : index
    %208 = vector.load %arg18[%c60_256, %c224_257] : memref<80x1120xf32, #tpu.memory_space<vmem>>, vector<10x224xf32>
    tpu.vector_store %arg18[%c60_256, %c224_257], %207 {strides = array<i32>} : memref<80x1120xf32, #tpu.memory_space<vmem>>, vector<10x224xf32>,
    %209 = vector.extract_strided_slice %144 {offsets = [86, 0], sizes = [10, 224], strides = [1, 1]} : vector<112x224xf32> to vector<10x224xf32>
    %c60_258 = arith.constant 60 : index
    %c448_259 = arith.constant 448 : index
    %210 = vector.load %arg18[%c60_258, %c448_259] : memref<80x1120xf32, #tpu.memory_space<vmem>>, vector<10x224xf32>
    tpu.vector_store %arg18[%c60_258, %c448_259], %209 {strides = array<i32>} : memref<80x1120xf32, #tpu.memory_space<vmem>>, vector<10x224xf32>,
    %211 = vector.extract_strided_slice %144 {offsets = [87, 0], sizes = [10, 224], strides = [1, 1]} : vector<112x224xf32> to vector<10x224xf32>
    %c60_260 = arith.constant 60 : index
    %c672_261 = arith.constant 672 : index
    %212 = vector.load %arg18[%c60_260, %c672_261] : memref<80x1120xf32, #tpu.memory_space<vmem>>, vector<10x224xf32>
    tpu.vector_store %arg18[%c60_260, %c672_261], %211 {strides = array<i32>} : memref<80x1120xf32, #tpu.memory_space<vmem>>, vector<10x224xf32>,
    %213 = vector.extract_strided_slice %144 {offsets = [88, 0], sizes = [10, 224], strides = [1, 1]} : vector<112x224xf32> to vector<10x224xf32>
    %c60_262 = arith.constant 60 : index
    %c896_263 = arith.constant 896 : index
    %214 = vector.load %arg18[%c60_262, %c896_263] : memref<80x1120xf32, #tpu.memory_space<vmem>>, vector<10x224xf32>
    tpu.vector_store %arg18[%c60_262, %c896_263], %213 {strides = array<i32>} : memref<80x1120xf32, #tpu.memory_space<vmem>>, vector<10x224xf32>,
    %215 = vector.extract_strided_slice %144 {offsets = [98, 0], sizes = [10, 224], strides = [1, 1]} : vector<112x224xf32> to vector<10x224xf32>
    %c70 = arith.constant 70 : index
    %c0_264 = arith.constant 0 : index
    %216 = vector.load %arg18[%c70, %c0_264] : memref<80x1120xf32, #tpu.memory_space<vmem>>, vector<10x224xf32>
    tpu.vector_store %arg18[%c70, %c0_264], %215 {strides = array<i32>} : memref<80x1120xf32, #tpu.memory_space<vmem>>, vector<10x224xf32>,
    %217 = vector.extract_strided_slice %144 {offsets = [99, 0], sizes = [10, 224], strides = [1, 1]} : vector<112x224xf32> to vector<10x224xf32>
    %c70_265 = arith.constant 70 : index
    %c224_266 = arith.constant 224 : index
    %218 = vector.load %arg18[%c70_265, %c224_266] : memref<80x1120xf32, #tpu.memory_space<vmem>>, vector<10x224xf32>
    tpu.vector_store %arg18[%c70_265, %c224_266], %217 {strides = array<i32>} : memref<80x1120xf32, #tpu.memory_space<vmem>>, vector<10x224xf32>,
    %219 = vector.extract_strided_slice %144 {offsets = [100, 0], sizes = [10, 224], strides = [1, 1]} : vector<112x224xf32> to vector<10x224xf32>
    %c70_267 = arith.constant 70 : index
    %c448_268 = arith.constant 448 : index
    %220 = vector.load %arg18[%c70_267, %c448_268] : memref<80x1120xf32, #tpu.memory_space<vmem>>, vector<10x224xf32>
    tpu.vector_store %arg18[%c70_267, %c448_268], %219 {strides = array<i32>} : memref<80x1120xf32, #tpu.memory_space<vmem>>, vector<10x224xf32>,
    %221 = vector.extract_strided_slice %144 {offsets = [101, 0], sizes = [10, 224], strides = [1, 1]} : vector<112x224xf32> to vector<10x224xf32>
    %c70_269 = arith.constant 70 : index
    %c672_270 = arith.constant 672 : index
    %222 = vector.load %arg18[%c70_269, %c672_270] : memref<80x1120xf32, #tpu.memory_space<vmem>>, vector<10x224xf32>
    tpu.vector_store %arg18[%c70_269, %c672_270], %221 {strides = array<i32>} : memref<80x1120xf32, #tpu.memory_space<vmem>>, vector<10x224xf32>,
    %223 = vector.extract_strided_slice %144 {offsets = [102, 0], sizes = [10, 224], strides = [1, 1]} : vector<112x224xf32> to vector<10x224xf32>
    %c70_271 = arith.constant 70 : index
    %c896_272 = arith.constant 896 : index
    %224 = vector.load %arg18[%c70_271, %c896_272] : memref<80x1120xf32, #tpu.memory_space<vmem>>, vector<10x224xf32>
    tpu.vector_store %arg18[%c70_271, %c896_272], %223 {strides = array<i32>} : memref<80x1120xf32, #tpu.memory_space<vmem>>, vector<10x224xf32>,
    %c0_273 = arith.constant 0 : index
    %c0_274 = arith.constant 0 : index
    %225 = vector.load %arg18[%c0_273, %c0_274] : memref<80x1120xf32, #tpu.memory_space<vmem>>, vector<80x1120xf32>
    %226 = arith.truncf %225 : vector<80x1120xf32> to vector<80x1120xbf16>
    %c0_275 = arith.constant 0 : index
    %c0_276 = arith.constant 0 : index
    %227 = vector.load %arg6[%c0_275, %c0_276] : memref<1120x320xbf16, #tpu.memory_space<vmem>>, vector<1120x320xbf16>
    %cst_277 = arith.constant dense<0.000000e+00> : vector<80x320xf32>
    %228 = tpu.matmul %226, %227, %cst_277 {dimension_numbers = #tpu.dot_dimension_numbers<[1], [0], [0], [1], [0, 0, 1, 1], [], []>} : vector<80x1120xbf16>, vector<1120x320xbf16>, vector<80x320xf32> -> vector<80x320xf32>
    %c0_278 = arith.constant 0 : index
    %c0_279 = arith.constant 0 : index
    %229 = vector.load %arg7[%c0_278, %c0_279] : memref<1x320xf32, #tpu.memory_space<vmem>>, vector<1x320xf32>
    %230 = vector.broadcast %229 : vector<1x320xf32> to vector<80x320xf32>
    %231 = arith.addf %228, %230 : vector<80x320xf32>
    %cst_280 = arith.constant 0.000000e+00 : f32
    %232 = vector.broadcast %cst_280 : f32 to vector<80x320xf32>
    %233 = arith.maximumf %231, %232 : vector<80x320xf32>
    %234 = arith.truncf %233 : vector<80x320xf32> to vector<80x320xbf16>
    %c0_281 = arith.constant 0 : index
    %c0_282 = arith.constant 0 : index
    %c0_283 = arith.constant 0 : index
    %235 = vector.load %arg8[%c0_281, %c0_282, %c0_283] : memref<2x320x160xbf16, #tpu.memory_space<vmem>>, vector<1x320x160xbf16>
    %236 = vector.shape_cast %235 : vector<1x320x160xbf16> to vector<320x160xbf16>
    %cst_284 = arith.constant dense<0.000000e+00> : vector<80x160xf32>
    %237 = tpu.matmul %234, %236, %cst_284 {dimension_numbers = #tpu.dot_dimension_numbers<[1], [0], [0], [1], [0, 0, 1, 1], [], []>} : vector<80x320xbf16>, vector<320x160xbf16>, vector<80x160xf32> -> vector<80x160xf32>
    %c1_285 = arith.constant 1 : index
    %c0_286 = arith.constant 0 : index
    %c0_287 = arith.constant 0 : index
    %238 = vector.load %arg8[%c1_285, %c0_286, %c0_287] : memref<2x320x160xbf16, #tpu.memory_space<vmem>>, vector<1x320x160xbf16>
    %239 = vector.shape_cast %238 : vector<1x320x160xbf16> to vector<320x160xbf16>
    %cst_288 = arith.constant dense<0.000000e+00> : vector<80x160xf32>
    %240 = tpu.matmul %234, %239, %cst_288 {dimension_numbers = #tpu.dot_dimension_numbers<[1], [0], [0], [1], [0, 0, 1, 1], [], []>} : vector<80x320xbf16>, vector<320x160xbf16>, vector<80x160xf32> -> vector<80x160xf32>
    %241 = arith.maximumf %237, %240 : vector<80x160xf32>
    %242 = arith.truncf %241 : vector<80x160xf32> to vector<80x160xbf16>
    %c0_289 = arith.constant 0 : index
    %c0_290 = arith.constant 0 : index
    %c0_291 = arith.constant 0 : index
    %243 = vector.load %arg9[%c0_289, %c0_290, %c0_291] : memref<2x40x80xbf16, #tpu.memory_space<vmem>>, vector<1x40x80xbf16>
    %244 = vector.shape_cast %243 : vector<1x40x80xbf16> to vector<40x80xbf16>
    %cst_292 = arith.constant dense<0.000000e+00> : vector<40x160xf32>
    %245 = tpu.matmul %244, %242, %cst_292 {dimension_numbers = #tpu.dot_dimension_numbers<[1], [0], [0], [1], [0, 0, 1, 1], [], []>} : vector<40x80xbf16>, vector<80x160xbf16>, vector<40x160xf32> -> vector<40x160xf32>
    %c1_293 = arith.constant 1 : index
    %c0_294 = arith.constant 0 : index
    %c0_295 = arith.constant 0 : index
    %246 = vector.load %arg9[%c1_293, %c0_294, %c0_295] : memref<2x40x80xbf16, #tpu.memory_space<vmem>>, vector<1x40x80xbf16>
    %247 = vector.shape_cast %246 : vector<1x40x80xbf16> to vector<40x80xbf16>
    %cst_296 = arith.constant dense<0.000000e+00> : vector<40x160xf32>
    %248 = tpu.matmul %247, %242, %cst_296 {dimension_numbers = #tpu.dot_dimension_numbers<[1], [0], [0], [1], [0, 0, 1, 1], [], []>} : vector<40x80xbf16>, vector<80x160xbf16>, vector<40x160xf32> -> vector<40x160xf32>
    %249 = arith.maximumf %245, %248 : vector<40x160xf32>
    %250 = vector.extract_strided_slice %249 {offsets = [0, 0], sizes = [1, 160], strides = [1, 1]} : vector<40x160xf32> to vector<1x160xf32>
    %c0_297 = arith.constant 0 : index
    %c0_298 = arith.constant 0 : index
    %251 = vector.load %arg19[%c0_297, %c0_298] : memref<8x800xf32, #tpu.memory_space<vmem>>, vector<1x160xf32>
    tpu.vector_store %arg19[%c0_297, %c0_298], %250 {strides = array<i32>} : memref<8x800xf32, #tpu.memory_space<vmem>>, vector<1x160xf32>,
    %252 = vector.extract_strided_slice %249 {offsets = [1, 0], sizes = [1, 160], strides = [1, 1]} : vector<40x160xf32> to vector<1x160xf32>
    %c0_299 = arith.constant 0 : index
    %c160 = arith.constant 160 : index
    %253 = vector.load %arg19[%c0_299, %c160] : memref<8x800xf32, #tpu.memory_space<vmem>>, vector<1x160xf32>
    tpu.vector_store %arg19[%c0_299, %c160], %252 {strides = array<i32>} : memref<8x800xf32, #tpu.memory_space<vmem>>, vector<1x160xf32>,
    %254 = vector.extract_strided_slice %249 {offsets = [2, 0], sizes = [1, 160], strides = [1, 1]} : vector<40x160xf32> to vector<1x160xf32>
    %c0_300 = arith.constant 0 : index
    %c320 = arith.constant 320 : index
    %255 = vector.load %arg19[%c0_300, %c320] : memref<8x800xf32, #tpu.memory_space<vmem>>, vector<1x160xf32>
    tpu.vector_store %arg19[%c0_300, %c320], %254 {strides = array<i32>} : memref<8x800xf32, #tpu.memory_space<vmem>>, vector<1x160xf32>,
    %256 = vector.extract_strided_slice %249 {offsets = [3, 0], sizes = [1, 160], strides = [1, 1]} : vector<40x160xf32> to vector<1x160xf32>
    %c0_301 = arith.constant 0 : index
    %c480 = arith.constant 480 : index
    %257 = vector.load %arg19[%c0_301, %c480] : memref<8x800xf32, #tpu.memory_space<vmem>>, vector<1x160xf32>
    tpu.vector_store %arg19[%c0_301, %c480], %256 {strides = array<i32>} : memref<8x800xf32, #tpu.memory_space<vmem>>, vector<1x160xf32>,
    %258 = vector.extract_strided_slice %249 {offsets = [4, 0], sizes = [1, 160], strides = [1, 1]} : vector<40x160xf32> to vector<1x160xf32>
    %c0_302 = arith.constant 0 : index
    %c640 = arith.constant 640 : index
    %259 = vector.load %arg19[%c0_302, %c640] : memref<8x800xf32, #tpu.memory_space<vmem>>, vector<1x160xf32>
    tpu.vector_store %arg19[%c0_302, %c640], %258 {strides = array<i32>} : memref<8x800xf32, #tpu.memory_space<vmem>>, vector<1x160xf32>,
    %260 = vector.extract_strided_slice %249 {offsets = [5, 0], sizes = [1, 160], strides = [1, 1]} : vector<40x160xf32> to vector<1x160xf32>
    %c1_303 = arith.constant 1 : index
    %c0_304 = arith.constant 0 : index
    %261 = vector.load %arg19[%c1_303, %c0_304] : memref<8x800xf32, #tpu.memory_space<vmem>>, vector<1x160xf32>
    tpu.vector_store %arg19[%c1_303, %c0_304], %260 {strides = array<i32>} : memref<8x800xf32, #tpu.memory_space<vmem>>, vector<1x160xf32>,
    %262 = vector.extract_strided_slice %249 {offsets = [6, 0], sizes = [1, 160], strides = [1, 1]} : vector<40x160xf32> to vector<1x160xf32>
    %c1_305 = arith.constant 1 : index
    %c160_306 = arith.constant 160 : index
    %263 = vector.load %arg19[%c1_305, %c160_306] : memref<8x800xf32, #tpu.memory_space<vmem>>, vector<1x160xf32>
    tpu.vector_store %arg19[%c1_305, %c160_306], %262 {strides = array<i32>} : memref<8x800xf32, #tpu.memory_space<vmem>>, vector<1x160xf32>,
    %264 = vector.extract_strided_slice %249 {offsets = [7, 0], sizes = [1, 160], strides = [1, 1]} : vector<40x160xf32> to vector<1x160xf32>
    %c1_307 = arith.constant 1 : index
    %c320_308 = arith.constant 320 : index
    %265 = vector.load %arg19[%c1_307, %c320_308] : memref<8x800xf32, #tpu.memory_space<vmem>>, vector<1x160xf32>
    tpu.vector_store %arg19[%c1_307, %c320_308], %264 {strides = array<i32>} : memref<8x800xf32, #tpu.memory_space<vmem>>, vector<1x160xf32>,
    %266 = vector.extract_strided_slice %249 {offsets = [8, 0], sizes = [1, 160], strides = [1, 1]} : vector<40x160xf32> to vector<1x160xf32>
    %c1_309 = arith.constant 1 : index
    %c480_310 = arith.constant 480 : index
    %267 = vector.load %arg19[%c1_309, %c480_310] : memref<8x800xf32, #tpu.memory_space<vmem>>, vector<1x160xf32>
    tpu.vector_store %arg19[%c1_309, %c480_310], %266 {strides = array<i32>} : memref<8x800xf32, #tpu.memory_space<vmem>>, vector<1x160xf32>,
    %268 = vector.extract_strided_slice %249 {offsets = [9, 0], sizes = [1, 160], strides = [1, 1]} : vector<40x160xf32> to vector<1x160xf32>
    %c1_311 = arith.constant 1 : index
    %c640_312 = arith.constant 640 : index
    %269 = vector.load %arg19[%c1_311, %c640_312] : memref<8x800xf32, #tpu.memory_space<vmem>>, vector<1x160xf32>
    tpu.vector_store %arg19[%c1_311, %c640_312], %268 {strides = array<i32>} : memref<8x800xf32, #tpu.memory_space<vmem>>, vector<1x160xf32>,
    %270 = vector.extract_strided_slice %249 {offsets = [10, 0], sizes = [1, 160], strides = [1, 1]} : vector<40x160xf32> to vector<1x160xf32>
    %c2_313 = arith.constant 2 : index
    %c0_314 = arith.constant 0 : index
    %271 = vector.load %arg19[%c2_313, %c0_314] : memref<8x800xf32, #tpu.memory_space<vmem>>, vector<1x160xf32>
    tpu.vector_store %arg19[%c2_313, %c0_314], %270 {strides = array<i32>} : memref<8x800xf32, #tpu.memory_space<vmem>>, vector<1x160xf32>,
    %272 = vector.extract_strided_slice %249 {offsets = [11, 0], sizes = [1, 160], strides = [1, 1]} : vector<40x160xf32> to vector<1x160xf32>
    %c2_315 = arith.constant 2 : index
    %c160_316 = arith.constant 160 : index
    %273 = vector.load %arg19[%c2_315, %c160_316] : memref<8x800xf32, #tpu.memory_space<vmem>>, vector<1x160xf32>
    tpu.vector_store %arg19[%c2_315, %c160_316], %272 {strides = array<i32>} : memref<8x800xf32, #tpu.memory_space<vmem>>, vector<1x160xf32>,
    %274 = vector.extract_strided_slice %249 {offsets = [12, 0], sizes = [1, 160], strides = [1, 1]} : vector<40x160xf32> to vector<1x160xf32>
    %c2_317 = arith.constant 2 : index
    %c320_318 = arith.constant 320 : index
    %275 = vector.load %arg19[%c2_317, %c320_318] : memref<8x800xf32, #tpu.memory_space<vmem>>, vector<1x160xf32>
    tpu.vector_store %arg19[%c2_317, %c320_318], %274 {strides = array<i32>} : memref<8x800xf32, #tpu.memory_space<vmem>>, vector<1x160xf32>,
    %276 = vector.extract_strided_slice %249 {offsets = [13, 0], sizes = [1, 160], strides = [1, 1]} : vector<40x160xf32> to vector<1x160xf32>
    %c2_319 = arith.constant 2 : index
    %c480_320 = arith.constant 480 : index
    %277 = vector.load %arg19[%c2_319, %c480_320] : memref<8x800xf32, #tpu.memory_space<vmem>>, vector<1x160xf32>
    tpu.vector_store %arg19[%c2_319, %c480_320], %276 {strides = array<i32>} : memref<8x800xf32, #tpu.memory_space<vmem>>, vector<1x160xf32>,
    %278 = vector.extract_strided_slice %249 {offsets = [14, 0], sizes = [1, 160], strides = [1, 1]} : vector<40x160xf32> to vector<1x160xf32>
    %c2_321 = arith.constant 2 : index
    %c640_322 = arith.constant 640 : index
    %279 = vector.load %arg19[%c2_321, %c640_322] : memref<8x800xf32, #tpu.memory_space<vmem>>, vector<1x160xf32>
    tpu.vector_store %arg19[%c2_321, %c640_322], %278 {strides = array<i32>} : memref<8x800xf32, #tpu.memory_space<vmem>>, vector<1x160xf32>,
    %280 = vector.extract_strided_slice %249 {offsets = [15, 0], sizes = [1, 160], strides = [1, 1]} : vector<40x160xf32> to vector<1x160xf32>
    %c3_323 = arith.constant 3 : index
    %c0_324 = arith.constant 0 : index
    %281 = vector.load %arg19[%c3_323, %c0_324] : memref<8x800xf32, #tpu.memory_space<vmem>>, vector<1x160xf32>
    tpu.vector_store %arg19[%c3_323, %c0_324], %280 {strides = array<i32>} : memref<8x800xf32, #tpu.memory_space<vmem>>, vector<1x160xf32>,
    %282 = vector.extract_strided_slice %249 {offsets = [16, 0], sizes = [1, 160], strides = [1, 1]} : vector<40x160xf32> to vector<1x160xf32>
    %c3_325 = arith.constant 3 : index
    %c160_326 = arith.constant 160 : index
    %283 = vector.load %arg19[%c3_325, %c160_326] : memref<8x800xf32, #tpu.memory_space<vmem>>, vector<1x160xf32>
    tpu.vector_store %arg19[%c3_325, %c160_326], %282 {strides = array<i32>} : memref<8x800xf32, #tpu.memory_space<vmem>>, vector<1x160xf32>,
    %284 = vector.extract_strided_slice %249 {offsets = [17, 0], sizes = [1, 160], strides = [1, 1]} : vector<40x160xf32> to vector<1x160xf32>
    %c3_327 = arith.constant 3 : index
    %c320_328 = arith.constant 320 : index
    %285 = vector.load %arg19[%c3_327, %c320_328] : memref<8x800xf32, #tpu.memory_space<vmem>>, vector<1x160xf32>
    tpu.vector_store %arg19[%c3_327, %c320_328], %284 {strides = array<i32>} : memref<8x800xf32, #tpu.memory_space<vmem>>, vector<1x160xf32>,
    %286 = vector.extract_strided_slice %249 {offsets = [18, 0], sizes = [1, 160], strides = [1, 1]} : vector<40x160xf32> to vector<1x160xf32>
    %c3_329 = arith.constant 3 : index
    %c480_330 = arith.constant 480 : index
    %287 = vector.load %arg19[%c3_329, %c480_330] : memref<8x800xf32, #tpu.memory_space<vmem>>, vector<1x160xf32>
    tpu.vector_store %arg19[%c3_329, %c480_330], %286 {strides = array<i32>} : memref<8x800xf32, #tpu.memory_space<vmem>>, vector<1x160xf32>,
    %288 = vector.extract_strided_slice %249 {offsets = [19, 0], sizes = [1, 160], strides = [1, 1]} : vector<40x160xf32> to vector<1x160xf32>
    %c3_331 = arith.constant 3 : index
    %c640_332 = arith.constant 640 : index
    %289 = vector.load %arg19[%c3_331, %c640_332] : memref<8x800xf32, #tpu.memory_space<vmem>>, vector<1x160xf32>
    tpu.vector_store %arg19[%c3_331, %c640_332], %288 {strides = array<i32>} : memref<8x800xf32, #tpu.memory_space<vmem>>, vector<1x160xf32>,
    %290 = vector.extract_strided_slice %249 {offsets = [20, 0], sizes = [1, 160], strides = [1, 1]} : vector<40x160xf32> to vector<1x160xf32>
    %c4_333 = arith.constant 4 : index
    %c0_334 = arith.constant 0 : index
    %291 = vector.load %arg19[%c4_333, %c0_334] : memref<8x800xf32, #tpu.memory_space<vmem>>, vector<1x160xf32>
    tpu.vector_store %arg19[%c4_333, %c0_334], %290 {strides = array<i32>} : memref<8x800xf32, #tpu.memory_space<vmem>>, vector<1x160xf32>,
    %292 = vector.extract_strided_slice %249 {offsets = [21, 0], sizes = [1, 160], strides = [1, 1]} : vector<40x160xf32> to vector<1x160xf32>
    %c4_335 = arith.constant 4 : index
    %c160_336 = arith.constant 160 : index
    %293 = vector.load %arg19[%c4_335, %c160_336] : memref<8x800xf32, #tpu.memory_space<vmem>>, vector<1x160xf32>
    tpu.vector_store %arg19[%c4_335, %c160_336], %292 {strides = array<i32>} : memref<8x800xf32, #tpu.memory_space<vmem>>, vector<1x160xf32>,
    %294 = vector.extract_strided_slice %249 {offsets = [22, 0], sizes = [1, 160], strides = [1, 1]} : vector<40x160xf32> to vector<1x160xf32>
    %c4_337 = arith.constant 4 : index
    %c320_338 = arith.constant 320 : index
    %295 = vector.load %arg19[%c4_337, %c320_338] : memref<8x800xf32, #tpu.memory_space<vmem>>, vector<1x160xf32>
    tpu.vector_store %arg19[%c4_337, %c320_338], %294 {strides = array<i32>} : memref<8x800xf32, #tpu.memory_space<vmem>>, vector<1x160xf32>,
    %296 = vector.extract_strided_slice %249 {offsets = [23, 0], sizes = [1, 160], strides = [1, 1]} : vector<40x160xf32> to vector<1x160xf32>
    %c4_339 = arith.constant 4 : index
    %c480_340 = arith.constant 480 : index
    %297 = vector.load %arg19[%c4_339, %c480_340] : memref<8x800xf32, #tpu.memory_space<vmem>>, vector<1x160xf32>
    tpu.vector_store %arg19[%c4_339, %c480_340], %296 {strides = array<i32>} : memref<8x800xf32, #tpu.memory_space<vmem>>, vector<1x160xf32>,
    %298 = vector.extract_strided_slice %249 {offsets = [24, 0], sizes = [1, 160], strides = [1, 1]} : vector<40x160xf32> to vector<1x160xf32>
    %c4_341 = arith.constant 4 : index
    %c640_342 = arith.constant 640 : index
    %299 = vector.load %arg19[%c4_341, %c640_342] : memref<8x800xf32, #tpu.memory_space<vmem>>, vector<1x160xf32>
    tpu.vector_store %arg19[%c4_341, %c640_342], %298 {strides = array<i32>} : memref<8x800xf32, #tpu.memory_space<vmem>>, vector<1x160xf32>,
    %300 = vector.extract_strided_slice %249 {offsets = [25, 0], sizes = [1, 160], strides = [1, 1]} : vector<40x160xf32> to vector<1x160xf32>
    %c5_343 = arith.constant 5 : index
    %c0_344 = arith.constant 0 : index
    %301 = vector.load %arg19[%c5_343, %c0_344] : memref<8x800xf32, #tpu.memory_space<vmem>>, vector<1x160xf32>
    tpu.vector_store %arg19[%c5_343, %c0_344], %300 {strides = array<i32>} : memref<8x800xf32, #tpu.memory_space<vmem>>, vector<1x160xf32>,
    %302 = vector.extract_strided_slice %249 {offsets = [26, 0], sizes = [1, 160], strides = [1, 1]} : vector<40x160xf32> to vector<1x160xf32>
    %c5_345 = arith.constant 5 : index
    %c160_346 = arith.constant 160 : index
    %303 = vector.load %arg19[%c5_345, %c160_346] : memref<8x800xf32, #tpu.memory_space<vmem>>, vector<1x160xf32>
    tpu.vector_store %arg19[%c5_345, %c160_346], %302 {strides = array<i32>} : memref<8x800xf32, #tpu.memory_space<vmem>>, vector<1x160xf32>,
    %304 = vector.extract_strided_slice %249 {offsets = [27, 0], sizes = [1, 160], strides = [1, 1]} : vector<40x160xf32> to vector<1x160xf32>
    %c5_347 = arith.constant 5 : index
    %c320_348 = arith.constant 320 : index
    %305 = vector.load %arg19[%c5_347, %c320_348] : memref<8x800xf32, #tpu.memory_space<vmem>>, vector<1x160xf32>
    tpu.vector_store %arg19[%c5_347, %c320_348], %304 {strides = array<i32>} : memref<8x800xf32, #tpu.memory_space<vmem>>, vector<1x160xf32>,
    %306 = vector.extract_strided_slice %249 {offsets = [28, 0], sizes = [1, 160], strides = [1, 1]} : vector<40x160xf32> to vector<1x160xf32>
    %c5_349 = arith.constant 5 : index
    %c480_350 = arith.constant 480 : index
    %307 = vector.load %arg19[%c5_349, %c480_350] : memref<8x800xf32, #tpu.memory_space<vmem>>, vector<1x160xf32>
    tpu.vector_store %arg19[%c5_349, %c480_350], %306 {strides = array<i32>} : memref<8x800xf32, #tpu.memory_space<vmem>>, vector<1x160xf32>,
    %308 = vector.extract_strided_slice %249 {offsets = [29, 0], sizes = [1, 160], strides = [1, 1]} : vector<40x160xf32> to vector<1x160xf32>
    %c5_351 = arith.constant 5 : index
    %c640_352 = arith.constant 640 : index
    %309 = vector.load %arg19[%c5_351, %c640_352] : memref<8x800xf32, #tpu.memory_space<vmem>>, vector<1x160xf32>
    tpu.vector_store %arg19[%c5_351, %c640_352], %308 {strides = array<i32>} : memref<8x800xf32, #tpu.memory_space<vmem>>, vector<1x160xf32>,
    %310 = vector.extract_strided_slice %249 {offsets = [30, 0], sizes = [1, 160], strides = [1, 1]} : vector<40x160xf32> to vector<1x160xf32>
    %c6_353 = arith.constant 6 : index
    %c0_354 = arith.constant 0 : index
    %311 = vector.load %arg19[%c6_353, %c0_354] : memref<8x800xf32, #tpu.memory_space<vmem>>, vector<1x160xf32>
    tpu.vector_store %arg19[%c6_353, %c0_354], %310 {strides = array<i32>} : memref<8x800xf32, #tpu.memory_space<vmem>>, vector<1x160xf32>,
    %312 = vector.extract_strided_slice %249 {offsets = [31, 0], sizes = [1, 160], strides = [1, 1]} : vector<40x160xf32> to vector<1x160xf32>
    %c6_355 = arith.constant 6 : index
    %c160_356 = arith.constant 160 : index
    %313 = vector.load %arg19[%c6_355, %c160_356] : memref<8x800xf32, #tpu.memory_space<vmem>>, vector<1x160xf32>
    tpu.vector_store %arg19[%c6_355, %c160_356], %312 {strides = array<i32>} : memref<8x800xf32, #tpu.memory_space<vmem>>, vector<1x160xf32>,
    %314 = vector.extract_strided_slice %249 {offsets = [32, 0], sizes = [1, 160], strides = [1, 1]} : vector<40x160xf32> to vector<1x160xf32>
    %c6_357 = arith.constant 6 : index
    %c320_358 = arith.constant 320 : index
    %315 = vector.load %arg19[%c6_357, %c320_358] : memref<8x800xf32, #tpu.memory_space<vmem>>, vector<1x160xf32>
    tpu.vector_store %arg19[%c6_357, %c320_358], %314 {strides = array<i32>} : memref<8x800xf32, #tpu.memory_space<vmem>>, vector<1x160xf32>,
    %316 = vector.extract_strided_slice %249 {offsets = [33, 0], sizes = [1, 160], strides = [1, 1]} : vector<40x160xf32> to vector<1x160xf32>
    %c6_359 = arith.constant 6 : index
    %c480_360 = arith.constant 480 : index
    %317 = vector.load %arg19[%c6_359, %c480_360] : memref<8x800xf32, #tpu.memory_space<vmem>>, vector<1x160xf32>
    tpu.vector_store %arg19[%c6_359, %c480_360], %316 {strides = array<i32>} : memref<8x800xf32, #tpu.memory_space<vmem>>, vector<1x160xf32>,
    %318 = vector.extract_strided_slice %249 {offsets = [34, 0], sizes = [1, 160], strides = [1, 1]} : vector<40x160xf32> to vector<1x160xf32>
    %c6_361 = arith.constant 6 : index
    %c640_362 = arith.constant 640 : index
    %319 = vector.load %arg19[%c6_361, %c640_362] : memref<8x800xf32, #tpu.memory_space<vmem>>, vector<1x160xf32>
    tpu.vector_store %arg19[%c6_361, %c640_362], %318 {strides = array<i32>} : memref<8x800xf32, #tpu.memory_space<vmem>>, vector<1x160xf32>,
    %320 = vector.extract_strided_slice %249 {offsets = [35, 0], sizes = [1, 160], strides = [1, 1]} : vector<40x160xf32> to vector<1x160xf32>
    %c7_363 = arith.constant 7 : index
    %c0_364 = arith.constant 0 : index
    %321 = vector.load %arg19[%c7_363, %c0_364] : memref<8x800xf32, #tpu.memory_space<vmem>>, vector<1x160xf32>
    tpu.vector_store %arg19[%c7_363, %c0_364], %320 {strides = array<i32>} : memref<8x800xf32, #tpu.memory_space<vmem>>, vector<1x160xf32>,
    %322 = vector.extract_strided_slice %249 {offsets = [36, 0], sizes = [1, 160], strides = [1, 1]} : vector<40x160xf32> to vector<1x160xf32>
    %c7_365 = arith.constant 7 : index
    %c160_366 = arith.constant 160 : index
    %323 = vector.load %arg19[%c7_365, %c160_366] : memref<8x800xf32, #tpu.memory_space<vmem>>, vector<1x160xf32>
    tpu.vector_store %arg19[%c7_365, %c160_366], %322 {strides = array<i32>} : memref<8x800xf32, #tpu.memory_space<vmem>>, vector<1x160xf32>,
    %324 = vector.extract_strided_slice %249 {offsets = [37, 0], sizes = [1, 160], strides = [1, 1]} : vector<40x160xf32> to vector<1x160xf32>
    %c7_367 = arith.constant 7 : index
    %c320_368 = arith.constant 320 : index
    %325 = vector.load %arg19[%c7_367, %c320_368] : memref<8x800xf32, #tpu.memory_space<vmem>>, vector<1x160xf32>
    tpu.vector_store %arg19[%c7_367, %c320_368], %324 {strides = array<i32>} : memref<8x800xf32, #tpu.memory_space<vmem>>, vector<1x160xf32>,
    %326 = vector.extract_strided_slice %249 {offsets = [38, 0], sizes = [1, 160], strides = [1, 1]} : vector<40x160xf32> to vector<1x160xf32>
    %c7_369 = arith.constant 7 : index
    %c480_370 = arith.constant 480 : index
    %327 = vector.load %arg19[%c7_369, %c480_370] : memref<8x800xf32, #tpu.memory_space<vmem>>, vector<1x160xf32>
    tpu.vector_store %arg19[%c7_369, %c480_370], %326 {strides = array<i32>} : memref<8x800xf32, #tpu.memory_space<vmem>>, vector<1x160xf32>,
    %328 = vector.extract_strided_slice %249 {offsets = [39, 0], sizes = [1, 160], strides = [1, 1]} : vector<40x160xf32> to vector<1x160xf32>
    %c7_371 = arith.constant 7 : index
    %c640_372 = arith.constant 640 : index
    %329 = vector.load %arg19[%c7_371, %c640_372] : memref<8x800xf32, #tpu.memory_space<vmem>>, vector<1x160xf32>
    tpu.vector_store %arg19[%c7_371, %c640_372], %328 {strides = array<i32>} : memref<8x800xf32, #tpu.memory_space<vmem>>, vector<1x160xf32>,
    %c0_373 = arith.constant 0 : index
    %c0_374 = arith.constant 0 : index
    %330 = vector.load %arg19[%c0_373, %c0_374] : memref<8x800xf32, #tpu.memory_space<vmem>>, vector<8x800xf32>
    %331 = arith.truncf %330 : vector<8x800xf32> to vector<8x800xbf16>
    %c0_375 = arith.constant 0 : index
    %c0_376 = arith.constant 0 : index
    %332 = vector.load %arg10[%c0_375, %c0_376] : memref<800x128xbf16, #tpu.memory_space<vmem>>, vector<800x128xbf16>
    %cst_377 = arith.constant dense<0.000000e+00> : vector<8x128xf32>
    %333 = tpu.matmul %331, %332, %cst_377 {dimension_numbers = #tpu.dot_dimension_numbers<[1], [0], [0], [1], [0, 0, 1, 1], [], []>} : vector<8x800xbf16>, vector<800x128xbf16>, vector<8x128xf32> -> vector<8x128xf32>
    %c0_378 = arith.constant 0 : index
    %c0_379 = arith.constant 0 : index
    %334 = vector.load %arg11[%c0_378, %c0_379] : memref<1x128xf32, #tpu.memory_space<vmem>>, vector<1x128xf32>
    %335 = vector.broadcast %334 : vector<1x128xf32> to vector<8x128xf32>
    %336 = arith.addf %333, %335 : vector<8x128xf32>
    %cst_380 = arith.constant 0.000000e+00 : f32
    %337 = vector.broadcast %cst_380 : f32 to vector<8x128xf32>
    %338 = arith.maximumf %336, %337 : vector<8x128xf32>
    %339 = arith.truncf %338 : vector<8x128xf32> to vector<8x128xbf16>
    %c0_381 = arith.constant 0 : index
    %c0_382 = arith.constant 0 : index
    %340 = vector.load %arg12[%c0_381, %c0_382] : memref<128x128xbf16, #tpu.memory_space<vmem>>, vector<128x128xbf16>
    %cst_383 = arith.constant dense<0.000000e+00> : vector<8x128xf32>
    %341 = tpu.matmul %339, %340, %cst_383 {dimension_numbers = #tpu.dot_dimension_numbers<[1], [0], [0], [1], [0, 0, 1, 1], [], []>} : vector<8x128xbf16>, vector<128x128xbf16>, vector<8x128xf32> -> vector<8x128xf32>
    %c0_384 = arith.constant 0 : index
    %c0_385 = arith.constant 0 : index
    %342 = vector.load %arg13[%c0_384, %c0_385] : memref<1x128xf32, #tpu.memory_space<vmem>>, vector<1x128xf32>
    %343 = vector.broadcast %342 : vector<1x128xf32> to vector<8x128xf32>
    %344 = arith.addf %341, %343 : vector<8x128xf32>
    %cst_386 = arith.constant 0.000000e+00 : f32
    %345 = vector.broadcast %cst_386 : f32 to vector<8x128xf32>
    %346 = arith.maximumf %344, %345 : vector<8x128xf32>
    %347 = arith.truncf %346 : vector<8x128xf32> to vector<8x128xbf16>
    %c0_387 = arith.constant 0 : index
    %c0_388 = arith.constant 0 : index
    %348 = vector.load %arg14[%c0_387, %c0_388] : memref<128x128xbf16, #tpu.memory_space<vmem>>, vector<128x128xbf16>
    %cst_389 = arith.constant dense<0.000000e+00> : vector<8x128xf32>
    %349 = tpu.matmul %347, %348, %cst_389 {dimension_numbers = #tpu.dot_dimension_numbers<[1], [0], [0], [1], [0, 0, 1, 1], [], []>} : vector<8x128xbf16>, vector<128x128xbf16>, vector<8x128xf32> -> vector<8x128xf32>
    %c0_390 = arith.constant 0 : index
    %c0_391 = arith.constant 0 : index
    %350 = vector.load %arg15[%c0_390, %c0_391] : memref<1x128xf32, #tpu.memory_space<vmem>>, vector<1x128xf32>
    %351 = vector.broadcast %350 : vector<1x128xf32> to vector<8x128xf32>
    %352 = arith.addf %349, %351 : vector<8x128xf32>
    %c0_392 = arith.constant 0 : index
    %c0_393 = arith.constant 0 : index
    %353 = vector.load %arg16[%c0_392, %c0_393] : memref<8x128xf32, #tpu.memory_space<vmem>>, vector<8x128xf32>
    tpu.vector_store %arg16[%c0_392, %c0_393], %352 {strides = array<i32>} : memref<8x128xf32, #tpu.memory_space<vmem>>, vector<8x128xf32>,
    return
  }
  func.func @transform_0(%arg0: i32) -> (i32, i32, i32) {
    %c0_i32 = arith.constant 0 : i32
    %c0_i32_0 = arith.constant 0 : i32
    %c0_i32_1 = arith.constant 0 : i32
    return %arg0, %c0_i32, %c0_i32_0 : i32, i32, i32
  }
  func.func @transform_1(%arg0: i32) -> (i32, i32) {
    %c0_i32 = arith.constant 0 : i32
    %c0_i32_0 = arith.constant 0 : i32
    %c0_i32_1 = arith.constant 0 : i32
    return %c0_i32, %c0_i32_0 : i32, i32
  }
  func.func @transform_2(%arg0: i32) -> (i32, i32) {
    %c0_i32 = arith.constant 0 : i32
    %c0_i32_0 = arith.constant 0 : i32
    %c0_i32_1 = arith.constant 0 : i32
    return %c0_i32, %c0_i32_0 : i32, i32
  }
  func.func @transform_3(%arg0: i32) -> (i32, i32, i32) {
    %c0_i32 = arith.constant 0 : i32
    %c0_i32_0 = arith.constant 0 : i32
    %c0_i32_1 = arith.constant 0 : i32
    %c0_i32_2 = arith.constant 0 : i32
    return %c0_i32, %c0_i32_0, %c0_i32_1 : i32, i32, i32
  }
  func.func @transform_4(%arg0: i32) -> (i32, i32, i32) {
    %c0_i32 = arith.constant 0 : i32
    %c0_i32_0 = arith.constant 0 : i32
    %c0_i32_1 = arith.constant 0 : i32
    %c0_i32_2 = arith.constant 0 : i32
    return %c0_i32, %c0_i32_0, %c0_i32_1 : i32, i32, i32
  }
  func.func @transform_5(%arg0: i32) -> (i32, i32) {
    %c0_i32 = arith.constant 0 : i32
    %c0_i32_0 = arith.constant 0 : i32
    %c0_i32_1 = arith.constant 0 : i32
    return %c0_i32, %c0_i32_0 : i32, i32
  }
  func.func @transform_6(%arg0: i32) -> (i32, i32) {
    %c0_i32 = arith.constant 0 : i32
    %c0_i32_0 = arith.constant 0 : i32
    %c0_i32_1 = arith.constant 0 : i32
    return %c0_i32, %c0_i32_0 : i32, i32
  }
  func.func @transform_7(%arg0: i32) -> (i32, i32, i32) {
    %c0_i32 = arith.constant 0 : i32
    %c0_i32_0 = arith.constant 0 : i32
    %c0_i32_1 = arith.constant 0 : i32
    %c0_i32_2 = arith.constant 0 : i32
    return %c0_i32, %c0_i32_0, %c0_i32_1 : i32, i32, i32
  }
  func.func @transform_8(%arg0: i32) -> (i32, i32, i32) {
    %c0_i32 = arith.constant 0 : i32
    %c0_i32_0 = arith.constant 0 : i32
    %c0_i32_1 = arith.constant 0 : i32
    %c0_i32_2 = arith.constant 0 : i32
    return %c0_i32, %c0_i32_0, %c0_i32_1 : i32, i32, i32
  }
  func.func @transform_9(%arg0: i32) -> (i32, i32) {
    %c0_i32 = arith.constant 0 : i32
    %c0_i32_0 = arith.constant 0 : i32
    %c0_i32_1 = arith.constant 0 : i32
    return %c0_i32, %c0_i32_0 : i32, i32
  }
  func.func @transform_10(%arg0: i32) -> (i32, i32) {
    %c0_i32 = arith.constant 0 : i32
    %c0_i32_0 = arith.constant 0 : i32
    %c0_i32_1 = arith.constant 0 : i32
    return %c0_i32, %c0_i32_0 : i32, i32
  }
  func.func @transform_11(%arg0: i32) -> (i32, i32) {
    %c0_i32 = arith.constant 0 : i32
    %c0_i32_0 = arith.constant 0 : i32
    %c0_i32_1 = arith.constant 0 : i32
    return %c0_i32, %c0_i32_0 : i32, i32
  }
  func.func @transform_12(%arg0: i32) -> (i32, i32) {
    %c0_i32 = arith.constant 0 : i32
    %c0_i32_0 = arith.constant 0 : i32
    %c0_i32_1 = arith.constant 0 : i32
    return %c0_i32, %c0_i32_0 : i32, i32
  }
  func.func @transform_13(%arg0: i32) -> (i32, i32) {
    %c0_i32 = arith.constant 0 : i32
    %c0_i32_0 = arith.constant 0 : i32
    %c0_i32_1 = arith.constant 0 : i32
    return %c0_i32, %c0_i32_0 : i32, i32
  }
  func.func @transform_14(%arg0: i32) -> (i32, i32) {
    %c0_i32 = arith.constant 0 : i32
    %c0_i32_0 = arith.constant 0 : i32
    %c0_i32_1 = arith.constant 0 : i32
    return %c0_i32, %c0_i32_0 : i32, i32
  }
  func.func @transform_15(%arg0: i32) -> (i32, i32) {
    %c0_i32 = arith.constant 0 : i32
    %c0_i32_0 = arith.constant 0 : i32
    return %arg0, %c0_i32 : i32, i32
  }
}

</mosaic_0001>

<bundles_post_ra>
// kernel: forward.1
= control target key start
LH: loop header
LB: loop body
LE: loop exit
PB: predicated region body
PF: predicated region fallthrough
CT: control target
= control target key end

     0   :  { %s12623_s22 = smov 64   ;;  %s12624_s23 = smov 96   ;;  %vm168_vm0 = vcmask 1043456   ;;  %vm55_vm1 = vcmask 785408   ;;  %vm18972_vm2 = vcmask 781312   ;;  %vm18971_vm3 = vcmask 785412   ;;  %s18952_s0 = inlined_call_operand.vmem [shape: f32[8,32,96], index: 0, kind: input, shape index: {}]   ;;  %s18953_s1 = inlined_call_operand.vmem [shape: bf16[480,448], index: 1, kind: input, shape index: {}]   ;;  %s18954_s3 = inlined_call_operand.vmem [shape: bf16[2,448,224], index: 3, kind: input, shape index: {}]   ;;  %s18955_s2 = inlined_call_operand.vmem [shape: f32[1,448], index: 2, kind: input, shape index: {}]   ;;  %s18956_s4 = inlined_call_operand.vmem [shape: bf16[2,112,224], index: 4, kind: input, shape index: {}]   ;;  %s18957_s5 = inlined_call_operand.vmem [shape: bf16[1120,320], index: 5, kind: input, shape index: {}]   ;;  %s18958_s7 = inlined_call_operand.vmem [shape: bf16[2,320,160], index: 7, kind: input, shape index: {}]   ;;  %s18959_s6 = inlined_call_operand.vmem [shape: f32[1,320], index: 6, kind: input, shape index: {}]   ;;  %s18960_s8 = inlined_call_operand.vmem [shape: bf16[2,40,80], index: 8, kind: input, shape index: {}]   ;;  %s18961_s9 = inlined_call_operand.vmem [shape: bf16[800,128], index: 9, kind: input, shape index: {}]   ;;  %s18962_s11 = inlined_call_operand.vmem [shape: bf16[128,128], index: 11, kind: input, shape index: {}]   ;;  %s18963_s13 = inlined_call_operand.vmem [shape: bf16[128,128], index: 13, kind: input, shape index: {}]   ;;  %s18964_s10 = inlined_call_operand.vmem [shape: f32[1,128], index: 10, kind: input, shape index: {}]   ;;  %s18965_s12 = inlined_call_operand.vmem [shape: f32[1,128], index: 12, kind: input, shape index: {}]   ;;  %s18966_s14 = inlined_call_operand.vmem [shape: f32[1,128], index: 14, kind: input, shape index: {}]   ;;  %s18967_s15 = inlined_call_operand.vmem [shape: f32[8,128], index: 15, kind: output, shape index: {}]  }
   0x1   :  { %v93_v0 = vld [vmem:[%s18952_s0 + $0x2] sm:$0xff]  ;;  %v94_v2 = vld [vmem:[%s18952_s0 + $0xa] sm:$0xff]  ;;  %s12625_s17 = smov 32   ;;  %v95_v6 = vld [vmem:[%s18952_s0 + $0x12] sm:$0xff]  ;;  %vm18992_vm4 = vcmask 261120   ;;  %vm19027_vm5 = vcmask 1048320  }
   0x2   :  { %v61_v1 = vld [vmem:[%s18952_s0 + $0x1] sm:$0xff]  ;;  %101 = vrot.lane.b32.xlu0 %v93_v0, %s12623_s22  ;;  %v62_v3 = vld [vmem:[%s18952_s0 + $0x9] sm:$0xff]  ;;  %v96_v7 = vld [vmem:[%s18952_s0 + $0x1a] sm:$0xf]  ;;  %vm83_vm6 = vcmask 523264   ;;  %vm18990_vm7 = vcmask 1048064  }
   0x3   :  { %69 = vrot.lane.b32.xlu1 %v61_v1, %s12624_s23  ;;  %v125_v4 = vld [vmem:[%s18952_s0 + $0x3] sm:$0xff]  ;;  %v126_v5 = vld [vmem:[%s18952_s0 + $0xb] sm:$0xff]  ;;  %v64_v14 = vld [vmem:[%s18952_s0 + $0x19] sm:$0xf]  ;;  %vm18991_vm8 = vcmask 1047808   ;;  %vm18987_vm9 = vcmask 257024  }
   0x4   :  { %v10422_v8 = vld [vmem:[%s18952_s0 + $0x22] sm:$0xff]  ;;  %v63_v11 = vld [vmem:[%s18952_s0 + $0x11] sm:$0xff]  ;;  %v128_v21 = vld [vmem:[%s18952_s0 + $0x1b] sm:$0xf]  ;;  %vm18969_vm10 = vcmask 261124   ;;  %vm18968_vm11 = vcmask 1044224  }
   0x5   :  { %v230_v9 = vrot.slane %v10422_v8, 4  ;;  %v11760_v10 = vld [vmem:[%s18953_s1 + $0xe4] ss:$16 sps:$4 sm:$0xff]   ;;  %v11762_v12 = vld [vmem:[%s18953_s1 + $0xe0] ss:$16 sps:$4 sm:$0xff]   ;;  %vm18988_vm12 = vcmask 519168  }
   0x6   :  { %103 = vrot.lane.b32.xlu0 %v94_v2, %s12623_s22  ;;  %2001 = vmatprep.subr.bf16.mxu0 %v11760_v10  ;;  %v11763_v13 = vld [vmem:[%s18953_s1 + $0xc4] ss:$16 sps:$4 sm:$0xff]   ;;  %v11765_v16 = vld [vmem:[%s18953_s1 + $0xc0] ss:$16 sps:$4 sm:$0xff]   ;;  %v10425_v44 = vld [vmem:[%s18952_s0 + $0x3a] sm:$0xf] }
   0x7   :  { %71 = vrot.lane.b32.xlu1 %v62_v3, %s12624_s23  ;;  %v127_v15 = vld [vmem:[%s18952_s0 + $0x13] sm:$0xff]  ;;  %2002 = vmatpush1.bf16.msra.mxu0 %v11762_v12  ;;  %v10418_v17 = vld [vmem:[%s18952_s0 + $0x21] sm:$0xff]  ;;  %v10423_v18 = vld [vmem:[%s18952_s0 + $0x2a] sm:$0xff]  ;;  %v235_v58 = vrot.slane %v10425_v44, 4  ;;  %vm18970_vm13 = vcmask 1043968   ;;  %vm18986_vm14 = vcmask 1043712  }
   0x8   :  { %2003 = vmatprep.subr.bf16.mxu0 %v11763_v13  ;;  %v11766_v19 = vld [vmem:[%s18953_s1 + $0xa4] ss:$16 sps:$4 sm:$0xff]   ;;  %v11768_v20 = vld [vmem:[%s18953_s1 + $0xa0] ss:$16 sps:$4 sm:$0xff]   ;;  %v193_v25 = vrot.slane %v10418_v17, 4  ;;  %v231_v27 = vrot.slane %v10423_v18, 4 }
   0x9   :  { %v10426_v22 = vld [vmem:[%s18952_s0 + $0x23] sm:$0xff]  ;;  %v12797_v26 = vld [vmem:[%s18952_s0 + $0x32] sm:$0xff]  ;;  %v10429_v62 = vld [vmem:[%s18952_s0 + $0x3b] sm:$0xf]  ;;  %vm18989_vm15 = vcmask 1048324  }
   0xa   :  { %133 = vrot.lane.b32.xlu0 %v125_v4, %s12625_s17  ;;  %v11769_v23 = vld [vmem:[%s18953_s1 + $0x2e4] ss:$16 sps:$4 sm:$0xff]   ;;  %v11771_v24 = vld [vmem:[%s18953_s1 + $0x2e0] ss:$16 sps:$4 sm:$0xff]   ;;  %v267_v33 = vrot.slane %v10426_v22, 4  ;;  %v232_v35 = vsel %vm168_vm0, %v230_v9, %v231_v27  ;;  %v233_v36 = vrot.slane %v12797_v26, 4 }
   0xb   :  { %135 = vrot.lane.b32.xlu1 %v126_v5, %s12625_s17  ;;  %2004 = vmatpush1.bf16.msra.mxu0 %v11765_v16  ;;  %v10419_v28 = vld [vmem:[%s18952_s0 + $0x29] sm:$0xff]  ;;  %v11772_v29 = vld [vmem:[%s18953_s1 + $0x84] ss:$16 sps:$4 sm:$0xff]   ;;  %v10421_v53 = vld [vmem:[%s18952_s0 + $0x39] sm:$0xf]  ;;  %v272_v8 = vrot.slane %v10429_v62, 4 }
   0xc   :  { %2005 = vmatprep.subr.bf16.mxu0 %v11766_v19  ;;  %2174 = vmatprep.subr.bf16.mxu1 %v11769_v23  ;;  %v11774_v30 = vld [vmem:[%s18953_s1 + $0x80] ss:$16 sps:$4 sm:$0xff]   ;;  %v11775_v31 = vld [vmem:[%s18953_s1 + $0x2c4] ss:$16 sps:$4 sm:$0xff]   ;;  %v194_v37 = vrot.slane %v10419_v28, 4  ;;  %v234_v45 = vsel %vm168_vm0, %v231_v27, %v233_v36  ;;  %v236_v0 = vsel %vm168_vm0, %v233_v36, %v235_v58  ;;  %v198_v1 = vrot.slane %v10421_v53, 4 }
   0xd   :  { %2175 = vmatpush1.bf16.msra.mxu1 %v11771_v24  ;;  %v11777_v32 = vld [vmem:[%s18953_s1 + $0x2c0] ss:$16 sps:$4 sm:$0xff]   ;;  %v11778_v39 = vld [vmem:[%s18953_s1 + $0x64] ss:$16 sps:$4 sm:$0xff]   ;;  %v52_v36 = vld [vmem:[%s18952_s0 + $0x8] sm:$0xff] }
   0xe   :  { %105 = vrot.lane.b32.xlu0 %v95_v6, %s12623_s22  ;;  %v12819_v34 = vld [vmem:[%s18952_s0 + $0x31] sm:$0xff]  ;;  %2176 = vmatprep.subr.bf16.mxu1 %v11775_v31  ;;  %v195_v46 = vsel %vm168_vm0, %v193_v25, %v194_v37  ;;  %v10442_v5 = vld [vmem:[%s18952_s0 + $0x42] sm:$0xff]  ;;  %57 = vst.msk [vmem:[#allocation2 + $0x20] sm:$0xff] %vm55_vm1, %v52_v36 }
   0xf   :  { %107 = vrot.lane.b32.xlu1 %v96_v7, %s12623_s22  ;;  %2006 = vmatpush1.bf16.msra.mxu0 %v11768_v20  ;;  %v10427_v38 = vld [vmem:[%s18952_s0 + $0x2b] sm:$0xff]  ;;  %v11781_v40 = vld [vmem:[%s18953_s1 + $0x2a4] ss:$16 sps:$4 sm:$0xff]   ;;  %v196_v47 = vrot.slane %v12819_v34, 4 }
  0x10   :  { %2007 = vmatprep.subr.bf16.mxu0 %v11772_v29  ;;  %v11780_v41 = vld [vmem:[%s18953_s1 + $0x60] ss:$16 sps:$4 sm:$0xff]   ;;  %v268_v48 = vrot.slane %v10427_v38, 4  ;;  %v11784_v49 = vld [vmem:[%s18953_s1 + $0x44] ss:$16 sps:$4 sm:$0xff]  }
  0x11   :  { %2177 = vmatpush1.bf16.msra.mxu1 %v11777_v32  ;;  %v11783_v42 = vld [vmem:[%s18953_s1 + $0x2a0] ss:$16 sps:$4 sm:$0xff]   ;;  %v11787_v50 = vld [vmem:[%s18953_s1 + $0x284] ss:$16 sps:$4 sm:$0xff]   ;;  %v197_v55 = vsel %vm168_vm0, %v194_v37, %v196_v47  ;;  %v199_v7 = vsel %vm168_vm0, %v196_v47, %v198_v1 }
  0x12   :  { %237 = vrot.lane.b32.xlu0 %v230_v9, %s12623_s22  ;;  %v12843_v43 = vld [vmem:[%s18952_s0 + $0x33] sm:$0xff]  ;;  %2178 = vmatprep.subr.bf16.mxu1 %v11781_v40  ;;  %v269_v56 = vsel %vm168_vm0, %v267_v33, %v268_v48  ;;  %v10438_v12 = vld [vmem:[%s18952_s0 + $0x41] sm:$0xff]  ;;  %v10443_v20 = vld [vmem:[%s18952_s0 + $0x4a] sm:$0xff] }
  0x13   :  { %73 = vrot.lane.b32.xlu1 %v63_v11, %s12624_s23  ;;  %2008 = vmatpush1.bf16.msra.mxu0 %v11774_v30  ;;  %v11789_v51 = vld [vmem:[%s18953_s1 + $0x280] ss:$16 sps:$4 sm:$0xff]   ;;  %v11790_v54 = vld [vmem:[%s18953_s1 + $0x24] ss:$16 sps:$4 sm:$0xff]   ;;  %v270_v57 = vrot.slane %v12843_v43, 4 }
  0x14   :  { %2009 = vmatprep.subr.bf16.mxu0 %v11778_v39  ;;  %v11786_v52 = vld [vmem:[%s18953_s1 + $0x40] ss:$16 sps:$4 sm:$0xff]   ;;  %v11793_v59 = vld [vmem:[%s18953_s1 + $0x264] ss:$16 sps:$4 sm:$0xff]  }
  0x15   :  { %2179 = vmatpush1.bf16.msra.mxu1 %v11783_v42  ;;  %v11795_v60 = vld [vmem:[%s18953_s1 + $0x260] ss:$16 sps:$4 sm:$0xff]   ;;  %v271_v63 = vsel %vm168_vm0, %v268_v48, %v270_v57  ;;  %v11796_v2 = vld [vmem:[%s18953_s1 + $0x4] ss:$16 sps:$4 sm:$0xff]   ;;  %v10445_v42 = vld [vmem:[%s18952_s0 + $0x5a] sm:$0xf] }
  0x16   :  { %75 = vrot.lane.b32.xlu0 %v64_v14, %s12624_s23  ;;  %2180 = vmatprep.subr.bf16.mxu1 %v11787_v50  ;;  %v11792_v61 = vld [vmem:[%s18953_s1 + $0x20] ss:$16 sps:$4 sm:$0xff]   ;;  %v11799_v3 = vld [vmem:[%s18953_s1 + $0x244] ss:$16 sps:$4 sm:$0xff]  }
  0x17   :  { %137 = vrot.lane.b32.xlu1 %v127_v15, %s12625_s17  ;;  %2010 = vmatpush1.bf16.msra.mxu0 %v11780_v41  ;;  %v11801_v4 = vld [vmem:[%s18953_s1 + $0x240] ss:$16 sps:$4 sm:$0xff]   ;;  %v11802_v9 = vld [vmem:[%s18953_s1 + $0x1e4] ss:$16 sps:$4 sm:$0xff]   ;;  %v273_v15 = vsel %vm168_vm0, %v270_v57, %v272_v8 }
  0x18   :  { %2011 = vmatprep.subr.bf16.mxu0 %v11784_v49  ;;  %v11798_v6 = vld [vmem:[%s18953_s1] ss:$16 sps:$4 sm:$0xff]   ;;  %v11805_v10 = vld [vmem:[%s18953_s1 + $0x224] ss:$16 sps:$4 sm:$0xff]  }
  0x19   :  { %2181 = vmatpush1.bf16.msra.mxu1 %v11789_v51  ;;  %v11807_v11 = vld [vmem:[%s18953_s1 + $0x220] ss:$16 sps:$4 sm:$0xff]   ;;  %v11811_v14 = vld [vmem:[%s18953_s1 + $0x204] ss:$16 sps:$4 sm:$0xff]  }
  0x1a   :  { %139 = vrot.lane.b32.xlu0 %v128_v21, %s12625_s17  ;;  %2182 = vmatprep.subr.bf16.mxu1 %v11793_v59  ;;  %v11804_v13 = vld [vmem:[%s18953_s1 + $0x1e0] ss:$16 sps:$4 sm:$0xff]   ;;  %v11808_v16 = vld [vmem:[%s18953_s1 + $0x1c4] ss:$16 sps:$4 sm:$0xff]  }
  0x1b   :  { %200 = vrot.lane.b32.xlu1 %v193_v25, %s12624_s23  ;;  %2012 = vmatpush1.bf16.msra.mxu0 %v11786_v52  ;;  %v11813_v17 = vld [vmem:[%s18953_s1 + $0x200] ss:$16 sps:$4 sm:$0xff]   ;;  %v11817_v21 = vld [vmem:[%s18953_s1 + $0x3a4] ss:$16 sps:$4 sm:$0xff]  }
  0x1c   :  { %2013 = vmatprep.subr.bf16.mxu0 %v11790_v54  ;;  %v10446_v18 = vld [vmem:[%s18952_s0 + $0x43] sm:$0xff]  ;;  %v10444_v25 = vld [vmem:[%s18952_s0 + $0x52] sm:$0xff] }
  0x1d   :  { %2183 = vmatpush1.bf16.msra.mxu1 %v11795_v60  ;;  %v11810_v19 = vld [vmem:[%s18953_s1 + $0x1c0] ss:$16 sps:$4 sm:$0xff]   ;;  %v11814_v22 = vld [vmem:[%s18953_s1 + $0x1a4] ss:$16 sps:$4 sm:$0xff]  }
  0x1e   :  { %274 = vrot.lane.b32.xlu0 %v267_v33, %s12625_s17  ;;  %2184 = vmatprep.subr.bf16.mxu1 %v11799_v3  ;;  %v11816_v23 = vld [vmem:[%s18953_s1 + $0x1a0] ss:$16 sps:$4 sm:$0xff]   ;;  %v11823_v26 = vld [vmem:[%s18953_s1 + $0x384] ss:$16 sps:$4 sm:$0xff]   ;;  %v54_v3 = vld [vmem:[%s18952_s0 + $0x18] sm:$0xf] }
  0x1f   :  { %239 = vrot.lane.b32.xlu1 %v232_v35, %s12623_s22  ;;  %2014 = vmatpush1.bf16.msra.mxu0 %v11792_v61  ;;  %v11819_v24 = vld [vmem:[%s18953_s1 + $0x3a0] ss:$16 sps:$4 sm:$0xff]   ;;  %v11820_v29 = vld [vmem:[%s18953_s1 + $0x184] ss:$16 sps:$4 sm:$0xff]   ;;  %60 = vst.msk [vmem:[#allocation2 + $0x60] sm:$0xf] %vm18972_vm2, %v54_v3 }
  0x20   :  { %2015 = vmatprep.subr.bf16.mxu0 %v11796_v2  ;;  %v10439_v27 = vld [vmem:[%s18952_s0 + $0x49] sm:$0xff]  ;;  %v51_v28 = vld [vmem:[%s18952_s0] sm:$0xff]  ;;  %v10440_v32 = vld [vmem:[%s18952_s0 + $0x51] sm:$0xff] }
  0x21   :  { %2185 = vmatpush1.bf16.msra.mxu1 %v11801_v4  ;;  %56 = vst.msk [vmem:[#allocation2] sm:$0xff] %vm55_vm1, %v51_v28  ;;  %v11822_v30 = vld [vmem:[%s18953_s1 + $0x180] ss:$16 sps:$4 sm:$0xff]   ;;  %v11829_v34 = vld [vmem:[%s18953_s1 + $0x364] ss:$16 sps:$4 sm:$0xff]  }
  0x22   :  { %241 = vrot.lane.b32.xlu0 %v234_v45, %s12623_s22  ;;  %2186 = vmatprep.subr.bf16.mxu1 %v11805_v10  ;;  %v11825_v31 = vld [vmem:[%s18953_s1 + $0x380] ss:$16 sps:$4 sm:$0xff]   ;;  %v11826_v37 = vld [vmem:[%s18953_s1 + $0x164] ss:$16 sps:$4 sm:$0xff]   ;;  %v10457_v3 = vld [vmem:[%s18952_s0 + $0x78] sm:$0xf] }
  0x23   :  { %202 = vrot.lane.b32.xlu1 %v195_v46, %s12624_s23  ;;  %2016 = vmatpush1.bf16.msra.mxu0 %v11798_v6  ;;  %v10447_v33 = vld [vmem:[%s18952_s0 + $0x4b] sm:$0xff]  ;;  %v10462_v35 = vld [vmem:[%s18952_s0 + $0x62] sm:$0xff]  ;;  %v10448_v43 = vld [vmem:[%s18952_s0 + $0x53] sm:$0xff] }
  0x24   :  { %2017 = vmatprep.subr.bf16.mxu0 %v11802_v9  ;;  %v13006_v38 = vld [vmem:[%s18952_s0 + $0x6a] sm:$0xff]  ;;  %v11835_v41 = vld [vmem:[%s18953_s1 + $0x344] ss:$16 sps:$4 sm:$0xff]   ;;  %v478_v44 = vrot.slane %v10462_v35, 4 }
  0x25   :  { %2187 = vmatpush1.bf16.msra.mxu1 %v11807_v11  ;;  %v11828_v39 = vld [vmem:[%s18953_s1 + $0x160] ss:$16 sps:$4 sm:$0xff]   ;;  %v479_v45 = vrot.slane %v13006_v38, 4  ;;  %v11832_v46 = vld [vmem:[%s18953_s1 + $0x144] ss:$16 sps:$4 sm:$0xff]   ;;  %v10415_v11 = vld [vmem:[%s18952_s0 + $0x28] sm:$0xff] }
  0x26   :  { %204 = vrot.lane.b32.xlu0 %v197_v55, %s12624_s23  ;;  %2188 = vmatprep.subr.bf16.mxu1 %v11811_v14  ;;  %v11831_v40 = vld [vmem:[%s18953_s1 + $0x360] ss:$16 sps:$4 sm:$0xff]   ;;  %v11841_v49 = vld [vmem:[%s18953_s1 + $0x324] ss:$16 sps:$4 sm:$0xff]   ;;  %v10441_v55 = vld [vmem:[%s18952_s0 + $0x59] sm:$0xf] }
  0x27   :  { %276 = vrot.lane.b32.xlu1 %v269_v56, %s12625_s17  ;;  %2018 = vmatpush2.bf16.msra.mxu0 %v11804_v13  ;;  %v11834_v47 = vld [vmem:[%s18953_s1 + $0x140] ss:$16 sps:$4 sm:$0xff]   ;;  %v480_v50 = vsel %vm168_vm0, %v478_v44, %v479_v45  ;;  %v11838_v53 = vld [vmem:[%s18953_s1 + $0x124] ss:$16 sps:$4 sm:$0xff]   ;;  %v10449_v56 = vld [vmem:[%s18952_s0 + $0x5b] sm:$0xf] }
  0x28   :  { %2019 = vmatprep.subr.bf16.mxu0 %v11808_v16  ;;  %v11837_v48 = vld [vmem:[%s18953_s1 + $0x340] ss:$16 sps:$4 sm:$0xff]   ;;  %v11847_v59 = vld [vmem:[%s18953_s1 + $0x304] ss:$16 sps:$4 sm:$0xff]   ;;  %v10465_v13 = vld [vmem:[%s18952_s0 + $0x7a] sm:$0xf] }
  0x29   :  { %2189 = vmatpush1.bf16.msra.mxu1 %v11813_v17  ;;  %v10458_v51 = vld [vmem:[%s18952_s0 + $0x61] sm:$0xff]  ;;  %v13049_v52 = vld [vmem:[%s18952_s0 + $0x69] sm:$0xff]  ;;  %v170_v14 = vrot.slane %v10415_v11, 4  ;;  %v153_v17 = vld [vmem:[%s18952_s0 + $0x14] sm:$0xff] }
  0x2a   :  { %278 = vrot.lane.b32.xlu0 %v271_v63, %s12625_s17  ;;  %2194 = vmatprep.subr.bf16.mxu1 %v11817_v21  ;;  %v11843_v54 = vld [vmem:[%s18953_s1 + $0x320] ss:$16 sps:$4 sm:$0xff]   ;;  %v443_v61 = vrot.slane %v10458_v51, 4  ;;  %v151_v62 = vld [vmem:[%s18952_s0 + $0x4] sm:$0xff]  ;;  %157 = vst.msk [vmem:[#allocation2 + $0x58] sm:$0xff] %vm55_vm1, %v153_v17  ;;  %v10432_v35 = vld [vmem:[%s18952_s0 + $0x34] sm:$0xff] }
  0x2b   :  { %243 = vrot.lane.b32.xlu1 %v236_v0, %s12623_s22  ;;  %2020 = vmatpush2.bf16.msra.mxu0 %v11810_v19  ;;  %v13066_v57 = vld [vmem:[%s18952_s0 + $0x63] sm:$0xff]  ;;  %v53_v60 = vld [vmem:[%s18952_s0 + $0x10] sm:$0xff]  ;;  %v444_v0 = vrot.slane %v13049_v52, 4  ;;  %155 = vst.msk [vmem:[#allocation2 + $0x18] sm:$0xff] %vm55_vm1, %v151_v62 }
  0x2c   :  { %2021 = vmatprep.subr.bf16.mxu0 %v11814_v22  ;;  %v11840_v58 = vld [vmem:[%s18953_s1 + $0x120] ss:$16 sps:$4 sm:$0xff]   ;;  %58 = vst.msk [vmem:[#allocation2 + $0x40] sm:$0xff] %vm55_vm1, %v53_v60  ;;  %v11844_v2 = vld [vmem:[%s18953_s1 + $0x104] ss:$16 sps:$4 sm:$0xff]   ;;  %v513_v8 = vrot.slane %v13066_v57, 4 }
  0x2d   :  { %2195 = vmatpush2.bf16.msra.mxu1 %v11819_v24  ;;  %v152_v63 = vld [vmem:[%s18952_s0 + $0xc] sm:$0xff]  ;;  %v445_v10 = vsel %vm168_vm0, %v443_v61, %v444_v0  ;;  %v10430_v19 = vld [vmem:[%s18952_s0 + $0x24] sm:$0xff]  ;;  %v10472_v17 = vld [vmem:[%s18952_s0 + $0x74] sm:$0xff] }
  0x2e   :  { %359 = vrot.lane.b32.xlu0 %v10442_v5, %s12623_s22  ;;  %2196 = vmatprep.subr.bf16.mxu1 %v11823_v26  ;;  %v13090_v1 = vld [vmem:[%s18952_s0 + $0x6b] sm:$0xff]  ;;  %156 = vst.msk [vmem:[#allocation2 + $0x38] sm:$0xff] %vm55_vm1, %v152_v63  ;;  %v10414_v5 = vld [vmem:[%s18952_s0 + $0x20] sm:$0xff]  ;;  %v299_v24 = vrot.slane %v10430_v19, 4  ;;  %v483_v26 = vrot.slane %v10465_v13, 4 }
  0x2f   :  { %206 = vrot.lane.b32.xlu1 %v199_v7, %s12624_s23  ;;  %2022 = vmatpush2.bf16.msra.mxu0 %v11816_v23  ;;  %v11849_v4 = vld [vmem:[%s18953_s1 + $0x300] ss:$16 sps:$4 sm:$0xff]   ;;  %v169_v7 = vrot.slane %v10414_v5, 4  ;;  %v514_v9 = vrot.slane %v13090_v1, 4  ;;  %v10450_v51 = vld [vmem:[%s18952_s0 + $0x44] sm:$0xff] }
  0x30   :  { %2023 = vmatprep.subr.bf16.mxu0 %v11820_v29  ;;  %v11846_v6 = vld [vmem:[%s18953_s1 + $0x100] ss:$16 sps:$4 sm:$0xff]   ;;  %v10417_v29 = vld [vmem:[%s18952_s0 + $0x38] sm:$0xf]  ;;  %310 = vst.msk [vmem:[#allocation2 + $0x78] sm:$0xf0] %vm18971_vm3, %v299_v24 }
  0x31   :  { %2197 = vmatpush2.bf16.msra.mxu1 %v11825_v31  ;;  %181 = vst.msk [vmem:[#allocation2 + $0x60] sm:$0xf0] %vm18971_vm3, %v169_v7  ;;  %v171_v23 = vsel %vm168_vm0, %v169_v7, %v170_v14  ;;  %v10461_v31 = vld [vmem:[%s18952_s0 + $0x79] sm:$0xf]  ;;  %v10451_v52 = vld [vmem:[%s18952_s0 + $0x4c] sm:$0xff]  ;;  %v10454_v60 = vld [vmem:[%s18952_s0 + $0x60] sm:$0xff] }
  0x32   :  { %280 = vrot.lane.b32.xlu0 %v273_v15, %s12625_s17  ;;  %2198 = vmatprep.subr.bf16.mxu1 %v11829_v34  ;;  %v10416_v15 = vld [vmem:[%s18952_s0 + $0x30] sm:$0xff]  ;;  %v1052_v21 = vld [vmem:[#allocation2 + $0x18] sm:$0xff]  ;;  %182 = vst.msk [vmem:[#allocation2 + $0x80] sm:$0xff] %vm55_vm1, %v171_v23  ;;  %407 = vst.msk [vmem:[#allocation2 + $0xf8] sm:$0xff] %vm55_vm1, %v10450_v51  ;;  %v420_v63 = vrot.slane %v10454_v60, 4 }
  0x33   :  { %331 = vrot.lane.b32.xlu1 %v10438_v12, %s12624_s23  ;;  %2024 = vmatpush2.bf16.msra.mxu0 %v11822_v30  ;;  %v10464_v12 = vld [vmem:[%s18952_s0 + $0x72] sm:$0xff]  ;;  %v172_v16 = vrot.slane %v10416_v15, 4  ;;  %408 = vst.msk [vmem:[#allocation2 + $0x118] sm:$0xff] %vm55_vm1, %v10451_v52  ;;  %v10453_v5 = vld [vmem:[%s18952_s0 + $0x5c] sm:$0xf]  ;;  %v10483_v7 = vld [vmem:[%s18952_s0 + $0x8a] sm:$0xff] }
  0x34   :  { %2025 = vmatprep.subr.bf16.mxu0 %v11826_v37  ;;  %v10460_v30 = vld [vmem:[%s18952_s0 + $0x71] sm:$0xff]  ;;  %431 = vst.msk [vmem:[#allocation2 + $0x140] sm:$0xf0] %vm18971_vm3, %v420_v63  ;;  %v10474_v11 = vld [vmem:[%s18952_s0 + $0x80] sm:$0xff]  ;;  %v10473_v19 = vld [vmem:[%s18952_s0 + $0x7c] sm:$0xf] }
  0x35   :  { %2199 = vmatpush2.bf16.msra.mxu1 %v11831_v40  ;;  %v1056_v22 = vld [vmem:[#allocation2 + $0x38] sm:$0xff]  ;;  %v173_v28 = vsel %vm168_vm0, %v170_v14, %v172_v16  ;;  %v10431_v34 = vld [vmem:[%s18952_s0 + $0x2c] sm:$0xff]  ;;  %410 = vst.msk [vmem:[#allocation2 + $0x158] sm:$0xf] %vm18972_vm2, %v10453_v5 }
  0x36   :  { %387 = vrot.lane.b32.xlu0 %v10446_v18, %s12625_s17  ;;  %2200 = vmatprep.subr.bf16.mxu1 %v11835_v41  ;;  %v154_v18 = vld [vmem:[%s18952_s0 + $0x1c] sm:$0xf]  ;;  %183 = vst.msk [vmem:[#allocation2 + $0xa0] sm:$0xff] %vm55_vm1, %v173_v28  ;;  %v300_v37 = vrot.slane %v10431_v34, 4  ;;  %v10435_v40 = vld [vmem:[%s18952_s0 + $0x48] sm:$0xff]  ;;  %564 = vst.msk [vmem:[#allocation2 + $0x1c0] sm:$0xff] %vm55_vm1, %v10474_v11 }
  0x37   :  { %361 = vrot.lane.b32.xlu1 %v10443_v20, %s12623_s22  ;;  %2026 = vmatpush2.bf16.msra.mxu0 %v11828_v39  ;;  %v515_v20 = vsel %vm168_vm0, %v513_v8, %v514_v9  ;;  %158 = vst.msk [vmem:[#allocation2 + $0x78] sm:$0xf] %vm18972_vm2, %v154_v18  ;;  %v302_v39 = vrot.slane %v10432_v35, 4  ;;  %v10484_v34 = vld [vmem:[%s18952_s0 + $0x92] sm:$0xff]  ;;  %v10485_v35 = vld [vmem:[%s18952_s0 + $0x9a] sm:$0xf] }
  0x38   :  { %2027 = vmatprep.subr.bf16.mxu0 %v11832_v46  ;;  %320 = vst.msk [vmem:[#allocation2 + $0x100] sm:$0xff] %vm55_vm1, %v10435_v40  ;;  %v10468_v46 = vld [vmem:[%s18952_s0 + $0x73] sm:$0xff]  ;;  %v301_v38 = vsel %vm168_vm0, %v299_v24, %v300_v37  ;;  %v549_v24 = vrot.slane %v10473_v19, 4 }
  0x39   :  { %2201 = vmatpush2.bf16.msra.mxu1 %v11837_v48  ;;  %v10436_v48 = vld [vmem:[%s18952_s0 + $0x50] sm:$0xff]  ;;  %311 = vst.msk [vmem:[#allocation2 + $0x98] sm:$0xff] %vm55_vm1, %v301_v38  ;;  %v10481_v38 = vld [vmem:[%s18952_s0 + $0x99] sm:$0xf] }
  0x3a   :  { %363 = vrot.lane.b32.xlu0 %v10444_v25, %s12623_s22  ;;  %2202 = vmatprep.subr.bf16.mxu1 %v11841_v49  ;;  %v481_v25 = vrot.slane %v10464_v12, 4  ;;  %321 = vst.msk [vmem:[#allocation2 + $0x120] sm:$0xff] %vm55_vm1, %v10436_v48  ;;  %v10433_v49 = vld [vmem:[%s18952_s0 + $0x3c] sm:$0xf]  ;;  %v10480_v40 = vld [vmem:[%s18952_s0 + $0x91] sm:$0xff]  ;;  %v13373_v48 = vld [vmem:[%s18952_s0 + $0xa1] sm:$0xff] }
  0x3b   :  { %333 = vrot.lane.b32.xlu1 %v10439_v27, %s12624_s23  ;;  %2028 = vmatpush2.bf16.msra.mxu0 %v11834_v47  ;;  %v13147_v27 = vpack.c.bf16 %v1056_v22, %v1052_v21  ;;  %v10469_v47 = vld [vmem:[%s18952_s0 + $0x7b] sm:$0xf]  ;;  %v10490_v21 = vld [vmem:[%s18952_s0 + $0x84] sm:$0xff]  ;;  %v10491_v22 = vld [vmem:[%s18952_s0 + $0x8c] sm:$0xff]  ;;  %v688_v52 = vrot.slane %v13373_v48, 4 }
  0x3c   :  { %2029 = vmatprep.subr.bf16.mxu0 %v11838_v53  ;;  %v482_v41 = vsel %vm168_vm0, %v479_v45, %v481_v25  ;;  %v303_v45 = vsel %vm168_vm0, %v300_v37, %v302_v39  ;;  %652 = vst.msk [vmem:[#allocation2 + $0x1d8] sm:$0xff] %vm55_vm1, %v10490_v21  ;;  %653 = vst.msk [vmem:[#allocation2 + $0x1f8] sm:$0xff] %vm55_vm1, %v10491_v22  ;;  %v10494_v37 = vld [vmem:[%s18952_s0 + $0xa0] sm:$0xff]  ;;  %v13403_v60 = vld [vmem:[%s18952_s0 + $0xb2] sm:$0xff] }
  0x3d   :  { %2203 = vmatpush2.bf16.msra.mxu1 %v11843_v54  ;;  %10674 = vmatprep.mubr.msk.bf16.mxu1 %vm55_vm1, %v13147_v27  ;;  %312 = vst.msk [vmem:[#allocation2 + $0xb8] sm:$0xff] %vm55_vm1, %v303_v45  ;;  %v10488_v45 = vld [vmem:[%s18952_s0 + $0x93] sm:$0xff] }
  0x3e   :  { %335 = vrot.lane.b32.xlu0 %v10440_v32, %s12624_s23  ;;  %2204 = vmatprep.subr.bf16.mxu1 %v11847_v59  ;;  %v174_v32 = vrot.slane %v10417_v29, 4  ;;  %v10452_v59 = vld [vmem:[%s18952_s0 + $0x54] sm:$0xff] }
  0x3f   :  { %389 = vrot.lane.b32.xlu1 %v10447_v33, %s12625_s17  ;;  %2030 = vmatpush2.bf16.msra.mxu0 %v11840_v58  ;;  %v10434_v33 = vld [vmem:[%s18952_s0 + $0x40] sm:$0xff]  ;;  %v10437_v58 = vld [vmem:[%s18952_s0 + $0x58] sm:$0xf]  ;;  %409 = vst.msk [vmem:[#allocation2 + $0x138] sm:$0xff] %vm55_vm1, %v10452_v59 }
  0x40   :  { %2031 = vmatprep.subr.bf16.mxu0 %v11844_v2  ;;  %319 = vst.msk [vmem:[#allocation2 + $0xe0] sm:$0xff] %vm55_vm1, %v10434_v33  ;;  %v175_v36 = vsel %vm168_vm0, %v172_v16, %v174_v32  ;;  %v10456_v2 = vld [vmem:[%s18952_s0 + $0x70] sm:$0xff]  ;;  %v10475_v16 = vld [vmem:[%s18952_s0 + $0x88] sm:$0xff]  ;;  %v10477_v33 = vld [vmem:[%s18952_s0 + $0x98] sm:$0xf] }
  0x41   :  { %2205 = vmatpush2.bf16.msra.mxu1 %v11849_v4  ;;  %184 = vst.msk [vmem:[#allocation2 + $0xc0] sm:$0xff] %vm55_vm1, %v175_v36  ;;  %v423_v4 = vrot.slane %v10456_v2, 4  ;;  %565 = vst.msk [vmem:[#allocation2 + $0x1e0] sm:$0xff] %vm55_vm1, %v10475_v16  ;;  %v10487_v32 = vld [vmem:[%s18952_s0 + $0x8b] sm:$0xff]  ;;  %v13331_v36 = vld [vmem:[%s18952_s0 + $0xa2] sm:$0xff] }
  0x42   :  { %391 = vrot.lane.b32.xlu0 %v10448_v43, %s12625_s17  ;;  %v446_v43 = vrot.slane %v10460_v30, 4  ;;  %322 = vst.msk [vmem:[#allocation2 + $0x140] sm:$0xf] %vm18972_vm2, %v10437_v58  ;;  %v10476_v30 = vld [vmem:[%s18952_s0 + $0x90] sm:$0xff]  ;;  %567 = vst.msk [vmem:[#allocation2 + $0x220] sm:$0xf] %vm18972_vm2, %v10477_v33 }
  0x43   :  { %365 = vrot.lane.b32.xlu1 %v10445_v42, %s12623_s22  ;;  %2032 = vmatpush2.bf16.msra.mxu0 %v11846_v6  ;;  %v484_v42 = vsel %vm168_vm0, %v481_v25, %v483_v26  ;;  %v10482_v6 = vld [vmem:[%s18952_s0 + $0x82] sm:$0xff]  ;;  %566 = vst.msk [vmem:[#allocation2 + $0x200] sm:$0xff] %vm55_vm1, %v10476_v30  ;;  %v10511_v2 = vld [vmem:[%s18952_s0 + $0xac] sm:$0xff]  ;;  %v10497_v16 = vld [vmem:[%s18952_s0 + $0xb8] sm:$0xf] }
  0x44   :  { %v447_v53 = vsel %vm168_vm0, %v444_v0, %v446_v43  ;;  %v10455_v0 = vld [vmem:[%s18952_s0 + $0x68] sm:$0xff]  ;;  %v1060_v30 = vld [vmem:[#allocation2 + $0x58] sm:$0xff] }
  0x45   :  { %v421_v1 = vrot.slane %v10455_v0, 4  ;;  %v10478_v25 = vld [vmem:[%s18952_s0 + $0x81] sm:$0xff]  ;;  %v10479_v26 = vld [vmem:[%s18952_s0 + $0x89] sm:$0xff]  ;;  %v1064_v33 = vld [vmem:[#allocation2 + $0x78] sm:$0xff] }
  0x46   :  { %485 = vrot.lane.b32.xlu0 %v478_v44, %s12623_s22  ;;  %v448_v44 = vrot.slane %v10461_v31, 4  ;;  %v10486_v31 = vld [vmem:[%s18952_s0 + $0x83] sm:$0xff] }
  0x47   :  { %487 = vrot.lane.b32.xlu1 %v480_v50, %s12623_s22  ;;  %v304_v50 = vrot.slane %v10433_v49, 4  ;;  %v422_v12 = vsel %vm168_vm0, %v420_v63, %v421_v1  ;;  %v424_v13 = vsel %vm168_vm0, %v421_v1, %v423_v4  ;;  %v790_v1 = vrot.slane %v10511_v2, 4  ;;  %v11864_v2 = vld [vmem:[%s18953_s1 + $0xac] ss:$16 sps:$4 sm:$0xff]  }
  0x48   :  { %v449_v54 = vsel %vm168_vm0, %v446_v43, %v448_v44  ;;  %432 = vst.msk [vmem:[#allocation2 + $0x160] sm:$0xff] %vm55_vm1, %v422_v12  ;;  %433 = vst.msk [vmem:[#allocation2 + $0x180] sm:$0xff] %vm55_vm1, %v424_v13  ;;  %v10492_v44 = vld [vmem:[%s18952_s0 + $0x94] sm:$0xff] }
  0x49   :  { %v305_v57 = vsel %vm168_vm0, %v302_v39, %v304_v50  ;;  %v665_v39 = vrot.slane %v10494_v37, 4  ;;  %654 = vst.msk [vmem:[#allocation2 + $0x218] sm:$0xff] %vm55_vm1, %v10492_v44  ;;  %v10503_v50 = vld [vmem:[%s18952_s0 + $0xaa] sm:$0xff]  ;;  %v10501_v37 = vld [vmem:[%s18952_s0 + $0xb9] sm:$0xf] }
  0x4a   :  { %337 = vrot.lane.b32.xlu0 %v10441_v55, %s12624_s23  ;;  %v516_v55 = vrot.slane %v10468_v46, 4  ;;  %313 = vst.msk [vmem:[#allocation2 + $0xd8] sm:$0xff] %vm55_vm1, %v305_v57  ;;  %v10493_v46 = vld [vmem:[%s18952_s0 + $0x9c] sm:$0xf]  ;;  %v13394_v57 = vld [vmem:[%s18952_s0 + $0xa3] sm:$0xff]  ;;  %v724_v59 = vrot.slane %v10503_v50, 4 }
  0x4b   :  { %393 = vrot.lane.b32.xlu1 %v10449_v56, %s12625_s17  ;;  %v518_v56 = vrot.slane %v10469_v47, 4  ;;  %676 = vst.msk [vmem:[#allocation2 + $0x220] sm:$0xf0] %vm18971_vm3, %v665_v39  ;;  %v10495_v47 = vld [vmem:[%s18952_s0 + $0xa8] sm:$0xff]  ;;  %v758_v5 = vrot.slane %v13394_v57, 4 }
  0x4c   :  { %655 = vst.msk [vmem:[#allocation2 + $0x238] sm:$0xf] %vm18972_vm2, %v10493_v46  ;;  %v666_v49 = vrot.slane %v10495_v47, 4  ;;  %v11853_v44 = vld [vmem:[%s18953_s1 + $0x2e8] ss:$16 sps:$4 sm:$0xff]   ;;  %v10514_v46 = vld [vmem:[%s18952_s0 + $0xc0] sm:$0xff] }
  0x4d   :  { %v519_v62 = vsel %vm168_vm0, %v516_v55, %v518_v56  ;;  %v10489_v56 = vld [vmem:[%s18952_s0 + $0x9b] sm:$0xf]  ;;  %809 = vst.msk [vmem:[#allocation2 + $0x2a0] sm:$0xff] %vm55_vm1, %v10514_v46 }
  0x4e   :  { %450 = vrot.lane.b32.xlu0 %v443_v61, %s12624_s23  ;;  %v517_v61 = vsel %vm168_vm0, %v514_v9, %v516_v55  ;;  %v10470_v9 = vld [vmem:[%s18952_s0 + $0x64] sm:$0xff]  ;;  %v667_v51 = vsel %vm168_vm0, %v665_v39, %v666_v49  ;;  %v10496_v55 = vld [vmem:[%s18952_s0 + $0xb0] sm:$0xff]  ;;  %v10513_v50 = vld [vmem:[%s18952_s0 + $0xbc] sm:$0xf] }
  0x4f   :  { %452 = vrot.lane.b32.xlu1 %v445_v10, %s12624_s23  ;;  %v10471_v10 = vld [vmem:[%s18952_s0 + $0x6c] sm:$0xff]  ;;  %v544_v14 = vrot.slane %v10470_v9, 4  ;;  %677 = vst.msk [vmem:[#allocation2 + $0x240] sm:$0xff] %vm55_vm1, %v667_v51  ;;  %v668_v58 = vrot.slane %v10496_v55, 4 }
  0x50   :  { %v545_v15 = vrot.slane %v10471_v10, 4  ;;  %v13434_v9 = vld [vmem:[%s18952_s0 + $0xb1] sm:$0xff]  ;;  %v11852_v10 = vld [vmem:[%s18953_s1 + $0xec] ss:$16 sps:$4 sm:$0xff]  }
  0x51   :  { %555 = vst.msk [vmem:[#allocation2 + $0x158] sm:$0xf0] %vm18971_vm3, %v544_v14  ;;  %2347 = vmatprep.subr.bf16.mxu1 %v11852_v10  ;;  %v691_v21 = vrot.slane %v13434_v9, 4  ;;  %v11861_v55 = vld [vmem:[%s18953_s1 + $0x2cc] ss:$16 sps:$4 sm:$0xff]  }
  0x52   :  { %520 = vrot.lane.b32.xlu0 %v513_v8, %s12625_s17  ;;  %v425_v8 = vrot.slane %v10457_v3, 4  ;;  %v546_v23 = vsel %vm168_vm0, %v544_v14, %v545_v15  ;;  %v13418_v3 = vld [vmem:[%s18952_s0 + $0xb4] sm:$0xff]  ;;  %v11870_v9 = vld [vmem:[%s18953_s1 + $0x8c] ss:$16 sps:$4 sm:$0xff]  }
  0x53   :  { %522 = vrot.lane.b32.xlu1 %v515_v20, %s12625_s17  ;;  %v547_v20 = vrot.slane %v10472_v17, 4  ;;  %556 = vst.msk [vmem:[#allocation2 + $0x178] sm:$0xff] %vm55_vm1, %v546_v23  ;;  %v11855_v17 = vld [vmem:[%s18953_s1 + $0x2ec] ss:$16 sps:$4 sm:$0xff]   ;;  %v13469_v23 = vld [vmem:[%s18952_s0 + $0xb3] sm:$0xff] }
  0x54   :  { %v426_v18 = vsel %vm168_vm0, %v423_v4, %v425_v8  ;;  %v792_v4 = vrot.slane %v13418_v3, 4  ;;  %2520 = vmatprep.subr.bf16.mxu0 %v11855_v17  ;;  %v10522_v3 = vld [vmem:[%s18952_s0 + $0xc2] sm:$0xff] }
  0x55   :  { %434 = vst.msk [vmem:[#allocation2 + $0x1a0] sm:$0xff] %vm55_vm1, %v426_v18  ;;  %v548_v28 = vsel %vm168_vm0, %v545_v15, %v547_v20  ;;  %v550_v29 = vsel %vm168_vm0, %v547_v20, %v549_v24  ;;  %v13446_v15 = vld [vmem:[%s18952_s0 + $0xab] sm:$0xff]  ;;  %v670_v18 = vrot.slane %v10497_v16, 4 }
  0x56   :  { %489 = vrot.lane.b32.xlu0 %v482_v41, %s12623_s22  ;;  %557 = vst.msk [vmem:[#allocation2 + $0x198] sm:$0xff] %vm55_vm1, %v548_v28  ;;  %558 = vst.msk [vmem:[#allocation2 + $0x1b8] sm:$0xff] %vm55_vm1, %v550_v29  ;;  %v13346_v41 = vld [vmem:[%s18952_s0 + $0xa4] sm:$0xff]  ;;  %v793_v12 = vsel %vm168_vm0, %v790_v1, %v792_v4  ;;  %v759_v22 = vrot.slane %v13446_v15, 4  ;;  %v10505_v29 = vld [vmem:[%s18952_s0 + $0xba] sm:$0xf] }
  0x57   :  { %491 = vrot.lane.b32.xlu1 %v484_v42, %s12623_s22  ;;  %v723_v42 = vrot.slane %v13331_v36, 4  ;;  %v789_v43 = vrot.slane %v13346_v41, 4  ;;  %802 = vst.msk [vmem:[#allocation2 + $0x278] sm:$0xff] %vm55_vm1, %v793_v12  ;;  %v671_v24 = vsel %vm168_vm0, %v668_v58, %v670_v18  ;;  %v761_v36 = vrot.slane %v13469_v23, 4  ;;  %v11865_v10 = vld [vmem:[%s18953_s1 + $0x2a8] ss:$16 sps:$4 sm:$0xff]  }
  0x58   :  { %679 = vst.msk [vmem:[#allocation2 + $0x280] sm:$0xff] %vm55_vm1, %v671_v24  ;;  %v760_v41 = vsel %vm168_vm0, %v758_v5, %v759_v22  ;;  %v11868_v17 = vld [vmem:[%s18953_s1 + $0x88] ss:$16 sps:$4 sm:$0xff]   ;;  %v11873_v18 = vld [vmem:[%s18953_s1 + $0x6c] ss:$16 sps:$4 sm:$0xff]  }
  0x59   :  { %800 = vst.msk [vmem:[#allocation2 + $0x238] sm:$0xf0] %vm18971_vm3, %v789_v43  ;;  %v791_v11 = vsel %vm168_vm0, %v789_v43, %v790_v1  ;;  %v11850_v43 = vld [vmem:[%s18953_s1 + $0xe8] ss:$16 sps:$4 sm:$0xff]   ;;  %v11876_v23 = vld [vmem:[%s18953_s1 + $0x28c] ss:$16 sps:$4 sm:$0xff]  }
  0x5a   :  { %454 = vrot.lane.b32.xlu0 %v447_v53, %s12624_s23  ;;  %801 = vst.msk [vmem:[#allocation2 + $0x258] sm:$0xff] %vm55_vm1, %v791_v11  ;;  %v11867_v11 = vld [vmem:[%s18953_s1 + $0x2ac] ss:$16 sps:$4 sm:$0xff]  }
  0x5b   :  { %456 = vrot.lane.b32.xlu1 %v449_v54, %s12624_s23  ;;  %v10531_v24 = vld [vmem:[%s18952_s0 + $0xcc] sm:$0xff] }
  0x5c   :  { %898 = vst.msk [vmem:[#allocation2 + $0x2d8] sm:$0xff] %vm55_vm1, %v10531_v24  ;;  %v13769_v24 = vld [vmem:[%s18952_s0 + $0xec] sm:$0xff] }
  0x5e   :  { %524 = vrot.lane.b32.xlu0 %v517_v61, %s12625_s17  ;;  %v13408_v61 = vld [vmem:[%s18952_s0 + $0xa9] sm:$0xff] }
  0x5f   :  { %526 = vrot.lane.b32.xlu1 %v519_v62, %s12625_s17  ;;  %v669_v62 = vsel %vm168_vm0, %v666_v49, %v668_v58  ;;  %v689_v8 = vrot.slane %v13408_v61, 4  ;;  %v13507_v49 = vpack.c.bf16 %v1064_v33, %v1060_v30  ;;  %v693_v58 = vrot.slane %v10501_v37, 4  ;;  %v10530_v61 = vld [vmem:[%s18952_s0 + $0xc4] sm:$0xff] }
  0x60   :  { %678 = vst.msk [vmem:[#allocation2 + $0x260] sm:$0xff] %vm55_vm1, %v669_v62  ;;  %897 = vst.msk [vmem:[#allocation2 + $0x2b8] sm:$0xff] %vm55_vm1, %v10530_v61  ;;  %v11871_v30 = vld [vmem:[%s18953_s1 + $0x68] ss:$16 sps:$4 sm:$0xff]  }
  0x61   :  { %v690_v20 = vsel %vm168_vm0, %v688_v52, %v689_v8  ;;  %v694_v1 = vsel %vm168_vm0, %v691_v21, %v693_v58  ;;  %v13694_v58 = vld [vmem:[%s18952_s0 + $0xe2] sm:$0xff] }
  0x62   :  { %604 = vrot.lane.b32.xlu0 %v10482_v6, %s12623_s22  ;;  %v726_v6 = vrot.slane %v13403_v60, 4  ;;  %v10509_v60 = vld [vmem:[%s18952_s0 + $0xbb] sm:$0xf] }
  0x63   :  { %606 = vrot.lane.b32.xlu1 %v10483_v7, %s12623_s22  ;;  %v725_v7 = vsel %vm168_vm0, %v723_v42, %v724_v59 }
  0x64   :  { %v727_v19 = vsel %vm168_vm0, %v724_v59, %v726_v6 }
  0x66   :  { %576 = vrot.lane.b32.xlu0 %v10478_v25, %s12624_s23 }
  0x67   :  { %578 = vrot.lane.b32.xlu1 %v10479_v26, %s12624_s23 }
  0x6a   :  { %632 = vrot.lane.b32.xlu0 %v10486_v31, %s12625_s17 }
  0x6b   :  { %634 = vrot.lane.b32.xlu1 %v10487_v32, %s12625_s17 }
  0x6e   :  { %608 = vrot.lane.b32.xlu0 %v10484_v34, %s12623_s22 }
  0x6f   :  { %610 = vrot.lane.b32.xlu1 %v10485_v35, %s12623_s22 }
  0x72   :  { %730 = vrot.lane.b32.xlu0 %v723_v42, %s12623_s22  ;;  %v728_v42 = vrot.slane %v10505_v29, 4 }
  0x73   :  { %580 = vrot.lane.b32.xlu1 %v10480_v40, %s12624_s23  ;;  %v692_v40 = vsel %vm168_vm0, %v689_v8, %v691_v21  ;;  %v11862_v8 = vld [vmem:[%s18953_s1 + $0xa8] ss:$16 sps:$4 sm:$0xff]  }
  0x74   :  { %v102_v53 = vpop.permute.xlu0 %101  ;;  %v729_v57 = vsel %vm168_vm0, %v726_v6, %v728_v42  ;;  %v1068_v21 = vld [vmem:[#allocation2 + $0x98] sm:$0xff]  ;;  %v10519_v42 = vld [vmem:[%s18952_s0 + $0xc9] sm:$0xff] }
  0x75   :  { %v70_v54 = vpop.permute.xlu1 %69  ;;  %116 = vst.msk [vmem:[#allocation2 + $0x10] sm:$0xff] %vm18992_vm4, %v102_v53 }
  0x76   :  { %82 = vst.msk [vmem:[#allocation2] sm:$0xff] %vm19027_vm5, %v70_v54  ;;  %582 = vrot.lane.b32.xlu0 %v10481_v38, %s12624_s23 }
  0x77   :  { %84 = vst.msk [vmem:[#allocation2 + $0x8] sm:$0xff] %vm83_vm6, %v70_v54  ;;  %636 = vrot.lane.b32.xlu1 %v10488_v45, %s12625_s17  ;;  %v794_v54 = vrot.slane %v10513_v50, 4 }
  0x78   :  { %114 = vst.msk [vmem:[#allocation2 + $0x8] sm:$0xff] %vm18990_vm7, %v102_v53  ;;  %v104_v63 = vpop.permute.xlu0 %103  ;;  %v11858_v53 = vld [vmem:[%s18953_s1 + $0xcc] ss:$16 sps:$4 sm:$0xff]  }
  0x79   :  { %v72_v0 = vpop.permute.xlu1 %71  ;;  %118 = vst.msk [vmem:[#allocation2 + $0x30] sm:$0xff] %vm18992_vm4, %v104_v63  ;;  %v795_v59 = vsel %vm168_vm0, %v792_v4, %v794_v54  ;;  %v763_v4 = vrot.slane %v10509_v60, 4  ;;  %v11885_v54 = vld [vmem:[%s18953_s1 + $0x2c] ss:$16 sps:$4 sm:$0xff]   ;;  %v10534_v60 = vld [vmem:[%s18952_s0 + $0xe0] sm:$0xff] }
  0x7a   :  { %85 = vst.msk [vmem:[#allocation2 + $0x20] sm:$0xff] %vm19027_vm5, %v72_v0  ;;  %638 = vrot.lane.b32.xlu0 %v10489_v56, %s12625_s17  ;;  %v762_v56 = vsel %vm168_vm0, %v759_v22, %v761_v36  ;;  %v1072_v22 = vld [vmem:[#allocation2 + $0xb8] sm:$0xff] }
  0x7b   :  { %86 = vst.msk [vmem:[#allocation2 + $0x28] sm:$0xff] %vm83_vm6, %v72_v0  ;;  %695 = vrot.lane.b32.xlu1 %v688_v52, %s12624_s23  ;;  %v11859_v52 = vld [vmem:[%s18953_s1 + $0x2c8] ss:$16 sps:$4 sm:$0xff]   ;;  %v764_v12 = vsel %vm168_vm0, %v761_v36, %v763_v4 }
  0x7c   :  { %117 = vst.msk [vmem:[#allocation2 + $0x28] sm:$0xff] %vm18990_vm7, %v104_v63  ;;  %v134_v13 = vpop.permute.xlu0 %133  ;;  %v11856_v0 = vld [vmem:[%s18953_s1 + $0xc8] ss:$16 sps:$4 sm:$0xff]  }
  0x7d   :  { %v136_v14 = vpop.permute.xlu1 %135  ;;  %146 = vst.msk [vmem:[#allocation2 + $0x10] sm:$0xff] %vm18991_vm8, %v134_v13  ;;  %v1049_v35 = vld [vmem:[#allocation2] sm:$0xff]  ;;  %v10528_v4 = vld [vmem:[%s18952_s0 + $0xd3] sm:$0xff] }
  0x7e   :  { %147 = vst.msk [vmem:[#allocation2 + $0x30] sm:$0xff] %vm18991_vm8, %v136_v14  ;;  %765 = vrot.lane.b32.xlu0 %v758_v5, %s12625_s17  ;;  %v10515_v5 = vld [vmem:[%s18952_s0 + $0xc8] sm:$0xff]  ;;  %v10516_v14 = vld [vmem:[%s18952_s0 + $0xd0] sm:$0xff] }
  0x7f   :  { %732 = vrot.lane.b32.xlu1 %v725_v7, %s12623_s22  ;;  %v1050_v31 = vld [vmem:[#allocation2 + $0x8] sm:$0xff]  ;;  %803 = vst.msk [vmem:[#allocation2 + $0x298] sm:$0xff] %vm55_vm1, %v795_v59  ;;  %810 = vst.msk [vmem:[#allocation2 + $0x2c0] sm:$0xff] %vm55_vm1, %v10515_v5  ;;  %v10525_v5 = vld [vmem:[%s18952_s0 + $0xda] sm:$0xf] }
  0x80   :  { %v106_v25 = vpop.permute.xlu0 %105  ;;  %v10518_v13 = vld [vmem:[%s18952_s0 + $0xc1] sm:$0xff]  ;;  %811 = vst.msk [vmem:[#allocation2 + $0x2e0] sm:$0xff] %vm55_vm1, %v10516_v14 }
  0x81   :  { %v13472_v26 = vpop.permute.xlu1 %107  ;;  %v1053_v28 = vld [vmem:[#allocation2 + $0x20] sm:$0xff]  ;;  %120 = vst.msk [vmem:[#allocation2 + $0x50] sm:$0xff] %vm18992_vm4, %v106_v25 }
  0x82   :  { %124 = vst.msk [vmem:[#allocation2 + $0x70] sm:$0xf] %vm18987_vm9, %v13472_v26  ;;  %734 = vrot.lane.b32.xlu0 %v727_v19, %s12623_s22  ;;  %v13489_v39 = vpack.c.bf16 %v1053_v28, %v1049_v35  ;;  %v10526_v19 = vld [vmem:[%s18952_s0 + $0xc3] sm:$0xff]  ;;  %v11879_v35 = vld [vmem:[%s18953_s1 + $0x4c] ss:$16 sps:$4 sm:$0xff]  }
  0x83   :  { %v1054_v32 = vld [vmem:[#allocation2 + $0x28] sm:$0xff]  ;;  %697 = vrot.lane.b32.xlu1 %v690_v20, %s12624_s23 }
  0x84   :  { %v13483_v34 = vpack.c.bf16 %v1054_v32, %v1050_v31  ;;  %v13504_v47 = vpop.permute.xlu0 %237  ;;  %v1051_v45 = vld [vmem:[#allocation2 + $0x10] sm:$0xff]  ;;  %v11874_v31 = vld [vmem:[%s18953_s1 + $0x288] ss:$16 sps:$4 sm:$0xff]  }
  0x85   :  { %v74_v38 = vpop.permute.xlu1 %73  ;;  %v1055_v48 = vld [vmem:[#allocation2 + $0x30] sm:$0xff]  ;;  %252 = vst.msk [vmem:[#allocation2 + $0x70] sm:$0xf0] %vm18969_vm10, %v13504_v47  ;;  %vm18984_vm10 = vcmask 1048068  }
  0x86   :  { %2033 = vmatprep.mubr.bf16.mxu0 %v13483_v34  ;;  %87 = vst.msk [vmem:[#allocation2 + $0x40] sm:$0xff] %vm19027_vm5, %v74_v38  ;;  %v13518_v51 = vpack.c.bf16 %v1055_v48, %v1051_v45  ;;  %699 = vrot.lane.b32.xlu0 %v692_v40, %s12624_s23  ;;  %v10523_v20 = vld [vmem:[%s18952_s0 + $0xca] sm:$0xff]  ;;  %v13660_v45 = vpack.c.bf16 %v1072_v22, %v1068_v21 }
  0x87   :  { %88 = vst.msk [vmem:[#allocation2 + $0x48] sm:$0xff] %vm83_vm6, %v74_v38  ;;  %2034 = vmatmul.mubr.bf16.vlgmr.msra.gmra.mxu0 %v13489_v39  ;;  %767 = vrot.lane.b32.xlu1 %v760_v41, %s12625_s17  ;;  %v10524_v41 = vld [vmem:[%s18952_s0 + $0xd2] sm:$0xff] }
  0x88   :  { %119 = vst.msk [vmem:[#allocation2 + $0x48] sm:$0xff] %vm18990_vm7, %v106_v25  ;;  %2207 = vmatmul.mubr.bf16.vlgmr.msra.gmra.mxu1 %v13518_v51  ;;  %2521 = vmatpush1.bf16.msra.mxu0 %v11853_v44  ;;  %v76_v62 = vpop.permute.xlu0 %75  ;;  %v10532_v25 = vld [vmem:[%s18952_s0 + $0xd4] sm:$0xff] }
  0x89   :  { %v138_v63 = vpop.permute.xlu1 %137  ;;  %10675 = vmatprep.mubr.msk.bf16.mxu1 %vm55_vm1, %v13507_v49  ;;  %2348 = vmatpush1.bf16.msra.mxu1 %v11850_v43  ;;  %90 = vst.msk [vmem:[#allocation2 + $0x60] sm:$0xf] %vm18968_vm11, %v76_v62  ;;  %vm18985_vm11 = vcmask 523268   ;;  %v11882_v43 = vld [vmem:[%s18953_s1 + $0x26c] ss:$16 sps:$4 sm:$0xff]  }
  0x8a   :  { %92 = vst.msk [vmem:[#allocation2 + $0x68] sm:$0xf] %vm18988_vm12, %v76_v62  ;;  %2349 = vmatprep.subr.bf16.mxu1 %v11858_v53  ;;  %2522 = vmatprep.subr.bf16.mxu0 %v11861_v55  ;;  %v11877_v48 = vld [vmem:[%s18953_s1 + $0x48] ss:$16 sps:$4 sm:$0xff]  }
  0x8b   :  { %148 = vst.msk [vmem:[#allocation2 + $0x50] sm:$0xff] %vm18991_vm8, %v138_v63  ;;  %769 = vrot.lane.b32.xlu0 %v762_v56, %s12625_s17  ;;  %736 = vrot.lane.b32.xlu1 %v729_v57, %s12623_s22  ;;  %v11880_v53 = vld [vmem:[%s18953_s1 + $0x268] ss:$16 sps:$4 sm:$0xff]  }
  0x8c   :  { %122 = vst.msk [vmem:[#allocation2 + $0x68] sm:$0xf] %vm18970_vm13, %v13472_v26  ;;  %2523 = vmatpush1.bf16.msra.mxu0 %v11859_v52  ;;  %v140_v6 = vpop.permute.xlu0 %139  ;;  %vm18983_vm13 = vcmask 1047812   ;;  %v10517_v55 = vld [vmem:[%s18952_s0 + $0xd8] sm:$0xf]  ;;  %v10527_v57 = vld [vmem:[%s18952_s0 + $0xcb] sm:$0xff] }
  0x8d   :  { %v201_v7 = vpop.permute.xlu1 %200  ;;  %2350 = vmatpush1.bf16.msra.mxu1 %v11856_v0  ;;  %150 = vst.msk [vmem:[#allocation2 + $0x70] sm:$0xf] %vm18986_vm14, %v140_v6  ;;  %2524 = vmatprep.subr.bf16.mxu0 %v11867_v11  ;;  %v1057_v37 = vld [vmem:[#allocation2 + $0x40] sm:$0xff]  ;;  %v10520_v56 = vld [vmem:[%s18952_s0 + $0xd1] sm:$0xff]  ;;  %v11888_v52 = vld [vmem:[%s18953_s1 + $0x24c] ss:$16 sps:$4 sm:$0xff]  }
  0x8e   :  { %213 = vst.msk [vmem:[#allocation2 + $0x60] sm:$0xf0] %vm18989_vm15, %v201_v7  ;;  %2351 = vmatprep.subr.bf16.mxu1 %v11864_v2  ;;  %v13702_v62 = vld [vmem:[%s18952_s0 + $0xea] sm:$0xff] }
  0x8f   :  { %215 = vst.msk [vmem:[#allocation2 + $0x68] sm:$0xf0] %vm18985_vm11, %v201_v7  ;;  %849 = vrot.lane.b32.xlu0 %v10522_v3, %s12623_s22  ;;  %701 = vrot.lane.b32.xlu1 %v694_v1, %s12624_s23  ;;  %v1058_v32 = vld [vmem:[#allocation2 + $0x48] sm:$0xff]  ;;  %v910_v3 = vrot.slane %v10534_v60, 4  ;;  %v968_v7 = vrot.slane %v13694_v58, 4  ;;  %v10536_v60 = vld [vmem:[%s18952_s0 + $0xf0] sm:$0xff] }
  0x90   :  { %250 = vst.msk [vmem:[#allocation2 + $0x68] sm:$0xf0] %vm18984_vm10, %v13504_v47  ;;  %v275_v15 = vpop.permute.xlu0 %274  ;;  %2525 = vmatpush1.bf16.msra.mxu0 %v11865_v10  ;;  %v11883_v63 = vld [vmem:[%s18953_s1 + $0x28] ss:$16 sps:$4 sm:$0xff]   ;;  %v11891_v2 = vld [vmem:[%s18953_s1 + $0xc] ss:$16 sps:$4 sm:$0xff]  }
  0x91   :  { %v240_v16 = vpop.permute.xlu1 %239  ;;  %2352 = vmatpush1.bf16.msra.mxu1 %v11862_v8  ;;  %287 = vst.msk [vmem:[#allocation2 + $0x70] sm:$0xf0] %vm18983_vm13, %v275_v15  ;;  %2526 = vmatprep.subr.bf16.mxu0 %v11876_v23  ;;  %v11886_v0 = vld [vmem:[%s18953_s1 + $0x248] ss:$16 sps:$4 sm:$0xff]   ;;  %v969_v8 = vrot.slane %v13702_v62, 4 }
  0x92   :  { %254 = vst.msk [vmem:[#allocation2 + $0x90] sm:$0xff] %vm18992_vm4, %v240_v16  ;;  %2353 = vmatprep.subr.bf16.mxu1 %v11870_v9  ;;  %v1059_v47 = vld [vmem:[#allocation2 + $0x50] sm:$0xff]  ;;  %v13723_v1 = vld [vmem:[%s18952_s0 + $0xe8] sm:$0xff]  ;;  %v1076_v9 = vld [vmem:[#allocation2 + $0xd8] sm:$0xff] }
  0x93   :  { %771 = vrot.lane.b32.xlu0 %v764_v12, %s12625_s17  ;;  %821 = vrot.lane.b32.xlu1 %v10518_v13, %s12624_s23  ;;  %899 = vst.msk [vmem:[#allocation2 + $0x2f8] sm:$0xff] %vm55_vm1, %v10532_v25  ;;  %v911_v6 = vrot.slane %v13723_v1, 4  ;;  %v1080_v10 = vld [vmem:[#allocation2 + $0xf8] sm:$0xff]  ;;  %v13764_v23 = vld [vmem:[%s18952_s0 + $0xe1] sm:$0xff] }
  0x94   :  { %v242_v26 = vpop.permute.xlu0 %241  ;;  %2527 = vmatpush1.bf16.msra.mxu0 %v11874_v31  ;;  %812 = vst.msk [vmem:[#allocation2 + $0x300] sm:$0xf] %vm18972_vm2, %v10517_v55  ;;  %v11894_v11 = vld [vmem:[%s18953_s1 + $0x22c] ss:$16 sps:$4 sm:$0xff]   ;;  %v11898_v58 = vld [vmem:[%s18953_s1 + $0x208] ss:$16 sps:$4 sm:$0xff]  }
  0x95   :  { %v203_v28 = vpop.permute.xlu1 %202  ;;  %v1061_v29 = vld [vmem:[#allocation2 + $0x60] sm:$0xff]  ;;  %2354 = vmatpush1.bf16.msra.mxu1 %v11868_v17  ;;  %256 = vst.msk [vmem:[#allocation2 + $0xb0] sm:$0xff] %vm18992_vm4, %v242_v26  ;;  %2528 = vmatprep.subr.bf16.mxu0 %v11882_v43  ;;  %v912_v17 = vsel %vm168_vm0, %v910_v3, %v911_v6  ;;  %v10533_v31 = vld [vmem:[%s18952_s0 + $0xdc] sm:$0xf]  ;;  %v11895_v43 = vld [vmem:[%s18953_s1 + $0x1e8] ss:$16 sps:$4 sm:$0xff]  }
  0x96   :  { %216 = vst.msk [vmem:[#allocation2 + $0x80] sm:$0xff] %vm19027_vm5, %v203_v28  ;;  %2355 = vmatprep.subr.bf16.mxu1 %v11873_v18  ;;  %v13648_v40 = vpack.c.bf16 %v1061_v29, %v1057_v37  ;;  %v13779_v29 = vld [vmem:[%s18952_s0 + $0xe9] sm:$0xff] }
  0x97   :  { %217 = vst.msk [vmem:[#allocation2 + $0x88] sm:$0xff] %vm83_vm6, %v203_v28  ;;  %v1062_v33 = vld [vmem:[#allocation2 + $0x68] sm:$0xff]  ;;  %877 = vrot.lane.b32.xlu0 %v10526_v19, %s12625_s17  ;;  %851 = vrot.lane.b32.xlu1 %v10523_v20, %s12623_s22  ;;  %v970_v28 = vsel %vm168_vm0, %v968_v7, %v969_v8  ;;  %v934_v55 = vrot.slane %v13779_v29, 4  ;;  %v1096_v29 = vld [vmem:[#allocation2 + $0x178] sm:$0xff] }
  0x98   :  { %253 = vst.msk [vmem:[#allocation2 + $0x88] sm:$0xff] %vm18990_vm7, %v240_v16  ;;  %v13646_v36 = vpack.c.bf16 %v1062_v33, %v1058_v32  ;;  %v205_v44 = vpop.permute.xlu0 %204  ;;  %v1063_v38 = vld [vmem:[#allocation2 + $0x70] sm:$0xff]  ;;  %2529 = vmatpush1.bf16.msra.mxu0 %v11880_v53  ;;  %v11889_v16 = vld [vmem:[%s18953_s1 + $0x8] ss:$16 sps:$4 sm:$0xff]   ;;  %v11897_v19 = vld [vmem:[%s18953_s1 + $0x1ec] ss:$16 sps:$4 sm:$0xff]  }
  0x99   :  { %v277_v46 = vpop.permute.xlu1 %276  ;;  %2356 = vmatpush1.bf16.msra.mxu1 %v11871_v30  ;;  %218 = vst.msk [vmem:[#allocation2 + $0xa0] sm:$0xff] %vm19027_vm5, %v205_v44  ;;  %v13669_v50 = vpack.c.bf16 %v1063_v38, %v1059_v47  ;;  %2530 = vmatprep.subr.bf16.mxu0 %v11888_v52  ;;  %v10550_v20 = vld [vmem:[%s18952_s0 + $0xe4] sm:$0xff]  ;;  %v1035_v32 = vrot.slane %v13769_v24, 4  ;;  %v11903_v47 = vld [vmem:[%s18953_s1 + $0x1cc] ss:$16 sps:$4 sm:$0xff]  }
  0x9a   :  { %2043 = vmatprep.mubr.bf16.mxu0 %v13646_v36  ;;  %219 = vst.msk [vmem:[#allocation2 + $0xa8] sm:$0xff] %vm83_vm6, %v205_v44  ;;  %2357 = vmatprep.subr.bf16.mxu1 %v11879_v35  ;;  %v1034_v25 = vrot.slane %v10550_v20, 4  ;;  %v11892_v30 = vld [vmem:[%s18953_s1 + $0x228] ss:$16 sps:$4 sm:$0xff]  }
  0x9b   :  { %288 = vst.msk [vmem:[#allocation2 + $0x90] sm:$0xff] %vm18991_vm8, %v277_v46  ;;  %2044 = vmatmul.mubr.bf16.gmra.mxu0 %v13648_v40  ;;  %853 = vrot.lane.b32.xlu0 %v10524_v41, %s12623_s22  ;;  %v11900_v46 = vld [vmem:[%s18953_s1 + $0x20c] ss:$16 sps:$4 sm:$0xff]   ;;  %v13889_v20 = vld [vmem:[%s18952_s0 + $0xf1] sm:$0xff] }
  0x9c   :  { %255 = vst.msk [vmem:[#allocation2 + $0xa8] sm:$0xff] %vm18990_vm7, %v242_v26  ;;  %823 = vrot.lane.b32.xlu1 %v10519_v42, %s12624_s23  ;;  %2217 = vmatmul.mubr.bf16.gmra.mxu1 %v13669_v50  ;;  %v279_v59 = vpop.permute.xlu0 %278  ;;  %v13789_v42 = vpack.c.bf16 %v1080_v10, %v1076_v9  ;;  %v1036_v38 = vsel %vm168_vm0, %v1034_v25, %v1035_v32  ;;  %v10529_v53 = vld [vmem:[%s18952_s0 + $0xdb] sm:$0xf] }
  0x9d   :  { %v244_v61 = vpop.permute.xlu1 %243  ;;  %10676 = vmatprep.mubr.msk.bf16.mxu1 %vm55_vm1, %v13660_v45  ;;  %2358 = vmatpush1.bf16.msra.mxu1 %v11877_v48  ;;  %289 = vst.msk [vmem:[#allocation2 + $0xb0] sm:$0xff] %vm18991_vm8, %v279_v59  ;;  %v1065_v22 = vld [vmem:[#allocation2 + $0x80] sm:$0xff]  ;;  %v10521_v48 = vld [vmem:[%s18952_s0 + $0xd9] sm:$0xf] }
  0x9e   :  { %258 = vst.msk [vmem:[#allocation2 + $0xd0] sm:$0xff] %vm18992_vm4, %v244_v61  ;;  %2359 = vmatprep.subr.bf16.mxu1 %v11885_v54  ;;  %2531 = vmatpush1.bf16.msra.mxu0 %v11886_v0  ;;  %v933_v54 = vrot.slane %v13764_v23, 4  ;;  %v11909_v0 = vld [vmem:[%s18953_s1 + $0x1ac] ss:$16 sps:$4 sm:$0xff]  }
  0x9f   :  { %825 = vrot.lane.b32.xlu0 %v10520_v56, %s12624_s23  ;;  %921 = vst.msk [vmem:[#allocation2 + $0x300] sm:$0xf0] %vm18971_vm3, %v910_v3  ;;  %v1066_v14 = vld [vmem:[#allocation2 + $0x88] sm:$0xff]  ;;  %2532 = vmatprep.subr.bf16.mxu0 %v11894_v11  ;;  %1045 = vst.msk [vmem:[#allocation2 + $0x318] sm:$0xf0] %vm18971_vm3, %v1034_v25  ;;  %v1084_v11 = vld [vmem:[#allocation2 + $0x118] sm:$0xff] }
  0xa0   :  { %879 = vrot.lane.b32.xlu1 %v10527_v57, %s12625_s17  ;;  %v360_v12 = vpop.permute.xlu0 %359  ;;  %v1069_v15 = vld [vmem:[#allocation2 + $0xa0] sm:$0xff]  ;;  %922 = vst.msk [vmem:[#allocation2 + $0x320] sm:$0xff] %vm55_vm1, %v912_v17  ;;  %1046 = vst.msk [vmem:[#allocation2 + $0x338] sm:$0xff] %vm55_vm1, %v1036_v38  ;;  %v13832_v57 = vld [vmem:[%s18952_s0 + $0xeb] sm:$0xff]  ;;  %v935_v9 = vsel %vm168_vm0, %v933_v54, %v934_v55  ;;  %vm19044_vm3 = vcmask 261124  }
  0xa1   :  { %v207_v13 = vpop.permute.xlu1 %206  ;;  %2360 = vmatpush1.bf16.msra.mxu1 %v11883_v63  ;;  %372 = vst.msk [vmem:[#allocation2 + $0xf0] sm:$0xff] %vm18992_vm4, %v360_v12  ;;  %v13771_v26 = vpack.c.bf16 %v1069_v15, %v1065_v22  ;;  %v13827_v56 = vld [vmem:[%s18952_s0 + $0xe3] sm:$0xff]  ;;  %v11906_v63 = vld [vmem:[%s18953_s1 + $0x3ac] ss:$16 sps:$4 sm:$0xff]  }
  0xa2   :  { %220 = vst.msk [vmem:[#allocation2 + $0xc0] sm:$0xff] %vm19027_vm5, %v207_v13  ;;  %2361 = vmatprep.subr.bf16.mxu1 %v11891_v2  ;;  %v1067_v37 = vld [vmem:[#allocation2 + $0x90] sm:$0xff]  ;;  %2533 = vmatpush1.bf16.msra.mxu0 %v11892_v30  ;;  %v913_v2 = vrot.slane %v10536_v60, 4  ;;  %v1003_v3 = vrot.slane %v13827_v56, 4  ;;  %v13871_v10 = vld [vmem:[%s18952_s0 + $0xfa] sm:$0xf] }
  0xa3   :  { %221 = vst.msk [vmem:[#allocation2 + $0xc8] sm:$0xff] %vm83_vm6, %v207_v13  ;;  %v1070_v18 = vld [vmem:[#allocation2 + $0xa8] sm:$0xff]  ;;  %881 = vrot.lane.b32.xlu0 %v10528_v4, %s12625_s17  ;;  %2534 = vmatprep.subr.bf16.mxu0 %v11900_v46  ;;  %v1004_v4 = vrot.slane %v13832_v57, 4  ;;  %v10553_v46 = vld [vmem:[%s18952_s0 + $0xfc] sm:$0xf]  ;;  %v10548_v56 = vld [vmem:[%s18952_s0 + $0xf3] sm:$0xff] }
  0xa4   :  { %257 = vst.msk [vmem:[#allocation2 + $0xc8] sm:$0xff] %vm18990_vm7, %v244_v61  ;;  %855 = vrot.lane.b32.xlu1 %v10525_v5, %s12623_s22  ;;  %v13759_v21 = vpack.c.bf16 %v1070_v18, %v1066_v14  ;;  %v281_v33 = vpop.permute.xlu0 %280  ;;  %v1071_v41 = vld [vmem:[#allocation2 + $0xb0] sm:$0xff]  ;;  %v11901_v61 = vld [vmem:[%s18953_s1 + $0x1c8] ss:$16 sps:$4 sm:$0xff]   ;;  %v914_v13 = vsel %vm168_vm0, %v911_v6, %v913_v2  ;;  %v11912_v23 = vld [vmem:[%s18953_s1 + $0x38c] ss:$16 sps:$4 sm:$0xff]  }
  0xa5   :  { %v332_v35 = vpop.permute.xlu1 %331  ;;  %2362 = vmatpush1.bf16.msra.mxu1 %v11889_v16  ;;  %900 = vst.msk [vmem:[#allocation2 + $0x318] sm:$0xf] %vm18972_vm2, %v10533_v31  ;;  %v13800_v44 = vpack.c.bf16 %v1071_v41, %v1067_v37  ;;  %v13860_v5 = vld [vmem:[%s18952_s0 + $0xf2] sm:$0xff]  ;;  %v1005_v37 = vsel %vm168_vm0, %v1003_v3, %v1004_v4  ;;  %v973_v41 = vrot.slane %v13871_v10, 4  ;;  %v11918_v60 = vld [vmem:[%s18953_s1 + $0x36c] ss:$16 sps:$4 sm:$0xff]  }
  0xa6   :  { %2053 = vmatprep.mubr.bf16.mxu0 %v13759_v21  ;;  %290 = vst.msk [vmem:[#allocation2 + $0xd0] sm:$0xff] %vm18991_vm8, %v281_v33  ;;  %2363 = vmatprep.subr.bf16.mxu1 %v11897_v19  ;;  %v1088_v18 = vld [vmem:[#allocation2 + $0x138] sm:$0xff]  ;;  %v971_v30 = vrot.slane %v13860_v5, 4  ;;  %vm19046_vm2 = vcmask 1043968  }
  0xa7   :  { %343 = vst.msk [vmem:[#allocation2 + $0xe0] sm:$0xff] %vm19027_vm5, %v332_v35  ;;  %2054 = vmatmul.mubr.bf16.gmra.mxu0 %v13771_v26  ;;  %975 = vrot.lane.b32.xlu0 %v968_v7, %s12623_s22  ;;  %v10537_v7 = vld [vmem:[%s18952_s0 + $0xf8] sm:$0xf]  ;;  %v11933_v57 = vld [vmem:[%s18953_s1 + $0x12c] ss:$16 sps:$4 sm:$0xff]  }
  0xa8   :  { %344 = vst.msk [vmem:[#allocation2 + $0xe8] sm:$0xff] %vm83_vm6, %v332_v35  ;;  %977 = vrot.lane.b32.xlu1 %v970_v28, %s12623_s22  ;;  %2227 = vmatmul.mubr.bf16.gmra.mxu1 %v13800_v44  ;;  %v388_v52 = vpop.permute.xlu0 %387  ;;  %v915_v14 = vrot.slane %v10537_v7, 4  ;;  %v11907_v19 = vld [vmem:[%s18953_s1 + $0x1a8] ss:$16 sps:$4 sm:$0xff]   ;;  %v972_v24 = vsel %vm168_vm0, %v969_v8, %v971_v30 }
  0xa9   :  { %371 = vst.msk [vmem:[#allocation2 + $0xe8] sm:$0xff] %vm18990_vm7, %v360_v12  ;;  %v362_v59 = vpop.permute.xlu1 %361  ;;  %10677 = vmatprep.mubr.msk.bf16.mxu1 %vm55_vm1, %v13789_v42  ;;  %2364 = vmatpush2.bf16.msra.mxu1 %v11895_v43  ;;  %v11904_v12 = vld [vmem:[%s18953_s1 + $0x3a8] ss:$16 sps:$4 sm:$0xff]   ;;  %v1073_v28 = vld [vmem:[#allocation2 + $0xc0] sm:$0xff] }
  0xaa   :  { %399 = vst.msk [vmem:[#allocation2 + $0xf0] sm:$0xff] %vm18991_vm8, %v388_v52  ;;  %2365 = vmatprep.subr.bf16.mxu1 %v11903_v47  ;;  %2535 = vmatpush1.bf16.msra.mxu0 %v11898_v58  ;;  %v916_v22 = vsel %vm168_vm0, %v913_v2, %v915_v14  ;;  %v10541_v31 = vld [vmem:[%s18952_s0 + $0xf9] sm:$0xf]  ;;  %v13923_v58 = vpack.c.bf16 %v1088_v18, %v1084_v11  ;;  %v936_v2 = vrot.slane %v13889_v20, 4 }
  0xab   :  { %374 = vst.msk [vmem:[#allocation2 + $0x110] sm:$0xff] %vm18992_vm4, %v362_v59  ;;  %827 = vrot.lane.b32.xlu0 %v10521_v48, %s12624_s23  ;;  %2540 = vmatprep.subr.bf16.mxu0 %v11906_v63  ;;  %v1074_v1 = vld [vmem:[#allocation2 + $0xc8] sm:$0xff]  ;;  %v10552_v33 = vld [vmem:[%s18952_s0 + $0xf4] sm:$0xff]  ;;  %v938_v7 = vrot.slane %v10541_v31, 4 }
  0xac   :  { %883 = vrot.lane.b32.xlu1 %v10529_v53, %s12625_s17  ;;  %v364_v15 = vpop.permute.xlu0 %363  ;;  %923 = vst.msk [vmem:[#allocation2 + $0x340] sm:$0xff] %vm55_vm1, %v914_v13  ;;  %924 = vst.msk [vmem:[#allocation2 + $0x360] sm:$0xff] %vm55_vm1, %v916_v22  ;;  %v11910_v43 = vld [vmem:[%s18953_s1 + $0x388] ss:$16 sps:$4 sm:$0xff]   ;;  %v1037_v47 = vrot.slane %v10552_v33, 4  ;;  %v1006_v13 = vrot.slane %v10548_v56, 4  ;;  %v937_v14 = vsel %vm168_vm0, %v934_v55, %v936_v2 }
  0xad   :  { %v334_v16 = vpop.permute.xlu1 %333  ;;  %2366 = vmatpush2.bf16.msra.mxu1 %v11901_v61  ;;  %376 = vst.msk [vmem:[#allocation2 + $0x130] sm:$0xff] %vm18992_vm4, %v364_v15  ;;  %v1075_v53 = vld [vmem:[#allocation2 + $0xd0] sm:$0xff]  ;;  %v11915_v52 = vld [vmem:[%s18953_s1 + $0x18c] ss:$16 sps:$4 sm:$0xff]   ;;  %v11913_v63 = vld [vmem:[%s18953_s1 + $0x188] ss:$16 sps:$4 sm:$0xff]  }
  0xae   :  { %v1077_v17 = vld [vmem:[#allocation2 + $0xe0] sm:$0xff]  ;;  %345 = vst.msk [vmem:[#allocation2 + $0x100] sm:$0xff] %vm19027_vm5, %v334_v16  ;;  %2367 = vmatprep.subr.bf16.mxu1 %v11909_v0  ;;  %2541 = vmatpush2.bf16.msra.mxu0 %v11904_v12  ;;  %v1038_v0 = vsel %vm168_vm0, %v1035_v32, %v1037_v47  ;;  %v974_v32 = vsel %vm168_vm0, %v971_v30, %v973_v41  ;;  %v10549_v10 = vld [vmem:[%s18952_s0 + $0xfb] sm:$0xf] }
  0xaf   :  { %346 = vst.msk [vmem:[#allocation2 + $0x108] sm:$0xff] %vm83_vm6, %v334_v16  ;;  %940 = vrot.lane.b32.xlu0 %v933_v54, %s12624_s23  ;;  %v13908_v35 = vpack.c.bf16 %v1077_v17, %v1073_v28  ;;  %2542 = vmatprep.subr.bf16.mxu0 %v11912_v23  ;;  %v11924_v11 = vld [vmem:[%s18953_s1 + $0x34c] ss:$16 sps:$4 sm:$0xff]   ;;  %v11919_v12 = vld [vmem:[%s18953_s1 + $0x168] ss:$16 sps:$4 sm:$0xff]   ;;  %v1008_v16 = vrot.slane %v10549_v10, 4 }
  0xb0   :  { %v1078_v6 = vld [vmem:[#allocation2 + $0xe8] sm:$0xff]  ;;  %373 = vst.msk [vmem:[#allocation2 + $0x108] sm:$0xff] %vm18990_vm7, %v362_v59  ;;  %942 = vrot.lane.b32.xlu1 %v935_v9, %s12624_s23  ;;  %v336_v38 = vpop.permute.xlu0 %335  ;;  %v1039_v59 = vrot.slane %v10553_v46, 4  ;;  %v1092_v17 = vld [vmem:[#allocation2 + $0x158] sm:$0xff] }
  0xb1   :  { %v13898_v25 = vpack.c.bf16 %v1078_v6, %v1074_v1  ;;  %v390_v48 = vpop.permute.xlu1 %389  ;;  %v1079_v54 = vld [vmem:[#allocation2 + $0xf0] sm:$0xff]  ;;  %2368 = vmatpush2.bf16.msra.mxu1 %v11907_v19  ;;  %347 = vst.msk [vmem:[#allocation2 + $0x120] sm:$0xff] %vm19027_vm5, %v336_v38  ;;  %v11921_v9 = vld [vmem:[%s18953_s1 + $0x16c] ss:$16 sps:$4 sm:$0xff]   ;;  %v11922_v18 = vld [vmem:[%s18953_s1 + $0x348] ss:$16 sps:$4 sm:$0xff]   ;;  %v1009_v41 = vsel %vm168_vm0, %v1006_v13, %v1008_v16 }
  0xb2   :  { %348 = vst.msk [vmem:[#allocation2 + $0x128] sm:$0xff] %vm83_vm6, %v336_v38  ;;  %v13932_v61 = vpack.c.bf16 %v1079_v54, %v1075_v53  ;;  %v1040_v5 = vsel %vm168_vm0, %v1037_v47, %v1039_v59  ;;  %2543 = vmatpush2.bf16.msra.mxu0 %v11910_v43  ;;  %2369 = vmatprep.subr.bf16.mxu1 %v11915_v52  ;;  %v11927_v19 = vld [vmem:[%s18953_s1 + $0x14c] ss:$16 sps:$4 sm:$0xff]   ;;  %v11925_v28 = vld [vmem:[%s18953_s1 + $0x148] ss:$16 sps:$4 sm:$0xff]  }
  0xb3   :  { %2063 = vmatprep.mubr.bf16.mxu0 %v13898_v25  ;;  %400 = vst.msk [vmem:[#allocation2 + $0x110] sm:$0xff] %vm18991_vm8, %v390_v48  ;;  %1010 = vrot.lane.b32.xlu0 %v1003_v3, %s12625_s17  ;;  %v11916_v3 = vld [vmem:[%s18953_s1 + $0x368] ss:$16 sps:$4 sm:$0xff]   ;;  %v11930_v55 = vld [vmem:[%s18953_s1 + $0x32c] ss:$16 sps:$4 sm:$0xff]   ;;  %v14013_v53 = vpack.c.bf16 %v1096_v29, %v1092_v17 }
  0xb4   :  { %2064 = vmatmul.mubr.bf16.gmra.mxu0 %v13908_v35  ;;  %375 = vst.msk [vmem:[#allocation2 + $0x128] sm:$0xff] %vm18990_vm7, %v364_v15  ;;  %1012 = vrot.lane.b32.xlu1 %v1005_v37, %s12625_s17  ;;  %v392_v62 = vpop.permute.xlu0 %391  ;;  %v939_v15 = vsel %vm168_vm0, %v936_v2, %v938_v7  ;;  %v1007_v37 = vsel %vm168_vm0, %v1004_v4, %v1006_v13  ;;  %v11928_v43 = vld [vmem:[%s18953_s1 + $0x328] ss:$16 sps:$4 sm:$0xff]   ;;  %v11936_v52 = vld [vmem:[%s18953_s1 + $0x30c] ss:$16 sps:$4 sm:$0xff]  }
  0xb5   :  { %1047 = vst.msk [vmem:[#allocation2 + $0x358] sm:$0xff] %vm55_vm1, %v1038_v0  ;;  %2237 = vmatmul.mubr.bf16.gmra.mxu1 %v13932_v61  ;;  %1048 = vst.msk [vmem:[#allocation2 + $0x378] sm:$0xff] %vm55_vm1, %v1040_v5  ;;  %v366_v8 = vpop.permute.xlu1 %365  ;;  %2544 = vmatprep.subr.bf16.mxu0 %v11918_v60  ;;  %v1081_v31 = vld [vmem:[#allocation2 + $0x100] sm:$0xff]  ;;  %v11931_v54 = vld [vmem:[%s18953_s1 + $0x128] ss:$16 sps:$4 sm:$0xff]  }
  0xb6   :  { %10678 = vmatprep.mubr.msk.bf16.mxu1 %vm55_vm1, %v13923_v58  ;;  %401 = vst.msk [vmem:[#allocation2 + $0x130] sm:$0xff] %vm18991_vm8, %v392_v62  ;;  %2370 = vmatpush2.bf16.msra.mxu1 %v11913_v63  ;;  %v11939_v59 = vld [vmem:[%s18953_s1 + $0x10c] ss:$16 sps:$4 sm:$0xff]   ;;  %v11934_v63 = vld [vmem:[%s18953_s1 + $0x308] ss:$16 sps:$4 sm:$0xff]  }
  0xb7   :  { %378 = vst.msk [vmem:[#allocation2 + $0x150] sm:$0xf] %vm18987_vm9, %v366_v8  ;;  %979 = vrot.lane.b32.xlu0 %v972_v24, %s12623_s22  ;;  %2545 = vmatpush2.bf16.msra.mxu0 %v11916_v3  ;;  %v1082_v22 = vld [vmem:[#allocation2 + $0x108] sm:$0xff]  ;;  %v1104_v10 = vld [vmem:[#allocation2 + $0x1b8] sm:$0xff] }
  0xb8   :  { %981 = vrot.lane.b32.xlu1 %v974_v32, %s12623_s22  ;;  %2371 = vmatprep.subr.bf16.mxu1 %v11921_v9  ;;  %v486_v1 = vpop.permute.xlu0 %485  ;;  %v1085_v20 = vld [vmem:[#allocation2 + $0x120] sm:$0xff]  ;;  %v11937_v2 = vld [vmem:[%s18953_s1 + $0x108] ss:$16 sps:$4 sm:$0xff]  }
  0xb9   :  { %v488_v6 = vpop.permute.xlu1 %487  ;;  %2546 = vmatprep.subr.bf16.mxu0 %v11924_v11  ;;  %498 = vst.msk [vmem:[#allocation2 + $0x150] sm:$0xf0] %vm19044_vm3, %v486_v1  ;;  %v14003_v33 = vpack.c.bf16 %v1085_v20, %v1081_v31  ;;  %vm19045_vm3 = vcmask 1044224   ;;  %v1100_v9 = vld [vmem:[#allocation2 + $0x198] sm:$0xff] }
  0xba   :  { %500 = vst.msk [vmem:[#allocation2 + $0x170] sm:$0xff] %vm18992_vm4, %v488_v6  ;;  %2372 = vmatpush2.bf16.msra.mxu1 %v11919_v12  ;;  %v1083_v38 = vld [vmem:[#allocation2 + $0x110] sm:$0xff]  ;;  %v14060_v17 = vpack.c.bf16 %v1104_v10, %v1100_v9  ;;  %v1112_v31 = vld [vmem:[#allocation2 + $0x1f8] sm:$0xff] }
  0xbb   :  { %v1086_v23 = vld [vmem:[#allocation2 + $0x128] sm:$0xff]  ;;  %944 = vrot.lane.b32.xlu0 %v937_v14, %s12624_s23  ;;  %2547 = vmatpush2.bf16.msra.mxu0 %v11922_v18 }
  0xbc   :  { %946 = vrot.lane.b32.xlu1 %v939_v15, %s12624_s23  ;;  %v14001_v30 = vpack.c.bf16 %v1086_v23, %v1082_v22  ;;  %2373 = vmatprep.subr.bf16.mxu1 %v11927_v19  ;;  %v338_v46 = vpop.permute.xlu0 %337  ;;  %v1108_v22 = vld [vmem:[#allocation2 + $0x1d8] sm:$0xff] }
  0xbd   :  { %v394_v47 = vpop.permute.xlu1 %393  ;;  %v1087_v48 = vld [vmem:[#allocation2 + $0x130] sm:$0xff]  ;;  %2548 = vmatprep.subr.bf16.mxu0 %v11930_v55  ;;  %349 = vst.msk [vmem:[#allocation2 + $0x140] sm:$0xf] %vm19045_vm3, %v338_v46 }
  0xbe   :  { %2073 = vmatprep.mubr.bf16.mxu0 %v14001_v30  ;;  %350 = vst.msk [vmem:[#allocation2 + $0x148] sm:$0xf] %vm18988_vm12, %v338_v46  ;;  %v14022_v4 = vpack.c.bf16 %v1087_v48, %v1083_v38  ;;  %2374 = vmatpush2.bf16.msra.mxu1 %v11925_v28  ;;  %v14083_v48 = vpack.c.bf16 %v1112_v31, %v1108_v22 }
  0xbf   :  { %402 = vst.msk [vmem:[#allocation2 + $0x150] sm:$0xf] %vm18986_vm14, %v394_v47  ;;  %2074 = vmatmul.mubr.bf16.gmra.mxu0 %v14003_v33  ;;  %1014 = vrot.lane.b32.xlu0 %v1007_v37, %s12625_s17 }
  0xc0   :  { %377 = vst.msk [vmem:[#allocation2 + $0x148] sm:$0xf] %vm19046_vm2, %v366_v8  ;;  %1016 = vrot.lane.b32.xlu1 %v1009_v41, %s12625_s17  ;;  %2247 = vmatmul.mubr.bf16.gmra.mxu1 %v14022_v4  ;;  %v451_v60 = vpop.permute.xlu0 %450  ;;  %vm19047_vm2 = vcmask 261124  }
  0xc1   :  { %2549 = vmatpush2.bf16.msra.mxu0 %v11928_v43  ;;  %v453_v0 = vpop.permute.xlu1 %452  ;;  %10679 = vmatprep.mubr.msk.bf16.mxu1 %vm55_vm1, %v14013_v53  ;;  %462 = vst.msk [vmem:[#allocation2 + $0x140] sm:$0xf0] %vm18989_vm15, %v451_v60 }
  0xc2   :  { %2375 = vmatprep.subr.bf16.mxu1 %v11933_v57  ;;  %463 = vst.msk [vmem:[#allocation2 + $0x148] sm:$0xf0] %vm18985_vm11, %v451_v60  ;;  %2550 = vmatprep.subr.bf16.mxu0 %v11936_v52 }
  0xc3   :  { %464 = vst.msk [vmem:[#allocation2 + $0x160] sm:$0xff] %vm19027_vm5, %v453_v0  ;;  %2376 = vmatpush2.bf16.msra.mxu1 %v11931_v54 }
  0xc4   :  { %465 = vst.msk [vmem:[#allocation2 + $0x168] sm:$0xff] %vm83_vm6, %v453_v0  ;;  %2377 = vmatprep.subr.bf16.mxu1 %v11939_v59  ;;  %v521_v5 = vpop.permute.xlu0 %520 }
  0xc5   :  { %497 = vst.msk [vmem:[#allocation2 + $0x148] sm:$0xf0] %vm18984_vm10, %v486_v1  ;;  %2551 = vmatpush2.bf16.msra.mxu0 %v11934_v63  ;;  %v523_v24 = vpop.permute.xlu1 %522 }
  0xc6   :  { %499 = vst.msk [vmem:[#allocation2 + $0x168] sm:$0xff] %vm18990_vm7, %v488_v6 }
  0xc7   :  { %532 = vst.msk [vmem:[#allocation2 + $0x150] sm:$0xf0] %vm18983_vm13, %v521_v5  ;;  %2378 = vmatpush2.bf16.msra.mxu1 %v11937_v2  ;;  %v1116_v2 = vld [vmem:[#allocation2 + $0x218] sm:$0xff] }
  0xc8   :  { %533 = vst.msk [vmem:[#allocation2 + $0x170] sm:$0xff] %vm18991_vm8, %v523_v24  ;;  %v490_v32 = vpop.permute.xlu0 %489  ;;  %v1089_v56 = vld [vmem:[#allocation2 + $0x140] sm:$0xff] }
  0xc9   :  { %v492_v7 = vpop.permute.xlu1 %491  ;;  %502 = vst.msk [vmem:[#allocation2 + $0x190] sm:$0xff] %vm18992_vm4, %v490_v32 }
  0xca   :  { %v1093_v3 = vld [vmem:[#allocation2 + $0x160] sm:$0xff]  ;;  %504 = vst.msk [vmem:[#allocation2 + $0x1b0] sm:$0xff] %vm18992_vm4, %v492_v7 }
  0xcb   :  { %v14057_v12 = vpack.c.bf16 %v1093_v3, %v1089_v56 }
  0xcc   :  { %v1090_v62 = vld [vmem:[#allocation2 + $0x148] sm:$0xff]  ;;  %v455_v13 = vpop.permute.xlu0 %454 }
  0xcd   :  { %v1094_v8 = vld [vmem:[#allocation2 + $0x168] sm:$0xff]  ;;  %v457_v14 = vpop.permute.xlu1 %456  ;;  %466 = vst.msk [vmem:[#allocation2 + $0x180] sm:$0xff] %vm19027_vm5, %v455_v13 }
  0xce   :  { %v14055_v11 = vpack.c.bf16 %v1094_v8, %v1090_v62  ;;  %v1091_v15 = vld [vmem:[#allocation2 + $0x150] sm:$0xff]  ;;  %467 = vst.msk [vmem:[#allocation2 + $0x188] sm:$0xff] %vm83_vm6, %v455_v13  ;;  %469 = vst.msk [vmem:[#allocation2 + $0x1a8] sm:$0xff] %vm83_vm6, %v457_v14 }
  0xcf   :  { %v1095_v16 = vld [vmem:[#allocation2 + $0x170] sm:$0xff]  ;;  %468 = vst.msk [vmem:[#allocation2 + $0x1a0] sm:$0xff] %vm19027_vm5, %v457_v14 }
  0xd0   :  { %2083 = vmatprep.mubr.bf16.mxu0 %v14055_v11  ;;  %v14067_v18 = vpack.c.bf16 %v1095_v16, %v1091_v15  ;;  %501 = vst.msk [vmem:[#allocation2 + $0x188] sm:$0xff] %vm18990_vm7, %v490_v32  ;;  %503 = vst.msk [vmem:[#allocation2 + $0x1a8] sm:$0xff] %vm18990_vm7, %v492_v7  ;;  %v525_v19 = vpop.permute.xlu0 %524  ;;  %v1120_v32 = vld [vmem:[#allocation2 + $0x238] sm:$0xff] }
  0xd1   :  { %2084 = vmatmul.mubr.bf16.gmra.mxu0 %v14057_v12  ;;  %v527_v1 = vpop.permute.xlu1 %526  ;;  %534 = vst.msk [vmem:[#allocation2 + $0x190] sm:$0xff] %vm18991_vm8, %v525_v19  ;;  %v14106_v10 = vpack.c.bf16 %v1120_v32, %v1116_v2  ;;  %v1136_v32 = vld [vmem:[#allocation2 + $0x2b8] sm:$0xff] }
  0xd2   :  { %2257 = vmatmul.mubr.bf16.gmra.mxu1 %v14067_v18  ;;  %535 = vst.msk [vmem:[#allocation2 + $0x1b0] sm:$0xff] %vm18991_vm8, %v527_v1 }
  0xd3   :  { %10680 = vmatprep.mubr.msk.bf16.mxu1 %vm55_vm1, %v14060_v17 }
  0xd4   :  { %v605_v6 = vpop.permute.xlu0 %604  ;;  %v1097_v29 = vld [vmem:[#allocation2 + $0x180] sm:$0xff] }
  0xd5   :  { %v607_v20 = vpop.permute.xlu1 %606  ;;  %617 = vst.msk [vmem:[#allocation2 + $0x1d0] sm:$0xff] %vm18992_vm4, %v605_v6 }
  0xd6   :  { %v1101_v55 = vld [vmem:[#allocation2 + $0x1a0] sm:$0xff]  ;;  %619 = vst.msk [vmem:[#allocation2 + $0x1f0] sm:$0xff] %vm18992_vm4, %v607_v20 }
  0xd7   :  { %v1098_v23 = vld [vmem:[#allocation2 + $0x188] sm:$0xff]  ;;  %v14080_v41 = vpack.c.bf16 %v1101_v55, %v1097_v29  ;;  %v1124_v29 = vld [vmem:[#allocation2 + $0x258] sm:$0xff] }
  0xd8   :  { %v1102_v28 = vld [vmem:[#allocation2 + $0x1a8] sm:$0xff]  ;;  %v577_v43 = vpop.permute.xlu0 %576  ;;  %v1099_v47 = vld [vmem:[#allocation2 + $0x190] sm:$0xff]  ;;  %v1128_v55 = vld [vmem:[#allocation2 + $0x278] sm:$0xff] }
  0xd9   :  { %v14078_v37 = vpack.c.bf16 %v1102_v28, %v1098_v23  ;;  %v579_v46 = vpop.permute.xlu1 %578  ;;  %v1103_v38 = vld [vmem:[#allocation2 + $0x1b0] sm:$0xff]  ;;  %588 = vst.msk [vmem:[#allocation2 + $0x1c0] sm:$0xff] %vm19027_vm5, %v577_v43 }
  0xda   :  { %589 = vst.msk [vmem:[#allocation2 + $0x1c8] sm:$0xff] %vm83_vm6, %v577_v43  ;;  %591 = vst.msk [vmem:[#allocation2 + $0x1e8] sm:$0xff] %vm83_vm6, %v579_v46  ;;  %v14090_v57 = vpack.c.bf16 %v1103_v38, %v1099_v47 }
  0xdb   :  { %2093 = vmatprep.mubr.bf16.mxu0 %v14078_v37  ;;  %590 = vst.msk [vmem:[#allocation2 + $0x1e0] sm:$0xff] %vm19027_vm5, %v579_v46 }
  0xdc   :  { %2094 = vmatmul.mubr.bf16.gmra.mxu0 %v14080_v41  ;;  %616 = vst.msk [vmem:[#allocation2 + $0x1c8] sm:$0xff] %vm18990_vm7, %v605_v6  ;;  %618 = vst.msk [vmem:[#allocation2 + $0x1e8] sm:$0xff] %vm18990_vm7, %v607_v20  ;;  %2267 = vmatmul.mubr.bf16.gmra.mxu1 %v14090_v57  ;;  %v633_v54 = vpop.permute.xlu0 %632  ;;  %v11942_v20 = vld [vmem:[%s18954_s3 + $0x74] ss:$8 sps:$4 sm:$0xff]  }
  0xdd   :  { %v635_v52 = vpop.permute.xlu1 %634  ;;  %10681 = vmatprep.mubr.msk.bf16.mxu1 %vm55_vm1, %v14083_v48  ;;  %644 = vst.msk [vmem:[#allocation2 + $0x1d0] sm:$0xff] %vm18991_vm8, %v633_v54  ;;  %3239 = vmatprep.subr.bf16.mxu1 %v11942_v20 }
  0xde   :  { %645 = vst.msk [vmem:[#allocation2 + $0x1f0] sm:$0xff] %vm18991_vm8, %v635_v52 }
  0xe0   :  { %v609_v59 = vpop.permute.xlu0 %608  ;;  %v1105_v60 = vld [vmem:[#allocation2 + $0x1c0] sm:$0xff] }
  0xe1   :  { %v611_v63 = vpop.permute.xlu1 %610  ;;  %621 = vst.msk [vmem:[#allocation2 + $0x210] sm:$0xff] %vm18992_vm4, %v609_v59 }
  0xe2   :  { %v1109_v0 = vld [vmem:[#allocation2 + $0x1e0] sm:$0xff]  ;;  %623 = vst.msk [vmem:[#allocation2 + $0x230] sm:$0xf] %vm18987_vm9, %v611_v63 }
  0xe3   :  { %v1106_v5 = vld [vmem:[#allocation2 + $0x1c8] sm:$0xff]  ;;  %v14103_v56 = vpack.c.bf16 %v1109_v0, %v1105_v60  ;;  %v14140_v60 = vpack.c.bf16 %v1128_v55, %v1124_v29 }
  0xe4   :  { %v1110_v24 = vld [vmem:[#allocation2 + $0x1e8] sm:$0xff]  ;;  %v731_v3 = vpop.permute.xlu0 %730  ;;  %v1107_v62 = vld [vmem:[#allocation2 + $0x1d0] sm:$0xff] }
  0xe5   :  { %v14101_v7 = vpack.c.bf16 %v1110_v24, %v1106_v5  ;;  %v581_v9 = vpop.permute.xlu1 %580  ;;  %v1111_v8 = vld [vmem:[#allocation2 + $0x1f0] sm:$0xff]  ;;  %743 = vst.msk [vmem:[#allocation2 + $0x230] sm:$0xf0] %vm19047_vm2, %v731_v3  ;;  %vm19048_vm2 = vcmask 1043968   ;;  %v1132_v24 = vld [vmem:[#allocation2 + $0x298] sm:$0xff] }
  0xe6   :  { %592 = vst.msk [vmem:[#allocation2 + $0x200] sm:$0xff] %vm19027_vm5, %v581_v9  ;;  %v14112_v13 = vpack.c.bf16 %v1111_v8, %v1107_v62  ;;  %v14163_v55 = vpack.c.bf16 %v1136_v32, %v1132_v24 }
  0xe7   :  { %2103 = vmatprep.mubr.bf16.mxu0 %v14101_v7  ;;  %593 = vst.msk [vmem:[#allocation2 + $0x208] sm:$0xff] %vm83_vm6, %v581_v9 }
  0xe8   :  { %2104 = vmatmul.mubr.bf16.gmra.mxu0 %v14103_v56  ;;  %620 = vst.msk [vmem:[#allocation2 + $0x208] sm:$0xff] %vm18990_vm7, %v609_v59  ;;  %2277 = vmatmul.mubr.bf16.gmra.mxu1 %v14112_v13  ;;  %v583_v14 = vpop.permute.xlu0 %582 }
  0xe9   :  { %v637_v15 = vpop.permute.xlu1 %636  ;;  %10682 = vmatprep.mubr.msk.bf16.mxu1 %vm55_vm1, %v14106_v10  ;;  %594 = vst.msk [vmem:[#allocation2 + $0x220] sm:$0xf] %vm19045_vm3, %v583_v14  ;;  %vm19049_vm3 = vcmask 261124  }
  0xea   :  { %595 = vst.msk [vmem:[#allocation2 + $0x228] sm:$0xf] %vm18988_vm12, %v583_v14 }
  0xeb   :  { %646 = vst.msk [vmem:[#allocation2 + $0x210] sm:$0xff] %vm18991_vm8, %v637_v15 }
  0xec   :  { %622 = vst.msk [vmem:[#allocation2 + $0x228] sm:$0xf] %vm19048_vm2, %v611_v63  ;;  %v639_v16 = vpop.permute.xlu0 %638  ;;  %vm19050_vm2 = vcmask 1044224  }
  0xed   :  { %v696_v19 = vpop.permute.xlu1 %695  ;;  %647 = vst.msk [vmem:[#allocation2 + $0x230] sm:$0xf] %vm18986_vm14, %v639_v16  ;;  %v1113_v28 = vld [vmem:[#allocation2 + $0x200] sm:$0xff] }
  0xee   :  { %707 = vst.msk [vmem:[#allocation2 + $0x220] sm:$0xf0] %vm18989_vm15, %v696_v19 }
  0xef   :  { %708 = vst.msk [vmem:[#allocation2 + $0x228] sm:$0xf0] %vm18985_vm11, %v696_v19  ;;  %v1114_v43 = vld [vmem:[#allocation2 + $0x208] sm:$0xff] }
  0xf0   :  { %742 = vst.msk [vmem:[#allocation2 + $0x228] sm:$0xf0] %vm18984_vm10, %v731_v3  ;;  %v766_v1 = vpop.permute.xlu0 %765 }
  0xf1   :  { %v733_v6 = vpop.permute.xlu1 %732  ;;  %777 = vst.msk [vmem:[#allocation2 + $0x230] sm:$0xf0] %vm18983_vm13, %v766_v1 }
  0xf2   :  { %745 = vst.msk [vmem:[#allocation2 + $0x250] sm:$0xff] %vm18992_vm4, %v733_v6  ;;  %v1115_v38 = vld [vmem:[#allocation2 + $0x210] sm:$0xff] }
  0xf4   :  { %v735_v22 = vpop.permute.xlu0 %734 }
  0xf5   :  { %v698_v23 = vpop.permute.xlu1 %697  ;;  %v1117_v31 = vld [vmem:[#allocation2 + $0x220] sm:$0xff]  ;;  %747 = vst.msk [vmem:[#allocation2 + $0x270] sm:$0xff] %vm18992_vm4, %v735_v22 }
  0xf6   :  { %709 = vst.msk [vmem:[#allocation2 + $0x240] sm:$0xff] %vm19027_vm5, %v698_v23  ;;  %v14137_v54 = vpack.c.bf16 %v1117_v31, %v1113_v28  ;;  %v1140_v31 = vld [vmem:[#allocation2 + $0x2d8] sm:$0xff] }
  0xf7   :  { %710 = vst.msk [vmem:[#allocation2 + $0x248] sm:$0xff] %vm83_vm6, %v698_v23  ;;  %v1118_v46 = vld [vmem:[#allocation2 + $0x228] sm:$0xff] }
  0xf8   :  { %744 = vst.msk [vmem:[#allocation2 + $0x248] sm:$0xff] %vm18990_vm7, %v733_v6  ;;  %v14135_v47 = vpack.c.bf16 %v1118_v46, %v1114_v43  ;;  %v700_v52 = vpop.permute.xlu0 %699  ;;  %v1119_v63 = vld [vmem:[#allocation2 + $0x230] sm:$0xff]  ;;  %v1144_v43 = vld [vmem:[#allocation2 + $0x2f8] sm:$0xff] }
  0xf9   :  { %v768_v59 = vpop.permute.xlu1 %767  ;;  %711 = vst.msk [vmem:[#allocation2 + $0x260] sm:$0xff] %vm19027_vm5, %v700_v52  ;;  %v14146_v0 = vpack.c.bf16 %v1119_v63, %v1115_v38 }
  0xfa   :  { %2113 = vmatprep.mubr.bf16.mxu0 %v14135_v47  ;;  %712 = vst.msk [vmem:[#allocation2 + $0x268] sm:$0xff] %vm83_vm6, %v700_v52 }
  0xfb   :  { %778 = vst.msk [vmem:[#allocation2 + $0x250] sm:$0xff] %vm18991_vm8, %v768_v59  ;;  %2114 = vmatmul.mubr.bf16.gmra.mxu0 %v14137_v54  ;;  %2287 = vmatmul.mubr.bf16.gmra.mxu1 %v14146_v0 }
  0xfc   :  { %746 = vst.msk [vmem:[#allocation2 + $0x268] sm:$0xff] %vm18990_vm7, %v735_v22  ;;  %10683 = vmatprep.mubr.msk.bf16.mxu1 %vm55_vm1, %v14140_v60 }
  0xfd   :  { %v770_v2 = vpop.permute.xlu0 %769  ;;  %v737_v5 = vpop.permute.xlu1 %736  ;;  %v1121_v62 = vld [vmem:[#allocation2 + $0x240] sm:$0xff] }
  0xfe   :  { %779 = vst.msk [vmem:[#allocation2 + $0x270] sm:$0xff] %vm18991_vm8, %v770_v2 }
  0xff   :  { %749 = vst.msk [vmem:[#allocation2 + $0x290] sm:$0xff] %vm18992_vm4, %v737_v5  ;;  %v1122_v14 = vld [vmem:[#allocation2 + $0x248] sm:$0xff] }
 0x100   :  { %v1125_v8 = vld [vmem:[#allocation2 + $0x260] sm:$0xff] }
 0x101   :  { %v850_v3 = vpop.permute.xlu0 %849  ;;  %v702_v9 = vpop.permute.xlu1 %701  ;;  %v14160_v1 = vpack.c.bf16 %v1125_v8, %v1121_v62  ;;  %v14186_v8 = vpack.c.bf16 %v1144_v43, %v1140_v31 }
 0x102   :  { %862 = vst.msk [vmem:[#allocation2 + $0x2b0] sm:$0xff] %vm18992_vm4, %v850_v3  ;;  %v1123_v19 = vld [vmem:[#allocation2 + $0x250] sm:$0xff] }
 0x103   :  { %713 = vst.msk [vmem:[#allocation2 + $0x280] sm:$0xff] %vm19027_vm5, %v702_v9  ;;  %v1126_v15 = vld [vmem:[#allocation2 + $0x268] sm:$0xff] }
 0x104   :  { %714 = vst.msk [vmem:[#allocation2 + $0x288] sm:$0xff] %vm83_vm6, %v702_v9  ;;  %v14158_v16 = vpack.c.bf16 %v1126_v15, %v1122_v14 }
 0x105   :  { %748 = vst.msk [vmem:[#allocation2 + $0x288] sm:$0xff] %vm18990_vm7, %v737_v5  ;;  %v772_v6 = vpop.permute.xlu0 %771  ;;  %v822_v20 = vpop.permute.xlu1 %821  ;;  %v1127_v29 = vld [vmem:[#allocation2 + $0x270] sm:$0xff] }
 0x106   :  { %2123 = vmatprep.mubr.bf16.mxu0 %v14158_v16  ;;  %780 = vst.msk [vmem:[#allocation2 + $0x290] sm:$0xff] %vm18991_vm8, %v772_v6  ;;  %v14169_v22 = vpack.c.bf16 %v1127_v29, %v1123_v19  ;;  %v1148_v6 = vld [vmem:[#allocation2 + $0x318] sm:$0xff] }
 0x107   :  { %833 = vst.msk [vmem:[#allocation2 + $0x2a0] sm:$0xff] %vm19027_vm5, %v822_v20  ;;  %2124 = vmatmul.mubr.bf16.gmra.mxu0 %v14160_v1 }
 0x108   :  { %834 = vst.msk [vmem:[#allocation2 + $0x2a8] sm:$0xff] %vm83_vm6, %v822_v20  ;;  %2297 = vmatmul.mubr.bf16.gmra.mxu1 %v14169_v22  ;;  %v1152_v20 = vld [vmem:[#allocation2 + $0x338] sm:$0xff] }
 0x109   :  { %861 = vst.msk [vmem:[#allocation2 + $0x2a8] sm:$0xff] %vm18990_vm7, %v850_v3  ;;  %v878_v23 = vpop.permute.xlu0 %877  ;;  %v852_v28 = vpop.permute.xlu1 %851  ;;  %10684 = vmatprep.mubr.msk.bf16.mxu1 %vm55_vm1, %v14163_v55 }
 0x10a   :  { %889 = vst.msk [vmem:[#allocation2 + $0x2b0] sm:$0xff] %vm18991_vm8, %v878_v23  ;;  %v1129_v52 = vld [vmem:[#allocation2 + $0x280] sm:$0xff] }
 0x10b   :  { %864 = vst.msk [vmem:[#allocation2 + $0x2d0] sm:$0xff] %vm18992_vm4, %v852_v28 }
 0x10c   :  { %v1130_v63 = vld [vmem:[#allocation2 + $0x288] sm:$0xff] }
 0x10d   :  { %v854_v46 = vpop.permute.xlu0 %853  ;;  %v1131_v24 = vld [vmem:[#allocation2 + $0x290] sm:$0xff] }
 0x10e   :  { %v824_v38 = vpop.permute.xlu1 %823  ;;  %v1133_v59 = vld [vmem:[#allocation2 + $0x2a0] sm:$0xff]  ;;  %866 = vst.msk [vmem:[#allocation2 + $0x2f0] sm:$0xff] %vm18992_vm4, %v854_v46 }
 0x10f   :  { %835 = vst.msk [vmem:[#allocation2 + $0x2c0] sm:$0xff] %vm19027_vm5, %v824_v38  ;;  %v14183_v32 = vpack.c.bf16 %v1133_v59, %v1129_v52 }
 0x110   :  { %836 = vst.msk [vmem:[#allocation2 + $0x2c8] sm:$0xff] %vm83_vm6, %v824_v38  ;;  %v1134_v2 = vld [vmem:[#allocation2 + $0x2a8] sm:$0xff] }
 0x111   :  { %863 = vst.msk [vmem:[#allocation2 + $0x2c8] sm:$0xff] %vm18990_vm7, %v852_v28  ;;  %v14181_v5 = vpack.c.bf16 %v1134_v2, %v1130_v63  ;;  %v826_v3 = vpop.permute.xlu0 %825  ;;  %v1135_v62 = vld [vmem:[#allocation2 + $0x2b0] sm:$0xff] }
 0x112   :  { %v880_v9 = vpop.permute.xlu1 %879  ;;  %837 = vst.msk [vmem:[#allocation2 + $0x2e0] sm:$0xff] %vm19027_vm5, %v826_v3  ;;  %v14192_v14 = vpack.c.bf16 %v1135_v62, %v1131_v24 }
 0x113   :  { %2133 = vmatprep.mubr.bf16.mxu0 %v14181_v5  ;;  %838 = vst.msk [vmem:[#allocation2 + $0x2e8] sm:$0xff] %vm83_vm6, %v826_v3  ;;  %v14207_v3 = vpack.c.bf16 %v1152_v20, %v1148_v6 }
 0x114   :  { %890 = vst.msk [vmem:[#allocation2 + $0x2d0] sm:$0xff] %vm18991_vm8, %v880_v9  ;;  %2134 = vmatmul.mubr.bf16.gmra.mxu0 %v14183_v32  ;;  %2307 = vmatmul.mubr.bf16.gmra.mxu1 %v14192_v14 }
 0x115   :  { %865 = vst.msk [vmem:[#allocation2 + $0x2e8] sm:$0xff] %vm18990_vm7, %v854_v46  ;;  %v882_v15 = vpop.permute.xlu0 %881  ;;  %10685 = vmatprep.mubr.msk.bf16.mxu1 %vm55_vm1, %v14186_v8 }
 0x116   :  { %v856_v19 = vpop.permute.xlu1 %855  ;;  %891 = vst.msk [vmem:[#allocation2 + $0x2f0] sm:$0xff] %vm18991_vm8, %v882_v15  ;;  %v1137_v28 = vld [vmem:[#allocation2 + $0x2c0] sm:$0xff] }
 0x117   :  { %868 = vst.msk [vmem:[#allocation2 + $0x310] sm:$0xf] %vm18987_vm9, %v856_v19  ;;  %vm5010_vm9 = vcmask 783360  }
 0x118   :  { %v1138_v43 = vld [vmem:[#allocation2 + $0x2c8] sm:$0xff] }
 0x119   :  { %v976_v29 = vpop.permute.xlu0 %975  ;;  %v1141_v31 = vld [vmem:[#allocation2 + $0x2e0] sm:$0xff] }
 0x11a   :  { %v978_v23 = vpop.permute.xlu1 %977  ;;  %988 = vst.msk [vmem:[#allocation2 + $0x310] sm:$0xf0] %vm19049_vm3, %v976_v29  ;;  %v14204_v59 = vpack.c.bf16 %v1141_v31, %v1137_v28  ;;  %vm19051_vm3 = vcmask 1043968  }
 0x11b   :  { %990 = vst.msk [vmem:[#allocation2 + $0x330] sm:$0xff] %vm18992_vm4, %v978_v23  ;;  %v1139_v52 = vld [vmem:[#allocation2 + $0x2d0] sm:$0xff] }
 0x11c   :  { %v1142_v46 = vld [vmem:[#allocation2 + $0x2e8] sm:$0xff] }
 0x11d   :  { %v14202_v38 = vpack.c.bf16 %v1142_v46, %v1138_v43  ;;  %v828_v63 = vpop.permute.xlu0 %827  ;;  %v1143_v24 = vld [vmem:[#allocation2 + $0x2f0] sm:$0xff]  ;;  %v1156_v46 = vld [vmem:[#allocation2 + $0x358] sm:$0xff] }
 0x11e   :  { %v884_v2 = vpop.permute.xlu1 %883  ;;  %839 = vst.msk [vmem:[#allocation2 + $0x300] sm:$0xf] %vm19050_vm2, %v828_v63  ;;  %v14213_v9 = vpack.c.bf16 %v1143_v24, %v1139_v52  ;;  %vm4786_vm2 = vcmask 779264  }
 0x11f   :  { %2143 = vmatprep.mubr.bf16.mxu0 %v14202_v38  ;;  %840 = vst.msk [vmem:[#allocation2 + $0x308] sm:$0xf] %vm18988_vm12, %v828_v63  ;;  %vm5130_vm12 = vcmask 785414  }
 0x120   :  { %892 = vst.msk [vmem:[#allocation2 + $0x310] sm:$0xf] %vm18986_vm14, %v884_v2  ;;  %2144 = vmatmul.mubr.bf16.gmra.mxu0 %v14204_v59  ;;  %2317 = vmatmul.mubr.bf16.gmra.mxu1 %v14213_v9  ;;  %vm4911_vm14 = vcmask 1042432  }
 0x121   :  { %867 = vst.msk [vmem:[#allocation2 + $0x308] sm:$0xf] %vm19051_vm3, %v856_v19  ;;  %v941_v62 = vpop.permute.xlu0 %940  ;;  %10686 = vmatprep.mubr.msk.bf16.mxu1 %vm55_vm1, %v14207_v3  ;;  %vm4792_vm3 = vcmask 1046528  }
 0x122   :  { %v943_v15 = vpop.permute.xlu1 %942  ;;  %952 = vst.msk [vmem:[#allocation2 + $0x300] sm:$0xf0] %vm18989_vm15, %v941_v62  ;;  %vm19234_vm15 = vcmask 781312  }
 0x123   :  { %953 = vst.msk [vmem:[#allocation2 + $0x308] sm:$0xf0] %vm18985_vm11, %v941_v62  ;;  %vm4823_vm11 = vcmask 1045504  }
 0x124   :  { %954 = vst.msk [vmem:[#allocation2 + $0x320] sm:$0xff] %vm19027_vm5, %v943_v15 }
 0x125   :  { %955 = vst.msk [vmem:[#allocation2 + $0x328] sm:$0xff] %vm83_vm6, %v943_v15  ;;  %v1011_v19 = vpop.permute.xlu0 %1010 }
 0x126   :  { %987 = vst.msk [vmem:[#allocation2 + $0x308] sm:$0xf0] %vm18984_vm10, %v976_v29  ;;  %v1013_v6 = vpop.permute.xlu1 %1012  ;;  %v1160_v29 = vld [vmem:[#allocation2 + $0x378] sm:$0xff]  ;;  %vm4854_vm10 = vcmask 1044480  }
 0x127   :  { %989 = vst.msk [vmem:[#allocation2 + $0x328] sm:$0xff] %vm18990_vm7, %v978_v23 }
 0x128   :  { %1022 = vst.msk [vmem:[#allocation2 + $0x310] sm:$0xf0] %vm18983_vm13, %v1011_v19  ;;  %vm4905_vm13 = vcmask 785410  }
 0x129   :  { %1023 = vst.msk [vmem:[#allocation2 + $0x330] sm:$0xff] %vm18991_vm8, %v1013_v6  ;;  %v980_v20 = vpop.permute.xlu0 %979  ;;  %v1145_v31 = vld [vmem:[#allocation2 + $0x300] sm:$0xff]  ;;  %v14234_v6 = vpack.c.bf16 %v1160_v29, %v1156_v46 }
 0x12a   :  { %v982_v28 = vpop.permute.xlu1 %981  ;;  %992 = vst.msk [vmem:[#allocation2 + $0x350] sm:$0xff] %vm18992_vm4, %v980_v20 }
 0x12b   :  { %v1149_v43 = vld [vmem:[#allocation2 + $0x320] sm:$0xff]  ;;  %994 = vst.msk [vmem:[#allocation2 + $0x370] sm:$0xff] %vm18992_vm4, %v982_v28  ;;  %vm4977_vm4 = vcmask 1040384  }
 0x12c   :  { %v14231_v23 = vpack.c.bf16 %v1149_v43, %v1145_v31 }
 0x12d   :  { %v1146_v52 = vld [vmem:[#allocation2 + $0x308] sm:$0xff]  ;;  %v945_v24 = vpop.permute.xlu0 %944 }
 0x12e   :  { %v1150_v63 = vld [vmem:[#allocation2 + $0x328] sm:$0xff]  ;;  %v947_v62 = vpop.permute.xlu1 %946  ;;  %956 = vst.msk [vmem:[#allocation2 + $0x340] sm:$0xff] %vm19027_vm5, %v945_v24 }
 0x12f   :  { %v14229_v2 = vpack.c.bf16 %v1150_v63, %v1146_v52  ;;  %v1147_v15 = vld [vmem:[#allocation2 + $0x310] sm:$0xff]  ;;  %957 = vst.msk [vmem:[#allocation2 + $0x348] sm:$0xff] %vm83_vm6, %v945_v24  ;;  %959 = vst.msk [vmem:[#allocation2 + $0x368] sm:$0xff] %vm83_vm6, %v947_v62 }
 0x130   :  { %v1151_v19 = vld [vmem:[#allocation2 + $0x330] sm:$0xff]  ;;  %958 = vst.msk [vmem:[#allocation2 + $0x360] sm:$0xff] %vm19027_vm5, %v947_v62 }
 0x131   :  { %2153 = vmatprep.mubr.bf16.mxu0 %v14229_v2  ;;  %v14241_v31 = vpack.c.bf16 %v1151_v19, %v1147_v15  ;;  %991 = vst.msk [vmem:[#allocation2 + $0x348] sm:$0xff] %vm18990_vm7, %v980_v20  ;;  %993 = vst.msk [vmem:[#allocation2 + $0x368] sm:$0xff] %vm18990_vm7, %v982_v28  ;;  %v1015_v43 = vpop.permute.xlu0 %1014  ;;  %vm19235_vm7 = vcmask 785412  }
 0x132   :  { %2154 = vmatmul.mubr.bf16.gmra.mxu0 %v14231_v23  ;;  %v1017_v46 = vpop.permute.xlu1 %1016  ;;  %1024 = vst.msk [vmem:[#allocation2 + $0x350] sm:$0xff] %vm18991_vm8, %v1015_v43  ;;  %v11940_v43 = vld [vmem:[%s18954_s3 + $0x70] ss:$8 sps:$4 sm:$0xff]  }
 0x133   :  { %2327 = vmatmul.mubr.bf16.gmra.mxu1 %v14241_v31  ;;  %1025 = vst.msk [vmem:[#allocation2 + $0x370] sm:$0xff] %vm18991_vm8, %v1017_v46  ;;  %v11945_v46 = vld [vmem:[%s18954_s3 + $0x64] ss:$8 sps:$4 sm:$0xff]   ;;  %vm4946_vm8 = vcmask 1041408  }
 0x134   :  { %10687 = vmatprep.mubr.msk.bf16.mxu1 %vm55_vm1, %v14234_v6 }
 0x135   :  { %v1153_v52 = vld [vmem:[#allocation2 + $0x340] sm:$0xff] }
 0x137   :  { %v1157_v63 = vld [vmem:[#allocation2 + $0x360] sm:$0xff] }
 0x138   :  { %v1154_v29 = vld [vmem:[#allocation2 + $0x348] sm:$0xff]  ;;  %v14252_v20 = vpack.c.bf16 %v1157_v63, %v1153_v52  ;;  %v11954_v52 = vld [vmem:[%s18954_s3 + $0x34] ss:$8 sps:$4 sm:$0xff]  }
 0x139   :  { %v1158_v24 = vld [vmem:[#allocation2 + $0x368] sm:$0xff]  ;;  %v1155_v28 = vld [vmem:[#allocation2 + $0x350] sm:$0xff] }
 0x13a   :  { %v14250_v62 = vpack.c.bf16 %v1158_v24, %v1154_v29  ;;  %v1159_v15 = vld [vmem:[#allocation2 + $0x370] sm:$0xff]  ;;  %v11957_v24 = vld [vmem:[%s18954_s3 + $0x24] ss:$8 sps:$4 sm:$0xff]  }
 0x13b   :  { %v14256_v19 = vpack.c.bf16 %v1159_v15, %v1155_v28 }
 0x13c   :  { %2163 = vmatprep.mubr.bf16.mxu0 %v14250_v62 }
 0x13d   :  { %2164 = vmatmul.mubr.bf16.gmra.mxu0 %v14252_v20  ;;  %2337 = vmatmul.mubr.bf16.gmra.mxu1 %v14256_v19 }
 0x13e   :  { %10688 = vmatprep.mubr.msk.bf16.mxu0 %vm55_vm1, %v13147_v27  ;;  %2379 = vmatprep.mubr.bf16.mxu1 %v13483_v34  ;;  %v11943_v27 = vld [vmem:[%s18954_s3 + $0x60] ss:$8 sps:$4 sm:$0xff]   ;;  %v11948_v34 = vld [vmem:[%s18954_s3 + $0x54] ss:$8 sps:$4 sm:$0xff]  }
 0x145   :  { %2553 = vmatmul.mubr.bf16.vlgmr.msra.gmra.mxu0 %v13518_v51  ;;  %2380 = vmatmul.mubr.bf16.vlgmr.msra.gmra.mxu1 %v13489_v39  ;;  %v11946_v51 = vld [vmem:[%s18954_s3 + $0x50] ss:$8 sps:$4 sm:$0xff]   ;;  %v11951_v39 = vld [vmem:[%s18954_s3 + $0x44] ss:$8 sps:$4 sm:$0xff]  }
 0x146   :  { %10689 = vmatprep.mubr.msk.bf16.mxu0 %vm55_vm1, %v13507_v49  ;;  %2389 = vmatprep.mubr.bf16.mxu1 %v13646_v36  ;;  %v11949_v36 = vld [vmem:[%s18954_s3 + $0x40] ss:$8 sps:$4 sm:$0xff]  }
 0x147   :  { %3240 = vmatpush1.bf16.msra.mxu1 %v11940_v43  ;;  %v14288_v49 = vpop.f32.mrf.mxu0 }
 0x148   :  { %3241 = vmatprep.subr.bf16.mxu1 %v11945_v46  ;;  %v11993_v46 = vld [vmem:[%s18954_s3 + $0x164] ss:$8 sps:$4 sm:$0xff]  }
 0x149   :  { %v14300_v63 = vpop.f32.mrf.mxu0 }
 0x14b   :  { %3242 = vmatpush1.bf16.msra.mxu1 %v11943_v27  ;;  %v14319_v28 = vpop.f32.mrf.mxu0 }
 0x14c   :  { %3243 = vmatprep.subr.bf16.mxu1 %v11948_v34 }
 0x14d   :  { %2563 = vmatmul.mubr.bf16.gmra.mxu0 %v13669_v50  ;;  %2390 = vmatmul.mubr.bf16.gmra.mxu1 %v13648_v40  ;;  %v14295_v50 = vpop.f32.mrf.mxu1  ;;  %v11952_v40 = vld [vmem:[%s18954_s3 + $0x30] ss:$8 sps:$4 sm:$0xff]   ;;  %v14331_v43 = vpop.f32.mrf.mxu0 }
 0x14e   :  { %10690 = vmatprep.mubr.msk.bf16.mxu0 %vm55_vm1, %v13660_v45  ;;  %2399 = vmatprep.mubr.bf16.mxu1 %v13759_v21  ;;  %v11988_v45 = vld [vmem:[%s18954_s3 + $0x170] ss:$8 sps:$4 sm:$0xff]   ;;  %v11990_v21 = vld [vmem:[%s18954_s3 + $0x174] ss:$8 sps:$4 sm:$0xff]  }
 0x14f   :  { %3244 = vmatpush1.bf16.msra.mxu1 %v11946_v51  ;;  %v14311_v29 = vpop.f32.mrf.mxu1  ;;  %3412 = vmatprep.subr.bf16.mxu0 %v11990_v21  ;;  %v11963_v51 = vld [vmem:[%s18954_s3 + $0x4] ss:$8 sps:$4 sm:$0xff]  }
 0x150   :  { %3245 = vmatprep.subr.bf16.mxu1 %v11951_v39  ;;  %3413 = vmatpush1.bf16.msra.mxu0 %v11988_v45  ;;  %v11964_v45 = vld [vmem:[%s18954_s3 + $0xf0] ss:$8 sps:$4 sm:$0xff]  }
 0x151   :  { %v14326_v15 = vpop.f32.mrf.mxu1  ;;  %3414 = vmatprep.subr.bf16.mxu0 %v11993_v46  ;;  %v12002_v46 = vld [vmem:[%s18954_s3 + $0x144] ss:$8 sps:$4 sm:$0xff]  }
 0x153   :  { %3246 = vmatpush1.bf16.msra.mxu1 %v11949_v36  ;;  %v14342_v27 = vpop.f32.mrf.mxu1 }
 0x154   :  { %3247 = vmatprep.subr.bf16.mxu1 %v11954_v52 }
 0x155   :  { %2573 = vmatmul.mubr.bf16.gmra.mxu0 %v13800_v44  ;;  %2400 = vmatmul.mubr.bf16.gmra.mxu1 %v13771_v26  ;;  %v11955_v44 = vld [vmem:[%s18954_s3 + $0x20] ss:$8 sps:$4 sm:$0xff]   ;;  %v11958_v26 = vld [vmem:[%s18954_s3 + $0x10] ss:$8 sps:$4 sm:$0xff]  }
 0x156   :  { %10691 = vmatprep.mubr.msk.bf16.mxu0 %vm55_vm1, %v13789_v42  ;;  %2409 = vmatprep.mubr.bf16.mxu1 %v13898_v25  ;;  %v11960_v42 = vld [vmem:[%s18954_s3 + $0x14] ss:$8 sps:$4 sm:$0xff]   ;;  %v11991_v25 = vld [vmem:[%s18954_s3 + $0x160] ss:$8 sps:$4 sm:$0xff]  }
 0x157   :  { %3248 = vmatpush1.bf16.msra.mxu1 %v11952_v40  ;;  %3415 = vmatpush1.bf16.msra.mxu0 %v11991_v25  ;;  %v11994_v40 = vld [vmem:[%s18954_s3 + $0x150] ss:$8 sps:$4 sm:$0xff]  }
 0x158   :  { %3249 = vmatprep.subr.bf16.mxu1 %v11957_v24  ;;  %v11969_v24 = vld [vmem:[%s18954_s3 + $0xe4] ss:$8 sps:$4 sm:$0xff]  }
 0x15b   :  { %3250 = vmatpush1.bf16.msra.mxu1 %v11955_v44  ;;  %v14344_v34 = vpop.f32.mrf.mxu0 }
 0x15c   :  { %3251 = vmatprep.subr.bf16.mxu1 %v11960_v42  ;;  %v14354_v36 = vpop.f32.mrf.mxu1 }
 0x15d   :  { %2583 = vmatmul.mubr.bf16.gmra.mxu0 %v13932_v61  ;;  %v14352_v39 = vpop.f32.mrf.mxu0  ;;  %2410 = vmatmul.mubr.bf16.gmra.mxu1 %v13908_v35  ;;  %v11961_v61 = vld [vmem:[%s18954_s3] ss:$8 sps:$4 sm:$0xff]   ;;  %v11996_v35 = vld [vmem:[%s18954_s3 + $0x154] ss:$8 sps:$4 sm:$0xff]  }
 0x15e   :  { %10692 = vmatprep.mubr.msk.bf16.mxu0 %vm55_vm1, %v13923_v58  ;;  %2419 = vmatprep.mubr.bf16.mxu1 %v14001_v30  ;;  %v14361_v52 = vpop.f32.mrf.mxu1  ;;  %v11966_v58 = vld [vmem:[%s18954_s3 + $0xf4] ss:$8 sps:$4 sm:$0xff]  }
 0x15f   :  { %3252 = vmatpush1.bf16.msra.mxu1 %v11958_v26  ;;  %v14372_v30 = vpop.f32.mrf.mxu0  ;;  %3416 = vmatprep.subr.bf16.mxu0 %v11996_v35 }
 0x160   :  { %3253 = vmatprep.subr.bf16.mxu1 %v11963_v51  ;;  %v14377_v21 = vpop.f32.mrf.mxu1  ;;  %3417 = vmatpush1.bf16.msra.mxu0 %v11994_v40 }
 0x161   :  { %v14385_v44 = vpop.f32.mrf.mxu0  ;;  %3418 = vmatprep.subr.bf16.mxu0 %v12002_v46 }
 0x162   :  { %v14392_v42 = vpop.f32.mrf.mxu1 }
 0x163   :  { %3254 = vmatpush1.bf16.msra.mxu1 %v11961_v61  ;;  %v11975_v61 = vld [vmem:[%s18954_s3 + $0xc4] ss:$8 sps:$4 sm:$0xff]  }
 0x164   :  { %3255 = vmatprep.subr.bf16.mxu1 %v11966_v58 }
 0x165   :  { %2593 = vmatmul.mubr.bf16.gmra.mxu0 %v14022_v4  ;;  %2420 = vmatmul.mubr.bf16.gmra.mxu1 %v14003_v33  ;;  %v11967_v4 = vld [vmem:[%s18954_s3 + $0xe0] ss:$8 sps:$4 sm:$0xff]   ;;  %v11970_v33 = vld [vmem:[%s18954_s3 + $0xd0] ss:$8 sps:$4 sm:$0xff]  }
 0x166   :  { %10693 = vmatprep.mubr.msk.bf16.mxu0 %vm55_vm1, %v14013_v53  ;;  %2429 = vmatprep.mubr.bf16.mxu1 %v14055_v11  ;;  %v11972_v53 = vld [vmem:[%s18954_s3 + $0xd4] ss:$8 sps:$4 sm:$0xff]   ;;  %v12000_v11 = vld [vmem:[%s18954_s3 + $0x140] ss:$8 sps:$4 sm:$0xff]  }
 0x167   :  { %3256 = vmatpush2.bf16.msra.mxu1 %v11964_v45  ;;  %v14394_v26 = vpop.f32.mrf.mxu0  ;;  %3419 = vmatpush1.bf16.msra.mxu0 %v12000_v11  ;;  %v11981_v45 = vld [vmem:[%s18954_s3 + $0xa4] ss:$8 sps:$4 sm:$0xff]  }
 0x168   :  { %3257 = vmatprep.subr.bf16.mxu1 %v11969_v24  ;;  %v14399_v25 = vpop.f32.mrf.mxu1  ;;  %v12014_v24 = vld [vmem:[%s18954_s3 + $0x134] ss:$8 sps:$4 sm:$0xff]  }
 0x169   :  { %v14410_v51 = vpop.f32.mrf.mxu0  ;;  %3420 = vmatprep.subr.bf16.mxu0 %v12014_v24 }
 0x16a   :  { %v14418_v58 = vpop.f32.mrf.mxu1 }
 0x16b   :  { %3258 = vmatpush2.bf16.msra.mxu1 %v11967_v4  ;;  %v14425_v40 = vpop.f32.mrf.mxu0  ;;  %v12012_v4 = vld [vmem:[%s18954_s3 + $0x130] ss:$8 sps:$4 sm:$0xff]  }
 0x16c   :  { %3259 = vmatprep.subr.bf16.mxu1 %v11972_v53  ;;  %v14430_v35 = vpop.f32.mrf.mxu1  ;;  %3421 = vmatpush1.bf16.msra.mxu0 %v12012_v4 }
 0x16d   :  { %2603 = vmatmul.mubr.bf16.gmra.mxu0 %v14067_v18  ;;  %2430 = vmatmul.mubr.bf16.gmra.mxu1 %v14057_v12  ;;  %v11973_v18 = vld [vmem:[%s18954_s3 + $0xc0] ss:$8 sps:$4 sm:$0xff]   ;;  %v11976_v12 = vld [vmem:[%s18954_s3 + $0xb0] ss:$8 sps:$4 sm:$0xff]  }
 0x16e   :  { %10694 = vmatprep.mubr.msk.bf16.mxu0 %vm55_vm1, %v14060_v17  ;;  %2439 = vmatprep.mubr.bf16.mxu1 %v14078_v37  ;;  %v11978_v17 = vld [vmem:[%s18954_s3 + $0xb4] ss:$8 sps:$4 sm:$0xff]   ;;  %v14435_v37 = vpop.f32.mrf.mxu0  ;;  %v14449_v53 = vpop.f32.mrf.mxu1 }
 0x16f   :  { %3260 = vmatpush2.bf16.msra.mxu1 %v11970_v33 }
 0x170   :  { %3261 = vmatprep.subr.bf16.mxu1 %v11975_v61  ;;  %v11982_v61 = vld [vmem:[%s18954_s3 + $0x90] ss:$8 sps:$4 sm:$0xff]  }
 0x173   :  { %3262 = vmatpush2.bf16.msra.mxu1 %v11973_v18 }
 0x174   :  { %3263 = vmatprep.subr.bf16.mxu1 %v11978_v17  ;;  %v14451_v33 = vpop.f32.mrf.mxu0  ;;  %v11987_v17 = vld [vmem:[%s18954_s3 + $0x84] ss:$8 sps:$4 sm:$0xff]  }
 0x175   :  { %2613 = vmatmul.mubr.bf16.gmra.mxu0 %v14090_v57  ;;  %2440 = vmatmul.mubr.bf16.gmra.mxu1 %v14080_v41  ;;  %v11979_v57 = vld [vmem:[%s18954_s3 + $0xa0] ss:$8 sps:$4 sm:$0xff]   ;;  %v14458_v11 = vpop.f32.mrf.mxu1  ;;  %v12020_v41 = vld [vmem:[%s18954_s3 + $0x124] ss:$8 sps:$4 sm:$0xff]  }
 0x176   :  { %10695 = vmatprep.mubr.msk.bf16.mxu0 %vm55_vm1, %v14083_v48  ;;  %2449 = vmatprep.mubr.bf16.mxu1 %v14101_v7  ;;  %v11984_v48 = vld [vmem:[%s18954_s3 + $0x94] ss:$8 sps:$4 sm:$0xff]   ;;  %v12018_v7 = vld [vmem:[%s18954_s3 + $0x120] ss:$8 sps:$4 sm:$0xff]   ;;  %v14469_v46 = vpop.f32.mrf.mxu0 }
 0x177   :  { %3264 = vmatpush2.bf16.msra.mxu1 %v11976_v12  ;;  %3422 = vmatprep.subr.bf16.mxu0 %v12020_v41  ;;  %v14474_v18 = vpop.f32.mrf.mxu1  ;;  %v12026_v12 = vld [vmem:[%s18954_s3 + $0x114] ss:$8 sps:$4 sm:$0xff]  }
 0x178   :  { %3265 = vmatprep.subr.bf16.mxu1 %v11981_v45  ;;  %3423 = vmatpush1.bf16.msra.mxu0 %v12018_v7  ;;  %v12024_v45 = vld [vmem:[%s18954_s3 + $0x110] ss:$8 sps:$4 sm:$0xff]   ;;  %v14488_v24 = vpop.f32.mrf.mxu0  ;;  %v12038_v7 = vld [vmem:[%s18954_s3 + $0x1b4] ss:$8 sps:$4 sm:$0xff]  }
 0x179   :  { %3424 = vmatprep.subr.bf16.mxu0 %v12026_v12  ;;  %v14495_v4 = vpop.f32.mrf.mxu1  ;;  %v12044_v12 = vld [vmem:[%s18954_s3 + $0x1a4] ss:$8 sps:$4 sm:$0xff]  }
 0x17b   :  { %3266 = vmatpush2.bf16.msra.mxu1 %v11979_v57  ;;  %v12032_v57 = vld [vmem:[%s18954_s3 + $0x104] ss:$8 sps:$4 sm:$0xff]  }
 0x17c   :  { %3267 = vmatprep.subr.bf16.mxu1 %v11984_v48  ;;  %3425 = vmatpush1.bf16.msra.mxu0 %v12024_v45  ;;  %v14508_v48 = vpop.f32.mrf.mxu1 }
 0x17d   :  { %2623 = vmatmul.mubr.bf16.gmra.mxu0 %v14112_v13  ;;  %2450 = vmatmul.mubr.bf16.gmra.mxu1 %v14103_v56  ;;  %v11985_v13 = vld [vmem:[%s18954_s3 + $0x80] ss:$8 sps:$4 sm:$0xff]  }
 0x17e   :  { %10696 = vmatprep.mubr.msk.bf16.mxu0 %vm55_vm1, %v14106_v10  ;;  %2459 = vmatprep.mubr.bf16.mxu1 %v14135_v47  ;;  %v11999_v10 = vld [vmem:[%s18954_s3 + $0x234] ss:$8 sps:$4 sm:$0xff]   ;;  %v12030_v56 = vld [vmem:[%s18954_s3 + $0x100] ss:$8 sps:$4 sm:$0xff]   ;;  %v14506_v47 = vpop.f32.mrf.mxu0 }
 0x17f   :  { %3268 = vmatpush2.bf16.msra.mxu1 %v11982_v61  ;;  %3426 = vmatprep.subr.bf16.mxu0 %v12032_v57  ;;  %v12036_v61 = vld [vmem:[%s18954_s3 + $0x1b0] ss:$8 sps:$4 sm:$0xff]   ;;  %v12056_v57 = vld [vmem:[%s18954_s3 + $0x184] ss:$8 sps:$4 sm:$0xff]  }
 0x180   :  { %3269 = vmatprep.subr.bf16.mxu1 %v11987_v17  ;;  %v14510_v41 = vpop.f32.mrf.mxu0  ;;  %3427 = vmatpush1.bf16.msra.mxu0 %v12030_v56  ;;  %v14521_v17 = vpop.f32.mrf.mxu1 }
 0x181   :  { %3436 = vmatprep.subr.bf16.mxu0 %v12038_v7 }
 0x182   :  { %v14533_v45 = vpop.f32.mrf.mxu1 }
 0x183   :  { %3270 = vmatpush2.bf16.msra.mxu1 %v11985_v13 }
 0x184   :  { %3922 = vmatprep.subr.bf16.mxu1 %v11999_v10  ;;  %3437 = vmatpush2.bf16.msra.mxu0 %v12036_v61  ;;  %v14546_v10 = vpop.f32.mrf.mxu1 }
 0x185   :  { %2633 = vmatmul.mubr.bf16.gmra.mxu0 %v14146_v0  ;;  %2460 = vmatmul.mubr.bf16.gmra.mxu1 %v14137_v54  ;;  %v14525_v0 = vpop.f32.mrf.mxu0  ;;  %v12050_v54 = vld [vmem:[%s18954_s3 + $0x194] ss:$8 sps:$4 sm:$0xff]  }
 0x186   :  { %10697 = vmatprep.mubr.msk.bf16.mxu0 %vm55_vm1, %v14140_v60  ;;  %2469 = vmatprep.mubr.bf16.mxu1 %v14158_v16  ;;  %v12042_v60 = vld [vmem:[%s18954_s3 + $0x1a0] ss:$8 sps:$4 sm:$0xff]   ;;  %v12048_v16 = vld [vmem:[%s18954_s3 + $0x190] ss:$8 sps:$4 sm:$0xff]   ;;  %v14558_v56 = vpop.f32.mrf.mxu1 }
 0x187   :  { %3438 = vmatprep.subr.bf16.mxu0 %v12044_v12  ;;  %v14535_v13 = vpop.f32.mrf.mxu0 }
 0x188   :  { %3439 = vmatpush2.bf16.msra.mxu0 %v12042_v60 }
 0x189   :  { %3440 = vmatprep.subr.bf16.mxu0 %v12050_v54 }
 0x18c   :  { %3441 = vmatpush2.bf16.msra.mxu0 %v12048_v16 }
 0x18d   :  { %2643 = vmatmul.mubr.bf16.gmra.mxu0 %v14169_v22  ;;  %2470 = vmatmul.mubr.bf16.gmra.mxu1 %v14160_v1  ;;  %v14550_v22 = vpop.f32.mrf.mxu0 }
 0x18e   :  { %10698 = vmatprep.mubr.msk.bf16.mxu0 %vm55_vm1, %v14163_v55  ;;  %2479 = vmatprep.mubr.bf16.mxu1 %v14181_v5  ;;  %v12054_v55 = vld [vmem:[%s18954_s3 + $0x180] ss:$8 sps:$4 sm:$0xff]   ;;  %v18973_v5 = vlaneseq }
 0x18f   :  { %3442 = vmatprep.subr.bf16.mxu0 %v12056_v57 }
 0x190   :  { %3443 = vmatpush2.bf16.msra.mxu0 %v12054_v55  ;;  %v14574_v60 = vshrl.u32 %v18973_v5, 7 }
 0x191   :  { %v14560_v7 = vpop.f32.mrf.mxu0 }
 0x192   :  { %v14562_v1 = vpop.f32.mrf.mxu1  ;;  %19053 = vst [vmem:[#allocation6_spill] sm:$0xff] %v14574_v60  ;;  %v18976_v55 = vsub.s32 0, %v14574_v60 }
 0x193   :  { %19052 = vst [vmem:[#allocation5_spill] sm:$0xff] %v14562_v1  ;;  %v14567_v61 = vpop.f32.mrf.mxu0 }
 0x194   :  { %v14571_v12 = vpop.f32.mrf.mxu1 }
 0x195   :  { %2653 = vmatmul.mubr.bf16.gmra.mxu0 %v14192_v14  ;;  %2480 = vmatmul.mubr.bf16.gmra.mxu1 %v14183_v32  ;;  %v14576_v54 = vpop.f32.mrf.mxu0  ;;  %v18975_v14 = vsub.s32 1, %v14574_v60  ;;  %v14587_v32 = vld [vmem:[%s18955_s2] sm:$0xf] }
 0x196   :  { %10699 = vmatprep.mubr.msk.bf16.mxu0 %vm55_vm1, %v14186_v8  ;;  %2489 = vmatprep.mubr.bf16.mxu1 %v14202_v38  ;;  %v14579_v16 = vpop.f32.mrf.mxu1  ;;  %19054 = vst [vmem:[#allocation7_spill] sm:$0xff] %v14587_v32 }
 0x197   :  { %v14589_v8 = vpop.f32.mrf.mxu0  ;;  %v14595_v38 = vrot.slane %v14587_v32, %v18975_v14 }
 0x19c   :  { %v14600_v57 = vpop.f32.mrf.mxu0 }
 0x19d   :  { %2663 = vmatmul.mubr.bf16.gmra.mxu0 %v14213_v9  ;;  %2490 = vmatmul.mubr.bf16.gmra.mxu1 %v14204_v59  ;;  %v14598_v9 = vpop.f32.mrf.mxu1  ;;  %v2038_v59 = vadd.f32 %v14300_v63, %v14595_v38 }
 0x19e   :  { %10700 = vmatprep.mubr.msk.bf16.mxu0 %vm55_vm1, %v14207_v3  ;;  %2499 = vmatprep.mubr.bf16.mxu1 %v14229_v2  ;;  %v2042_v3 = vadd.f32 %v14331_v43, %v14595_v38  ;;  %v14609_v1 = vpop.f32.mrf.mxu0  ;;  %v14618_v43 = vrot.slane %v14587_v32, %v18976_v55 }
 0x19f   :  { %v14605_v5 = vpop.f32.mrf.mxu1  ;;  %v2211_v63 = vadd.f32 %v14311_v29, %v2038_v59 }
 0x1a0   :  { %v2215_v2 = vadd.f32 %v14342_v27, %v2042_v3  ;;  %v14627_v27 = vpop.f32.mrf.mxu0  ;;  %v2036_v55 = vadd.f32 %v14288_v49, %v14618_v43 }
 0x1a1   :  { %v14620_v14 = vpop.f32.mrf.mxu1  ;;  %v2694_v60 = vmax.f32 %v2211_v63, 0.0 }
 0x1a2   :  { %v2698_v3 = vmax.f32 %v2215_v2, 0.0  ;;  %v14638_v29 = vpop.f32.mrf.mxu0 }
 0x1a3   :  { %v14633_v32 = vpop.f32.mrf.mxu1 }
 0x1a4   :  { %v14642_v59 = vpack.c.bf16 %v2698_v3, %v2694_v60 }
 0x1a5   :  { %2673 = vmatmul.mubr.bf16.gmra.mxu0 %v14241_v31  ;;  %2500 = vmatmul.mubr.bf16.gmra.mxu1 %v14231_v23  ;;  %v2040_v31 = vadd.f32 %v14319_v28, %v14618_v43  ;;  %v2048_v23 = vadd.f32 %v14352_v39, %v14595_v38  ;;  %v14645_v2 = vpop.f32.mrf.mxu1 }
 0x1a6   :  { %10701 = vmatprep.mubr.msk.bf16.mxu0 %vm55_vm1, %v14234_v6  ;;  %2509 = vmatprep.mubr.bf16.mxu1 %v14250_v62  ;;  %v2052_v6 = vadd.f32 %v14385_v44, %v14595_v38  ;;  %v2209_v44 = vadd.f32 %v14295_v50, %v2036_v55  ;;  %v2062_v50 = vadd.f32 %v14435_v37, %v14595_v38 }
 0x1a7   :  { %v2213_v62 = vadd.f32 %v14326_v15, %v2040_v31  ;;  %v2221_v39 = vadd.f32 %v14361_v52, %v2048_v23  ;;  %v2046_v55 = vadd.f32 %v14344_v34, %v14618_v43  ;;  %v2058_v52 = vadd.f32 %v14410_v51, %v14595_v38  ;;  %v12005_v34 = vld [vmem:[%s18954_s3 + $0x224] ss:$8 sps:$4 sm:$0xff]  }
 0x1a8   :  { %v2225_v28 = vadd.f32 %v14392_v42, %v2052_v6  ;;  %v14647_v49 = vpop.f32.mrf.mxu0  ;;  %v14654_v63 = vpop.f32.mrf.mxu1  ;;  %v2693_v60 = vmax.f32 %v2209_v44, 0.0  ;;  %v2235_v37 = vadd.f32 %v14449_v53, %v2062_v50  ;;  %v2060_v53 = vadd.f32 %v14425_v40, %v14618_v43 }
 0x1a9   :  { %v2697_v15 = vmax.f32 %v2213_v62, 0.0  ;;  %v2219_v51 = vadd.f32 %v14354_v36, %v2046_v55  ;;  %v2231_v44 = vadd.f32 %v14418_v58, %v2058_v52  ;;  %v12008_v36 = vld [vmem:[%s18954_s3 + $0x214] ss:$8 sps:$4 sm:$0xff]   ;;  %v2072_v58 = vadd.f32 %v14506_v47, %v14595_v38 }
 0x1aa   :  { %v2706_v42 = vmax.f32 %v2225_v28, 0.0  ;;  %v14660_v31 = vpop.f32.mrf.mxu0  ;;  %v14670_v23 = vpop.f32.mrf.mxu1  ;;  %v2056_v50 = vadd.f32 %v14394_v26, %v14618_v43  ;;  %v2068_v40 = vadd.f32 %v14469_v46, %v14595_v38  ;;  %v12011_v26 = vld [vmem:[%s18954_s3 + $0x204] ss:$8 sps:$4 sm:$0xff]  }
 0x1ab   :  { %v14667_v3 = vpack.c.bf16 %v2697_v15, %v2693_v60  ;;  %v2710_v55 = vmax.f32 %v2231_v44, 0.0  ;;  %v2245_v46 = vadd.f32 %v14508_v48, %v2072_v58  ;;  %v2066_v58 = vadd.f32 %v14451_v33, %v14618_v43 }
 0x1ac   :  { %v14679_v28 = vpop.f32.mrf.mxu0  ;;  %v14689_v15 = vpop.f32.mrf.mxu1 }
 0x1ad   :  { %2683 = vmatmul.mubr.bf16.gmra.mxu0 %v14256_v19  ;;  %2510 = vmatmul.mubr.bf16.gmra.mxu1 %v14252_v20  ;;  %v2050_v19 = vadd.f32 %v14372_v30, %v14618_v43  ;;  %v2702_v20 = vmax.f32 %v2221_v39, 0.0  ;;  %v11997_v30 = vld [vmem:[%s18954_s3 + $0x230] ss:$8 sps:$4 sm:$0xff]  }
 0x1ae   :  { %3271 = vmatprep.mubr.bf16.mxu1 %v14642_v59  ;;  %v14698_v60 = vpop.f32.mrf.mxu0  ;;  %v14708_v47 = vpop.f32.mrf.mxu1 }
 0x1af   :  { %v2223_v6 = vadd.f32 %v14377_v21, %v2050_v19  ;;  %v14676_v62 = vpack.c.bf16 %v2706_v42, %v2702_v20  ;;  %v12003_v21 = vld [vmem:[%s18954_s3 + $0x220] ss:$8 sps:$4 sm:$0xff]   ;;  %v2714_v19 = vmax.f32 %v2235_v37, 0.0  ;;  %v2701_v42 = vmax.f32 %v2219_v51, 0.0  ;;  %v12006_v20 = vld [vmem:[%s18954_s3 + $0x210] ss:$8 sps:$4 sm:$0xff]  }
 0x1b0   :  { %v2229_v37 = vadd.f32 %v14399_v25, %v2056_v50 }
 0x1b1   :  { %v2705_v39 = vmax.f32 %v2223_v6, 0.0 }
 0x1b3   :  { %v14705_v52 = vpack.c.bf16 %v2705_v39, %v2701_v42  ;;  %v2070_v39 = vadd.f32 %v14488_v24, %v14618_v43  ;;  %v2078_v24 = vadd.f32 %v14525_v0, %v14595_v38  ;;  %v12023_v0 = vld [vmem:[%s18954_s3 + $0x1e4] ss:$8 sps:$4 sm:$0xff]  }
 0x1b5   :  { %3272 = vmatmul.mubr.bf16.vlgmr.msra.gmra.mxu1 %v14667_v3 }
 0x1b6   :  { %3281 = vmatprep.mubr.bf16.mxu1 %v14676_v62  ;;  %3923 = vmatpush1.bf16.msra.mxu1 %v11997_v30  ;;  %v2233_v30 = vadd.f32 %v14430_v35, %v2060_v53  ;;  %v2241_v35 = vadd.f32 %v14474_v18, %v2068_v40  ;;  %v12017_v53 = vld [vmem:[%s18954_s3 + $0x1f4] ss:$8 sps:$4 sm:$0xff]   ;;  %v2082_v18 = vadd.f32 %v14550_v22, %v14595_v38 }
 0x1b7   :  { %3924 = vmatprep.subr.bf16.mxu1 %v12005_v34  ;;  %v14716_v34 = vpack.c.bf16 %v2714_v19, %v2710_v55  ;;  %v2709_v19 = vmax.f32 %v2229_v37, 0.0  ;;  %v12015_v55 = vld [vmem:[%s18954_s3 + $0x1f0] ss:$8 sps:$4 sm:$0xff]   ;;  %v12074_v40 = vld [vmem:[%s18954_s3 + $0x334] ss:$8 sps:$4 sm:$0xff]  }
 0x1b8   :  { %v2713_v48 = vmax.f32 %v2233_v30, 0.0  ;;  %v2718_v50 = vmax.f32 %v2241_v35, 0.0  ;;  %v2255_v30 = vadd.f32 %v14558_v56, %v2082_v18  ;;  %4095 = vmatprep.subr.bf16.mxu0 %v12074_v40  ;;  %v12021_v35 = vld [vmem:[%s18954_s3 + $0x1e0] ss:$8 sps:$4 sm:$0xff]   ;;  %v2080_v56 = vadd.f32 %v14535_v13, %v14618_v43 }
 0x1b9   :  { %v2076_v18 = vadd.f32 %v14510_v41, %v14618_v43  ;;  %v12035_v41 = vld [vmem:[%s18954_s3 + $0x1c4] ss:$8 sps:$4 sm:$0xff]  }
 0x1ba   :  { %3925 = vmatpush1.bf16.msra.mxu1 %v12003_v21  ;;  %v12009_v21 = vld [vmem:[%s18954_s3 + $0x200] ss:$8 sps:$4 sm:$0xff]   ;;  %v14750_v22 = vpack.c.bf16 %v2713_v48, %v2709_v19 }
 0x1bb   :  { %v14710_v6 = vpop.f32.mrf.mxu0  ;;  %3926 = vmatprep.subr.bf16.mxu1 %v12008_v36  ;;  %v14721_v44 = vpop.f32.mrf.mxu1  ;;  %v2722_v36 = vmax.f32 %v2245_v46, 0.0  ;;  %v2239_v46 = vadd.f32 %v14458_v11, %v2066_v58 }
 0x1bd   :  { %v14719_v51 = vpop.f32.mrf.mxu0  ;;  %3282 = vmatmul.mubr.bf16.gmra.mxu1 %v14705_v52  ;;  %v14731_v25 = vpop.f32.mrf.mxu1 }
 0x1be   :  { %3291 = vmatprep.mubr.bf16.mxu1 %v14716_v34  ;;  %3927 = vmatpush1.bf16.msra.mxu1 %v12006_v20  ;;  %v2243_v20 = vadd.f32 %v14495_v4, %v2070_v39  ;;  %v2251_v4 = vadd.f32 %v14533_v45, %v2078_v24  ;;  %v12029_v45 = vld [vmem:[%s18954_s3 + $0x1d4] ss:$8 sps:$4 sm:$0xff]   ;;  %v2730_v39 = vmax.f32 %v2255_v30, 0.0  ;;  %v12027_v24 = vld [vmem:[%s18954_s3 + $0x1d0] ss:$8 sps:$4 sm:$0xff]  }
 0x1bf   :  { %3928 = vmatprep.subr.bf16.mxu1 %v12011_v26  ;;  %v14740_v42 = vpop.f32.mrf.mxu0  ;;  %v14753_v33 = vpop.f32.mrf.mxu1  ;;  %v14759_v26 = vpack.c.bf16 %v2722_v36, %v2718_v50  ;;  %v2717_v36 = vmax.f32 %v2239_v46, 0.0  ;;  %v2088_v50 = vadd.f32 %v14567_v61, %v14595_v38  ;;  %v2249_v61 = vadd.f32 %v14521_v17, %v2076_v18  ;;  %v12041_v17 = vld [vmem:[%s18954_s3 + $0x2b4] ss:$8 sps:$4 sm:$0xff]  }
 0x1c0   :  { %v2726_v58 = vmax.f32 %v2251_v4, 0.0 }
 0x1c1   :  { %v14762_v37 = vpop.f32.mrf.mxu0  ;;  %v14772_v48 = vpop.f32.mrf.mxu1  ;;  %v2261_v46 = vadd.f32 %v14571_v12, %v2088_v50  ;;  %v2102_v12 = vadd.f32 %v14638_v29, %v14595_v38 }
 0x1c2   :  { %3929 = vmatpush1.bf16.msra.mxu1 %v12009_v21  ;;  %v2721_v21 = vmax.f32 %v2243_v20, 0.0 }
 0x1c3   :  { %3930 = vmatprep.subr.bf16.mxu1 %v12017_v53  ;;  %v2092_v53 = vadd.f32 %v14589_v8, %v14595_v38  ;;  %v2253_v8 = vadd.f32 %v14546_v10, %v2080_v56  ;;  %v12033_v10 = vld [vmem:[%s18954_s3 + $0x1c0] ss:$8 sps:$4 sm:$0xff]   ;;  %v2725_v56 = vmax.f32 %v2249_v61, 0.0 }
 0x1c4   :  { %v12045_v61 = vld [vmem:[%s18954_s3 + $0x2a0] ss:$8 sps:$4 sm:$0xff]  }
 0x1c5   :  { %3292 = vmatmul.mubr.bf16.gmra.mxu1 %v14750_v22  ;;  %v2265_v20 = vadd.f32 %v14598_v9, %v2092_v53  ;;  %v2729_v4 = vmax.f32 %v2253_v8, 0.0  ;;  %v2090_v9 = vadd.f32 %v14576_v54, %v14618_v43  ;;  %v2734_v53 = vmax.f32 %v2261_v46, 0.0  ;;  %v19055_v8 = vld [vmem:[#allocation5_spill] sm:$0xff] }
 0x1c6   :  { %3301 = vmatprep.mubr.bf16.mxu1 %v14759_v26  ;;  %3931 = vmatpush1.bf16.msra.mxu1 %v12015_v55  ;;  %v14792_v55 = vpack.c.bf16 %v2721_v21, %v2717_v36  ;;  %v2098_v54 = vadd.f32 %v14609_v1, %v14595_v38  ;;  %v12039_v36 = vld [vmem:[%s18954_s3 + $0x2b0] ss:$8 sps:$4 sm:$0xff]   ;;  %v2275_v1 = vadd.f32 %v14645_v2, %v2102_v12 }
 0x1c7   :  { %v14774_v11 = vpop.f32.mrf.mxu0  ;;  %3932 = vmatprep.subr.bf16.mxu1 %v12023_v0  ;;  %v14801_v0 = vpack.c.bf16 %v2730_v39, %v2726_v58  ;;  %v2738_v21 = vmax.f32 %v2265_v20, 0.0  ;;  %v14830_v18 = vpack.c.bf16 %v2729_v4, %v2725_v56  ;;  %v2263_v58 = vadd.f32 %v14579_v16, %v2090_v9  ;;  %v12053_v4 = vld [vmem:[%s18954_s3 + $0x294] ss:$8 sps:$4 sm:$0xff]  }
 0x1c8   :  { %v14785_v13 = vpop.f32.mrf.mxu1  ;;  %v2271_v16 = vadd.f32 %v14620_v14, %v2098_v54  ;;  %v2100_v2 = vadd.f32 %v14627_v27, %v14618_v43  ;;  %v2746_v9 = vmax.f32 %v2275_v1, 0.0  ;;  %v2112_v14 = vadd.f32 %v14698_v60, %v14595_v38 }
 0x1c9   :  { %v14783_v19 = vpop.f32.mrf.mxu0  ;;  %v2737_v46 = vmax.f32 %v2263_v58, 0.0  ;;  %v2108_v27 = vadd.f32 %v14660_v31, %v14595_v38 }
 0x1ca   :  { %3933 = vmatpush1.bf16.msra.mxu1 %v12021_v35  ;;  %v14795_v40 = vpop.f32.mrf.mxu1  ;;  %v2742_v56 = vmax.f32 %v2271_v16, 0.0  ;;  %v2273_v54 = vadd.f32 %v14633_v32, %v2100_v2  ;;  %v12057_v32 = vld [vmem:[%s18954_s3 + $0x280] ss:$8 sps:$4 sm:$0xff]  }
 0x1cb   :  { %3934 = vmatprep.subr.bf16.mxu1 %v12029_v45  ;;  %v14804_v30 = vpop.f32.mrf.mxu0  ;;  %v2086_v45 = vadd.f32 %v14560_v7, %v14618_v43  ;;  %v12047_v7 = vld [vmem:[%s18954_s3 + $0x2a4] ss:$8 sps:$4 sm:$0xff]   ;;  %v2281_v1 = vadd.f32 %v14670_v23, %v2108_v27  ;;  %v2122_v23 = vadd.f32 %v14762_v37, %v14595_v38 }
 0x1cc   :  { %v14814_v35 = vpop.f32.mrf.mxu1  ;;  %v14879_v58 = vpack.c.bf16 %v2746_v9, %v2742_v56 }
 0x1cd   :  { %3302 = vmatmul.mubr.bf16.gmra.mxu1 %v14792_v55  ;;  %v14823_v39 = vpop.f32.mrf.mxu0  ;;  %v2750_v9 = vmax.f32 %v2281_v1, 0.0  ;;  %v2295_v56 = vadd.f32 %v14772_v48, %v2122_v23  ;;  %v2120_v48 = vadd.f32 %v14740_v42, %v14618_v43  ;;  %v2128_v42 = vadd.f32 %v14783_v19, %v14595_v38 }
 0x1ce   :  { %3311 = vmatprep.mubr.bf16.mxu1 %v14801_v0  ;;  %3935 = vmatpush1.bf16.msra.mxu1 %v12027_v24  ;;  %v14833_v29 = vpop.f32.mrf.mxu1  ;;  %v14841_v24 = vpack.c.bf16 %v2738_v21, %v2734_v53  ;;  %v2096_v21 = vadd.f32 %v14600_v57, %v14618_v43  ;;  %v12059_v57 = vld [vmem:[%s18954_s3 + $0x284] ss:$8 sps:$4 sm:$0xff]  }
 0x1cf   :  { %3936 = vmatprep.subr.bf16.mxu1 %v12035_v41  ;;  %v2259_v41 = vadd.f32 %v19055_v8, %v2086_v45  ;;  %v12051_v45 = vld [vmem:[%s18954_s3 + $0x290] ss:$8 sps:$4 sm:$0xff]   ;;  %v2745_v8 = vmax.f32 %v2273_v54, 0.0  ;;  %v2293_v23 = vadd.f32 %v14753_v33, %v2120_v48  ;;  %v12069_v33 = vld [vmem:[%s18954_s3 + $0x240] ss:$8 sps:$4 sm:$0xff]  }
 0x1d0   :  { %v2269_v31 = vadd.f32 %v14605_v5, %v2096_v21  ;;  %v12062_v5 = vld [vmem:[%s18954_s3 + $0x274] ss:$8 sps:$4 sm:$0xff]  }
 0x1d2   :  { %3937 = vmatpush1.bf16.msra.mxu1 %v12033_v10 }
 0x1d3   :  { %3938 = vmatprep.subr.bf16.mxu1 %v12041_v17  ;;  %v2733_v17 = vmax.f32 %v2259_v41, 0.0 }
 0x1d4   :  { %v14835_v50 = vpop.f32.mrf.mxu0  ;;  %v14844_v20 = vpop.f32.mrf.mxu1 }
 0x1d5   :  { %3312 = vmatmul.mubr.bf16.gmra.mxu1 %v14830_v18  ;;  %v14870_v53 = vpack.c.bf16 %v2737_v46, %v2733_v17  ;;  %v2106_v46 = vadd.f32 %v14647_v49, %v14618_v43  ;;  %v12065_v49 = vld [vmem:[%s18954_s3 + $0x264] ss:$8 sps:$4 sm:$0xff]  }
 0x1d6   :  { %3321 = vmatprep.mubr.bf16.mxu1 %v14841_v24  ;;  %3939 = vmatpush2.bf16.msra.mxu1 %v12039_v36  ;;  %v14854_v10 = vpop.f32.mrf.mxu0  ;;  %v14863_v12 = vpop.f32.mrf.mxu1  ;;  %v2285_v36 = vadd.f32 %v14708_v47, %v2112_v14  ;;  %v2110_v47 = vadd.f32 %v14679_v28, %v14618_v43  ;;  %v2118_v28 = vadd.f32 %v14719_v51, %v14595_v38  ;;  %v12060_v14 = vld [vmem:[%s18954_s3 + $0x270] ss:$8 sps:$4 sm:$0xff]  }
 0x1d7   :  { %3940 = vmatprep.subr.bf16.mxu1 %v12047_v7  ;;  %v2279_v51 = vadd.f32 %v14654_v63, %v2106_v46  ;;  %v12068_v63 = vld [vmem:[%s18954_s3 + $0x254] ss:$8 sps:$4 sm:$0xff]   ;;  %v2138_v48 = vadd.f32 %v14854_v10, %v14595_v38 }
 0x1d8   :  { %v14873_v60 = vpop.f32.mrf.mxu0  ;;  %v14882_v7 = vpop.f32.mrf.mxu1  ;;  %v2754_v16 = vmax.f32 %v2285_v36, 0.0  ;;  %v2283_v37 = vadd.f32 %v14689_v15, %v2110_v47  ;;  %v2291_v54 = vadd.f32 %v14731_v25, %v2118_v28  ;;  %v12063_v15 = vld [vmem:[%s18954_s3 + $0x260] ss:$8 sps:$4 sm:$0xff]   ;;  %v2132_v25 = vadd.f32 %v14823_v39, %v14595_v38 }
 0x1d9   :  { %v2749_v1 = vmax.f32 %v2279_v51, 0.0  ;;  %v2301_v28 = vadd.f32 %v14795_v40, %v2128_v42  ;;  %v2126_v40 = vadd.f32 %v14774_v11, %v14618_v43 }
 0x1da   :  { %3941 = vmatpush2.bf16.msra.mxu1 %v12045_v61  ;;  %v2141_v41 = vpop.f32.mrf.mxu0  ;;  %v2741_v61 = vmax.f32 %v2269_v31, 0.0  ;;  %v14899_v2 = vpop.f32.mrf.mxu1  ;;  %v14917_v27 = vpack.c.bf16 %v2754_v16, %v2750_v9  ;;  %v2762_v31 = vmax.f32 %v2295_v56, 0.0  ;;  %v2758_v47 = vmax.f32 %v2291_v54, 0.0 }
 0x1db   :  { %3942 = vmatprep.subr.bf16.mxu1 %v12053_v4  ;;  %v2142_v56 = vadd.f32 %v2141_v41, %v14595_v38 }
 0x1dc   :  { %v14908_v17 = vpack.c.bf16 %v2745_v8, %v2741_v61  ;;  %v2305_v61 = vadd.f32 %v14833_v29, %v2132_v25  ;;  %v14955_v46 = vpack.c.bf16 %v2762_v31, %v2758_v47  ;;  %v2130_v29 = vadd.f32 %v14804_v30, %v14618_v43 }
 0x1dd   :  { %3322 = vmatmul.mubr.bf16.gmra.mxu1 %v14870_v53  ;;  %v2315_v25 = vadd.f32 %v14899_v2, %v2142_v56  ;;  %v2140_v47 = vadd.f32 %v14873_v60, %v14618_v43 }
 0x1de   :  { %3331 = vmatprep.mubr.bf16.mxu1 %v14879_v58  ;;  %3943 = vmatpush2.bf16.msra.mxu1 %v12051_v45 }
 0x1df   :  { %3944 = vmatprep.subr.bf16.mxu1 %v12059_v57  ;;  %v2753_v57 = vmax.f32 %v2283_v37, 0.0 }
 0x1e0   :  { %v14901_v4 = vpop.f32.mrf.mxu0  ;;  %v14911_v21 = vpop.f32.mrf.mxu1 }
 0x1e1   :  { %v14946_v16 = vpack.c.bf16 %v2753_v57, %v2749_v1  ;;  %v2766_v57 = vmax.f32 %v2301_v28, 0.0  ;;  %v2299_v1 = vadd.f32 %v14785_v13, %v2126_v40  ;;  %v2136_v13 = vadd.f32 %v14835_v50, %v14618_v43 }
 0x1e2   :  { %3945 = vmatpush2.bf16.msra.mxu1 %v12057_v32  ;;  %v14920_v45 = vpop.f32.mrf.mxu0  ;;  %v14930_v36 = vpop.f32.mrf.mxu1  ;;  %v2116_v32 = vadd.f32 %v14710_v6, %v14618_v43  ;;  %v12071_v6 = vld [vmem:[%s18954_s3 + $0x244] ss:$8 sps:$4 sm:$0xff]  }
 0x1e3   :  { %3946 = vmatprep.subr.bf16.mxu1 %v12062_v5  ;;  %v12066_v5 = vld [vmem:[%s18954_s3 + $0x250] ss:$8 sps:$4 sm:$0xff]  }
 0x1e4   :  { %v14939_v8 = vpop.f32.mrf.mxu0  ;;  %v14949_v39 = vpop.f32.mrf.mxu1  ;;  %v2289_v19 = vadd.f32 %v14721_v44, %v2116_v32  ;;  %v2770_v44 = vmax.f32 %v2305_v61, 0.0  ;;  %v2311_v32 = vadd.f32 %v14863_v12, %v2138_v48  ;;  %v2148_v12 = vadd.f32 %v14920_v45, %v14595_v38 }
 0x1e5   :  { %3332 = vmatmul.mubr.bf16.gmra.mxu1 %v14908_v17 }
 0x1e6   :  { %3341 = vmatprep.mubr.bf16.mxu1 %v14917_v27  ;;  %3947 = vmatpush2.bf16.msra.mxu1 %v12060_v14  ;;  %v2151_v9 = vpop.f32.mrf.mxu0  ;;  %v2761_v14 = vmax.f32 %v2293_v23, 0.0  ;;  %v2324_v37 = vpop.f32.mrf.mxu1  ;;  %v2757_v51 = vmax.f32 %v2289_v19, 0.0  ;;  %v14979_v41 = vpack.c.bf16 %v2770_v44, %v2766_v57  ;;  %v2313_v19 = vadd.f32 %v14882_v7, %v2140_v47  ;;  %v19056_v57 = vld [vmem:[#allocation6_spill] sm:$0xff] }
 0x1e7   :  { %3948 = vmatprep.subr.bf16.mxu1 %v12065_v49  ;;  %v2152_v2 = vadd.f32 %v2151_v9, %v14595_v38  ;;  %v2309_v9 = vadd.f32 %v14844_v20, %v2136_v13  ;;  %v2321_v50 = vadd.f32 %v14930_v36, %v2148_v12  ;;  %v2150_v7 = vadd.f32 %v14939_v8, %v14618_v43 }
 0x1e8   :  { %v14975_v30 = vpack.c.bf16 %v2761_v14, %v2757_v51  ;;  %v2777_v45 = vmax.f32 %v2313_v19, 0.0  ;;  %v1353_v20 = vsub.s32 3, %v19056_v57 }
 0x1e9   :  { %v2773_v48 = vmax.f32 %v2309_v9, 0.0  ;;  %v2323_v47 = vadd.f32 %v14949_v39, %v2150_v7 }
 0x1ea   :  { %3949 = vmatpush2.bf16.msra.mxu1 %v12063_v15 }
 0x1eb   :  { %3950 = vmatprep.subr.bf16.mxu1 %v12068_v63  ;;  %v2303_v63 = vadd.f32 %v14814_v35, %v2130_v29  ;;  %v2778_v35 = vmax.f32 %v2315_v25, 0.0  ;;  %v15017_v8 = vpack.c.bf16 %v2777_v45, %v2773_v48  ;;  %v2785_v39 = vmax.f32 %v2323_v47, 0.0 }
 0x1ed   :  { %3342 = vmatmul.mubr.bf16.gmra.mxu1 %v14946_v16  ;;  %v2769_v10 = vmax.f32 %v2303_v63, 0.0  ;;  %v2146_v63 = vadd.f32 %v14901_v4, %v14618_v43 }
 0x1ee   :  { %3351 = vmatprep.mubr.bf16.mxu1 %v14955_v46  ;;  %3951 = vmatpush2.bf16.msra.mxu1 %v12066_v5  ;;  %v2765_v5 = vmax.f32 %v2299_v1, 0.0 }
 0x1ef   :  { %3952 = vmatprep.subr.bf16.mxu1 %v12071_v6  ;;  %v2774_v6 = vmax.f32 %v2311_v32, 0.0  ;;  %v18981_v32 = vsub.s32 2, %v19056_v57  ;;  %v2319_v4 = vadd.f32 %v14911_v21, %v2146_v63 }
 0x1f0   :  { %v14994_v61 = vpack.c.bf16 %v2769_v10, %v2765_v5  ;;  %v2782_v10 = vmax.f32 %v2321_v50, 0.0 }
 0x1f1   :  { %v14999_v14 = vpack.c.bf16 %v2778_v35, %v2774_v6  ;;  %v2781_v7 = vmax.f32 %v2319_v4, 0.0 }
 0x1f2   :  { %v14966_v49 = vpop.f32.mrf.mxu0  ;;  %3953 = vmatpush2.bf16.msra.mxu1 %v12069_v33  ;;  %v2325_v33 = vadd.f32 %v2324_v37, %v2152_v2 }
 0x1f3   :  { %v14971_v15 = vpop.f32.mrf.mxu1 }
 0x1f4   :  { %v2157_v54 = vpop.f32.mrf.mxu0  ;;  %v2786_v40 = vmax.f32 %v2325_v33, 0.0 }
 0x1f5   :  { %v2330_v31 = vpop.f32.mrf.mxu1  ;;  %3352 = vmatmul.mubr.bf16.gmra.mxu1 %v14975_v30  ;;  %v2158_v25 = vadd.f32 %v2157_v54, %v14595_v38 }
 0x1f6   :  { %v2159_v11 = vpop.f32.mrf.mxu0  ;;  %3361 = vmatprep.mubr.bf16.mxu1 %v14979_v41  ;;  %v15020_v13 = vpack.c.bf16 %v2786_v40, %v2782_v10  ;;  %v15041_v10 = vpack.c.bf16 %v2785_v39, %v2781_v7 }
 0x1f7   :  { %v14987_v42 = vpop.f32.mrf.mxu1  ;;  %v2331_v54 = vadd.f32 %v2330_v31, %v2158_v25 }
 0x1f8   :  { %v2161_v23 = vpop.f32.mrf.mxu0 }
 0x1f9   :  { %v2334_v28 = vpop.f32.mrf.mxu1  ;;  %v2162_v56 = vadd.f32 %v2161_v23, %v14595_v38  ;;  %v19057_v23 = vld [vmem:[#allocation7_spill] sm:$0xff]  ;;  %v2790_v40 = vmax.f32 %v2331_v54, 0.0 }
 0x1fa   :  { %v15023_v6 = vrot.slane %v19057_v23, %v1353_v20  ;;  %v15029_v12 = vrot.slane %v19057_v23, %v18981_v32 }
 0x1fb   :  { %v2335_v35 = vadd.f32 %v2334_v28, %v2162_v56  ;;  %v2160_v28 = vadd.f32 %v2159_v11, %v14618_v43  ;;  %v2156_v56 = vadd.f32 %v14966_v49, %v14618_v43 }
 0x1fd   :  { %v14997_v60 = vpop.f32.mrf.mxu0  ;;  %v15002_v44 = vpop.f32.mrf.mxu1  ;;  %3362 = vmatmul.mubr.bf16.gmra.mxu1 %v14994_v61  ;;  %v2794_v9 = vmax.f32 %v2335_v35, 0.0  ;;  %v2333_v47 = vadd.f32 %v14987_v42, %v2160_v28 }
 0x1fe   :  { %3371 = vmatprep.mubr.bf16.mxu1 %v14999_v14  ;;  %v2166_v7 = vadd.f32 %v14997_v60, %v14618_v43 }
 0x1ff   :  { %v2167_v29 = vpop.f32.mrf.mxu0  ;;  %v2340_v51 = vpop.f32.mrf.mxu1  ;;  %v15044_v23 = vpack.c.bf16 %v2794_v9, %v2790_v40  ;;  %v2793_v42 = vmax.f32 %v2333_v47, 0.0 }
 0x200   :  { %v2168_v25 = vadd.f32 %v2167_v29, %v14595_v38 }
 0x201   :  { %v2169_v37 = vpop.f32.mrf.mxu0  ;;  %v15014_v1 = vpop.f32.mrf.mxu1 }
 0x202   :  { %v2341_v29 = vadd.f32 %v2340_v51, %v2168_v25  ;;  %v2170_v28 = vadd.f32 %v2169_v37, %v14618_v43  ;;  %v12072_v25 = vld [vmem:[%s18954_s3 + $0x330] ss:$8 sps:$4 sm:$0xff]  }
 0x203   :  { %v2171_v36 = vpop.f32.mrf.mxu0  ;;  %v2344_v2 = vpop.f32.mrf.mxu1 }
 0x204   :  { %v2172_v21 = vadd.f32 %v2171_v36, %v14595_v38  ;;  %v2343_v47 = vadd.f32 %v15014_v1, %v2170_v28 }
 0x205   :  { %v2554_v5 = vpop.f32.mrf.mxu0  ;;  %v2381_v19 = vpop.f32.mrf.mxu1  ;;  %3372 = vmatmul.mubr.bf16.gmra.mxu1 %v15017_v8 }
 0x206   :  { %3381 = vmatprep.mubr.bf16.mxu1 %v15020_v13  ;;  %v2382_v20 = vadd.f32 %v2381_v19, %v15029_v12  ;;  %v2345_v4 = vadd.f32 %v2344_v2, %v2172_v21  ;;  %v2329_v19 = vadd.f32 %v14971_v15, %v2156_v56 }
 0x207   :  { %v2556_v33 = vpop.f32.mrf.mxu0  ;;  %v2383_v50 = vpop.f32.mrf.mxu1 }
 0x208   :  { %v2384_v31 = vadd.f32 %v2383_v50, %v15023_v6  ;;  %v2555_v32 = vadd.f32 %v2554_v5, %v2382_v20  ;;  %v2789_v5 = vmax.f32 %v2329_v19, 0.0 }
 0x209   :  { %v2558_v45 = vpop.f32.mrf.mxu0  ;;  %v2385_v48 = vpop.f32.mrf.mxu1 }
 0x20a   :  { %v2386_v11 = vadd.f32 %v2385_v48, %v15029_v12  ;;  %v2557_v50 = vadd.f32 %v2556_v33, %v2384_v31  ;;  %v2695_v56 = vmax.f32 %v2555_v32, 0.0  ;;  %v2798_v48 = vmax.f32 %v2341_v29, 0.0 }
 0x20b   :  { %v2560_v63 = vpop.f32.mrf.mxu0  ;;  %v2387_v36 = vpop.f32.mrf.mxu1 }
 0x20c   :  { %v2559_v49 = vadd.f32 %v2558_v45, %v2386_v11  ;;  %v2388_v54 = vadd.f32 %v2387_v36, %v15023_v6  ;;  %v2802_v45 = vmax.f32 %v2345_v4, 0.0  ;;  %v2696_v21 = vmax.f32 %v2557_v50, 0.0 }
 0x20d   :  { %v2564_v35 = vpop.f32.mrf.mxu0  ;;  %v2391_v57 = vpop.f32.mrf.mxu1  ;;  %3382 = vmatmul.mubr.bf16.gmra.mxu1 %v15041_v10  ;;  %v15061_v11 = vpack.c.bf16 %v2793_v42, %v2789_v5  ;;  %v2801_v42 = vmax.f32 %v2343_v47, 0.0  ;;  %v12083_v47 = vld [vmem:[%s18954_s3 + $0x304] ss:$8 sps:$4 sm:$0xff]  }
 0x20e   :  { %v2561_v39 = vadd.f32 %v2560_v63, %v2388_v54  ;;  %3391 = vmatprep.mubr.bf16.mxu1 %v15044_v23  ;;  %v2699_v9 = vmax.f32 %v2559_v49, 0.0  ;;  %v2392_v51 = vadd.f32 %v2391_v57, %v15029_v12  ;;  %v12077_v57 = vld [vmem:[%s18954_s3 + $0x324] ss:$8 sps:$4 sm:$0xff]   ;;  %v15072_v49 = vpack.c.bf16 %v2802_v45, %v2798_v48 }
 0x20f   :  { %v2566_v38 = vpop.f32.mrf.mxu0  ;;  %v2393_v2 = vpop.f32.mrf.mxu1  ;;  %v2339_v54 = vadd.f32 %v15002_v44, %v2166_v7  ;;  %v12080_v44 = vld [vmem:[%s18954_s3 + $0x314] ss:$8 sps:$4 sm:$0xff]  }
 0x210   :  { %v2700_v31 = vmax.f32 %v2561_v39, 0.0  ;;  %v2394_v15 = vadd.f32 %v2393_v2, %v15023_v6  ;;  %v15064_v36 = vpack.c.bf16 %v2699_v9, %v2695_v56  ;;  %v2565_v1 = vadd.f32 %v2564_v35, %v2392_v51 }
 0x211   :  { %v2568_v33 = vpop.f32.mrf.mxu0  ;;  %v2395_v40 = vpop.f32.mrf.mxu1 }
 0x212   :  { %v15055_v63 = vpack.c.bf16 %v2700_v31, %v2696_v21  ;;  %v2396_v37 = vadd.f32 %v2395_v40, %v15029_v12  ;;  %v2567_v32 = vadd.f32 %v2566_v38, %v2394_v15  ;;  %v12075_v38 = vld [vmem:[%s18954_s3 + $0x320] ss:$8 sps:$4 sm:$0xff]   ;;  %v2797_v21 = vmax.f32 %v2339_v54, 0.0  ;;  %v12078_v40 = vld [vmem:[%s18954_s3 + $0x310] ss:$8 sps:$4 sm:$0xff]  }
 0x213   :  { %v2570_v20 = vpop.f32.mrf.mxu0  ;;  %v2397_v43 = vpop.f32.mrf.mxu1  ;;  %v2703_v31 = vmax.f32 %v2565_v1, 0.0 }
 0x214   :  { %v2569_v4 = vadd.f32 %v2568_v33, %v2396_v37  ;;  %v2398_v50 = vadd.f32 %v2397_v43, %v15023_v6  ;;  %10758 = vmatprep.mubr.msk.bf16.mxu0 %vm83_vm6, %v15055_v63  ;;  %v2704_v35 = vmax.f32 %v2567_v32, 0.0 }
 0x215   :  { %v2574_v60 = vpop.f32.mrf.mxu0  ;;  %v2401_v19 = vpop.f32.mrf.mxu1  ;;  %3392 = vmatmul.mubr.bf16.gmra.mxu1 %v15061_v11  ;;  %3445 = vmatmul.mubr.bf16.vlgmr.msra.gmra.mxu0 %v15064_v36 }
 0x216   :  { %v2571_v39 = vadd.f32 %v2570_v20, %v2398_v50  ;;  %3401 = vmatprep.mubr.bf16.mxu1 %v15072_v49  ;;  %4096 = vmatpush1.bf16.msra.mxu0 %v12072_v25  ;;  %v2707_v28 = vmax.f32 %v2569_v4, 0.0  ;;  %v2402_v15 = vadd.f32 %v2401_v19, %v15029_v12  ;;  %v15092_v20 = vpack.c.bf16 %v2801_v42, %v2797_v21  ;;  %v12081_v19 = vld [vmem:[%s18954_s3 + $0x300] ss:$8 sps:$4 sm:$0xff]   ;;  %v12084_v21 = vld [vmem:[%s18954_s3 + $0x2f0] ss:$8 sps:$4 sm:$0xff]  }
 0x217   :  { %v2576_v29 = vpop.f32.mrf.mxu0  ;;  %v2403_v9 = vpop.f32.mrf.mxu1  ;;  %4097 = vmatprep.subr.bf16.mxu0 %v12077_v57 }
 0x218   :  { %v2708_v33 = vmax.f32 %v2571_v39, 0.0  ;;  %v2404_v45 = vadd.f32 %v2403_v9, %v15023_v6  ;;  %v15094_v48 = vpack.c.bf16 %v2707_v28, %v2703_v31  ;;  %v2575_v4 = vadd.f32 %v2574_v60, %v2402_v15  ;;  %v12086_v60 = vld [vmem:[%s18954_s3 + $0x2f4] ss:$8 sps:$4 sm:$0xff]  }
 0x219   :  { %v2578_v2 = vpop.f32.mrf.mxu0  ;;  %v2405_v5 = vpop.f32.mrf.mxu1 }
 0x21a   :  { %v15086_v56 = vpack.c.bf16 %v2708_v33, %v2704_v35  ;;  %v2406_v51 = vadd.f32 %v2405_v5, %v15029_v12  ;;  %4098 = vmatpush1.bf16.msra.mxu0 %v12075_v38  ;;  %v2577_v43 = vadd.f32 %v2576_v29, %v2404_v45 }
 0x21b   :  { %v2580_v7 = vpop.f32.mrf.mxu0  ;;  %v2407_v37 = vpop.f32.mrf.mxu1  ;;  %4099 = vmatprep.subr.bf16.mxu0 %v12080_v44 }
 0x21c   :  { %v2579_v57 = vadd.f32 %v2578_v2, %v2406_v51  ;;  %v2408_v32 = vadd.f32 %v2407_v37, %v15023_v6  ;;  %10759 = vmatprep.mubr.msk.bf16.mxu0 %vm83_vm6, %v15086_v56  ;;  %v2712_v42 = vmax.f32 %v2577_v43, 0.0  ;;  %v2711_v2 = vmax.f32 %v2575_v4, 0.0  ;;  %v12087_v4 = vld [vmem:[%s18954_s3 + $0x2e0] ss:$8 sps:$4 sm:$0xff]  }
 0x21d   :  { %v2584_v25 = vpop.f32.mrf.mxu0  ;;  %v2411_v50 = vpop.f32.mrf.mxu1  ;;  %3402 = vmatmul.mubr.bf16.gmra.mxu1 %v15092_v20  ;;  %3455 = vmatmul.mubr.bf16.gmra.mxu0 %v15094_v48 }
 0x21e   :  { %v2581_v1 = vadd.f32 %v2580_v7, %v2408_v32  ;;  %3954 = vmatprep.mubr.bf16.mxu1 %v14642_v59  ;;  %4100 = vmatpush1.bf16.msra.mxu0 %v12078_v40  ;;  %v2715_v29 = vmax.f32 %v2579_v57, 0.0  ;;  %v2412_v59 = vadd.f32 %v2411_v50, %v15029_v12  ;;  %v12089_v7 = vld [vmem:[%s18954_s3 + $0x2e4] ss:$8 sps:$4 sm:$0xff]  }
 0x21f   :  { %v2586_v54 = vpop.f32.mrf.mxu0  ;;  %v2413_v39 = vpop.f32.mrf.mxu1  ;;  %4101 = vmatprep.subr.bf16.mxu0 %v12083_v47 }
 0x220   :  { %v2716_v28 = vmax.f32 %v2581_v1, 0.0  ;;  %v2414_v9 = vadd.f32 %v2413_v39, %v15023_v6  ;;  %v15119_v31 = vpack.c.bf16 %v2715_v29, %v2711_v2  ;;  %v2585_v47 = vadd.f32 %v2584_v25, %v2412_v59  ;;  %v12092_v25 = vld [vmem:[%s18954_s3 + $0x2d4] ss:$8 sps:$4 sm:$0xff]  }
 0x221   :  { %v2588_v38 = vpop.f32.mrf.mxu0  ;;  %v2415_v44 = vpop.f32.mrf.mxu1 }
 0x222   :  { %v15113_v33 = vpack.c.bf16 %v2716_v28, %v2712_v42  ;;  %v2416_v45 = vadd.f32 %v2415_v44, %v15029_v12  ;;  %4102 = vmatpush1.bf16.msra.mxu0 %v12081_v19  ;;  %v2587_v51 = vadd.f32 %v2586_v54, %v2414_v9  ;;  %v2719_v39 = vmax.f32 %v2585_v47, 0.0  ;;  %v12090_v9 = vld [vmem:[%s18954_s3 + $0x2d0] ss:$8 sps:$4 sm:$0xff]   ;;  %v12093_v47 = vld [vmem:[%s18954_s3 + $0x2c0] ss:$8 sps:$4 sm:$0xff]  }
 0x223   :  { %v2590_v35 = vpop.f32.mrf.mxu0  ;;  %v2417_v15 = vpop.f32.mrf.mxu1  ;;  %4103 = vmatprep.subr.bf16.mxu0 %v12086_v60 }
 0x224   :  { %v2589_v40 = vadd.f32 %v2588_v38, %v2416_v45  ;;  %v2418_v37 = vadd.f32 %v2417_v15, %v15023_v6  ;;  %10760 = vmatprep.mubr.msk.bf16.mxu0 %vm83_vm6, %v15113_v33  ;;  %v2720_v19 = vmax.f32 %v2587_v51, 0.0 }
 0x225   :  { %v2594_v5 = vpop.f32.mrf.mxu0  ;;  %v2421_v43 = vpop.f32.mrf.mxu1  ;;  %3465 = vmatmul.mubr.bf16.gmra.mxu0 %v15119_v31  ;;  %3955 = vmatmul.mubr.bf16.vlgmr.msra.gmra.mxu1 %v14667_v3 }
 0x226   :  { %v2591_v32 = vadd.f32 %v2590_v35, %v2418_v37  ;;  %3964 = vmatprep.mubr.bf16.mxu1 %v14676_v62  ;;  %4104 = vmatpush1.bf16.msra.mxu0 %v12084_v21  ;;  %v2723_v50 = vmax.f32 %v2589_v40, 0.0  ;;  %v2422_v62 = vadd.f32 %v2421_v43, %v15029_v12  ;;  %v12095_v35 = vld [vmem:[%s18954_s3 + $0x2c4] ss:$8 sps:$4 sm:$0xff]  }
 0x227   :  { %v2596_v57 = vpop.f32.mrf.mxu0  ;;  %v2423_v54 = vpop.f32.mrf.mxu1  ;;  %4105 = vmatprep.subr.bf16.mxu0 %v12089_v7 }
 0x228   :  { %v2724_v29 = vmax.f32 %v2591_v32, 0.0  ;;  %v2424_v3 = vadd.f32 %v2423_v54, %v15023_v6  ;;  %v15144_v2 = vpack.c.bf16 %v2723_v50, %v2719_v39  ;;  %v2595_v7 = vadd.f32 %v2594_v5, %v2422_v62  ;;  %v12098_v5 = vld [vmem:[%s18954_s3 + $0x374] ss:$8 sps:$4 sm:$0xff]  }
 0x229   :  { %v2598_v1 = vpop.f32.mrf.mxu0  ;;  %v2425_v38 = vpop.f32.mrf.mxu1 }
 0x22a   :  { %v15138_v42 = vpack.c.bf16 %v2724_v29, %v2720_v19  ;;  %v2426_v28 = vadd.f32 %v2425_v38, %v15029_v12  ;;  %4106 = vmatpush1.bf16.msra.mxu0 %v12087_v4  ;;  %v2597_v45 = vadd.f32 %v2596_v57, %v2424_v3  ;;  %v2727_v54 = vmax.f32 %v2595_v7, 0.0  ;;  %v12096_v3 = vld [vmem:[%s18954_s3 + $0x370] ss:$8 sps:$4 sm:$0xff]   ;;  %v12099_v7 = vld [vmem:[%s18954_s3 + $0x360] ss:$8 sps:$4 sm:$0xff]  }
 0x22b   :  { %v2600_v60 = vpop.f32.mrf.mxu0  ;;  %v2427_v59 = vpop.f32.mrf.mxu1  ;;  %4107 = vmatprep.subr.bf16.mxu0 %v12092_v25 }
 0x22c   :  { %v2599_v21 = vadd.f32 %v2598_v1, %v2426_v28  ;;  %v2428_v15 = vadd.f32 %v2427_v59, %v15023_v6  ;;  %10761 = vmatprep.mubr.msk.bf16.mxu0 %vm83_vm6, %v15138_v42  ;;  %v2728_v4 = vmax.f32 %v2597_v45, 0.0 }
 0x22d   :  { %v2604_v44 = vpop.f32.mrf.mxu0  ;;  %v2431_v51 = vpop.f32.mrf.mxu1  ;;  %3475 = vmatmul.mubr.bf16.gmra.mxu0 %v15144_v2  ;;  %3965 = vmatmul.mubr.bf16.gmra.mxu1 %v14705_v52 }
 0x22e   :  { %v2601_v37 = vadd.f32 %v2600_v60, %v2428_v15  ;;  %3974 = vmatprep.mubr.bf16.mxu1 %v14716_v34  ;;  %4108 = vmatpush1.bf16.msra.mxu0 %v12090_v9  ;;  %v2731_v43 = vmax.f32 %v2599_v21, 0.0  ;;  %v2432_v34 = vadd.f32 %v2431_v51, %v15029_v12  ;;  %v12101_v60 = vld [vmem:[%s18954_s3 + $0x364] ss:$8 sps:$4 sm:$0xff]  }
 0x22f   :  { %v2606_v40 = vpop.f32.mrf.mxu0  ;;  %v2433_v57 = vpop.f32.mrf.mxu1  ;;  %4109 = vmatprep.subr.bf16.mxu0 %v12095_v35 }
 0x230   :  { %v2732_v50 = vmax.f32 %v2601_v37, 0.0  ;;  %v2434_v52 = vadd.f32 %v2433_v57, %v15023_v6  ;;  %v15169_v39 = vpack.c.bf16 %v2731_v43, %v2727_v54  ;;  %v2605_v35 = vadd.f32 %v2604_v44, %v2432_v34  ;;  %v12104_v44 = vld [vmem:[%s18954_s3 + $0x354] ss:$8 sps:$4 sm:$0xff]  }
 0x231   :  { %v2608_v32 = vpop.f32.mrf.mxu0  ;;  %v2435_v1 = vpop.f32.mrf.mxu1 }
 0x232   :  { %v15163_v19 = vpack.c.bf16 %v2732_v50, %v2728_v4  ;;  %v2436_v29 = vadd.f32 %v2435_v1, %v15029_v12  ;;  %4110 = vmatpush1.bf16.msra.mxu0 %v12093_v47  ;;  %v2607_v28 = vadd.f32 %v2606_v40, %v2434_v52  ;;  %v2735_v57 = vmax.f32 %v2605_v35, 0.0  ;;  %v12102_v52 = vld [vmem:[%s18954_s3 + $0x350] ss:$8 sps:$4 sm:$0xff]   ;;  %v12105_v35 = vld [vmem:[%s18954_s3 + $0x340] ss:$8 sps:$4 sm:$0xff]  }
 0x233   :  { %v2610_v25 = vpop.f32.mrf.mxu0  ;;  %v2437_v62 = vpop.f32.mrf.mxu1  ;;  %4119 = vmatprep.subr.bf16.mxu0 %v12098_v5 }
 0x234   :  { %v2609_v9 = vadd.f32 %v2608_v32, %v2436_v29  ;;  %v2438_v59 = vadd.f32 %v2437_v62, %v15023_v6  ;;  %10762 = vmatprep.mubr.msk.bf16.mxu0 %vm83_vm6, %v15163_v19  ;;  %v2736_v47 = vmax.f32 %v2607_v28, 0.0 }
 0x235   :  { %v2614_v38 = vpop.f32.mrf.mxu0  ;;  %v2441_v45 = vpop.f32.mrf.mxu1  ;;  %3485 = vmatmul.mubr.bf16.gmra.mxu0 %v15169_v39  ;;  %3975 = vmatmul.mubr.bf16.gmra.mxu1 %v14750_v22 }
 0x236   :  { %v2611_v15 = vadd.f32 %v2610_v25, %v2438_v59  ;;  %3984 = vmatprep.mubr.bf16.mxu1 %v14759_v26  ;;  %4120 = vmatpush2.bf16.msra.mxu0 %v12096_v3  ;;  %v2739_v51 = vmax.f32 %v2609_v9, 0.0  ;;  %v2442_v26 = vadd.f32 %v2441_v45, %v15029_v12  ;;  %v12107_v25 = vld [vmem:[%s18954_s3 + $0x344] ss:$8 sps:$4 sm:$0xff]  }
 0x237   :  { %v2616_v21 = vpop.f32.mrf.mxu0  ;;  %v2443_v40 = vpop.f32.mrf.mxu1  ;;  %4121 = vmatprep.subr.bf16.mxu0 %v12101_v60 }
 0x238   :  { %v2740_v43 = vmax.f32 %v2611_v15, 0.0  ;;  %v2444_v22 = vadd.f32 %v2443_v40, %v15023_v6  ;;  %v15194_v54 = vpack.c.bf16 %v2739_v51, %v2735_v57  ;;  %v2615_v60 = vadd.f32 %v2614_v38, %v2442_v26 }
 0x239   :  { %v2618_v37 = vpop.f32.mrf.mxu0  ;;  %v2445_v32 = vpop.f32.mrf.mxu1 }
 0x23a   :  { %v15188_v4 = vpack.c.bf16 %v2740_v43, %v2736_v47  ;;  %v2446_v50 = vadd.f32 %v2445_v32, %v15029_v12  ;;  %4122 = vmatpush2.bf16.msra.mxu0 %v12099_v7  ;;  %v2617_v29 = vadd.f32 %v2616_v21, %v2444_v22  ;;  %v2743_v40 = vmax.f32 %v2615_v60, 0.0 }
 0x23b   :  { %v2620_v5 = vpop.f32.mrf.mxu0  ;;  %v2447_v34 = vpop.f32.mrf.mxu1  ;;  %4123 = vmatprep.subr.bf16.mxu0 %v12104_v44 }
 0x23c   :  { %v2619_v3 = vadd.f32 %v2618_v37, %v2446_v50  ;;  %v2448_v62 = vadd.f32 %v2447_v34, %v15023_v6  ;;  %10763 = vmatprep.mubr.msk.bf16.mxu0 %vm83_vm6, %v15188_v4  ;;  %v2744_v7 = vmax.f32 %v2617_v29, 0.0 }
 0x23d   :  { %v2624_v1 = vpop.f32.mrf.mxu0  ;;  %v2451_v28 = vpop.f32.mrf.mxu1  ;;  %3495 = vmatmul.mubr.bf16.gmra.mxu0 %v15194_v54  ;;  %3985 = vmatmul.mubr.bf16.gmra.mxu1 %v14792_v55 }
 0x23e   :  { %v2621_v59 = vadd.f32 %v2620_v5, %v2448_v62  ;;  %3994 = vmatprep.mubr.bf16.mxu1 %v14801_v0  ;;  %4124 = vmatpush2.bf16.msra.mxu0 %v12102_v52  ;;  %v2747_v45 = vmax.f32 %v2619_v3, 0.0  ;;  %v2452_v37 = vadd.f32 %v2451_v28, %v15029_v12 }
 0x23f   :  { %v2626_v9 = vpop.f32.mrf.mxu0  ;;  %v2453_v21 = vpop.f32.mrf.mxu1  ;;  %4125 = vmatprep.subr.bf16.mxu0 %v12107_v25 }
 0x240   :  { %v2748_v38 = vmax.f32 %v2621_v59, 0.0  ;;  %v2454_v51 = vadd.f32 %v2453_v21, %v15023_v6  ;;  %v15213_v43 = vpack.c.bf16 %v2747_v45, %v2743_v40  ;;  %v2625_v50 = vadd.f32 %v2624_v1, %v2452_v37 }
 0x241   :  { %v2628_v15 = vpop.f32.mrf.mxu0  ;;  %v2455_v55 = vpop.f32.mrf.mxu1 }
 0x242   :  { %v15210_v47 = vpack.c.bf16 %v2748_v38, %v2744_v7  ;;  %v2456_v0 = vadd.f32 %v2455_v55, %v15029_v12  ;;  %4126 = vmatpush2.bf16.msra.mxu0 %v12105_v35  ;;  %v2627_v26 = vadd.f32 %v2626_v9, %v2454_v51  ;;  %v2751_v59 = vmax.f32 %v2625_v50, 0.0 }
 0x243   :  { %v2630_v44 = vpop.f32.mrf.mxu0  ;;  %v2457_v22 = vpop.f32.mrf.mxu1 }
 0x244   :  { %v2629_v32 = vadd.f32 %v2628_v15, %v2456_v0  ;;  %v2458_v5 = vadd.f32 %v2457_v22, %v15023_v6  ;;  %10764 = vmatprep.mubr.msk.bf16.mxu0 %vm83_vm6, %v15210_v47  ;;  %v2752_v60 = vmax.f32 %v2627_v26, 0.0 }
 0x245   :  { %v2634_v57 = vpop.f32.mrf.mxu0  ;;  %v2461_v52 = vpop.f32.mrf.mxu1  ;;  %3505 = vmatmul.mubr.bf16.gmra.mxu0 %v15213_v43  ;;  %3995 = vmatmul.mubr.bf16.gmra.mxu1 %v14830_v18 }
 0x246   :  { %v2631_v25 = vadd.f32 %v2630_v44, %v2458_v5  ;;  %4004 = vmatprep.mubr.bf16.mxu1 %v14841_v24  ;;  %v2755_v29 = vmax.f32 %v2629_v32, 0.0  ;;  %v2462_v35 = vadd.f32 %v2461_v52, %v15029_v12 }
 0x247   :  { %v2636_v34 = vpop.f32.mrf.mxu0  ;;  %v2463_v3 = vpop.f32.mrf.mxu1 }
 0x248   :  { %v2756_v28 = vmax.f32 %v2631_v25, 0.0  ;;  %v2464_v9 = vadd.f32 %v2463_v3, %v15023_v6  ;;  %v15226_v18 = vpack.c.bf16 %v2755_v29, %v2751_v59  ;;  %v2635_v37 = vadd.f32 %v2634_v57, %v2462_v35 }
 0x249   :  { %v2638_v62 = vpop.f32.mrf.mxu0  ;;  %v2465_v1 = vpop.f32.mrf.mxu1 }
 0x24a   :  { %v15223_v21 = vpack.c.bf16 %v2756_v28, %v2752_v60  ;;  %v2466_v15 = vadd.f32 %v2465_v1, %v15029_v12  ;;  %v2637_v38 = vadd.f32 %v2636_v34, %v2464_v9  ;;  %v2759_v34 = vmax.f32 %v2635_v37, 0.0 }
 0x24b   :  { %v2640_v45 = vpop.f32.mrf.mxu0  ;;  %v2467_v7 = vpop.f32.mrf.mxu1 }
 0x24c   :  { %v2639_v51 = vadd.f32 %v2638_v62, %v2466_v15  ;;  %v2468_v40 = vadd.f32 %v2467_v7, %v15023_v6  ;;  %10765 = vmatprep.mubr.msk.bf16.mxu0 %vm83_vm6, %v15223_v21  ;;  %v2760_v5 = vmax.f32 %v2637_v38, 0.0 }
 0x24d   :  { %v2644_v24 = vpop.f32.mrf.mxu0  ;;  %v2471_v55 = vpop.f32.mrf.mxu1  ;;  %3515 = vmatmul.mubr.bf16.gmra.mxu0 %v15226_v18  ;;  %4005 = vmatmul.mubr.bf16.gmra.mxu1 %v14870_v53 }
 0x24e   :  { %v2641_v0 = vadd.f32 %v2640_v45, %v2468_v40  ;;  %4014 = vmatprep.mubr.bf16.mxu1 %v14879_v58  ;;  %v2763_v22 = vmax.f32 %v2639_v51, 0.0  ;;  %v2472_v25 = vadd.f32 %v2471_v55, %v15029_v12 }
 0x24f   :  { %v2646_v44 = vpop.f32.mrf.mxu0  ;;  %v2473_v26 = vpop.f32.mrf.mxu1 }
 0x250   :  { %v2764_v50 = vmax.f32 %v2641_v0, 0.0  ;;  %v2474_v52 = vadd.f32 %v2473_v26, %v15023_v6  ;;  %v15239_v53 = vpack.c.bf16 %v2763_v22, %v2759_v34  ;;  %v2645_v35 = vadd.f32 %v2644_v24, %v2472_v25 }
 0x251   :  { %v2648_v32 = vpop.f32.mrf.mxu0  ;;  %v2475_v57 = vpop.f32.mrf.mxu1 }
 0x252   :  { %v15236_v3 = vpack.c.bf16 %v2764_v50, %v2760_v5  ;;  %v2476_v62 = vadd.f32 %v2475_v57, %v15029_v12  ;;  %v2647_v28 = vadd.f32 %v2646_v44, %v2474_v52  ;;  %v2767_v44 = vmax.f32 %v2645_v35, 0.0 }
 0x253   :  { %v2650_v29 = vpop.f32.mrf.mxu0  ;;  %v2477_v60 = vpop.f32.mrf.mxu1 }
 0x254   :  { %v2649_v9 = vadd.f32 %v2648_v32, %v2476_v62  ;;  %v2478_v59 = vadd.f32 %v2477_v60, %v15023_v6  ;;  %10766 = vmatprep.mubr.msk.bf16.mxu0 %vm83_vm6, %v15236_v3  ;;  %v2768_v40 = vmax.f32 %v2647_v28, 0.0 }
 0x255   :  { %v2654_v58 = vpop.f32.mrf.mxu0  ;;  %v2481_v1 = vpop.f32.mrf.mxu1  ;;  %3525 = vmatmul.mubr.bf16.gmra.mxu0 %v15239_v53  ;;  %4015 = vmatmul.mubr.bf16.gmra.mxu1 %v14908_v17 }
 0x256   :  { %v2651_v15 = vadd.f32 %v2650_v29, %v2478_v59  ;;  %4024 = vmatprep.mubr.bf16.mxu1 %v14917_v27  ;;  %v2771_v7 = vmax.f32 %v2649_v9, 0.0  ;;  %v2482_v0 = vadd.f32 %v2481_v1, %v15029_v12 }
 0x257   :  { %v2656_v45 = vpop.f32.mrf.mxu0  ;;  %v2483_v38 = vpop.f32.mrf.mxu1 }
 0x258   :  { %v2772_v37 = vmax.f32 %v2651_v15, 0.0  ;;  %v2484_v55 = vadd.f32 %v2483_v38, %v15023_v6  ;;  %v15252_v17 = vpack.c.bf16 %v2771_v7, %v2767_v44  ;;  %v2655_v25 = vadd.f32 %v2654_v58, %v2482_v0 }
 0x259   :  { %v2658_v51 = vpop.f32.mrf.mxu0  ;;  %v2485_v24 = vpop.f32.mrf.mxu1 }
 0x25a   :  { %v15249_v26 = vpack.c.bf16 %v2772_v37, %v2768_v40  ;;  %v2486_v32 = vadd.f32 %v2485_v24, %v15029_v12  ;;  %v2657_v50 = vadd.f32 %v2656_v45, %v2484_v55  ;;  %v2775_v45 = vmax.f32 %v2655_v25, 0.0 }
 0x25b   :  { %v2660_v22 = vpop.f32.mrf.mxu0  ;;  %v2487_v5 = vpop.f32.mrf.mxu1 }
 0x25c   :  { %v2659_v52 = vadd.f32 %v2658_v51, %v2486_v32  ;;  %v2488_v34 = vadd.f32 %v2487_v5, %v15023_v6  ;;  %10767 = vmatprep.mubr.msk.bf16.mxu0 %vm83_vm6, %v15249_v26  ;;  %v2776_v59 = vmax.f32 %v2657_v50, 0.0 }
 0x25d   :  { %v2664_v27 = vpop.f32.mrf.mxu0  ;;  %v2491_v57 = vpop.f32.mrf.mxu1  ;;  %3535 = vmatmul.mubr.bf16.gmra.mxu0 %v15252_v17  ;;  %4025 = vmatmul.mubr.bf16.gmra.mxu1 %v14946_v16 }
 0x25e   :  { %v2661_v62 = vadd.f32 %v2660_v22, %v2488_v34  ;;  %4034 = vmatprep.mubr.bf16.mxu1 %v14955_v46  ;;  %v2779_v60 = vmax.f32 %v2659_v52, 0.0  ;;  %v2492_v15 = vadd.f32 %v2491_v57, %v15029_v12 }
 0x25f   :  { %v2666_v29 = vpop.f32.mrf.mxu0  ;;  %v2493_v28 = vpop.f32.mrf.mxu1 }
 0x260   :  { %v2780_v35 = vmax.f32 %v2661_v62, 0.0  ;;  %v2494_v1 = vadd.f32 %v2493_v28, %v15023_v6  ;;  %v15265_v16 = vpack.c.bf16 %v2779_v60, %v2775_v45  ;;  %v2665_v0 = vadd.f32 %v2664_v27, %v2492_v15 }
 0x261   :  { %v2668_v9 = vpop.f32.mrf.mxu0  ;;  %v2495_v58 = vpop.f32.mrf.mxu1 }
 0x262   :  { %v15262_v38 = vpack.c.bf16 %v2780_v35, %v2776_v59  ;;  %v2496_v51 = vadd.f32 %v2495_v58, %v15029_v12  ;;  %v2667_v37 = vadd.f32 %v2666_v29, %v2494_v1  ;;  %v2783_v29 = vmax.f32 %v2665_v0, 0.0 }
 0x263   :  { %v2670_v7 = vpop.f32.mrf.mxu0  ;;  %v2497_v40 = vpop.f32.mrf.mxu1 }
 0x264   :  { %v2669_v55 = vadd.f32 %v2668_v9, %v2496_v51  ;;  %v2498_v44 = vadd.f32 %v2497_v40, %v15023_v6  ;;  %10768 = vmatprep.mubr.msk.bf16.mxu0 %vm83_vm6, %v15262_v38  ;;  %v2784_v34 = vmax.f32 %v2667_v37, 0.0 }
 0x265   :  { %v2674_v46 = vpop.f32.mrf.mxu0  ;;  %v2501_v24 = vpop.f32.mrf.mxu1  ;;  %3545 = vmatmul.mubr.bf16.gmra.mxu0 %v15265_v16  ;;  %4035 = vmatmul.mubr.bf16.gmra.mxu1 %v14975_v30 }
 0x266   :  { %v2671_v32 = vadd.f32 %v2670_v7, %v2498_v44  ;;  %4044 = vmatprep.mubr.bf16.mxu1 %v14979_v41  ;;  %v2787_v5 = vmax.f32 %v2669_v55, 0.0  ;;  %v2502_v62 = vadd.f32 %v2501_v24, %v15029_v12 }
 0x267   :  { %v2676_v22 = vpop.f32.mrf.mxu0  ;;  %v2503_v50 = vpop.f32.mrf.mxu1 }
 0x268   :  { %v2788_v25 = vmax.f32 %v2671_v32, 0.0  ;;  %v2504_v57 = vadd.f32 %v2503_v50, %v15023_v6  ;;  %v15278_v30 = vpack.c.bf16 %v2787_v5, %v2783_v29  ;;  %v2675_v15 = vadd.f32 %v2674_v46, %v2502_v62 }
 0x269   :  { %v2678_v52 = vpop.f32.mrf.mxu0  ;;  %v2505_v27 = vpop.f32.mrf.mxu1 }
 0x26a   :  { %v15275_v28 = vpack.c.bf16 %v2788_v25, %v2784_v34  ;;  %v2506_v9 = vadd.f32 %v2505_v27, %v15029_v12  ;;  %v2677_v35 = vadd.f32 %v2676_v22, %v2504_v57  ;;  %v2791_v24 = vmax.f32 %v2675_v15, 0.0 }
 0x26b   :  { %v2680_v60 = vpop.f32.mrf.mxu0  ;;  %v2507_v59 = vpop.f32.mrf.mxu1 }
 0x26c   :  { %v2679_v1 = vadd.f32 %v2678_v52, %v2506_v9  ;;  %v2508_v45 = vadd.f32 %v2507_v59, %v15023_v6  ;;  %10769 = vmatprep.mubr.msk.bf16.mxu0 %vm83_vm6, %v15275_v28  ;;  %v2792_v55 = vmax.f32 %v2677_v35, 0.0 }
 0x26d   :  { %v2684_v41 = vpop.f32.mrf.mxu0  ;;  %v2511_v58 = vpop.f32.mrf.mxu1  ;;  %3555 = vmatmul.mubr.bf16.gmra.mxu0 %v15278_v30  ;;  %4045 = vmatmul.mubr.bf16.gmra.mxu1 %v14994_v61 }
 0x26e   :  { %v2681_v51 = vadd.f32 %v2680_v60, %v2508_v45  ;;  %4054 = vmatprep.mubr.bf16.mxu1 %v14999_v14  ;;  %v2795_v40 = vmax.f32 %v2679_v1, 0.0  ;;  %v2512_v22 = vadd.f32 %v2511_v58, %v15029_v12 }
 0x26f   :  { %v2686_v7 = vpop.f32.mrf.mxu0  ;;  %v2513_v37 = vpop.f32.mrf.mxu1 }
 0x270   :  { %v2796_v44 = vmax.f32 %v2681_v51, 0.0  ;;  %v2514_v0 = vadd.f32 %v2513_v37, %v15023_v6  ;;  %v15291_v52 = vpack.c.bf16 %v2795_v40, %v2791_v24  ;;  %v2685_v57 = vadd.f32 %v2684_v41, %v2512_v22 }
 0x271   :  { %v2688_v32 = vpop.f32.mrf.mxu0  ;;  %v2515_v46 = vpop.f32.mrf.mxu1 }
 0x272   :  { %v15288_v5 = vpack.c.bf16 %v2796_v44, %v2792_v55  ;;  %v2516_v50 = vadd.f32 %v2515_v46, %v15029_v12  ;;  %v2687_v34 = vadd.f32 %v2686_v7, %v2514_v0 }
 0x273   :  { %v2517_v61 = vpop.f32.mrf.mxu1  ;;  %v2690_v29 = vpop.f32.mrf.mxu0 }
 0x274   :  { %v2689_v14 = vadd.f32 %v2688_v32, %v2516_v50  ;;  %v2518_v25 = vadd.f32 %v2517_v61, %v15023_v6  ;;  %10770 = vmatprep.mubr.msk.bf16.mxu0 %vm83_vm6, %v15288_v5  ;;  %v2800_v9 = vmax.f32 %v2687_v34, 0.0  ;;  %v2799_v6 = vmax.f32 %v2685_v57, 0.0 }
 0x275   :  { %v15296_v62 = vpop.f32.mrf.mxu1  ;;  %3565 = vmatmul.mubr.bf16.gmra.mxu0 %v15291_v52  ;;  %4055 = vmatmul.mubr.bf16.gmra.mxu1 %v15017_v8 }
 0x276   :  { %v2691_v27 = vadd.f32 %v2690_v29, %v2518_v25  ;;  %4064 = vmatprep.mubr.bf16.mxu1 %v15020_v13  ;;  %v2803_v12 = vmax.f32 %v2689_v14, 0.0 }
 0x277   :  { %v15301_v60 = vpop.f32.mrf.mxu1 }
 0x278   :  { %v2804_v59 = vmax.f32 %v2691_v27, 0.0  ;;  %v15307_v41 = vpack.c.bf16 %v2803_v12, %v2799_v6 }
 0x279   :  { %v15303_v35 = vpop.f32.mrf.mxu1 }
 0x27a   :  { %v15305_v1 = vpack.c.bf16 %v2804_v59, %v2800_v9 }
 0x27b   :  { %v15309_v45 = vpop.f32.mrf.mxu1 }
 0x27c   :  { %19058 = vst [vmem:[#allocation5_spill] sm:$0xff] %v15309_v45  ;;  %10771 = vmatprep.mubr.msk.bf16.mxu0 %vm83_vm6, %v15305_v1 }
 0x27d   :  { %v15313_v8 = vpop.f32.mrf.mxu1  ;;  %3575 = vmatmul.mubr.bf16.gmra.mxu0 %v15307_v41  ;;  %4065 = vmatmul.mubr.bf16.gmra.mxu1 %v15041_v10 }
 0x27e   :  { %4074 = vmatprep.mubr.bf16.mxu1 %v15044_v23  ;;  %10884 = vmatprep.mubr.msk.bf16.mxu0 %vm83_vm6, %v15055_v63 }
 0x27f   :  { %v15320_v13 = vpop.f32.mrf.mxu1 }
 0x281   :  { %v15322_v15 = vpop.f32.mrf.mxu1 }
 0x283   :  { %v15324_v58 = vpop.f32.mrf.mxu1 }
 0x284   :  { %19059 = vst [vmem:[#allocation7_spill] sm:$0xff] %v15324_v58 }
 0x285   :  { %v15326_v7 = vpop.f32.mrf.mxu1  ;;  %4075 = vmatmul.mubr.bf16.gmra.mxu1 %v15061_v11  ;;  %4128 = vmatmul.mubr.bf16.vlgmr.msra.gmra.mxu0 %v15064_v36 }
 0x286   :  { %4084 = vmatprep.mubr.bf16.mxu1 %v15072_v49  ;;  %10885 = vmatprep.mubr.msk.bf16.mxu0 %vm83_vm6, %v15086_v56 }
 0x287   :  { %v15333_v10 = vpop.f32.mrf.mxu1 }
 0x288   :  { %19060 = vst [vmem:[#allocation8_spill] sm:$0xff] %v15333_v10 }
 0x289   :  { %v15335_v23 = vpop.f32.mrf.mxu1 }
 0x28b   :  { %v15337_v63 = vpop.f32.mrf.mxu1 }
 0x28c   :  { %19061 = vst [vmem:[#allocation9_spill] sm:$0xff] %v15337_v63 }
 0x28d   :  { %v15339_v51 = vpop.f32.mrf.mxu1  ;;  %4085 = vmatmul.mubr.bf16.gmra.mxu1 %v15092_v20  ;;  %4138 = vmatmul.mubr.bf16.gmra.mxu0 %v15094_v48 }
 0x28e   :  { %10886 = vmatprep.mubr.msk.bf16.mxu0 %vm83_vm6, %v15113_v33 }
 0x28f   :  { %v15345_v11 = vpop.f32.mrf.mxu1 }
 0x290   :  { %19062 = vst [vmem:[#allocation10_spill] sm:$0xff] %v15345_v11 }
 0x291   :  { %v15347_v36 = vpop.f32.mrf.mxu1 }
 0x293   :  { %v15349_v49 = vpop.f32.mrf.mxu1 }
 0x294   :  { %19063 = vst [vmem:[#allocation11_spill] sm:$0xff] %v15349_v49 }
 0x295   :  { %v15351_v56 = vpop.f32.mrf.mxu1  ;;  %4148 = vmatmul.mubr.bf16.gmra.mxu0 %v15119_v31 }
 0x296   :  { %10887 = vmatprep.mubr.msk.bf16.mxu0 %vm83_vm6, %v15138_v42 }
 0x297   :  { %v15356_v40 = vpop.f32.mrf.mxu1 }
 0x298   :  { %19064 = vst [vmem:[#allocation12_spill] sm:$0xff] %v15356_v40 }
 0x299   :  { %v15358_v20 = vpop.f32.mrf.mxu1 }
 0x29b   :  { %v15360_v48 = vpop.f32.mrf.mxu1 }
 0x29c   :  { %19065 = vst [vmem:[#allocation13_spill] sm:$0xff] %v15360_v48 }
 0x29d   :  { %v15362_v33 = vpop.f32.mrf.mxu1  ;;  %4158 = vmatmul.mubr.bf16.gmra.mxu0 %v15144_v2 }
 0x29e   :  { %10888 = vmatprep.mubr.msk.bf16.mxu0 %vm83_vm6, %v15163_v19 }
 0x29f   :  { %v15367_v37 = vpop.f32.mrf.mxu1 }
 0x2a0   :  { %19066 = vst [vmem:[#allocation14_spill] sm:$0xff] %v15367_v37 }
 0x2a1   :  { %v15369_v55 = vpop.f32.mrf.mxu1 }
 0x2a3   :  { %v15371_v31 = vpop.f32.mrf.mxu1 }
 0x2a4   :  { %19067 = vst [vmem:[#allocation15_spill] sm:$0xff] %v15371_v31 }
 0x2a5   :  { %v15373_v42 = vpop.f32.mrf.mxu1  ;;  %4168 = vmatmul.mubr.bf16.gmra.mxu0 %v15169_v39 }
 0x2a6   :  { %10889 = vmatprep.mubr.msk.bf16.mxu0 %vm83_vm6, %v15188_v4 }
 0x2a7   :  { %v15378_v44 = vpop.f32.mrf.mxu1 }
 0x2a8   :  { %19068 = vst [vmem:[#allocation16_spill] sm:$0xff] %v15378_v44 }
 0x2a9   :  { %v15380_v0 = vpop.f32.mrf.mxu1 }
 0x2ab   :  { %v15382_v2 = vpop.f32.mrf.mxu1 }
 0x2ac   :  { %19069 = vst [vmem:[#allocation17_spill] sm:$0xff] %v15382_v2 }
 0x2ad   :  { %v15384_v19 = vpop.f32.mrf.mxu1  ;;  %4178 = vmatmul.mubr.bf16.gmra.mxu0 %v15194_v54 }
 0x2ae   :  { %10890 = vmatprep.mubr.msk.bf16.mxu0 %vm83_vm6, %v15210_v47 }
 0x2af   :  { %v15389_v24 = vpop.f32.mrf.mxu1 }
 0x2b0   :  { %19070 = vst [vmem:[#allocation18_spill] sm:$0xff] %v15389_v24 }
 0x2b1   :  { %v15391_v22 = vpop.f32.mrf.mxu1 }
 0x2b3   :  { %v15393_v39 = vpop.f32.mrf.mxu1 }
 0x2b4   :  { %19071 = vst [vmem:[#allocation19_spill] sm:$0xff] %v15393_v39 }
 0x2b5   :  { %v15395_v4 = vpop.f32.mrf.mxu1  ;;  %4188 = vmatmul.mubr.bf16.gmra.mxu0 %v15213_v43 }
 0x2b6   :  { %19072 = vst [vmem:[#allocation20_spill] sm:$0xff] %v15395_v4  ;;  %10891 = vmatprep.mubr.msk.bf16.mxu0 %vm83_vm6, %v15223_v21 }
 0x2b7   :  { %v15400_v32 = vpop.f32.mrf.mxu1 }
 0x2b8   :  { %19073 = vst [vmem:[#allocation21_spill] sm:$0xff] %v15400_v32 }
 0x2b9   :  { %v15402_v46 = vpop.f32.mrf.mxu1 }
 0x2ba   :  { %19074 = vst [vmem:[#allocation22_spill] sm:$0xff] %v15402_v46 }
 0x2bb   :  { %v15404_v54 = vpop.f32.mrf.mxu1 }
 0x2bc   :  { %19075 = vst [vmem:[#allocation23_spill] sm:$0xff] %v15404_v54 }
 0x2bd   :  { %v15406_v47 = vpop.f32.mrf.mxu1  ;;  %4198 = vmatmul.mubr.bf16.gmra.mxu0 %v15226_v18 }
 0x2be   :  { %19076 = vst [vmem:[#allocation24_spill] sm:$0xff] %v15406_v47  ;;  %10892 = vmatprep.mubr.msk.bf16.mxu0 %vm83_vm6, %v15236_v3 }
 0x2bf   :  { %v15411_v50 = vpop.f32.mrf.mxu1 }
 0x2c0   :  { %19077 = vst [vmem:[#allocation25_spill] sm:$0xff] %v15411_v50 }
 0x2c1   :  { %v15413_v61 = vpop.f32.mrf.mxu1 }
 0x2c2   :  { %19078 = vst [vmem:[#allocation26_spill] sm:$0xff] %v15413_v61 }
 0x2c3   :  { %v15415_v43 = vpop.f32.mrf.mxu1 }
 0x2c4   :  { %19079 = vst [vmem:[#allocation27_spill] sm:$0xff] %v15415_v43 }
 0x2c5   :  { %v15417_v21 = vpop.f32.mrf.mxu1  ;;  %4208 = vmatmul.mubr.bf16.gmra.mxu0 %v15239_v53 }
 0x2c6   :  { %19080 = vst [vmem:[#allocation28_spill] sm:$0xff] %v15417_v21  ;;  %10893 = vmatprep.mubr.msk.bf16.mxu0 %vm83_vm6, %v15249_v26 }
 0x2c7   :  { %v15422_v34 = vpop.f32.mrf.mxu1 }
 0x2c8   :  { %19081 = vst [vmem:[#allocation29_spill] sm:$0xff] %v15422_v34 }
 0x2c9   :  { %v15424_v14 = vpop.f32.mrf.mxu1 }
 0x2ca   :  { %19082 = vst [vmem:[#allocation30_spill] sm:$0xff] %v15424_v14 }
 0x2cb   :  { %v15426_v18 = vpop.f32.mrf.mxu1 }
 0x2cc   :  { %19083 = vst [vmem:[#allocation31_spill] sm:$0xff] %v15426_v18 }
 0x2cd   :  { %v15428_v3 = vpop.f32.mrf.mxu1  ;;  %4218 = vmatmul.mubr.bf16.gmra.mxu0 %v15252_v17 }
 0x2ce   :  { %19084 = vst [vmem:[#allocation32_spill] sm:$0xff] %v15428_v3  ;;  %10894 = vmatprep.mubr.msk.bf16.mxu0 %vm83_vm6, %v15262_v38 }
 0x2cf   :  { %v15433_v25 = vpop.f32.mrf.mxu1 }
 0x2d0   :  { %19085 = vst [vmem:[#allocation33_spill] sm:$0xff] %v15433_v25 }
 0x2d1   :  { %v15435_v57 = vpop.f32.mrf.mxu1 }
 0x2d2   :  { %19086 = vst [vmem:[#allocation34_spill] sm:$0xff] %v15435_v57 }
 0x2d3   :  { %v15437_v53 = vpop.f32.mrf.mxu1 }
 0x2d4   :  { %19087 = vst [vmem:[#allocation35_spill] sm:$0xff] %v15437_v53 }
 0x2d5   :  { %v15439_v26 = vpop.f32.mrf.mxu1  ;;  %v15441_v29 = vpop.f32.mrf.mxu0  ;;  %4228 = vmatmul.mubr.bf16.gmra.mxu0 %v15265_v16 }
 0x2d6   :  { %19088 = vst [vmem:[#allocation36_spill] sm:$0xff] %v15439_v26  ;;  %10895 = vmatprep.mubr.msk.bf16.mxu0 %vm83_vm6, %v15275_v28 }
 0x2d7   :  { %v15446_v27 = vpop.f32.mrf.mxu1  ;;  %v15448_v17 = vpop.f32.mrf.mxu0 }
 0x2d8   :  { %19089 = vst [vmem:[#allocation37_spill] sm:$0xff] %v15446_v27 }
 0x2d9   :  { %v15450_v38 = vpop.f32.mrf.mxu1  ;;  %v15452_v12 = vpop.f32.mrf.mxu0 }
 0x2da   :  { %19090 = vst [vmem:[#allocation38_spill] sm:$0xff] %v15450_v38 }
 0x2db   :  { %v15454_v9 = vpop.f32.mrf.mxu1  ;;  %v15456_v59 = vpop.f32.mrf.mxu0 }
 0x2dc   :  { %19091 = vst [vmem:[#allocation39_spill] sm:$0xff] %v15454_v9  ;;  %19092 = vst [vmem:[#allocation40_spill] sm:$0xff] %v15456_v59 }
 0x2dd   :  { %v15458_v6 = vpop.f32.mrf.mxu1  ;;  %v15460_v32 = vpop.f32.mrf.mxu0  ;;  %4238 = vmatmul.mubr.bf16.gmra.mxu0 %v15278_v30 }
 0x2de   :  { %19093 = vst [vmem:[#allocation41_spill] sm:$0xff] %v15458_v6  ;;  %10896 = vmatprep.mubr.msk.bf16.mxu0 %vm83_vm6, %v15288_v5 }
 0x2df   :  { %v15465_v16 = vpop.f32.mrf.mxu1  ;;  %v15467_v28 = vpop.f32.mrf.mxu0 }
 0x2e0   :  { %19094 = vst [vmem:[#allocation42_spill] sm:$0xff] %v15465_v16 }
 0x2e1   :  { %v15469_v54 = vpop.f32.mrf.mxu1  ;;  %v15471_v50 = vpop.f32.mrf.mxu0 }
 0x2e2   :  { %19095 = vst [vmem:[#allocation43_spill] sm:$0xff] %v15469_v54 }
 0x2e3   :  { %v15473_v43 = vpop.f32.mrf.mxu1  ;;  %v15475_v34 = vpop.f32.mrf.mxu0 }
 0x2e4   :  { %19096 = vst [vmem:[#allocation44_spill] sm:$0xff] %v15473_v43  ;;  %19097 = vst [vmem:[#allocation45_spill] sm:$0xff] %v15475_v34 }
 0x2e5   :  { %v15477_v18 = vpop.f32.mrf.mxu0  ;;  %v15479_v25 = vpop.f32.mrf.mxu1  ;;  %4248 = vmatmul.mubr.bf16.gmra.mxu0 %v15291_v52 }
 0x2e6   :  { %10897 = vmatprep.mubr.msk.bf16.mxu0 %vm83_vm6, %v15305_v1 }
 0x2e7   :  { %v15484_v30 = vpop.f32.mrf.mxu0  ;;  %v15486_v5 = vpop.f32.mrf.mxu1 }
 0x2e8   :  { %19098 = vst [vmem:[#allocation46_spill] sm:$0xff] %v15484_v30 }
 0x2e9   :  { %v15488_v53 = vpop.f32.mrf.mxu0  ;;  %v15490_v27 = vpop.f32.mrf.mxu1 }
 0x2eb   :  { %v15492_v43 = vpop.f32.mrf.mxu0  ;;  %v15494_v16 = vpop.f32.mrf.mxu1 }
 0x2ec   :  { %19099 = vst [vmem:[#allocation47_spill] sm:$0xff] %v15492_v43  ;;  %19100 = vst [vmem:[#allocation48_spill] sm:$0xff] %v15494_v16 }
 0x2ed   :  { %v15496_v9 = vpop.f32.mrf.mxu0  ;;  %v15498_v54 = vpop.f32.mrf.mxu1  ;;  %4258 = vmatmul.mubr.bf16.gmra.mxu0 %v15307_v41 }
 0x2ef   :  { %v15501_v52 = vpop.f32.mrf.mxu0  ;;  %v15503_v1 = vpop.f32.mrf.mxu1 }
 0x2f0   :  { %19101 = vst [vmem:[#allocation49_spill] sm:$0xff] %v15501_v52 }
 0x2f1   :  { %v15505_v6 = vpop.f32.mrf.mxu0  ;;  %v15507_v38 = vpop.f32.mrf.mxu1 }
 0x2f3   :  { %v15509_v26 = vpop.f32.mrf.mxu0  ;;  %v15511_v57 = vpop.f32.mrf.mxu1 }
 0x2f4   :  { %19102 = vst [vmem:[#allocation50_spill] sm:$0xff] %v15509_v26  ;;  %19103 = vst [vmem:[#allocation51_spill] sm:$0xff] %v15511_v57 }
 0x2f5   :  { %v15513_v3 = vpop.f32.mrf.mxu0  ;;  %v15515_v59 = vpop.f32.mrf.mxu1 }
 0x2f7   :  { %v15517_v45 = vpop.f32.mrf.mxu0  ;;  %v15521_v41 = vpop.f32.mrf.mxu1 }
 0x2f8   :  { %19104 = vst [vmem:[#allocation52_spill] sm:$0xff] %v15517_v45  ;;  %19105 = vst [vmem:[#allocation53_spill] sm:$0xff] %v15521_v41 }
 0x2f9   :  { %v15519_v16 = vpop.f32.mrf.mxu0  ;;  %v15527_v34 = vpop.f32.mrf.mxu1 }
 0x2fb   :  { %v15523_v14 = vpop.f32.mrf.mxu0  ;;  %v15533_v57 = vpop.f32.mrf.mxu1 }
 0x2fc   :  { %19106 = vst [vmem:[#allocation54_spill] sm:$0xff] %v15523_v14  ;;  %19108 = vst [vmem:[#allocation56_spill] sm:$0xff] %v15533_v57 }
 0x2fd   :  { %v15525_v21 = vpop.f32.mrf.mxu0  ;;  %v15539_v63 = vpop.f32.mrf.mxu1 }
 0x2ff   :  { %v15529_v58 = vpop.f32.mrf.mxu0  ;;  %v15545_v47 = vpop.f32.mrf.mxu1 }
 0x300   :  { %19107 = vst [vmem:[#allocation55_spill] sm:$0xff] %v15529_v58  ;;  %19111 = vst [vmem:[#allocation59_spill] sm:$0xff] %v15545_v47 }
 0x301   :  { %v15531_v30 = vpop.f32.mrf.mxu0  ;;  %v15551_v26 = vpop.f32.mrf.mxu1 }
 0x303   :  { %v15535_v10 = vpop.f32.mrf.mxu0  ;;  %v15557_v45 = vpop.f32.mrf.mxu1 }
 0x304   :  { %19109 = vst [vmem:[#allocation57_spill] sm:$0xff] %v15535_v10  ;;  %19114 = vst [vmem:[#allocation62_spill] sm:$0xff] %v15557_v45 }
 0x305   :  { %v15537_v43 = vpop.f32.mrf.mxu0  ;;  %v15563_v48 = vpop.f32.mrf.mxu1 }
 0x307   :  { %v15541_v61 = vpop.f32.mrf.mxu0  ;;  %v15569_v58 = vpop.f32.mrf.mxu1 }
 0x308   :  { %19110 = vst [vmem:[#allocation58_spill] sm:$0xff] %v15541_v61  ;;  %19119 = vst [vmem:[#allocation67_spill] sm:$0xff] %v15569_v58 }
 0x309   :  { %v15543_v41 = vpop.f32.mrf.mxu0  ;;  %v15575_v31 = vpop.f32.mrf.mxu1 }
 0x30b   :  { %v15547_v52 = vpop.f32.mrf.mxu0  ;;  %v15581_v61 = vpop.f32.mrf.mxu1 }
 0x30c   :  { %19112 = vst [vmem:[#allocation60_spill] sm:$0xff] %v15547_v52  ;;  %19124 = vst [vmem:[#allocation72_spill] sm:$0xff] %v15581_v61 }
 0x30d   :  { %v15549_v11 = vpop.f32.mrf.mxu0 }
 0x30f   :  { %v15553_v49 = vpop.f32.mrf.mxu0 }
 0x310   :  { %19113 = vst [vmem:[#allocation61_spill] sm:$0xff] %v15553_v49 }
 0x311   :  { %v15555_v57 = vpop.f32.mrf.mxu0 }
 0x313   :  { %v15559_v40 = vpop.f32.mrf.mxu0 }
 0x314   :  { %19115 = vst [vmem:[#allocation63_spill] sm:$0xff] %v15559_v40 }
 0x315   :  { %v15561_v14 = vpop.f32.mrf.mxu0 }
 0x316   :  { %19116 = vst [vmem:[#allocation64_spill] sm:$0xff] %v15561_v14 }
 0x317   :  { %v15565_v46 = vpop.f32.mrf.mxu0 }
 0x318   :  { %19117 = vst [vmem:[#allocation65_spill] sm:$0xff] %v15565_v46  ;;  %v15587_v46 = vpop.f32.mrf.mxu1 }
 0x319   :  { %v15567_v47 = vpop.f32.mrf.mxu0 }
 0x31a   :  { %19118 = vst [vmem:[#allocation66_spill] sm:$0xff] %v15567_v47 }
 0x31b   :  { %v15571_v37 = vpop.f32.mrf.mxu0 }
 0x31c   :  { %19120 = vst [vmem:[#allocation68_spill] sm:$0xff] %v15571_v37  ;;  %v15593_v37 = vpop.f32.mrf.mxu1 }
 0x31d   :  { %v15573_v10 = vpop.f32.mrf.mxu0  ;;  %19129 = vst [vmem:[#allocation77_spill] sm:$0xff] %v15593_v37 }
 0x31e   :  { %19121 = vst [vmem:[#allocation69_spill] sm:$0xff] %v15573_v10 }
 0x31f   :  { %v15577_v4 = vpop.f32.mrf.mxu0 }
 0x320   :  { %19122 = vst [vmem:[#allocation70_spill] sm:$0xff] %v15577_v4  ;;  %v15599_v4 = vpop.f32.mrf.mxu1 }
 0x321   :  { %v15579_v45 = vpop.f32.mrf.mxu0 }
 0x322   :  { %19123 = vst [vmem:[#allocation71_spill] sm:$0xff] %v15579_v45 }
 0x323   :  { %v15583_v14 = vpop.f32.mrf.mxu0 }
 0x324   :  { %19125 = vst [vmem:[#allocation73_spill] sm:$0xff] %v15583_v14  ;;  %v15605_v14 = vpop.f32.mrf.mxu1 }
 0x325   :  { %v15585_v44 = vpop.f32.mrf.mxu0  ;;  %19134 = vst [vmem:[#allocation82_spill] sm:$0xff] %v15605_v14 }
 0x326   :  { %19126 = vst [vmem:[#allocation74_spill] sm:$0xff] %v15585_v44 }
 0x327   :  { %v15589_v47 = vpop.f32.mrf.mxu0 }
 0x328   :  { %19127 = vst [vmem:[#allocation75_spill] sm:$0xff] %v15589_v47  ;;  %v15611_v47 = vpop.f32.mrf.mxu1 }
 0x329   :  { %v15591_v58 = vpop.f32.mrf.mxu0 }
 0x32a   :  { %19128 = vst [vmem:[#allocation76_spill] sm:$0xff] %v15591_v58 }
 0x32b   :  { %v15595_v10 = vpop.f32.mrf.mxu0 }
 0x32c   :  { %19130 = vst [vmem:[#allocation78_spill] sm:$0xff] %v15595_v10  ;;  %v15617_v10 = vpop.f32.mrf.mxu1 }
 0x32d   :  { %v15597_v40 = vpop.f32.mrf.mxu0  ;;  %19139 = vst [vmem:[#allocation87_spill] sm:$0xff] %v15617_v10 }
 0x32e   :  { %19131 = vst [vmem:[#allocation79_spill] sm:$0xff] %v15597_v40 }
 0x32f   :  { %v15601_v45 = vpop.f32.mrf.mxu0 }
 0x330   :  { %19132 = vst [vmem:[#allocation80_spill] sm:$0xff] %v15601_v45  ;;  %v15623_v45 = vpop.f32.mrf.mxu1 }
 0x331   :  { %v15603_v61 = vpop.f32.mrf.mxu0 }
 0x332   :  { %19133 = vst [vmem:[#allocation81_spill] sm:$0xff] %v15603_v61 }
 0x333   :  { %v15607_v44 = vpop.f32.mrf.mxu0 }
 0x334   :  { %19135 = vst [vmem:[#allocation83_spill] sm:$0xff] %v15607_v44  ;;  %v15629_v44 = vpop.f32.mrf.mxu1 }
 0x335   :  { %v15609_v39 = vpop.f32.mrf.mxu0 }
 0x336   :  { %19136 = vst [vmem:[#allocation84_spill] sm:$0xff] %v15609_v39  ;;  %v15636_v10 = vpop.f32.mrf.mxu1 }
 0x337   :  { %v15613_v58 = vpop.f32.mrf.mxu0 }
 0x338   :  { %19137 = vst [vmem:[#allocation85_spill] sm:$0xff] %v15613_v58  ;;  %v3447_v58 = vadd.f32 %v15441_v29, %v15296_v62 }
 0x339   :  { %v15615_v37 = vpop.f32.mrf.mxu0 }
 0x33a   :  { %19138 = vst [vmem:[#allocation86_spill] sm:$0xff] %v15615_v37 }
 0x33b   :  { %v15619_v40 = vpop.f32.mrf.mxu0 }
 0x33c   :  { %19140 = vst [vmem:[#allocation88_spill] sm:$0xff] %v15619_v40 }
 0x33d   :  { %v15621_v49 = vpop.f32.mrf.mxu0 }
 0x33e   :  { %19141 = vst [vmem:[#allocation89_spill] sm:$0xff] %v15621_v49  ;;  %v15640_v49 = vadd.f32 %v15448_v17, %v15301_v60 }
 0x33f   :  { %v15625_v61 = vpop.f32.mrf.mxu0 }
 0x340   :  { %19142 = vst [vmem:[#allocation90_spill] sm:$0xff] %v15625_v61 }
 0x341   :  { %v15627_v14 = vpop.f32.mrf.mxu0 }
 0x342   :  { %19143 = vst [vmem:[#allocation91_spill] sm:$0xff] %v15627_v14 }
 0x343   :  { %v15631_v39 = vpop.f32.mrf.mxu0 }
 0x344   :  { %19144 = vst [vmem:[#allocation92_spill] sm:$0xff] %v15631_v39  ;;  %v3451_v39 = vadd.f32 %v15452_v12, %v15303_v35  ;;  %v15663_v12 = vadd.f32 %v15467_v28, %v15320_v13 }
 0x345   :  { %v4129_v24 = vpop.f32.mrf.mxu0 }
 0x346   :  { %v4130_v37 = vadd.f32 %v4129_v24, %v15479_v25  ;;  %v15650_v25 = vpop.f32.mrf.mxu1 }
 0x347   :  { %v4131_v40 = vpop.f32.mrf.mxu0 }
 0x348   :  { %v4268_v61 = vmax.f32 %v3447_v58, %v4130_v37  ;;  %v15643_v14 = vadd.f32 %v4131_v40, %v15486_v5  ;;  %v3457_v58 = vadd.f32 %v15460_v32, %v15313_v8  ;;  %v15659_v17 = vpop.f32.mrf.mxu1  ;;  %v3461_v32 = vadd.f32 %v15471_v50, %v15322_v15 }
 0x349   :  { %v4133_v52 = vpop.f32.mrf.mxu0 }
 0x34a   :  { %v4134_v24 = vadd.f32 %v4133_v52, %v15490_v27 }
 0x34b   :  { %v15652_v29 = vpop.f32.mrf.mxu0 }
 0x34c   :  { %v4270_v2 = vmax.f32 %v3451_v39, %v4134_v24  ;;  %v12110_v39 = vld [vmem:[%s18956_s4 + $0x4] ss:$8 sps:$4 sm:$0xff]   ;;  %v3467_v24 = vadd.f32 %v15477_v18, %v15326_v7 }
 0x34d   :  { %v4139_v60 = vpop.f32.mrf.mxu0  ;;  %10912 = vmatprep.mubr.msk.bf16.mxu1 %vm55_vm1, %v12110_v39 }
 0x34e   :  { %v15656_v40 = vpack.c.bf16 %v4270_v2, %v4268_v61  ;;  %v4140_v37 = vadd.f32 %v4139_v60, %v15498_v54  ;;  %v12113_v2 = vld [vmem:[%s18956_s4 + $0x74] ss:$8 sps:$4 sm:$0xff]   ;;  %v15680_v61 = vpop.f32.mrf.mxu1 }
 0x34f   :  { %v4141_v35 = vpop.f32.mrf.mxu0  ;;  %10947 = vmatprep.mubr.msk.bf16.mxu0 %vm55_vm1, %v12113_v2 }
 0x350   :  { %v4272_v27 = vmax.f32 %v3457_v58, %v4140_v37  ;;  %v15666_v5 = vadd.f32 %v4141_v35, %v15503_v1  ;;  %v15690_v50 = vpop.f32.mrf.mxu1  ;;  %v3471_v35 = vadd.f32 %v15488_v53, %v15335_v23  ;;  %v3477_v23 = vadd.f32 %v15496_v9, %v15339_v51 }
 0x351   :  { %v4143_v8 = vpop.f32.mrf.mxu0 }
 0x352   :  { %v4144_v54 = vadd.f32 %v4143_v8, %v15507_v38  ;;  %v15697_v8 = vpop.f32.mrf.mxu1 }
 0x353   :  { %v15682_v28 = vpop.f32.mrf.mxu0 }
 0x354   :  { %v4274_v52 = vmax.f32 %v3461_v32, %v4144_v54 }
 0x355   :  { %v4149_v1 = vpop.f32.mrf.mxu0 }
 0x356   :  { %v15687_v60 = vpack.c.bf16 %v4274_v52, %v4272_v27  ;;  %v4150_v15 = vadd.f32 %v4149_v1, %v15515_v59  ;;  %v15703_v59 = vpop.f32.mrf.mxu1 }
 0x357   :  { %v15692_v38 = vpop.f32.mrf.mxu0 }
 0x358   :  { %v4276_v58 = vmax.f32 %v3467_v24, %v4150_v15  ;;  %v15713_v1 = vpop.f32.mrf.mxu1 }
 0x359   :  { %v4153_v37 = vpop.f32.mrf.mxu0 }
 0x35a   :  { %v4154_v39 = vadd.f32 %v4153_v37, %v15527_v34  ;;  %v3481_v34 = vadd.f32 %v15505_v6, %v15347_v36  ;;  %v3487_v36 = vadd.f32 %v15513_v3, %v15351_v56 }
 0x35b   :  { %v15699_v2 = vpop.f32.mrf.mxu0 }
 0x35c   :  { %v4278_v7 = vmax.f32 %v3471_v35, %v4154_v39  ;;  %v15719_v39 = vpop.f32.mrf.mxu1 }
 0x35d   :  { %v4159_v18 = vpop.f32.mrf.mxu0 }
 0x35e   :  { %v15701_v27 = vpack.c.bf16 %v4278_v7, %v4276_v58  ;;  %v4160_v54 = vadd.f32 %v4159_v18, %v15539_v63  ;;  %v15729_v7 = vpop.f32.mrf.mxu1 }
 0x35f   :  { %v15705_v32 = vpop.f32.mrf.mxu0 }
 0x360   :  { %v4280_v15 = vmax.f32 %v3477_v23, %v4160_v54 }
 0x361   :  { %v4163_v52 = vpop.f32.mrf.mxu0 }
 0x362   :  { %v4164_v53 = vadd.f32 %v4163_v52, %v15551_v26  ;;  %v3491_v26 = vadd.f32 %v15519_v16, %v15358_v20  ;;  %v3497_v20 = vadd.f32 %v15525_v21, %v15362_v33  ;;  %v3507_v33 = vadd.f32 %v15537_v43, %v15373_v42 }
 0x363   :  { %v15715_v24 = vpop.f32.mrf.mxu0 }
 0x364   :  { %v4282_v58 = vmax.f32 %v3481_v34, %v4164_v53  ;;  %v15735_v53 = vpop.f32.mrf.mxu1 }
 0x365   :  { %v4169_v37 = vpop.f32.mrf.mxu0 }
 0x366   :  { %v15717_v35 = vpack.c.bf16 %v4282_v58, %v4280_v15  ;;  %v4170_v51 = vadd.f32 %v4169_v37, %v15563_v48  ;;  %v15743_v16 = vpop.f32.mrf.mxu1 }
 0x367   :  { %v15721_v63 = vpop.f32.mrf.mxu0 }
 0x368   :  { %v4284_v54 = vmax.f32 %v3487_v36, %v4170_v51 }
 0x369   :  { %v4173_v9 = vpop.f32.mrf.mxu0 }
 0x36a   :  { %v4174_v6 = vadd.f32 %v4173_v9, %v15575_v31  ;;  %v3501_v31 = vadd.f32 %v15531_v30, %v15369_v55  ;;  %v3511_v55 = vadd.f32 %v15543_v41, %v15380_v0  ;;  %v3517_v0 = vadd.f32 %v15549_v11, %v15384_v19  ;;  %v19151_v11 = vld [vmem:[#allocation87_spill] sm:$0xff] }
 0x36b   :  { %v15731_v18 = vpop.f32.mrf.mxu0 }
 0x36c   :  { %v4286_v52 = vmax.f32 %v3491_v26, %v4174_v6  ;;  %v15747_v26 = vpop.f32.mrf.mxu1 }
 0x36d   :  { %v4179_v23 = vpop.f32.mrf.mxu0 }
 0x36e   :  { %v15733_v34 = vpack.c.bf16 %v4286_v52, %v4284_v54  ;;  %v4180_v15 = vadd.f32 %v4179_v23, %v15587_v46  ;;  %v15755_v21 = vpop.f32.mrf.mxu1 }
 0x36f   :  { %v4181_v48 = vpop.f32.mrf.mxu0 }
 0x370   :  { %v4288_v37 = vmax.f32 %v3497_v20, %v4180_v15  ;;  %v15759_v20 = vpop.f32.mrf.mxu1 }
 0x371   :  { %v4183_v56 = vpop.f32.mrf.mxu0 }
 0x372   :  { %v4184_v3 = vadd.f32 %v4183_v56, %v15599_v4 }
 0x373   :  { %v4185_v58 = vpop.f32.mrf.mxu0 }
 0x374   :  { %v4290_v51 = vmax.f32 %v3501_v31, %v4184_v3 }
 0x375   :  { %v4189_v9 = vpop.f32.mrf.mxu0 }
 0x376   :  { %v15745_v36 = vpack.c.bf16 %v4290_v51, %v4288_v37  ;;  %v4190_v6 = vadd.f32 %v4189_v9, %v15611_v47  ;;  %v19145_v37 = vld [vmem:[#allocation17_spill] sm:$0xff]  ;;  %v19146_v51 = vld [vmem:[#allocation60_spill] sm:$0xff] }
 0x377   :  { %v4191_v46 = vpop.f32.mrf.mxu0  ;;  %v3513_v9 = vadd.f32 %v19146_v51, %v19145_v37  ;;  %v19156_v37 = vld [vmem:[#allocation82_spill] sm:$0xff] }
 0x378   :  { %v4292_v52 = vmax.f32 %v3507_v33, %v4190_v6  ;;  %v19147_v6 = vld [vmem:[#allocation18_spill] sm:$0xff]  ;;  %v4192_v19 = vadd.f32 %v4191_v46, %v19151_v11  ;;  %v4186_v51 = vadd.f32 %v4185_v58, %v19156_v37  ;;  %v19157_v46 = vld [vmem:[#allocation15_spill] sm:$0xff] }
 0x379   :  { %v4193_v54 = vpop.f32.mrf.mxu0  ;;  %v19160_v58 = vld [vmem:[#allocation14_spill] sm:$0xff] }
 0x37a   :  { %v4194_v4 = vadd.f32 %v4193_v54, %v15623_v45  ;;  %v3521_v45 = vadd.f32 %v15555_v57, %v15391_v22  ;;  %v19148_v54 = vld [vmem:[#allocation61_spill] sm:$0xff] }
 0x37b   :  { %v4195_v30 = vpop.f32.mrf.mxu0  ;;  %v3519_v33 = vadd.f32 %v19148_v54, %v19147_v6 }
 0x37c   :  { %v4294_v23 = vmax.f32 %v3511_v55, %v4194_v4  ;;  %v4196_v42 = vadd.f32 %v4195_v30, %v15629_v44  ;;  %v19150_v55 = vld [vmem:[#allocation63_spill] sm:$0xff]  ;;  %v15775_v4 = vpop.f32.mrf.mxu1 }
 0x37d   :  { %v4199_v15 = vpop.f32.mrf.mxu0 }
 0x37e   :  { %v15757_v56 = vpack.c.bf16 %v4294_v23, %v4292_v52  ;;  %v4200_v31 = vadd.f32 %v4199_v15, %v15636_v10  ;;  %v19149_v10 = vld [vmem:[#allocation19_spill] sm:$0xff]  ;;  %v19154_v15 = vld [vmem:[#allocation20_spill] sm:$0xff]  ;;  %v4295_v6 = vmax.f32 %v3513_v9, %v4196_v42 }
 0x37f   :  { %v4201_v47 = vpop.f32.mrf.mxu0  ;;  %v3523_v44 = vadd.f32 %v19150_v55, %v19149_v10  ;;  %v19161_v42 = vld [vmem:[#allocation55_spill] sm:$0xff] }
 0x380   :  { %v4202_v41 = vadd.f32 %v4201_v47, %v15650_v25  ;;  %v4296_v52 = vmax.f32 %v3517_v0, %v4200_v31  ;;  %v19152_v25 = vld [vmem:[#allocation16_spill] sm:$0xff]  ;;  %v19158_v31 = vld [vmem:[#allocation57_spill] sm:$0xff]  ;;  %v3499_v9 = vadd.f32 %v19161_v42, %v19160_v58 }
 0x381   :  { %v4203_v43 = vpop.f32.mrf.mxu0  ;;  %v19155_v47 = vld [vmem:[#allocation64_spill] sm:$0xff]  ;;  %v3503_v0 = vadd.f32 %v19158_v31, %v19157_v46  ;;  %v19170_v46 = vld [vmem:[#allocation62_spill] sm:$0xff] }
 0x382   :  { %v4204_v3 = vadd.f32 %v4203_v43, %v15659_v17  ;;  %v19153_v17 = vld [vmem:[#allocation58_spill] sm:$0xff]  ;;  %v3527_v43 = vadd.f32 %v19155_v47, %v19154_v15  ;;  %v4297_v10 = vmax.f32 %v3519_v33, %v4202_v41  ;;  %v4166_v31 = vadd.f32 %v15715_v24, %v19170_v46 }
 0x383   :  { %v4205_v30 = vpop.f32.mrf.mxu0  ;;  %v3509_v23 = vadd.f32 %v19153_v17, %v19152_v25  ;;  %v19162_v41 = vld [vmem:[#allocation22_spill] sm:$0xff] }
 0x384   :  { %v4298_v22 = vmax.f32 %v3521_v45, %v4204_v3  ;;  %v4206_v57 = vadd.f32 %v4205_v30, %v15680_v61  ;;  %v15787_v45 = vpop.f32.mrf.mxu1  ;;  %v19159_v3 = vld [vmem:[#allocation77_spill] sm:$0xff]  ;;  %v19163_v33 = vld [vmem:[#allocation66_spill] sm:$0xff] }
 0x385   :  { %v4209_v54 = vpop.f32.mrf.mxu0  ;;  %v4182_v30 = vadd.f32 %v4181_v48, %v19159_v3  ;;  %v4293_v11 = vmax.f32 %v3509_v23, %v4192_v19  ;;  %v19165_v48 = vld [vmem:[#allocation13_spill] sm:$0xff]  ;;  %v19166_v19 = vld [vmem:[#allocation54_spill] sm:$0xff] }
 0x386   :  { %v4338_v55 = vpack.c.bf16 %v4298_v22, %v4296_v52  ;;  %v4299_v62 = vmax.f32 %v3523_v44, %v4206_v57  ;;  %v4210_v13 = vadd.f32 %v4209_v54, %v15690_v50  ;;  %v3531_v44 = vadd.f32 %v19163_v33, %v19162_v41  ;;  %v19164_v52 = vld [vmem:[#allocation72_spill] sm:$0xff]  ;;  %v19175_v33 = vld [vmem:[#allocation49_spill] sm:$0xff] }
 0x387   :  { %v15789_v61 = vpop.f32.mrf.mxu0  ;;  %v4176_v50 = vadd.f32 %v15731_v18, %v19164_v52  ;;  %v4291_v57 = vmax.f32 %v3503_v0, %v4186_v51  ;;  %v4337_v47 = vpack.c.bf16 %v4295_v6, %v4293_v11  ;;  %v4289_v18 = vmax.f32 %v3499_v9, %v4182_v30  ;;  %v19169_v51 = vld [vmem:[#allocation52_spill] sm:$0xff]  ;;  %v19173_v30 = vld [vmem:[#allocation59_spill] sm:$0xff] }
 0x388   :  { %v4300_v25 = vmax.f32 %v3527_v43, %v4210_v13  ;;  %v4339_v17 = vpack.c.bf16 %v4299_v62, %v4297_v10  ;;  %v3493_v13 = vadd.f32 %v19166_v19, %v19165_v48  ;;  %v15801_v62 = vpop.f32.mrf.mxu1  ;;  %v19167_v43 = vld [vmem:[#allocation67_spill] sm:$0xff]  ;;  %v4162_v9 = vadd.f32 %v15705_v32, %v19173_v30  ;;  %v19176_v52 = vld [vmem:[#allocation24_spill] sm:$0xff] }
 0x389   :  { %v4213_v22 = vpop.f32.mrf.mxu0  ;;  %v4172_v37 = vadd.f32 %v15721_v63, %v19167_v43  ;;  %v4335_v11 = vpack.c.bf16 %v4291_v57, %v4289_v18  ;;  %v19178_v57 = vld [vmem:[#allocation26_spill] sm:$0xff]  ;;  %v19180_v19 = vld [vmem:[#allocation56_spill] sm:$0xff] }
 0x38a   :  { %v4214_v15 = vadd.f32 %v4213_v22, %v15703_v59  ;;  %4450 = vmatprep.subr.bf16.mxu1 %v4339_v17  ;;  %4652 = vmatprep.subr.bf16.mxu0 %v4339_v17  ;;  %v19168_v59 = vld [vmem:[#allocation12_spill] sm:$0xff]  ;;  %v4287_v0 = vmax.f32 %v3493_v13, %v4176_v50  ;;  %v19171_v17 = vld [vmem:[#allocation11_spill] sm:$0xff]  ;;  %v15815_v42 = vpop.f32.mrf.mxu1  ;;  %v19177_v50 = vld [vmem:[#allocation69_spill] sm:$0xff] }
 0x38b   :  { %v15803_v23 = vpop.f32.mrf.mxu0  ;;  %4451 = vmatpush1.bf16.msra.mxu1 %v4338_v55  ;;  %4653 = vmatpush1.bf16.msra.mxu0 %v4338_v55  ;;  %v3489_v10 = vadd.f32 %v19169_v51, %v19168_v59  ;;  %v19172_v55 = vld [vmem:[#allocation50_spill] sm:$0xff]  ;;  %v3537_v22 = vadd.f32 %v19177_v50, %v19176_v52  ;;  %v19183_v59 = vld [vmem:[#allocation53_spill] sm:$0xff] }
 0x38c   :  { %v4302_v54 = vmax.f32 %v3531_v44, %v4214_v15  ;;  %4452 = vmatprep.subr.bf16.mxu1 %v4337_v47  ;;  %4654 = vmatprep.subr.bf16.mxu0 %v4337_v47  ;;  %v3483_v58 = vadd.f32 %v19172_v55, %v19171_v17  ;;  %v19179_v15 = vld [vmem:[#allocation71_spill] sm:$0xff]  ;;  %v4152_v51 = vadd.f32 %v15692_v38, %v19183_v59  ;;  %v19190_v52 = vld [vmem:[#allocation74_spill] sm:$0xff] }
 0x38d   :  { %v4219_v6 = vpop.f32.mrf.mxu0  ;;  %v4285_v41 = vmax.f32 %v3489_v10, %v4172_v37  ;;  %v3541_v47 = vadd.f32 %v19179_v15, %v19178_v57  ;;  %v19182_v37 = vld [vmem:[#allocation47_spill] sm:$0xff]  ;;  %v19192_v57 = vld [vmem:[#allocation76_spill] sm:$0xff] }
 0x38e   :  { %v15811_v3 = vpack.c.bf16 %v4302_v54, %v4300_v25  ;;  %v4220_v24 = vadd.f32 %v4219_v6, %v15719_v39  ;;  %v19174_v25 = vld [vmem:[#allocation10_spill] sm:$0xff]  ;;  %v4283_v13 = vmax.f32 %v3483_v58, %v4166_v31  ;;  %v19181_v39 = vld [vmem:[#allocation9_spill] sm:$0xff]  ;;  %v15835_v54 = vpop.f32.mrf.mxu1  ;;  %v19186_v17 = vld [vmem:[#allocation51_spill] sm:$0xff] }
 0x38f   :  { %v15817_v63 = vpop.f32.mrf.mxu0  ;;  %4453 = vmatpush1.bf16.msra.mxu1 %v15757_v56  ;;  %4655 = vmatpush1.bf16.msra.mxu0 %v15757_v56  ;;  %v3479_v44 = vadd.f32 %v19175_v33, %v19174_v25  ;;  %v4156_v56 = vadd.f32 %v15699_v2, %v19180_v19  ;;  %v4333_v43 = vpack.c.bf16 %v4287_v0, %v4285_v41  ;;  %v19185_v31 = vld [vmem:[#allocation46_spill] sm:$0xff] }
 0x390   :  { %4454 = vmatprep.subr.bf16.mxu1 %v4335_v11  ;;  %4656 = vmatprep.subr.bf16.mxu0 %v4335_v11  ;;  %v3473_v18 = vadd.f32 %v19182_v37, %v19181_v39  ;;  %v4304_v2 = vmax.f32 %v3537_v22, %v4220_v24  ;;  %v4146_v55 = vadd.f32 %v15682_v28, %v19186_v17  ;;  %v4076_v41 = vpop.f32.mrf.mxu1  ;;  %v19189_v28 = vld [vmem:[#allocation28_spill] sm:$0xff]  ;;  %v19191_v22 = vld [vmem:[#allocation30_spill] sm:$0xff] }
 0x391   :  { %v4223_v48 = vpop.f32.mrf.mxu0  ;;  %v4281_v6 = vmax.f32 %v3479_v44, %v4162_v9  ;;  %v19188_v9 = vld [vmem:[#allocation45_spill] sm:$0xff]  ;;  %v3547_v50 = vadd.f32 %v19190_v52, %v19189_v28  ;;  %v3551_v15 = vadd.f32 %v19192_v57, %v19191_v22  ;;  %v19195_v39 = vld [vmem:[#allocation40_spill] sm:$0xff]  ;;  %v19204_v57 = vld [vmem:[#allocation38_spill] sm:$0xff] }
 0x392   :  { %v4224_v32 = vadd.f32 %v4223_v48, %v15735_v53  ;;  %v19184_v53 = vld [vmem:[#allocation8_spill] sm:$0xff]  ;;  %v4279_v58 = vmax.f32 %v3473_v18, %v4156_v56 }
 0x393   :  { %v15839_v10 = vpop.f32.mrf.mxu0  ;;  %4455 = vmatpush1.bf16.msra.mxu1 %v15745_v36  ;;  %4657 = vmatpush1.bf16.msra.mxu0 %v15745_v36  ;;  %v3469_v0 = vadd.f32 %v19185_v31, %v19184_v53  ;;  %v4331_v30 = vpack.c.bf16 %v4283_v13, %v4281_v6  ;;  %v19187_v36 = vld [vmem:[#allocation7_spill] sm:$0xff]  ;;  %v19193_v48 = vld [vmem:[#allocation48_spill] sm:$0xff] }
 0x394   :  { %v4306_v46 = vmax.f32 %v3541_v47, %v4224_v32  ;;  %4456 = vmatprep.subr.bf16.mxu1 %v4333_v43  ;;  %4658 = vmatprep.subr.bf16.mxu0 %v4333_v43  ;;  %v3463_v24 = vadd.f32 %v19188_v9, %v19187_v36  ;;  %v4136_v19 = vadd.f32 %v15652_v29, %v19193_v48  ;;  %v15863_v32 = vpop.f32.mrf.mxu1 }
 0x395   :  { %v4229_v11 = vpop.f32.mrf.mxu0  ;;  %v4277_v33 = vmax.f32 %v3469_v0, %v4152_v51  ;;  %v19197_v0 = vld [vmem:[#allocation32_spill] sm:$0xff] }
 0x396   :  { %v15847_v38 = vpack.c.bf16 %v4306_v46, %v4304_v2  ;;  %v4230_v44 = vadd.f32 %v4229_v11, %v15747_v26  ;;  %v4275_v56 = vmax.f32 %v3463_v24, %v4146_v55  ;;  %v19194_v26 = vld [vmem:[#allocation5_spill] sm:$0xff]  ;;  %v4080_v46 = vpop.f32.mrf.mxu1  ;;  %v19198_v11 = vld [vmem:[#allocation79_spill] sm:$0xff]  ;;  %v19199_v55 = vld [vmem:[#allocation34_spill] sm:$0xff] }
 0x397   :  { %v15849_v25 = vpop.f32.mrf.mxu0  ;;  %4457 = vmatpush1.bf16.msra.mxu1 %v15733_v34  ;;  %4659 = vmatpush1.bf16.msra.mxu0 %v15733_v34  ;;  %v4329_v13 = vpack.c.bf16 %v4279_v58, %v4277_v33  ;;  %v3453_v37 = vadd.f32 %v19195_v39, %v19194_v26  ;;  %v3557_v17 = vadd.f32 %v19198_v11, %v19197_v0  ;;  %v19200_v58 = vld [vmem:[#allocation81_spill] sm:$0xff]  ;;  %v19211_v11 = vld [vmem:[#allocation88_spill] sm:$0xff] }
 0x398   :  { %4458 = vmatprep.subr.bf16.mxu1 %v4331_v30  ;;  %4660 = vmatprep.subr.bf16.mxu0 %v4331_v30  ;;  %v4308_v18 = vmax.f32 %v3547_v50, %v4230_v44  ;;  %v3561_v30 = vadd.f32 %v19200_v58, %v19199_v55  ;;  %v4082_v9 = vpop.f32.mrf.mxu1  ;;  %v19203_v50 = vld [vmem:[#allocation84_spill] sm:$0xff]  ;;  %v19212_v55 = vld [vmem:[#allocation42_spill] sm:$0xff] }
 0x399   :  { %v4233_v47 = vpop.f32.mrf.mxu0  ;;  %v4271_v51 = vmax.f32 %v3453_v37, %v4136_v19  ;;  %v19213_v58 = vld [vmem:[#allocation90_spill] sm:$0xff] }
 0x39a   :  { %v4234_v34 = vadd.f32 %v4233_v47, %v15759_v20  ;;  %v19196_v20 = vmax.f32 %v15663_v12, %v15666_v5  ;;  %v19201_v5 = vmax.f32 %v15640_v49, %v15643_v14  ;;  %v4086_v28 = vpop.f32.mrf.mxu1 }
 0x39b   :  { %v15865_v43 = vpop.f32.mrf.mxu0  ;;  %4459 = vmatpush1.bf16.msra.mxu1 %v15717_v35  ;;  %4661 = vmatpush1.bf16.msra.mxu0 %v15717_v35 }
 0x39c   :  { %v4310_v59 = vmax.f32 %v3551_v15, %v4234_v34  ;;  %4460 = vmatprep.subr.bf16.mxu1 %v4329_v13  ;;  %4662 = vmatprep.subr.bf16.mxu0 %v4329_v13  ;;  %v4327_v2 = vpack.c.bf16 %v4275_v56, %v19196_v20  ;;  %v4325_v36 = vpack.c.bf16 %v4271_v51, %v19201_v5  ;;  %v4088_v48 = vpop.f32.mrf.mxu1  ;;  %v19208_v51 = vld [vmem:[#allocation43_spill] sm:$0xff]  ;;  %v19215_v5 = vld [vmem:[#allocation92_spill] sm:$0xff] }
 0x39d   :  { %v4239_v29 = vpop.f32.mrf.mxu0  ;;  %v19209_v20 = vld [vmem:[#allocation91_spill] sm:$0xff] }
 0x39e   :  { %v15871_v6 = vpack.c.bf16 %v4310_v59, %v4308_v18  ;;  %v4240_v35 = vadd.f32 %v4239_v29, %v15787_v45  ;;  %v4090_v39 = vpop.f32.mrf.mxu1  ;;  %v19206_v59 = vld [vmem:[#allocation41_spill] sm:$0xff] }
 0x39f   :  { %v4241_v53 = vpop.f32.mrf.mxu0  ;;  %4461 = vmatpush1.bf16.msra.mxu1 %v15701_v27  ;;  %4663 = vmatpush1.bf16.msra.mxu0 %v15701_v27 }
 0x3a0   :  { %4462 = vmatprep.subr.bf16.mxu1 %v4327_v2  ;;  %4664 = vmatprep.subr.bf16.mxu0 %v4327_v2  ;;  %v4312_v27 = vmax.f32 %v3557_v17, %v4240_v35  ;;  %v3581_v2 = vadd.f32 %v19209_v20, %v19208_v51  ;;  %v19225_v51 = vld [vmem:[#allocation75_spill] sm:$0xff] }
 0x3a1   :  { %v4243_v31 = vpop.f32.mrf.mxu0 }
 0x3a2   :  { %v4244_v12 = vadd.f32 %v4243_v31, %v15815_v42  ;;  %v19202_v42 = vld [vmem:[#allocation36_spill] sm:$0xff] }
 0x3a3   :  { %v4245_v24 = vpop.f32.mrf.mxu0  ;;  %4463 = vmatpush1.bf16.msra.mxu1 %v15687_v60  ;;  %4665 = vmatpush1.bf16.msra.mxu0 %v15687_v60  ;;  %v3567_v22 = vadd.f32 %v19203_v50, %v19202_v42  ;;  %v19205_v60 = vld [vmem:[#allocation86_spill] sm:$0xff]  ;;  %v19216_v42 = vld [vmem:[#allocation37_spill] sm:$0xff] }
 0x3a4   :  { %v4314_v45 = vmax.f32 %v3561_v30, %v4244_v12  ;;  %4464 = vmatprep.subr.bf16.mxu1 %v4325_v36  ;;  %4666 = vmatprep.subr.bf16.mxu0 %v4325_v36  ;;  %v3571_v15 = vadd.f32 %v19205_v60, %v19204_v57  ;;  %v3579_v30 = vadd.f32 %v19213_v58, %v19212_v55  ;;  %v19214_v12 = vld [vmem:[#allocation44_spill] sm:$0xff] }
 0x3a5   :  { %v4249_v33 = vpop.f32.mrf.mxu0  ;;  %v3583_v36 = vadd.f32 %v19215_v5, %v19214_v12  ;;  %v4216_v55 = vadd.f32 %v15803_v23, %v15713_v1  ;;  %v19231_v58 = vld [vmem:[#allocation68_spill] sm:$0xff]  ;;  %v19232_v12 = vld [vmem:[#allocation21_spill] sm:$0xff] }
 0x3a6   :  { %v15889_v44 = vpack.c.bf16 %v4314_v45, %v4312_v27  ;;  %v4250_v49 = vadd.f32 %v4249_v33, %v4076_v41  ;;  %v4092_v27 = vpop.f32.mrf.mxu1  ;;  %v19233_v5 = vld [vmem:[#allocation65_spill] sm:$0xff] }
 0x3a7   :  { %v4251_v52 = vpop.f32.mrf.mxu0  ;;  %4465 = vmatpush1.bf16.msra.mxu1 %v15656_v40  ;;  %4667 = vmatpush1.bf16.msra.mxu0 %v15656_v40  ;;  %v19207_v40 = vld [vmem:[#allocation89_spill] sm:$0xff] }
 0x3a8   :  { %v4316_v56 = vmax.f32 %v3567_v22, %v4250_v49  ;;  %v3577_v41 = vadd.f32 %v19207_v40, %v19206_v59  ;;  %v4252_v33 = vadd.f32 %v4251_v52, %v15863_v32  ;;  %v4246_v22 = vadd.f32 %v4245_v24, %v15835_v54  ;;  %v19220_v32 = vld [vmem:[#allocation33_spill] sm:$0xff]  ;;  %v19221_v52 = vld [vmem:[#allocation80_spill] sm:$0xff]  ;;  %v19222_v24 = vld [vmem:[#allocation31_spill] sm:$0xff] }
 0x3a9   :  { %v4253_v14 = vpop.f32.mrf.mxu0  ;;  %v19223_v40 = vld [vmem:[#allocation78_spill] sm:$0xff] }
 0x3aa   :  { %v4254_v47 = vadd.f32 %v4253_v14, %v4080_v46  ;;  %v19210_v46 = vld [vmem:[#allocation39_spill] sm:$0xff] }
 0x3ab   :  { %v4255_v19 = vpop.f32.mrf.mxu0  ;;  %v3573_v17 = vadd.f32 %v19211_v11, %v19210_v46  ;;  %v4222_v46 = vadd.f32 %v15817_v63, %v15729_v7  ;;  %v19229_v11 = vld [vmem:[#allocation70_spill] sm:$0xff]  ;;  %v4212_v7 = vadd.f32 %v15789_v61, %v15697_v8  ;;  %v12108_v8 = vld [vmem:[%s18956_s4] ss:$8 sps:$4 sm:$0xff]  }
 0x3ac   :  { %v4318_v34 = vmax.f32 %v3571_v15, %v4254_v47  ;;  %v4256_v35 = vadd.f32 %v4255_v19, %v4082_v9  ;;  %v19217_v9 = vld [vmem:[#allocation85_spill] sm:$0xff]  ;;  %v19219_v19 = vld [vmem:[#allocation83_spill] sm:$0xff] }
 0x3ad   :  { %v4259_v13 = vpop.f32.mrf.mxu0  ;;  %v3569_v50 = vadd.f32 %v19217_v9, %v19216_v42  ;;  %v12111_v61 = vld [vmem:[%s18956_s4 + $0x70] ss:$8 sps:$4 sm:$0xff]   ;;  %v12126_v42 = vld [vmem:[%s18956_s4 + $0x34] ss:$8 sps:$4 sm:$0xff]   ;;  %v12128_v9 = vld [vmem:[%s18956_s4 + $0xa4] ss:$8 sps:$4 sm:$0xff]  }
 0x3ae   :  { %v4348_v26 = vpack.c.bf16 %v4318_v34, %v4316_v56  ;;  %v4260_v18 = vadd.f32 %v4259_v13, %v4086_v28  ;;  %v4319_v57 = vmax.f32 %v3573_v17, %v4256_v35  ;;  %v4242_v34 = vadd.f32 %v4241_v53, %v15801_v62  ;;  %v19226_v35 = vld [vmem:[#allocation27_spill] sm:$0xff] }
 0x3af   :  { %v4261_v37 = vpop.f32.mrf.mxu0  ;;  %v4317_v13 = vmax.f32 %v3569_v50, %v4252_v33  ;;  %v4232_v62 = vadd.f32 %v15849_v25, %v15755_v21  ;;  %v19228_v25 = vld [vmem:[#allocation25_spill] sm:$0xff]  ;;  %v12130_v50 = vld [vmem:[%s18956_s4 + $0x30] ss:$8 sps:$4 sm:$0xff]  }
 0x3b0   :  { %v4262_v31 = vadd.f32 %v4261_v37, %v4088_v48  ;;  %v4320_v28 = vmax.f32 %v3577_v41, %v4260_v18  ;;  %v19218_v48 = vld [vmem:[#allocation35_spill] sm:$0xff]  ;;  %v3559_v37 = vadd.f32 %v19221_v52, %v19220_v32  ;;  %v4236_v18 = vadd.f32 %v15865_v43, %v15775_v4  ;;  %v12120_v33 = vld [vmem:[%s18956_s4 + $0x24] ss:$8 sps:$4 sm:$0xff]   ;;  %v12148_v32 = vld [vmem:[%s18956_s4 + $0x60] ss:$8 sps:$4 sm:$0xff]  }
 0x3b1   :  { %v4263_v29 = vpop.f32.mrf.mxu0  ;;  %v3563_v56 = vadd.f32 %v19219_v19, %v19218_v48  ;;  %v4349_v54 = vpack.c.bf16 %v4319_v57, %v4317_v13  ;;  %v3553_v41 = vadd.f32 %v19223_v40, %v19222_v24  ;;  %v4226_v4 = vadd.f32 %v15839_v10, %v15743_v16  ;;  %v12132_v57 = vld [vmem:[%s18956_s4 + $0x44] ss:$8 sps:$4 sm:$0xff]   ;;  %v12138_v48 = vld [vmem:[%s18956_s4 + $0x54] ss:$8 sps:$4 sm:$0xff]   ;;  %v12149_v52 = vld [vmem:[%s18956_s4 + $0xd0] ss:$8 sps:$4 sm:$0xff]  }
 0x3b2   :  { %v4264_v0 = vadd.f32 %v4263_v29, %v4090_v39  ;;  %v4321_v60 = vmax.f32 %v3579_v30, %v4262_v31  ;;  %v4313_v53 = vmax.f32 %v3559_v37, %v4242_v34  ;;  %v19224_v29 = vld [vmem:[#allocation29_spill] sm:$0xff]  ;;  %v3539_v17 = vadd.f32 %v19229_v11, %v19228_v25  ;;  %v12156_v24 = vld [vmem:[%s18957_s5 + $0x90] ss:$12 sps:$4 sm:$0xff]   ;;  %v12158_v40 = vld [vmem:[%s18957_s5 + $0x94] ss:$12 sps:$4 sm:$0xff]  }
 0x3b3   :  { %v4265_v45 = vpop.f32.mrf.mxu0  ;;  %v4315_v59 = vmax.f32 %v3563_v56, %v4246_v22  ;;  %v3549_v20 = vadd.f32 %v19225_v51, %v19224_v29  ;;  %v4311_v43 = vmax.f32 %v3553_v41, %v4236_v18  ;;  %v19227_v31 = vld [vmem:[#allocation73_spill] sm:$0xff]  ;;  %v12142_v56 = vld [vmem:[%s18956_s4 + $0x50] ss:$8 sps:$4 sm:$0xff]   ;;  %v12182_v11 = vld [vmem:[%s18957_s5 + $0x34] ss:$12 sps:$4 sm:$0xff]  }
 0x3b4   :  { %v4322_v49 = vmax.f32 %v3581_v2, %v4264_v0  ;;  %v4266_v14 = vadd.f32 %v4265_v45, %v4092_v27  ;;  %v3543_v0 = vadd.f32 %v19227_v31, %v19226_v35  ;;  %v4305_v63 = vmax.f32 %v3539_v17, %v4222_v46  ;;  %v12118_v45 = vld [vmem:[%s18956_s4 + $0x10] ss:$8 sps:$4 sm:$0xff]   ;;  %v12131_v22 = vld [vmem:[%s18956_s4 + $0xa0] ss:$8 sps:$4 sm:$0xff]   ;;  %v12140_v19 = vld [vmem:[%s18956_s4 + $0xc4] ss:$8 sps:$4 sm:$0xff]  }
 0x3b5   :  { %v4347_v2 = vpack.c.bf16 %v4315_v59, %v4313_v53  ;;  %v4309_v21 = vmax.f32 %v3549_v20, %v4232_v62  ;;  %v12143_v34 = vld [vmem:[%s18956_s4 + $0xc0] ss:$8 sps:$4 sm:$0xff]   ;;  %v12144_v13 = vld [vmem:[%s18956_s4 + $0x64] ss:$8 sps:$4 sm:$0xff]   ;;  %v12159_v41 = vld [vmem:[%s18957_s5 + $0x210] ss:$12 sps:$4 sm:$0xff]  }
 0x3b6   :  { %v4350_v15 = vpack.c.bf16 %v4322_v49, %v4320_v28  ;;  %v4323_v47 = vmax.f32 %v3583_v36, %v4266_v14  ;;  %v4307_v16 = vmax.f32 %v3543_v0, %v4226_v4  ;;  %v3529_v36 = vadd.f32 %v19233_v5, %v19232_v12  ;;  %v12122_v28 = vld [vmem:[%s18956_s4 + $0x94] ss:$8 sps:$4 sm:$0xff]   ;;  %v12124_v49 = vld [vmem:[%s18956_s4 + $0x20] ss:$8 sps:$4 sm:$0xff]   ;;  %v12125_v14 = vld [vmem:[%s18956_s4 + $0x90] ss:$8 sps:$4 sm:$0xff]  }
 0x3b7   :  { %v4345_v10 = vpack.c.bf16 %v4311_v43, %v4309_v21  ;;  %v12150_v37 = vld [vmem:[%s18957_s5 + $0xa8] ss:$12 sps:$4 sm:$0xff]   ;;  %v12152_v18 = vld [vmem:[%s18957_s5 + $0xac] ss:$12 sps:$4 sm:$0xff]   ;;  %v12170_v43 = vld [vmem:[%s18957_s5 + $0x64] ss:$12 sps:$4 sm:$0xff]  }
 0x3b8   :  { %v4351_v39 = vpack.c.bf16 %v4323_v47, %v4321_v60  ;;  %v4343_v1 = vpack.c.bf16 %v4307_v16, %v4305_v63  ;;  %v4301_v23 = vmax.f32 %v3529_v36, %v4212_v7  ;;  %v12134_v60 = vld [vmem:[%s18956_s4 + $0xb4] ss:$8 sps:$4 sm:$0xff]   ;;  %v12137_v47 = vld [vmem:[%s18956_s4 + $0xb0] ss:$8 sps:$4 sm:$0xff]   ;;  %v12168_v4 = vld [vmem:[%s18957_s5 + $0x60] ss:$12 sps:$4 sm:$0xff]  }
 0x3b9   :  { %v12153_v59 = vld [vmem:[%s18957_s5 + $0x228] ss:$12 sps:$4 sm:$0xff]   ;;  %v12162_v53 = vld [vmem:[%s18957_s5 + $0x78] ss:$12 sps:$4 sm:$0xff]   ;;  %v12180_v25 = vld [vmem:[%s18957_s5 + $0x30] ss:$12 sps:$4 sm:$0xff]  }
 0x3ba   :  { %4470 = vmatprep.subr.bf16.mxu1 %v4351_v39  ;;  %4672 = vmatprep.subr.bf16.mxu0 %v4351_v39  ;;  %v12146_v39 = vld [vmem:[%s18956_s4 + $0xd4] ss:$8 sps:$4 sm:$0xff]   ;;  %v12165_v51 = vld [vmem:[%s18957_s5 + $0x1f8] ss:$12 sps:$4 sm:$0xff]   ;;  %v12195_v5 = vld [vmem:[%s18957_s5 + $0x180] ss:$12 sps:$4 sm:$0xff]  }
 0x3bb   :  { %4471 = vmatpush2.bf16.msra.mxu1 %v4350_v15  ;;  %4673 = vmatpush2.bf16.msra.mxu0 %v4350_v15  ;;  %v12136_v15 = vld [vmem:[%s18956_s4 + $0x40] ss:$8 sps:$4 sm:$0xff]   ;;  %v12173_v35 = vld [vmem:[%s18957_s5 + $0x1e4] ss:$12 sps:$4 sm:$0xff]   ;;  %v12176_v0 = vld [vmem:[%s18957_s5 + $0x4c] ss:$12 sps:$4 sm:$0xff]  }
 0x3bc   :  { %4472 = vmatprep.subr.bf16.mxu1 %v4349_v54  ;;  %4674 = vmatprep.subr.bf16.mxu0 %v4349_v54  ;;  %v12155_v54 = vld [vmem:[%s18957_s5 + $0x22c] ss:$12 sps:$4 sm:$0xff]   ;;  %v12161_v62 = vld [vmem:[%s18957_s5 + $0x214] ss:$12 sps:$4 sm:$0xff]   ;;  %v12164_v29 = vld [vmem:[%s18957_s5 + $0x7c] ss:$12 sps:$4 sm:$0xff]  }
 0x3bd   :  { %v12167_v20 = vld [vmem:[%s18957_s5 + $0x1fc] ss:$12 sps:$4 sm:$0xff]   ;;  %v12179_v21 = vld [vmem:[%s18957_s5 + $0x1cc] ss:$12 sps:$4 sm:$0xff]   ;;  %v12194_v7 = vld [vmem:[%s18957_s5 + $0x4] ss:$12 sps:$4 sm:$0xff]  }
 0x3be   :  { %v12174_v31 = vld [vmem:[%s18957_s5 + $0x48] ss:$12 sps:$4 sm:$0xff]   ;;  %v12183_v17 = vld [vmem:[%s18957_s5 + $0x1b0] ss:$12 sps:$4 sm:$0xff]   ;;  %v12186_v16 = vld [vmem:[%s18957_s5 + $0x18] ss:$12 sps:$4 sm:$0xff]  }
 0x3bf   :  { %4473 = vmatpush2.bf16.msra.mxu1 %v4348_v26  ;;  %4675 = vmatpush2.bf16.msra.mxu0 %v4348_v26  ;;  %v19230_v26 = vld [vmem:[#allocation23_spill] sm:$0xff]  ;;  %v12177_v46 = vld [vmem:[%s18957_s5 + $0x1c8] ss:$12 sps:$4 sm:$0xff]   ;;  %v12197_v36 = vld [vmem:[%s18957_s5 + $0x184] ss:$12 sps:$4 sm:$0xff]  }
 0x3c0   :  { %4474 = vmatprep.subr.bf16.mxu1 %v4347_v2  ;;  %4676 = vmatprep.subr.bf16.mxu0 %v4347_v2  ;;  %v3533_v30 = vadd.f32 %v19231_v58, %v19230_v26  ;;  %v12171_v2 = vld [vmem:[%s18957_s5 + $0x1e0] ss:$12 sps:$4 sm:$0xff]   ;;  %v12189_v26 = vld [vmem:[%s18957_s5 + $0x198] ss:$12 sps:$4 sm:$0xff]   ;;  %v12191_v58 = vld [vmem:[%s18957_s5 + $0x19c] ss:$12 sps:$4 sm:$0xff]  }
 0x3c2   :  { %v4303_v27 = vmax.f32 %v3533_v30, %v4216_v55  ;;  %v12185_v55 = vld [vmem:[%s18957_s5 + $0x1b4] ss:$12 sps:$4 sm:$0xff]  }
 0x3c3   :  { %4475 = vmatpush2.bf16.msra.mxu1 %v15889_v44  ;;  %4677 = vmatpush2.bf16.msra.mxu0 %v15889_v44  ;;  %v12192_v30 = vld [vmem:[%s18957_s5] ss:$12 sps:$4 sm:$0xff]  }
 0x3c4   :  { %4476 = vmatprep.subr.bf16.mxu1 %v4345_v10  ;;  %4678 = vmatprep.subr.bf16.mxu0 %v4345_v10  ;;  %v4341_v44 = vpack.c.bf16 %v4303_v27, %v4301_v23  ;;  %v12188_v10 = vld [vmem:[%s18957_s5 + $0x1c] ss:$12 sps:$4 sm:$0xff]   ;;  %v12200_v23 = vld [vmem:[%s18957_s5 + $0x16c] ss:$12 sps:$4 sm:$0xff]  }
 0x3c7   :  { %4477 = vmatpush2.bf16.msra.mxu1 %v15871_v6  ;;  %4679 = vmatpush2.bf16.msra.mxu0 %v15871_v6  ;;  %v12114_v6 = vld [vmem:[%s18956_s4 + $0x14] ss:$8 sps:$4 sm:$0xff]  }
 0x3c8   :  { %4478 = vmatprep.subr.bf16.mxu1 %v4343_v1  ;;  %4680 = vmatprep.subr.bf16.mxu0 %v4343_v1  ;;  %v12198_v1 = vld [vmem:[%s18957_s5 + $0x168] ss:$12 sps:$4 sm:$0xff]  }
 0x3cb   :  { %4479 = vmatpush2.bf16.msra.mxu1 %v15847_v38  ;;  %4681 = vmatpush2.bf16.msra.mxu0 %v15847_v38  ;;  %v12116_v38 = vld [vmem:[%s18956_s4 + $0x84] ss:$8 sps:$4 sm:$0xff]  }
 0x3cc   :  { %4480 = vmatprep.subr.bf16.mxu1 %v4341_v44  ;;  %4682 = vmatprep.subr.bf16.mxu0 %v4341_v44 }
 0x3cf   :  { %4481 = vmatpush2.bf16.msra.mxu1 %v15811_v3  ;;  %4683 = vmatpush2.bf16.msra.mxu0 %v15811_v3  ;;  %v12119_v3 = vld [vmem:[%s18956_s4 + $0x80] ss:$8 sps:$4 sm:$0xff]  }
 0x3d0   :  { %7200 = vmatprep.subr.bf16.mxu1 %v12152_v18  ;;  %7283 = vmatprep.subr.bf16.mxu0 %v12155_v54 }
 0x3d2   :  { %4483 = vmatmul.mubr.bf16.vlgmr.msra.gmra.mxu1 %v12108_v8  ;;  %4685 = vmatmul.mubr.bf16.vlgmr.msra.gmra.mxu0 %v12111_v61 }
 0x3d3   :  { %10913 = vmatprep.mubr.msk.bf16.mxu1 %vm55_vm1, %v12114_v6  ;;  %10948 = vmatprep.mubr.msk.bf16.mxu0 %vm55_vm1, %v12116_v38  ;;  %v12201_v6 = vld [vmem:[%s18957_s5 + $0x2e8] ss:$12 sps:$4 sm:$0xff]  }
 0x3d4   :  { %7201 = vmatpush1.bf16.msra.mxu1 %v12150_v37  ;;  %7284 = vmatpush1.bf16.msra.mxu0 %v12153_v59  ;;  %v12212_v37 = vld [vmem:[%s18957_s5 + $0x13c] ss:$12 sps:$4 sm:$0xff]  }
 0x3d5   :  { %7202 = vmatprep.subr.bf16.mxu1 %v12158_v40  ;;  %7285 = vmatprep.subr.bf16.mxu0 %v12161_v62  ;;  %v12215_v62 = vld [vmem:[%s18957_s5 + $0x2bc] ss:$12 sps:$4 sm:$0xff]  }
 0x3d8   :  { %7203 = vmatpush1.bf16.msra.mxu1 %v12156_v24  ;;  %7286 = vmatpush1.bf16.msra.mxu0 %v12159_v41 }
 0x3d9   :  { %7204 = vmatprep.subr.bf16.mxu1 %v12164_v29  ;;  %7287 = vmatprep.subr.bf16.mxu0 %v12167_v20 }
 0x3da   :  { %4493 = vmatmul.mubr.bf16.gmra.mxu1 %v12118_v45  ;;  %4695 = vmatmul.mubr.bf16.gmra.mxu0 %v12119_v3  ;;  %v12203_v3 = vld [vmem:[%s18957_s5 + $0x2ec] ss:$12 sps:$4 sm:$0xff]  }
 0x3db   :  { %10914 = vmatprep.mubr.msk.bf16.mxu1 %vm55_vm1, %v12120_v33  ;;  %10949 = vmatprep.mubr.msk.bf16.mxu0 %vm55_vm1, %v12122_v28  ;;  %v12204_v28 = vld [vmem:[%s18957_s5 + $0x150] ss:$12 sps:$4 sm:$0xff]  }
 0x3dc   :  { %7205 = vmatpush1.bf16.msra.mxu1 %v12162_v53  ;;  %7288 = vmatpush1.bf16.msra.mxu0 %v12165_v51  ;;  %v12213_v51 = vld [vmem:[%s18957_s5 + $0x2b8] ss:$12 sps:$4 sm:$0xff]  }
 0x3dd   :  { %7206 = vmatprep.subr.bf16.mxu1 %v12170_v43  ;;  %7289 = vmatprep.subr.bf16.mxu0 %v12173_v35  ;;  %v12216_v35 = vld [vmem:[%s18957_s5 + $0x120] ss:$12 sps:$4 sm:$0xff]  }
 0x3e0   :  { %7207 = vmatpush1.bf16.msra.mxu1 %v12168_v4  ;;  %7290 = vmatpush1.bf16.msra.mxu0 %v12171_v2 }
 0x3e1   :  { %7208 = vmatprep.subr.bf16.mxu1 %v12176_v0  ;;  %7291 = vmatprep.subr.bf16.mxu0 %v12179_v21 }
 0x3e2   :  { %4503 = vmatmul.mubr.bf16.gmra.mxu1 %v12124_v49  ;;  %4705 = vmatmul.mubr.bf16.gmra.mxu0 %v12125_v14 }
 0x3e3   :  { %10915 = vmatprep.mubr.msk.bf16.mxu1 %vm55_vm1, %v12126_v42  ;;  %10950 = vmatprep.mubr.msk.bf16.mxu0 %vm55_vm1, %v12128_v9  ;;  %v12206_v42 = vld [vmem:[%s18957_s5 + $0x154] ss:$12 sps:$4 sm:$0xff]  }
 0x3e4   :  { %7209 = vmatpush1.bf16.msra.mxu1 %v12174_v31  ;;  %7292 = vmatpush1.bf16.msra.mxu0 %v12177_v46  ;;  %v12218_v31 = vld [vmem:[%s18957_s5 + $0x124] ss:$12 sps:$4 sm:$0xff]  }
 0x3e5   :  { %7210 = vmatprep.subr.bf16.mxu1 %v12182_v11  ;;  %7293 = vmatprep.subr.bf16.mxu0 %v12185_v55 }
 0x3e8   :  { %7211 = vmatpush1.bf16.msra.mxu1 %v12180_v25  ;;  %7294 = vmatpush1.bf16.msra.mxu0 %v12183_v17 }
 0x3e9   :  { %7212 = vmatprep.subr.bf16.mxu1 %v12188_v10  ;;  %7295 = vmatprep.subr.bf16.mxu0 %v12191_v58 }
 0x3ea   :  { %4513 = vmatmul.mubr.bf16.gmra.mxu1 %v12130_v50  ;;  %4715 = vmatmul.mubr.bf16.gmra.mxu0 %v12131_v22 }
 0x3eb   :  { %10916 = vmatprep.mubr.msk.bf16.mxu1 %vm55_vm1, %v12132_v57  ;;  %10951 = vmatprep.mubr.msk.bf16.mxu0 %vm55_vm1, %v12134_v60 }
 0x3ec   :  { %7213 = vmatpush1.bf16.msra.mxu1 %v12186_v16  ;;  %7296 = vmatpush1.bf16.msra.mxu0 %v12189_v26  ;;  %v12221_v16 = vld [vmem:[%s18957_s5 + $0x2a4] ss:$12 sps:$4 sm:$0xff]  }
 0x3ed   :  { %7214 = vmatprep.subr.bf16.mxu1 %v12194_v7  ;;  %7297 = vmatprep.subr.bf16.mxu0 %v12197_v36  ;;  %v12219_v7 = vld [vmem:[%s18957_s5 + $0x2a0] ss:$12 sps:$4 sm:$0xff]   ;;  %v12222_v36 = vld [vmem:[%s18957_s5 + $0x108] ss:$12 sps:$4 sm:$0xff]  }
 0x3f0   :  { %7215 = vmatpush1.bf16.msra.mxu1 %v12192_v30  ;;  %7298 = vmatpush1.bf16.msra.mxu0 %v12195_v5 }
 0x3f1   :  { %7216 = vmatprep.subr.bf16.mxu1 %v12200_v23  ;;  %7299 = vmatprep.subr.bf16.mxu0 %v12203_v3 }
 0x3f2   :  { %4523 = vmatmul.mubr.bf16.gmra.mxu1 %v12136_v15  ;;  %4725 = vmatmul.mubr.bf16.gmra.mxu0 %v12137_v47 }
 0x3f3   :  { %10917 = vmatprep.mubr.msk.bf16.mxu1 %vm55_vm1, %v12138_v48  ;;  %10952 = vmatprep.mubr.msk.bf16.mxu0 %vm55_vm1, %v12140_v19  ;;  %v12209_v48 = vld [vmem:[%s18957_s5 + $0x2d4] ss:$12 sps:$4 sm:$0xff]  }
 0x3f4   :  { %7217 = vmatpush2.bf16.msra.mxu1 %v12198_v1  ;;  %7300 = vmatpush2.bf16.msra.mxu0 %v12201_v6  ;;  %v12227_v6 = vld [vmem:[%s18957_s5 + $0x28c] ss:$12 sps:$4 sm:$0xff]  }
 0x3f5   :  { %7218 = vmatprep.subr.bf16.mxu1 %v12206_v42  ;;  %7301 = vmatprep.subr.bf16.mxu0 %v12209_v48 }
 0x3f8   :  { %7219 = vmatpush2.bf16.msra.mxu1 %v12204_v28 }
 0x3f9   :  { %7220 = vmatprep.subr.bf16.mxu1 %v12212_v37 }
 0x3fa   :  { %4533 = vmatmul.mubr.bf16.gmra.mxu1 %v12142_v56  ;;  %4735 = vmatmul.mubr.bf16.gmra.mxu0 %v12143_v34  ;;  %v12207_v56 = vld [vmem:[%s18957_s5 + $0x2d0] ss:$12 sps:$4 sm:$0xff]  }
 0x3fb   :  { %10918 = vmatprep.mubr.msk.bf16.mxu1 %vm55_vm1, %v12144_v13  ;;  %10953 = vmatprep.mubr.msk.bf16.mxu0 %vm55_vm1, %v12146_v39 }
 0x3fc   :  { %7302 = vmatpush2.bf16.msra.mxu0 %v12207_v56  ;;  %v12228_v56 = vld [vmem:[%s18957_s5 + $0xf0] ss:$12 sps:$4 sm:$0xff]  }
 0x3fd   :  { %7303 = vmatprep.subr.bf16.mxu0 %v12215_v62 }
 0x400   :  { %7304 = vmatpush2.bf16.msra.mxu0 %v12213_v51 }
 0x401   :  { %7305 = vmatprep.subr.bf16.mxu0 %v12221_v16 }
 0x402   :  { %4543 = vmatmul.mubr.bf16.gmra.mxu1 %v12148_v32  ;;  %4745 = vmatmul.mubr.bf16.gmra.mxu0 %v12149_v52  ;;  %v12210_v52 = vld [vmem:[%s18957_s5 + $0x138] ss:$12 sps:$4 sm:$0xff]  }
 0x403   :  { %7221 = vmatpush2.bf16.msra.mxu1 %v12210_v52 }
 0x404   :  { %7222 = vmatprep.subr.bf16.mxu1 %v12218_v31  ;;  %7306 = vmatpush2.bf16.msra.mxu0 %v12219_v7 }
 0x405   :  { %7307 = vmatprep.subr.bf16.mxu0 %v12227_v6 }
 0x407   :  { %7223 = vmatpush2.bf16.msra.mxu1 %v12216_v35 }
 0x492   :  { %v4484_v63 = vpop.f32.mrf.mxu1  ;;  %v4686_v12 = vpop.f32.mrf.mxu0 }
 0x493   :  { %v16134_v27 = vmax.f32 %v4484_v63, %v4686_v12 }
 0x494   :  { %v4486_v44 = vpop.f32.mrf.mxu1  ;;  %v4688_v8 = vpop.f32.mrf.mxu0 }
 0x495   :  { %4783 = vst [vmem:[#allocation3] sm:$0xff] %v16134_v27  ;;  %v16143_v61 = vmax.f32 %v4486_v44, %v4688_v8  ;;  %v4880_v9 = vrot.slane %v16134_v27, 4  ;;  %v4793_v34 = vrot.slane %v16134_v27, 1  ;;  %v4855_v53 = vrot.slane %v16134_v27, 3  ;;  %v12225_v8 = vld [vmem:[%s18957_s5 + $0x288] ss:$12 sps:$4 sm:$0xff]  }
 0x496   :  { %v4488_v38 = vpop.f32.mrf.mxu1  ;;  %v4690_v45 = vpop.f32.mrf.mxu0  ;;  %v4824_v20 = vrot.slane %v16134_v27, 2  ;;  %v12224_v27 = vld [vmem:[%s18957_s5 + $0x10c] ss:$12 sps:$4 sm:$0xff]   ;;  %7308 = vmatpush2.bf16.msra.mxu0 %v12225_v8 }
 0x497   :  { %4784 = vst.msk [vmem:[#allocation3 + $0x8] sm:$0xff] %vm55_vm1, %v16143_v61  ;;  %v16153_v33 = vmax.f32 %v4488_v38, %v4690_v45  ;;  %v4883_v46 = vrot.slane %v16143_v61, 4  ;;  %v4827_v11 = vrot.slane %v16143_v61, 2  ;;  %v4858_v58 = vrot.slane %v16143_v61, 3  ;;  %7224 = vmatprep.subr.bf16.mxu1 %v12224_v27 }
 0x498   :  { %v4490_v49 = vpop.f32.mrf.mxu1  ;;  %v4692_v14 = vpop.f32.mrf.mxu0  ;;  %v4796_v1 = vrot.slane %v16143_v61, 1  ;;  %7225 = vmatpush2.bf16.msra.mxu1 %v12222_v36 }
 0x499   :  { %4785 = vst [vmem:[#allocation3 + $0x48] sm:$0x3] %v16153_v33  ;;  %v4881_v50 = vrot.slane %v16153_v33, 4  ;;  %v4856_v22 = vrot.slane %v16153_v33, 3  ;;  %v4794_v57 = vrot.slane %v16153_v33, 1  ;;  %v16166_v60 = vmax.f32 %v4490_v49, %v4692_v14 }
 0x49a   :  { %v4696_v15 = vpop.f32.mrf.mxu0  ;;  %v4494_v47 = vpop.f32.mrf.mxu1  ;;  %v4825_v18 = vrot.slane %v16153_v33, 2  ;;  %v4912_v38 = vrot.slane %v16153_v33, 5  ;;  %v12230_v33 = vld [vmem:[%s18957_s5 + $0xf4] ss:$12 sps:$4 sm:$0xff]  }
 0x49b   :  { %v4882_v19 = vsel %vm168_vm0, %v4880_v9, %v4881_v50  ;;  %4892 = vst [vmem:[#allocation3 + $0x80] sm:$0x3] %v4881_v50  ;;  %4865 = vrot.lane.b32.xlu0 %v4856_v22, %s12625_s17  ;;  %4803 = vrot.lane.b32.xlu1 %v4794_v57, %s12624_s23  ;;  %v16178_v13 = vmax.f32 %v4494_v47, %v4696_v15  ;;  %4787 = vst.msk [vmem:[#allocation3 + $0x50] sm:$0x3] %vm4786_vm2, %v16166_v60  ;;  %v4828_v10 = vrot.slane %v16166_v60, 2 }
 0x49c   :  { %4890 = vst [vmem:[#allocation3 + $0x38] sm:$0xff] %v4882_v19  ;;  %v4496_v39 = vpop.f32.mrf.mxu1  ;;  %v4698_v32 = vpop.f32.mrf.mxu0  ;;  %v4795_v54 = vsel %vm4792_vm3, %v4793_v34, %v4794_v57  ;;  %v4857_v21 = vsel %vm4854_vm10, %v4855_v53, %v4856_v22  ;;  %v4826_v25 = vsel %vm4823_vm11, %v4824_v20, %v4825_v18  ;;  %v4797_v26 = vrot.slane %v16166_v60, 1  ;;  %7226 = vmatprep.subr.bf16.mxu1 %v12230_v33 }
 0x49d   :  { %v16189_v59 = vmax.f32 %v4496_v39, %v4698_v32  ;;  %v4896_v24 = vrot.slane %v16178_v13, 4  ;;  %5003 = vst [vmem:[#allocation3 + $0x80] sm:$0xfc] %v16178_v13  ;;  %v4859_v63 = vrot.slane %v16166_v60, 3  ;;  %v4913_v45 = vrot.slane %v16178_v13, 5  ;;  %7227 = vmatpush2.bf16.msra.mxu1 %v12228_v56 }
 0x49e   :  { %v4498_v40 = vpop.f32.mrf.mxu1  ;;  %v4700_v41 = vpop.f32.mrf.mxu0  ;;  %v4915_v3 = vrot.slane %v16166_v60, 5  ;;  %v4829_v14 = vsel %vm4823_vm11, %v4827_v11, %v4828_v10  ;;  %v4798_v42 = vsel %vm4792_vm3, %v4796_v1, %v4797_v26  ;;  %v4978_v57 = vrot.slane %v16178_v13, 7 }
 0x49f   :  { %4834 = vrot.lane.b32.xlu1 %v4825_v18, %s12623_s22  ;;  %4799 = vrot.lane.b32.xlu0 %v4795_v54, %s12624_s23  ;;  %v16200_v29 = vmax.f32 %v4498_v40, %v4700_v41  ;;  %5004 = vst.msk [vmem:[#allocation3 + $0x88] sm:$0xfc] %vm4905_vm13, %v16189_v59  ;;  %v4897_v4 = vsel %vm168_vm0, %v4881_v50, %v4896_v24  ;;  %4907 = vst [vmem:[#allocation3 + $0x90] sm:$0xf] %v4896_v24  ;;  %v4947_v15 = vrot.slane %v16178_v13, 6 }
 0x4a0   :  { %v4702_v43 = vpop.f32.mrf.mxu0  ;;  %v4500_v2 = vpop.f32.mrf.mxu1  ;;  %4904 = vst [vmem:[#allocation3 + $0x48] sm:$0xfc] %v4897_v4  ;;  %v4860_v22 = vsel %vm4854_vm10, %v4858_v58, %v4859_v63  ;;  %v4916_v47 = vrot.slane %v16189_v59, 5  ;;  %v4948_v34 = vrot.slane %v16189_v59, 6  ;;  %v16289_v37 = vsel %vm4911_vm14, %v4912_v38, %v4913_v45  ;;  %v12231_v4 = vld [vmem:[%s18957_s5 + $0x270] ss:$12 sps:$4 sm:$0xff]  }
 0x4a1   :  { %5005 = vst [vmem:[#allocation3 + $0xc8] ss:$-52 sps:$4 sm:$0xff] %v16200_v29   ;;  %v16216_v0 = vmax.f32 %v4500_v2, %v4702_v43  ;;  %v4918_v39 = vrot.slane %v16200_v29, 5  ;;  %v4979_v18 = vrot.slane %v16189_v59, 7  ;;  %v4949_v54 = vrot.slane %v16200_v29, 6 }
 0x4a2   :  { %v4504_v17 = vpop.f32.mrf.mxu1  ;;  %v4706_v55 = vpop.f32.mrf.mxu0  ;;  %v4980_v24 = vrot.slane %v16200_v29, 7  ;;  %v5014_v53 = vrot.slane %v16200_v29, 1  ;;  %v12233_v43 = vld [vmem:[%s18957_s5 + $0x274] ss:$12 sps:$4 sm:$0xff]   ;;  %v5044_v35 = vrot.slane %v16200_v29, 2 }
 0x4a3   :  { %4861 = vrot.lane.b32.xlu1 %v4857_v21, %s12625_s17  ;;  %4830 = vrot.lane.b32.xlu0 %v4826_v25, %s12623_s22  ;;  %5006 = vst.msk [vmem:[#allocation3 + $0xd0] sm:$0xf] %vm19234_vm15, %v16216_v0  ;;  %v16234_v30 = vmax.f32 %v4504_v17, %v4706_v55  ;;  %v4920_v51 = vrot.slane %v16216_v0, 5  ;;  %v4951_v31 = vrot.slane %v16216_v0, 6  ;;  %v4982_v21 = vrot.slane %v16216_v0, 7 }
 0x4a4   :  { %5008 = vst.msk [vmem:[#allocation3 + $0x98] sm:$0xf0] %vm19235_vm7, %v16216_v0  ;;  %v4708_v12 = vpop.f32.mrf.mxu0  ;;  %v4506_v5 = vpop.f32.mrf.mxu1  ;;  %v16314_v17 = vsel %vm4911_vm14, %v4915_v3, %v4916_v47  ;;  %v16317_v55 = vsel %vm4911_vm14, %v4913_v45, %v4918_v39  ;;  %7309 = vmatprep.subr.bf16.mxu0 %v12233_v43  ;;  %v12236_v58 = vld [vmem:[%s18957_s5 + $0xdc] ss:$12 sps:$4 sm:$0xff]   ;;  %v16332_v7 = vsel %vm4946_vm8, %v4947_v15, %v4949_v54  ;;  %v12237_v38 = vld [vmem:[%s18957_s5 + $0x258] ss:$12 sps:$4 sm:$0xff]  }
 0x4a5   :  { %5009 = vst [vmem:[#allocation3 + $0xd8] sm:$0x3f] %v16234_v30  ;;  %v5105_v23 = vrot.slane %v16234_v30, 4  ;;  %v16249_v44 = vmax.f32 %v4506_v5, %v4708_v12  ;;  %v19011_v2 = vrot.slane %v16234_v30, 1  ;;  %v5076_v12 = vrot.slane %v16200_v29, 3  ;;  %7310 = vmatpush2.bf16.msra.mxu0 %v12231_v4  ;;  %7228 = vmatprep.subr.bf16.mxu1 %v12236_v58 }
 0x4a6   :  { %v4508_v28 = vpop.f32.mrf.mxu1  ;;  %v4710_v49 = vpop.f32.mrf.mxu0  ;;  %v16344_v1 = vsel %vm4911_vm14, %v4916_v47, %v4920_v51  ;;  %v12239_v45 = vld [vmem:[%s18957_s5 + $0x25c] ss:$12 sps:$4 sm:$0xff]   ;;  %v19009_v3 = vrot.slane %v16234_v30, 2  ;;  %v12242_v39 = vld [vmem:[%s18957_s5 + $0xc4] ss:$12 sps:$4 sm:$0xff]  }
 0x4a7   :  { %4836 = vrot.lane.b32.xlu1 %v4828_v10, %s12623_s22  ;;  %4805 = vrot.lane.b32.xlu0 %v4797_v26, %s12624_s23  ;;  %5115 = vst [vmem:[#allocation3 + $0xc8] sm:$0xf0] %v5105_v23  ;;  %v5106_v9 = vrot.slane %v16249_v44, 4  ;;  %v16265_v50 = vmax.f32 %v4508_v28, %v4710_v49  ;;  %5011 = vst.msk [vmem:[#allocation3 + $0xe0] sm:$0x3f] %vm5010_vm9, %v16249_v44  ;;  %v16362_v28 = vsel %vm4946_vm8, %v4948_v34, %v4951_v31 }
 0x4a8   :  { %v4712_v48 = vpop.f32.mrf.mxu0  ;;  %v4510_v19 = vpop.f32.mrf.mxu1  ;;  %v12234_v26 = vld [vmem:[%s18957_s5 + $0xd8] ss:$12 sps:$4 sm:$0xff]   ;;  %v16372_v47 = vsel %vm4792_vm3, %v5014_v53, %v19011_v2  ;;  %7311 = vmatprep.subr.bf16.mxu0 %v12239_v45 }
 0x4a9   :  { %5116 = vst.msk [vmem:[#allocation3 + $0xd0] sm:$0xf0] %vm19235_vm7, %v5106_v9  ;;  %v5107_v32 = vrot.slane %v16265_v50, 4  ;;  %5219 = vst [vmem:[#allocation3 + $0x110] sm:$0xc0] %v16265_v50  ;;  %v16286_v52 = vmax.f32 %v4510_v19, %v4712_v48  ;;  %v19008_v48 = vrot.slane %v16234_v30, 3  ;;  %v16378_v19 = vsel %vm4977_vm4, %v4979_v18, %v4982_v21  ;;  %7229 = vmatpush2.bf16.msra.mxu1 %v12234_v26 }
 0x4aa   :  { %v4716_v40 = vpop.f32.mrf.mxu0  ;;  %v4514_v41 = vpop.f32.mrf.mxu1  ;;  %7312 = vmatpush2.bf16.msra.mxu0 %v12237_v38  ;;  %v12245_v13 = vld [vmem:[%s18957_s5 + $0x244] ss:$12 sps:$4 sm:$0xff]   ;;  %7230 = vmatprep.subr.bf16.mxu1 %v12242_v39  ;;  %vm19236_vm7 = vmmov %vm19234_vm15 }
 0x4ab   :  { %4867 = vrot.lane.b32.xlu1 %v4859_v63, %s12625_s17  ;;  %4832 = vrot.lane.b32.xlu0 %v4829_v14, %s12623_s22  ;;  %v5108_v62 = vsel %vm168_vm0, %v5105_v23, %v5107_v32  ;;  %5129 = vst [vmem:[#allocation3 + $0xd8] sm:$0xc0] %v5107_v32  ;;  %v16299_v20 = vmax.f32 %v4514_v41, %v4716_v40  ;;  %5220 = vst.msk [vmem:[#allocation3 + $0x118] sm:$0xc0] %vm5130_vm12, %v16286_v52  ;;  %v19005_v27 = vrot.slane %v16286_v52, 5 }
 0x4ac   :  { %5117 = vst [vmem:[#allocation3 + $0x110] sm:$0x3f] %v5108_v62  ;;  %v4516_v25 = vpop.f32.mrf.mxu1  ;;  %v4718_v11 = vpop.f32.mrf.mxu0  ;;  %v16337_v63 = vsel %vm4977_vm4, %v4978_v57, %v4980_v24  ;;  %v19004_v6 = vrot.slane %v16286_v52, 7  ;;  %7313 = vmatprep.subr.bf16.mxu0 %v12245_v13 }
 0x4ad   :  { %v5121_v16 = vrot.slane %v16299_v20, 4  ;;  %5221 = vst [vmem:[#allocation3 + $0x158] sm:$0xff] %v16299_v20  ;;  %v16321_v10 = vmax.f32 %v4516_v25, %v4718_v11 }
 0x4ae   :  { %v4518_v5 = vpop.f32.mrf.mxu1  ;;  %v4720_v36 = vpop.f32.mrf.mxu0 }
 0x4af   :  { %4863 = vrot.lane.b32.xlu0 %v4860_v22, %s12625_s17  ;;  %4801 = vrot.lane.b32.xlu1 %v4798_v42, %s12624_s23  ;;  %v5122_v23 = vsel %vm168_vm0, %v5107_v32, %v5121_v16  ;;  %5222 = vst.msk [vmem:[#allocation3 + $0x160] sm:$0xff] %vm55_vm1, %v16321_v10  ;;  %v16349_v8 = vmax.f32 %v4518_v5, %v4720_v36  ;;  %v5138_v42 = vrot.slane %v16321_v10, 5  ;;  %v5198_v33 = vrot.slane %v16321_v10, 7  ;;  %v12240_v22 = vld [vmem:[%s18957_s5 + $0xc0] ss:$12 sps:$4 sm:$0xff]  }
 0x4b0   :  { %5132 = vst [vmem:[#allocation3 + $0x120] sm:$0xff] %v5122_v23  ;;  %v4722_v49 = vpop.f32.mrf.mxu0  ;;  %v4520_v14 = vpop.f32.mrf.mxu1  ;;  %v5017_v32 = vrot.slane %v16216_v0, 1  ;;  %v4884_v16 = vrot.slane %v16166_v60, 4  ;;  %7231 = vmatpush2.bf16.msra.mxu1 %v12240_v22 }
 0x4b1   :  { %5223 = vst [vmem:[#allocation3 + $0x168] sm:$0xff] %v16349_v8  ;;  %v16381_v56 = vmax.f32 %v4520_v14, %v4722_v49  ;;  %v5311_v54 = vrot.slane %v16349_v8, 4  ;;  %v5231_v41 = vrot.slane %v16349_v8, 1  ;;  %v16392_v62 = vsel %vm4911_vm14, %v19005_v27, %v5138_v42 }
 0x4b2   :  { %v4524_v24 = vpop.f32.mrf.mxu1  ;;  %v4726_v40 = vpop.f32.mrf.mxu0  ;;  %v5259_v51 = vrot.slane %v16349_v8, 2  ;;  %v5287_v4 = vrot.slane %v16349_v8, 3  ;;  %v16409_v43 = vsel %vm4977_vm4, %v19004_v6, %v5198_v33  ;;  %v4885_v60 = vsel %vm168_vm0, %v4883_v46, %v4884_v16  ;;  %4893 = vst.msk [vmem:[#allocation3 + $0x88] sm:$0x3] %vm4786_vm2, %v4884_v16 }
 0x4b3   :  { %4984 = vrot.lane.b32.xlu1 %v4978_v57, %s12625_s17  ;;  %4953 = vrot.lane.b32.xlu0 %v4947_v15, %s12623_s22  ;;  %5224 = vst.msk [vmem:[#allocation3 + $0x170] sm:$0xff] %vm55_vm1, %v16381_v56  ;;  %v16402_v53 = vmax.f32 %v4524_v24, %v4726_v40  ;;  %v12243_v57 = vld [vmem:[%s18957_s5 + $0x240] ss:$12 sps:$4 sm:$0xff]   ;;  %v5234_v21 = vrot.slane %v16381_v56, 1  ;;  %v5262_v25 = vrot.slane %v16381_v56, 2  ;;  %v5290_v11 = vrot.slane %v16381_v56, 3 }
 0x4b4   :  { %v4728_v15 = vpop.f32.mrf.mxu0  ;;  %v4526_v31 = vpop.f32.mrf.mxu1  ;;  %v4898_v49 = vrot.slane %v16189_v59, 4  ;;  %7314 = vmatpush2.bf16.msra.mxu0 %v12243_v57  ;;  %4891 = vst.msk [vmem:[#allocation3 + $0x40] sm:$0xff] %vm55_vm1, %v4885_v60 }
 0x4b5   :  { %5225 = vst [vmem:[#allocation3 + $0x1b0] sm:$0x3] %v16402_v53  ;;  %v5312_v26 = vrot.slane %v16402_v53, 4  ;;  %v19003_v58 = vrot.slane %v16402_v53, 1  ;;  %v16424_v5 = vmax.f32 %v4526_v31, %v4728_v15  ;;  %v18998_v36 = vrot.slane %v16402_v53, 2 }
 0x4b6   :  { %v4528_v23 = vpop.f32.mrf.mxu1  ;;  %v4730_v8 = vpop.f32.mrf.mxu0  ;;  %v18994_v38 = vrot.slane %v16402_v53, 3  ;;  %v5341_v45 = vrot.slane %v16402_v53, 5  ;;  %4908 = vst.msk [vmem:[#allocation3 + $0x98] sm:$0xf] %vm19234_vm15, %v4898_v49  ;;  %vm19237_vm15 = vcmask 785412  }
 0x4b7   :  { %4922 = vrot.lane.b32.xlu0 %v16289_v37, %s12624_s23  ;;  %4924 = vrot.lane.b32.xlu1 %v16314_v17, %s12624_s23  ;;  %v5313_v14 = vsel %vm168_vm0, %v5311_v54, %v5312_v26  ;;  %5323 = vst [vmem:[#allocation3 + $0x1e8] sm:$0x3] %v5312_v26  ;;  %v16442_v61 = vsel %vm4792_vm3, %v5231_v41, %v19003_v58  ;;  %v18997_v42 = vrot.slane %v16424_v5, 1  ;;  %5226 = vst.msk [vmem:[#allocation3 + $0x1b8] sm:$0x3] %vm4786_vm2, %v16424_v5 }
 0x4b8   :  { %v16444_v46 = vmax.f32 %v4528_v23, %v4730_v8  ;;  %5321 = vst [vmem:[#allocation3 + $0x1a0] sm:$0xff] %v5313_v14  ;;  %v4732_v37 = vpop.f32.mrf.mxu0  ;;  %v16453_v17 = vsel %vm4823_vm11, %v5259_v51, %v18998_v36  ;;  %v4530_v33 = vpop.f32.mrf.mxu1  ;;  %v16458_v22 = vsel %vm4854_vm10, %v5287_v4, %v18994_v38  ;;  %v18995_v39 = vrot.slane %v16424_v5, 2 }
 0x4b9   :  { %v18993_v54 = vrot.slane %v16424_v5, 3  ;;  %v16465_v40 = vmax.f32 %v4530_v33, %v4732_v37  ;;  %v16470_v41 = vsel %vm4792_vm3, %v5234_v21, %v18997_v42  ;;  %v5344_v23 = vrot.slane %v16424_v5, 5 }
 0x4ba   :  { %v5327_v24 = vrot.slane %v16444_v46, 4  ;;  %5425 = vst [vmem:[#allocation3 + $0x1e8] sm:$0xfc] %v16444_v46  ;;  %v18996_v51 = vrot.slane %v16444_v46, 6  ;;  %v4534_v4 = vpop.f32.mrf.mxu1  ;;  %v4736_v57 = vpop.f32.mrf.mxu0  ;;  %v16476_v13 = vsel %vm4823_vm11, %v5262_v25, %v18995_v39  ;;  %v5342_v31 = vrot.slane %v16444_v46, 5 }
 0x4bb   :  { %v16481_v15 = vsel %vm4854_vm10, %v5290_v11, %v18993_v54  ;;  %4955 = vrot.lane.b32.xlu0 %v4948_v34, %s12623_s22  ;;  %4926 = vrot.lane.b32.xlu1 %v16317_v55, %s12624_s23  ;;  %v16491_v25 = vmax.f32 %v4534_v4, %v4736_v57  ;;  %v5345_v8 = vrot.slane %v16465_v40, 5  ;;  %v4899_v11 = vsel %vm168_vm0, %v4884_v16, %v4898_v49 }
 0x4bc   :  { %v5328_v21 = vsel %vm168_vm0, %v5312_v26, %v5327_v24  ;;  %5337 = vst [vmem:[#allocation3 + $0x1f8] sm:$0xf] %v5327_v24  ;;  %5426 = vst.msk [vmem:[#allocation3 + $0x1f0] sm:$0xfc] %vm4905_vm13, %v16465_v40  ;;  %v16502_v34 = vsel %vm4823_vm11, %v5044_v35, %v19009_v3  ;;  %v5018_v55 = vrot.slane %v16249_v44, 1  ;;  %v4738_v26 = vpop.f32.mrf.mxu0  ;;  %v4536_v60 = vpop.f32.mrf.mxu1  ;;  %v16506_v14 = vsel %vm4911_vm14, %v5341_v45, %v5342_v31 }
 0x4bd   :  { %5335 = vst [vmem:[#allocation3 + $0x1b0] sm:$0xfc] %v5328_v21  ;;  %4906 = vst.msk [vmem:[#allocation3 + $0x50] sm:$0xfc] %vm4905_vm13, %v4899_v11  ;;  %v19000_v16 = vrot.slane %v16465_v40, 6  ;;  %v16511_v49 = vmax.f32 %v4536_v60, %v4738_v26  ;;  %v5347_v37 = vrot.slane %v16491_v25, 5  ;;  %v16515_v35 = vsel %vm4911_vm14, %v5344_v23, %v5345_v8 }
 0x4be   :  { %5427 = vst [vmem:[#allocation3 + $0x230] ss:$-52 sps:$4 sm:$0xff] %v16491_v25   ;;  %v5375_v33 = vrot.slane %v16491_v25, 6  ;;  %v16523_v45 = vsel %vm4854_vm10, %v5076_v12, %v19008_v48  ;;  %v4538_v24 = vpop.f32.mrf.mxu1  ;;  %v4740_v4 = vpop.f32.mrf.mxu0  ;;  %v5435_v57 = vrot.slane %v16491_v25, 1  ;;  %v5463_v21 = vrot.slane %v16491_v25, 2 }
 0x4bf   :  { %v18999_v11 = vrot.slane %v16444_v46, 7  ;;  %4986 = vrot.lane.b32.xlu0 %v4979_v18, %s12625_s17  ;;  %4957 = vrot.lane.b32.xlu1 %v16332_v7, %s12623_s22  ;;  %5428 = vst.msk [vmem:[#allocation3 + $0x238] sm:$0xf] %vm19236_vm7, %v16511_v49  ;;  %v16537_v29 = vmax.f32 %v4538_v24, %v4740_v4  ;;  %v16540_v12 = vsel %vm4911_vm14, %v5342_v31, %v5347_v37  ;;  %v5349_v59 = vrot.slane %v16511_v49, 5  ;;  %vm19238_vm7 = vmmov %vm19237_vm15 }
 0x4c0   :  { %5430 = vst.msk [vmem:[#allocation3 + $0x200] sm:$0xf0] %vm19237_vm15, %v16511_v49  ;;  %v16545_v23 = vsel %vm4946_vm8, %v18996_v51, %v5375_v33  ;;  %v4742_v18 = vpop.f32.mrf.mxu0  ;;  %v4540_v7 = vpop.f32.mrf.mxu1  ;;  %v5438_v26 = vrot.slane %v16511_v49, 1  ;;  %v5377_v60 = vrot.slane %v16511_v49, 6  ;;  %v5466_v54 = vrot.slane %v16511_v49, 2 }
 0x4c1   :  { %v5403_v24 = vrot.slane %v16491_v25, 7  ;;  %5431 = vst [vmem:[#allocation3 + $0x240] sm:$0x3f] %v16537_v29  ;;  %v5521_v31 = vrot.slane %v16537_v29, 4  ;;  %v16554_v37 = vmax.f32 %v4540_v7, %v4742_v18  ;;  %v16557_v33 = vsel %vm4911_vm14, %v5345_v8, %v5349_v59 }
 0x4c2   :  { %v19002_v4 = vrot.slane %v16537_v29, 1  ;;  %v4544_v38 = vpop.f32.mrf.mxu1  ;;  %v4746_v39 = vpop.f32.mrf.mxu0  ;;  %v19001_v51 = vrot.slane %v16537_v29, 2  ;;  %v16564_v42 = vsel %vm4946_vm8, %v19000_v16, %v5377_v60  ;;  %v5493_v18 = vrot.slane %v16491_v25, 3 }
 0x4c3   :  { %v16569_v36 = vsel %vm4977_vm4, %v18999_v11, %v5403_v24  ;;  %4988 = vrot.lane.b32.xlu1 %v16337_v63, %s12625_s17  ;;  %5020 = vrot.lane.b32.xlu0 %v16372_v47, %s12624_s23  ;;  %5531 = vst [vmem:[#allocation3 + $0x230] sm:$0xf0] %v5521_v31  ;;  %v19010_v8 = vrot.slane %v16554_v37, 4  ;;  %v16582_v7 = vmax.f32 %v4544_v38, %v4746_v39  ;;  %v19006_v60 = vrot.slane %v16554_v37, 1 }
 0x4c4   :  { %v16580_v59 = vsel %vm4792_vm3, %v5435_v57, %v19002_v4  ;;  %5432 = vst.msk [vmem:[#allocation3 + $0x248] sm:$0x3f] %vm5010_vm9, %v16554_v37  ;;  %v4546_v25 = vpop.f32.mrf.mxu1  ;;  %v4748_v63 = vpop.f32.mrf.mxu0  ;;  %v16590_v47 = vsel %vm4823_vm11, %v5463_v21, %v19001_v51  ;;  %v19007_v24 = vrot.slane %v16554_v37, 2  ;;  %v5494_v11 = vrot.slane %v16537_v29, 3 }
 0x4c5   :  { %v19012_v57 = vrot.slane %v16465_v40, 7  ;;  %5532 = vst.msk [vmem:[#allocation3 + $0x238] sm:$0xf0] %vm19238_vm7, %v19010_v8  ;;  %v5523_v39 = vrot.slane %v16582_v7, 4  ;;  %5629 = vst [vmem:[#allocation3 + $0x278] sm:$0xc0] %v16582_v7  ;;  %v16601_v16 = vmax.f32 %v4546_v25, %v4748_v63  ;;  %v16606_v21 = vsel %vm4792_vm3, %v5438_v26, %v19006_v60 }
 0x4c6   :  { %v4548_v51 = vpop.f32.mrf.mxu1  ;;  %v4750_v4 = vpop.f32.mrf.mxu0  ;;  %v19014_v58 = vrot.slane %v16582_v7, 5  ;;  %v16612_v6 = vsel %vm4823_vm11, %v5466_v54, %v19007_v24  ;;  %v16615_v27 = vsel %vm4854_vm10, %v5493_v18, %v5494_v11  ;;  %v5405_v25 = vrot.slane %v16511_v49, 7 }
 0x4c7   :  { %4928 = vrot.lane.b32.xlu1 %v16344_v1, %s12624_s23  ;;  %5050 = vrot.lane.b32.xlu0 %v16502_v34, %s12623_s22  ;;  %v5524_v26 = vsel %vm168_vm0, %v5521_v31, %v5523_v39  ;;  %5545 = vst [vmem:[#allocation3 + $0x240] sm:$0xc0] %v5523_v39  ;;  %v4781_v63 = vmax.f32 %v4548_v51, %v4750_v4  ;;  %v5550_v60 = vrot.slane %v16601_v16, 5  ;;  %v19013_v54 = vrot.slane %v16582_v7, 6 }
 0x4c8   :  { %5630 = vst.msk [vmem:[#allocation3 + $0x280] sm:$0xc0] %vm5130_vm12, %v16601_v16  ;;  %5533 = vst [vmem:[#allocation3 + $0x278] sm:$0x3f] %v5524_v26  ;;  %v4550_v18 = vpop.f32.mrf.mxu1  ;;  %v4752_v24 = vpop.f32.mrf.mxu0  ;;  %v16630_v1 = vsel %vm4977_vm4, %v19012_v57, %v5405_v25  ;;  %v5496_v34 = vrot.slane %v16511_v49, 3  ;;  %v5497_v31 = vrot.slane %v16554_v37, 3 }
 0x4c9   :  { %v5605_v51 = vrot.slane %v16582_v7, 7  ;;  %v5537_v4 = vrot.slane %v4781_v63, 4  ;;  %5631 = vst [vmem:[#allocation3 + $0x2c0] sm:$0xff] %v4781_v63  ;;  %v4782_v48 = vmax.f32 %v4550_v18, %v4752_v24  ;;  %v5551_v3 = vrot.slane %v4781_v63, 5 }
 0x4ca   :  { %v5579_v8 = vrot.slane %v4781_v63, 6  ;;  %v16636_v26 = vsel %vm4854_vm10, %v5496_v34, %v5497_v31  ;;  %v19016_v2 = vrot.slane %v16601_v16, 6  ;;  %v5109_v38 = vrot.slane %v16286_v52, 4 }
 0x4cb   :  { %v5499_v25 = vrot.slane %v16582_v7, 3  ;;  %4959 = vrot.lane.b32.xlu1 %v16362_v28, %s12623_s22  ;;  %5086 = vrot.lane.b32.xlu0 %v16523_v45, %s12625_s17  ;;  %v5538_v49 = vsel %vm168_vm0, %v5523_v39, %v5537_v4  ;;  %5632 = vst.msk [vmem:[#allocation3 + $0x2c8] sm:$0xff] %vm55_vm1, %v4782_v48  ;;  %v16650_v24 = vsel %vm4911_vm14, %v19014_v58, %v5551_v3  ;;  %v5553_v34 = vrot.slane %v4782_v48, 5 }
 0x4cc   :  { %v16655_v18 = vsel %vm4946_vm8, %v19013_v54, %v5579_v8  ;;  %v5019_v28 = vsel %vm4792_vm3, %v5017_v32, %v5018_v55  ;;  %v5048_v45 = vrot.slane %v16249_v44, 2  ;;  %5547 = vst [vmem:[#allocation3 + $0x288] sm:$0xff] %v5538_v49  ;;  %v5110_v3 = vsel %vm168_vm0, %v5106_v9, %v5109_v38  ;;  %5131 = vst.msk [vmem:[#allocation3 + $0xe0] sm:$0xc0] %vm5130_vm12, %v5109_v38 }
 0x4cd   :  { %v5581_v39 = vrot.slane %v4782_v48, 6  ;;  %v16670_v8 = vsel %vm4911_vm14, %v5550_v60, %v5553_v34  ;;  %5118 = vst.msk [vmem:[#allocation3 + $0x118] sm:$0x3f] %vm5010_vm9, %v5110_v3  ;;  %v16674_v4 = vsel %vm4854_vm10, %v5494_v11, %v5499_v25  ;;  %v5501_v32 = vrot.slane %v16601_v16, 3 }
 0x4ce   :  { %v5607_v49 = vrot.slane %v4781_v63, 7  ;;  %v5314_v57 = vrot.slane %v16381_v56, 4  ;;  %v19015_v54 = vrot.slane %v16601_v16, 7  ;;  %v5609_v58 = vrot.slane %v4782_v48, 7 }
 0x4cf   :  { %v16681_v9 = vsel %vm4946_vm8, %v19016_v2, %v5581_v39  ;;  %4990 = vrot.lane.b32.xlu1 %v16378_v19, %s12625_s17  ;;  %5022 = vrot.lane.b32.xlu0 %v5019_v28, %s12624_s23  ;;  %v16688_v11 = vsel %vm4854_vm10, %v5497_v31, %v5501_v32  ;;  %v5123_v25 = vrot.slane %v16321_v10, 4  ;;  %v5315_v34 = vrot.slane %v16424_v5, 4 }
 0x4d0   :  { %v16693_v56 = vsel %vm4977_vm4, %v5605_v51, %v5607_v49  ;;  %v16698_v63 = vsel %vm4977_vm4, %v19015_v54, %v5609_v58  ;;  %v5079_v19 = vrot.slane %v16216_v0, 3  ;;  %v5329_v28 = vrot.slane %v16465_v40, 4 }
 0x4d1   :  { %v5525_v31 = vrot.slane %v16601_v16, 4  ;;  %v5539_v3 = vrot.slane %v4782_v48, 4  ;;  %v19239_v39 = vrot.slane %v16216_v0, 2  ;;  %v5080_v49 = vrot.slane %v16249_v44, 3  ;;  %5324 = vst.msk [vmem:[#allocation3 + $0x1f0] sm:$0x3] %vm4786_vm2, %v5315_v34 }
 0x4d2   :  { %v5124_v58 = vsel %vm168_vm0, %v5109_v38, %v5123_v25  ;;  %v5316_v54 = vsel %vm168_vm0, %v5314_v57, %v5315_v34  ;;  %v19240_v2 = vrot.slane %v16234_v30, 1  ;;  %v5330_v0 = vsel %vm168_vm0, %v5315_v34, %v5329_v28 }
 0x4d3   :  { %v5049_v32 = vsel %vm4823_vm11, %v19239_v39, %v5048_v45  ;;  %5133 = vst.msk [vmem:[#allocation3 + $0x128] sm:$0xff] %vm55_vm1, %v5124_v58  ;;  %5322 = vst.msk [vmem:[#allocation3 + $0x1a8] sm:$0xff] %vm55_vm1, %v5316_v54  ;;  %vm19241_vm11 = vcmask 781312   ;;  %v19242_v48 = vrot.slane %v16554_v37, 4  ;;  %v5540_v38 = vsel %vm168_vm0, %v5525_v31, %v5539_v3 }
 0x4d4   :  { %5024 = vrot.lane.b32.xlu1 %v19240_v2, %s12624_s23  ;;  %5052 = vrot.lane.b32.xlu0 %v5049_v32, %s12623_s22  ;;  %5338 = vst.msk [vmem:[#allocation3 + $0x200] sm:$0xf] %vm19241_vm11, %v5329_v28  ;;  %v5081_v2 = vsel %vm4854_vm10, %v5079_v19, %v5080_v49  ;;  %v19243_v54 = vrot.slane %v16234_v30, 2  ;;  %v5134_v25 = vrot.slane %v16265_v50, 5  ;;  %v5164_v34 = vrot.slane %v16265_v50, 6 }
 0x4d5   :  { %v5526_v57 = vsel %vm168_vm0, %v19242_v48, %v5525_v31  ;;  %5546 = vst.msk [vmem:[#allocation3 + $0x248] sm:$0xc0] %vm5130_vm12, %v5525_v31  ;;  %v5082_v28 = vrot.slane %v16265_v50, 3  ;;  %v5194_v19 = vrot.slane %v16265_v50, 7  ;;  %v5084_v31 = vrot.slane %v16286_v52, 3 }
 0x4d6   :  { %5336 = vst.msk [vmem:[#allocation3 + $0x1b8] sm:$0xfc] %vm4905_vm13, %v5330_v0  ;;  %v19244_v3 = vrot.slane %v16234_v30, 3  ;;  %v5136_v44 = vrot.slane %v16299_v20, 5  ;;  %v5165_v50 = vrot.slane %v16286_v52, 6  ;;  %v5166_v30 = vrot.slane %v16299_v20, 6 }
 0x4d7   :  { %5534 = vst.msk [vmem:[#allocation3 + $0x280] sm:$0x3f] %vm5010_vm9, %v5526_v57  ;;  %v5196_v58 = vrot.slane %v16299_v20, 7  ;;  %v19246_v48 = vrot.slane %v16286_v52, 7  ;;  %v5168_v20 = vrot.slane %v16321_v10, 6  ;;  %v19247_v10 = vrot.slane %v16402_v53, 1 }
 0x4d8   :  { %5548 = vst.msk [vmem:[#allocation3 + $0x290] sm:$0xff] %vm55_vm1, %v5540_v38  ;;  %5054 = vrot.lane.b32.xlu1 %v19243_v54, %s12623_s22  ;;  %5088 = vrot.lane.b32.xlu0 %v5081_v2, %s12625_s17  ;;  %v5083_v39 = vsel %vm4854_vm10, %v19244_v3, %v5082_v28  ;;  %v5137_v32 = vsel %vm4911_vm14, %v5134_v25, %v5136_v44  ;;  %vm4818_vm0 = vcmask 1042176   ;;  %vm4849_vm9 = vcmask 1041920  }
 0x4d9   :  { %v5167_v0 = vsel %vm4946_vm8, %v5164_v34, %v5166_v30  ;;  %v5197_v57 = vsel %vm4977_vm4, %v5194_v19, %v5196_v58  ;;  %v5169_v38 = vsel %vm4946_vm8, %v5165_v50, %v5168_v20  ;;  %vm4821_vm4 = vcmask 517120  }
 0x4da   :  { %vm19022_vm8 = vcmask 254976   ;;  %vm19252_vm12 = vcmask 261120   ;;  %vm19254_vm14 = vcmask 1047808   ;;  %v19255_v28 = vrot.slane %v16537_v29, 2 }
 0x4db   :  { %vm19253_vm13 = vmmov %vm19252_vm12  ;;  %vm19258_vm3 = vcmask 1048064   ;;  %vm4938_vm15 = vcmask 1048322   ;;  %vm4941_vm7 = vcmask 523266   ;;  %vm4969_vm11 = vcmask 1048066  }
 0x4dc   :  { %5026 = vrot.lane.b32.xlu1 %v5018_v55, %s12624_s23  ;;  %5140 = vrot.lane.b32.xlu0 %v5134_v25, %s12624_s23  ;;  %v5085_v55 = vsel %vm4854_vm10, %v5080_v49, %v5084_v31  ;;  %v12248_v49 = vld [vmem:[%s18957_s5 + $0x3ac] ss:$12 sps:$4 sm:$0xff]   ;;  %vm19018_vm10 = vcmask 1041664   ;;  %vm19257_vm2 = vmmov %vm19252_vm12 }
 0x4dd   :  { %7366 = vmatprep.subr.bf16.mxu1 %v12248_v49  ;;  %v5633_v49 = vld [vmem:[#allocation3] sm:$0xff] }
 0x4e0   :  { %5056 = vrot.lane.b32.xlu1 %v5048_v45, %s12623_s22  ;;  %5170 = vrot.lane.b32.xlu0 %v5164_v34, %s12623_s22  ;;  %v19245_v45 = vrot.slane %v16286_v52, 5  ;;  %v12257_v52 = vld [vmem:[%s18957_s5 + $0x52c] ss:$12 sps:$4 sm:$0xff]  }
 0x4e1   :  { %7449 = vmatprep.subr.bf16.mxu0 %v12257_v52 }
 0x4e4   :  { %5200 = vrot.lane.b32.xlu0 %v5194_v19, %s12625_s17  ;;  %5090 = vrot.lane.b32.xlu1 %v5083_v39, %s12625_s17 }
 0x4e8   :  { %5142 = vrot.lane.b32.xlu0 %v19245_v45, %s12624_s23  ;;  %5092 = vrot.lane.b32.xlu1 %v5085_v55, %s12625_s17  ;;  %v19259_v55 = vrot.slane %v16582_v7, 5 }
 0x4ec   :  { %5172 = vrot.lane.b32.xlu0 %v5165_v50, %s12623_s22  ;;  %5144 = vrot.lane.b32.xlu1 %v5137_v32, %s12624_s23 }
 0x4f0   :  { %5202 = vrot.lane.b32.xlu0 %v19246_v48, %s12625_s17  ;;  %5174 = vrot.lane.b32.xlu1 %v5167_v0, %s12623_s22  ;;  %v5642_v0 = vld [vmem:[#allocation3 + $0x48] sm:$0xff] }
 0x4f4   :  { %5204 = vrot.lane.b32.xlu1 %v5197_v57, %s12625_s17  ;;  %5237 = vrot.lane.b32.xlu0 %v16442_v61, %s12624_s23  ;;  %v19250_v61 = vrot.slane %v16444_v46, 6 }
 0x4f8   :  { %5146 = vrot.lane.b32.xlu1 %v16392_v62, %s12624_s23  ;;  %5265 = vrot.lane.b32.xlu0 %v16453_v17, %s12623_s22  ;;  %v19248_v62 = vrot.slane %v16402_v53, 2 }
 0x4fc   :  { %5176 = vrot.lane.b32.xlu1 %v5169_v38, %s12623_s22  ;;  %5293 = vrot.lane.b32.xlu0 %v16458_v22, %s12625_s17  ;;  %v12246_v38 = vld [vmem:[%s18957_s5 + $0x3a8] ss:$12 sps:$4 sm:$0xff]  }
 0x500   :  { %5206 = vrot.lane.b32.xlu1 %v16409_v43, %s12625_s17  ;;  %5239 = vrot.lane.b32.xlu0 %v16470_v41, %s12624_s23  ;;  %v19249_v43 = vrot.slane %v16424_v5, 1 }
 0x504   :  { %5241 = vrot.lane.b32.xlu1 %v19247_v10, %s12624_s23  ;;  %5267 = vrot.lane.b32.xlu0 %v16476_v13, %s12623_s22 }
 0x508   :  { %5269 = vrot.lane.b32.xlu1 %v19248_v62, %s12623_s22  ;;  %5295 = vrot.lane.b32.xlu0 %v16481_v15, %s12625_s17 }
 0x50c   :  { %5243 = vrot.lane.b32.xlu1 %v19249_v43, %s12624_s23  ;;  %5379 = vrot.lane.b32.xlu0 %v19250_v61, %s12623_s22 }
 0x50d   :  { %v4866_v17 = vpop.permute.xlu0 %4865  ;;  %v4804_v22 = vpop.permute.xlu1 %4803 }
 0x50e   :  { %4819 = vst.msk [vmem:[#allocation3 + $0x50] sm:$0x3] %vm4818_vm0, %v4804_v22 }
 0x510   :  { %5351 = vrot.lane.b32.xlu0 %v16506_v14, %s12624_s23  ;;  %5355 = vrot.lane.b32.xlu1 %v16540_v12, %s12624_s23 }
 0x511   :  { %v4835_v41 = vpop.permute.xlu1 %4834  ;;  %v4800_v13 = vpop.permute.xlu0 %4799 }
 0x512   :  { %4815 = vst.msk [vmem:[#allocation3 + $0x8] sm:$0xff] %vm19027_vm5, %v4800_v13 }
 0x514   :  { %5353 = vrot.lane.b32.xlu0 %v16515_v35, %s12624_s23  ;;  %5383 = vrot.lane.b32.xlu1 %v16545_v23, %s12623_s22  ;;  %v19251_v23 = vrot.slane %v16537_v29, 1 }
 0x515   :  { %v4862_v15 = vpop.permute.xlu1 %4861  ;;  %v4831_v2 = vpop.permute.xlu0 %4830 }
 0x518   :  { %5357 = vrot.lane.b32.xlu1 %v16557_v33, %s12624_s23  ;;  %5441 = vrot.lane.b32.xlu0 %v16580_v59, %s12624_s23 }
 0x519   :  { %v4837_v14 = vpop.permute.xlu1 %4836  ;;  %v4806_v12 = vpop.permute.xlu0 %4805  ;;  %v5634_v20 = vld [vmem:[#allocation3 + $0x8] sm:$0xff] }
 0x51a   :  { %v4839_v54 = vsel %vm83_vm6, %v4835_v41, %v4837_v14  ;;  %v4808_v35 = vsel %vm55_vm1, %v4804_v22, %v4806_v12  ;;  %4822 = vst.msk [vmem:[#allocation3 + $0x60] sm:$0x3] %vm4821_vm4, %v4806_v12  ;;  %v12249_v12 = vld [vmem:[%s18957_s5 + $0x390] ss:$12 sps:$4 sm:$0xff]  }
 0x51b   :  { %4853 = vst.msk [vmem:[#allocation3 + $0x70] sm:$0x3] %vm19022_vm8, %v4837_v14  ;;  %4851 = vst [vmem:[#allocation3 + $0x68] sm:$0x3] %v4839_v54  ;;  %v12263_v14 = vld [vmem:[%s18957_s5 + $0x514] ss:$12 sps:$4 sm:$0xff]  }
 0x51c   :  { %4820 = vst [vmem:[#allocation3 + $0x58] sm:$0x3] %v4808_v35  ;;  %4850 = vst.msk [vmem:[#allocation3 + $0x60] sm:$0x3] %vm4849_vm9, %v4835_v41  ;;  %5445 = vrot.lane.b32.xlu1 %v19251_v23, %s12624_s23  ;;  %5469 = vrot.lane.b32.xlu0 %v16590_v47, %s12623_s22  ;;  %v19256_v47 = vrot.slane %v16554_v37, 1  ;;  %v19265_v54 = vrot.slane %v16402_v53, 3 }
 0x51d   :  { %4878 = vst.msk [vmem:[#allocation3 + $0x70] sm:$0x3] %vm19018_vm10, %v4866_v17  ;;  %v4868_v33 = vpop.permute.xlu1 %4867  ;;  %v4833_v59 = vpop.permute.xlu0 %4832  ;;  %v12254_v35 = vld [vmem:[%s18957_s5 + $0x37c] ss:$12 sps:$4 sm:$0xff]   ;;  %vm5069_vm10 = vcmask 1046016   ;;  %vm19282_vm8 = vcmask 261120  }
 0x51e   :  { %v4870_v25 = vsel %vm19252_vm12, %v4866_v17, %v4868_v33  ;;  %v4838_v34 = vsel %vm83_vm6, %v4831_v2, %v4833_v59  ;;  %4848 = vst.msk [vmem:[#allocation3 + $0x28] sm:$0xff] %vm19253_vm13, %v4833_v59  ;;  %vm19019_vm12 = vcmask 261122   ;;  %vm19017_vm13 = vcmask 1047810   ;;  %v12261_v23 = vld [vmem:[%s18957_s5 + $0x510] ss:$12 sps:$4 sm:$0xff]  }
 0x51f   :  { %4879 = vst [vmem:[#allocation3 + $0x78] sm:$0x3] %v4870_v25  ;;  %4847 = vst [vmem:[#allocation3 + $0x20] sm:$0xff] %v4838_v34  ;;  %v16883_v17 = vpack.c.bf16 %v5642_v0, %v5633_v49  ;;  %v12269_v53 = vld [vmem:[%s18957_s5 + $0x4fc] ss:$12 sps:$4 sm:$0xff]   ;;  %v19268_v34 = vrot.slane %v16444_v46, 7 }
 0x520   :  { %4875 = vst.msk [vmem:[#allocation3 + $0x28] sm:$0xff] %vm19254_vm14, %v4862_v15  ;;  %5473 = vrot.lane.b32.xlu1 %v19255_v28, %s12623_s22  ;;  %5447 = vrot.lane.b32.xlu0 %v19256_v47, %s12624_s23  ;;  %vm19262_vm14 = vcmask 1044224   ;;  %v12260_v28 = vld [vmem:[%s18957_s5 + $0x364] ss:$12 sps:$4 sm:$0xff]   ;;  %v19278_v0 = vrot.slane %v16554_v37, 2 }
 0x521   :  { %v4864_v19 = vpop.permute.xlu0 %4863  ;;  %v4802_v31 = vpop.permute.xlu1 %4801  ;;  %v12267_v47 = vld [vmem:[%s18957_s5 + $0x4f8] ss:$12 sps:$4 sm:$0xff]   ;;  %v12270_v49 = vld [vmem:[%s18957_s5 + $0x330] ss:$12 sps:$4 sm:$0xff]  }
 0x522   :  { %v4869_v3 = vsel %vm19257_vm2, %v4862_v15, %v4864_v19  ;;  %v4807_v39 = vsel %vm55_vm1, %v4800_v13, %v4802_v31  ;;  %4817 = vst.msk [vmem:[#allocation3 + $0x18] sm:$0xff] %vm83_vm6, %v4802_v31  ;;  %v12251_v13 = vld [vmem:[%s18957_s5 + $0x394] ss:$12 sps:$4 sm:$0xff]   ;;  %v12293_v37 = vld [vmem:[%s18957_s5 + $0x49c] ss:$12 sps:$4 sm:$0xff]  }
 0x523   :  { %4876 = vst [vmem:[#allocation3 + $0x30] sm:$0xff] %v4869_v3  ;;  %4846 = vst.msk [vmem:[#allocation3 + $0x18] sm:$0xff] %vm19258_vm3, %v4831_v2  ;;  %vm19264_vm3 = vcmask 1048324   ;;  %v12258_v3 = vld [vmem:[%s18957_s5 + $0x360] ss:$12 sps:$4 sm:$0xff]  }
 0x524   :  { %5443 = vrot.lane.b32.xlu0 %v16606_v21, %s12624_s23  ;;  %5557 = vrot.lane.b32.xlu1 %v5550_v60, %s12624_s23  ;;  %v19260_v60 = vrot.slane %v16582_v7, 6 }
 0x525   :  { %v4985_v29 = vpop.permute.xlu1 %4984  ;;  %v4954_v44 = vpop.permute.xlu0 %4953 }
 0x528   :  { %5555 = vrot.lane.b32.xlu0 %v19259_v55, %s12624_s23  ;;  %5559 = vrot.lane.b32.xlu1 %v16650_v24, %s12624_s23  ;;  %v19261_v24 = vrot.slane %v16424_v5, 2 }
 0x529   :  { %v4923_v45 = vpop.permute.xlu0 %4922  ;;  %v4925_v50 = vpop.permute.xlu1 %4924 }
 0x52a   :  { %4939 = vst.msk [vmem:[#allocation3 + $0x50] sm:$0xfc] %vm4938_vm15, %v4923_v45  ;;  %v4930_v21 = vsel %vm55_vm1, %v4923_v45, %v4925_v50 }
 0x52b   :  { %4942 = vst.msk [vmem:[#allocation3 + $0x60] sm:$0xfc] %vm4941_vm7, %v4925_v50  ;;  %4940 = vst [vmem:[#allocation3 + $0x58] sm:$0xfc] %v4930_v21  ;;  %v12264_v21 = vld [vmem:[%s18957_s5 + $0x348] ss:$12 sps:$4 sm:$0xff]  }
 0x52c   :  { %4970 = vst.msk [vmem:[#allocation3 + $0x60] sm:$0xfc] %vm4969_vm11, %v4954_v44  ;;  %5583 = vrot.lane.b32.xlu0 %v19260_v60, %s12623_s22  ;;  %5271 = vrot.lane.b32.xlu1 %v19261_v24, %s12623_s22  ;;  %v19275_v60 = vrot.slane %v16465_v40, 7  ;;  %v12272_v24 = vld [vmem:[%s18957_s5 + $0x334] ss:$12 sps:$4 sm:$0xff]  }
 0x52d   :  { %v4956_v30 = vpop.permute.xlu0 %4955  ;;  %v4927_v32 = vpop.permute.xlu1 %4926 }
 0x52e   :  { %v4961_v58 = vsel %vm83_vm6, %v4954_v44, %v4956_v30  ;;  %4943 = vst.msk [vmem:[#allocation3 + $0x98] sm:$0xf] %vm19262_vm14, %v4927_v32  ;;  %vm19266_vm14 = vcmask 519168   ;;  %v12273_v44 = vld [vmem:[%s18957_s5 + $0x4e0] ss:$12 sps:$4 sm:$0xff]  }
 0x52f   :  { %4973 = vst.msk [vmem:[#allocation3 + $0x70] sm:$0xfc] %vm19019_vm12, %v4956_v30  ;;  %4971 = vst [vmem:[#allocation3 + $0x68] sm:$0xfc] %v4961_v58  ;;  %v12279_v30 = vld [vmem:[%s18957_s5 + $0x4c8] ss:$12 sps:$4 sm:$0xff]  }
 0x530   :  { %5587 = vrot.lane.b32.xlu1 %v16655_v18, %s12623_s22  ;;  %5561 = vrot.lane.b32.xlu0 %v16670_v8, %s12624_s23  ;;  %4999 = vst.msk [vmem:[#allocation3 + $0x70] sm:$0xfc] %vm19017_vm13, %v4985_v29  ;;  %v5636_v18 = vld [vmem:[#allocation3 + $0x18] sm:$0xff]  ;;  %v19263_v8 = vrot.slane %v16465_v40, 6  ;;  %vm19023_vm13 = vcmask 1048326   ;;  %vm19021_vm12 = vcmask 1045760  }
 0x531   :  { %v4987_v48 = vpop.permute.xlu0 %4986  ;;  %v4958_v57 = vpop.permute.xlu1 %4957  ;;  %v5643_v52 = vld [vmem:[#allocation3 + $0x50] sm:$0xff] }
 0x532   :  { %v4992_v10 = vsel %vm19257_vm2, %v4985_v29, %v4987_v48  ;;  %v16876_v62 = vpack.c.bf16 %v5643_v52, %v5634_v20  ;;  %v5644_v61 = vld [vmem:[#allocation3 + $0x58] sm:$0xff]  ;;  %vm19267_vm2 = vcmask 1043968  }
 0x533   :  { %v5645_v43 = vld [vmem:[#allocation3 + $0x60] sm:$0xff]  ;;  %5000 = vst [vmem:[#allocation3 + $0x78] sm:$0xfc] %v4992_v10  ;;  %v16887_v41 = vpack.c.bf16 %v5644_v61, %v4807_v39  ;;  %v19271_v39 = vrot.slane %v16424_v5, 3  ;;  %v12266_v29 = vld [vmem:[%s18957_s5 + $0x34c] ss:$12 sps:$4 sm:$0xff]  }
 0x534   :  { %5385 = vrot.lane.b32.xlu1 %v16564_v42, %s12623_s22  ;;  %5381 = vrot.lane.b32.xlu0 %v19263_v8, %s12623_s22  ;;  %v16885_v22 = vpack.c.bf16 %v5645_v43, %v5636_v18  ;;  %v12255_v42 = vld [vmem:[%s18957_s5 + $0x528] ss:$12 sps:$4 sm:$0xff]   ;;  %v12281_v5 = vld [vmem:[%s18957_s5 + $0x4cc] ss:$12 sps:$4 sm:$0xff]   ;;  %v19280_v10 = vrot.slane %v16601_v16, 6 }
 0x535   :  { %7232 = vmatprep.mubr.bf16.mxu1 %v16876_v62  ;;  %v4989_v15 = vpop.permute.xlu1 %4988  ;;  %v5021_v2 = vpop.permute.xlu0 %5020  ;;  %v12278_v48 = vld [vmem:[%s18957_s5 + $0x31c] ss:$12 sps:$4 sm:$0xff]   ;;  %v12284_v18 = vld [vmem:[%s18957_s5 + $0x304] ss:$12 sps:$4 sm:$0xff]  }
 0x536   :  { %7233 = vmatmul.mubr.bf16.vlgmr.msra.gmra.mxu1 %v16883_v17  ;;  %7315 = vmatprep.mubr.bf16.mxu0 %v16885_v22  ;;  %5036 = vst.msk [vmem:[#allocation3 + $0x98] sm:$0xf0] %vm19264_vm3, %v5021_v2  ;;  %vm19269_vm3 = vcmask 257024   ;;  %v12291_v43 = vld [vmem:[%s18957_s5 + $0x498] ss:$12 sps:$4 sm:$0xff]  }
 0x537   :  { %7316 = vmatmul.mubr.bf16.vlgmr.msra.gmra.mxu0 %v16887_v41  ;;  %7367 = vmatpush1.bf16.msra.mxu1 %v12246_v38 }
 0x538   :  { %5297 = vrot.lane.b32.xlu1 %v19265_v54, %s12625_s17  ;;  %5471 = vrot.lane.b32.xlu0 %v16612_v6, %s12623_s22  ;;  %v12252_v6 = vld [vmem:[%s18957_s5 + $0x378] ss:$12 sps:$4 sm:$0xff]   ;;  %v5651_v54 = vld [vmem:[#allocation3 + $0x90] sm:$0xff] }
 0x539   :  { %7368 = vmatprep.subr.bf16.mxu1 %v12251_v13  ;;  %7450 = vmatpush1.bf16.msra.mxu0 %v12255_v42  ;;  %v4929_v33 = vpop.permute.xlu1 %4928  ;;  %v5051_v59 = vpop.permute.xlu0 %5050  ;;  %v12282_v13 = vld [vmem:[%s18957_s5 + $0x300] ss:$12 sps:$4 sm:$0xff]  }
 0x53a   :  { %7451 = vmatprep.subr.bf16.mxu0 %v12263_v14  ;;  %v4931_v25 = vsel %vm55_vm1, %v4927_v32, %v4929_v33  ;;  %4945 = vst.msk [vmem:[#allocation3 + $0xa8] sm:$0xf] %vm19266_vm14, %v4929_v33  ;;  %vm19270_vm14 = vcmask 1043712   ;;  %v12290_v42 = vld [vmem:[%s18957_s5 + $0x46c] ss:$12 sps:$4 sm:$0xff]  }
 0x53b   :  { %7369 = vmatpush1.bf16.msra.mxu1 %v12249_v12  ;;  %4944 = vst [vmem:[#allocation3 + $0xa0] sm:$0xf] %v4931_v25  ;;  %4974 = vst.msk [vmem:[#allocation3 + $0xa8] sm:$0xf] %vm19267_vm2, %v4958_v57  ;;  %vm19272_vm2 = vcmask 261120  }
 0x53c   :  { %5411 = vrot.lane.b32.xlu1 %v16569_v36, %s12625_s17  ;;  %5407 = vrot.lane.b32.xlu0 %v19268_v34, %s12625_s17  ;;  %v12275_v36 = vld [vmem:[%s18957_s5 + $0x4e4] ss:$12 sps:$4 sm:$0xff]   ;;  %v12288_v12 = vld [vmem:[%s18957_s5 + $0x468] ss:$12 sps:$4 sm:$0xff]  }
 0x53d   :  { %7370 = vmatprep.subr.bf16.mxu1 %v12254_v35  ;;  %7452 = vmatpush1.bf16.msra.mxu0 %v12261_v23  ;;  %v4960_v19 = vpop.permute.xlu1 %4959  ;;  %v5087_v31 = vpop.permute.xlu0 %5086  ;;  %v5660_v35 = vld [vmem:[#allocation3 + $0xd8] sm:$0xff]  ;;  %v12296_v23 = vld [vmem:[%s18957_s5 + $0x454] ss:$12 sps:$4 sm:$0xff]  }
 0x53e   :  { %7453 = vmatprep.subr.bf16.mxu0 %v12269_v53  ;;  %v4962_v46 = vsel %vm83_vm6, %v4958_v57, %v4960_v19  ;;  %4976 = vst.msk [vmem:[#allocation3 + $0xb8] sm:$0xf] %vm19269_vm3, %v4960_v19  ;;  %vm19273_vm3 = vcmask 523268   ;;  %v12285_v57 = vld [vmem:[%s18957_s5 + $0x4b0] ss:$12 sps:$4 sm:$0xff]  }
 0x53f   :  { %7371 = vmatpush1.bf16.msra.mxu1 %v12252_v6  ;;  %4975 = vst [vmem:[#allocation3 + $0xb0] sm:$0xf] %v4962_v46  ;;  %5001 = vst.msk [vmem:[#allocation3 + $0xb8] sm:$0xf] %vm19270_vm14, %v4989_v15  ;;  %vm19274_vm14 = vcmask 1048068   ;;  %v5652_v53 = vld [vmem:[#allocation3 + $0x98] sm:$0xff] }
 0x540   :  { %5299 = vrot.lane.b32.xlu1 %v19271_v39, %s12625_s17  ;;  %5503 = vrot.lane.b32.xlu0 %v16615_v27, %s12625_s17  ;;  %v12294_v6 = vld [vmem:[%s18957_s5 + $0x450] ss:$12 sps:$4 sm:$0xff]   ;;  %v12311_v34 = vld [vmem:[%s18957_s5 + $0x5d4] ss:$12 sps:$4 sm:$0xff]  }
 0x541   :  { %7372 = vmatprep.subr.bf16.mxu1 %v12260_v28  ;;  %7454 = vmatpush1.bf16.msra.mxu0 %v12267_v47  ;;  %v4991_v55 = vpop.permute.xlu1 %4990  ;;  %v5023_v45 = vpop.permute.xlu0 %5022  ;;  %v19281_v28 = vrot.slane %v16601_v16, 7  ;;  %v17070_v47 = vpack.c.bf16 %v5660_v35, %v5651_v54  ;;  %v12302_v19 = vld [vmem:[%s18957_s5 + $0x43c] ss:$12 sps:$4 sm:$0xff]   ;;  %v12336_v35 = vld [vmem:[%s18957_s5 + $0x558] ss:$12 sps:$4 sm:$0xff]  }
 0x542   :  { %7455 = vmatprep.subr.bf16.mxu0 %v12275_v36  ;;  %v4993_v50 = vsel %vm19272_vm2, %v4989_v15, %v4991_v55  ;;  %v5028_v27 = vsel %vm55_vm1, %v5021_v2, %v5023_v45  ;;  %5038 = vst.msk [vmem:[#allocation3 + $0xa8] sm:$0xf0] %vm19273_vm3, %v5023_v45  ;;  %vm5039_vm2 = vcmask 1046272   ;;  %vm19276_vm3 = vcmask 261124   ;;  %v12297_v15 = vld [vmem:[%s18957_s5 + $0x480] ss:$12 sps:$4 sm:$0xff]  }
 0x543   :  { %7373 = vmatpush1.bf16.msra.mxu1 %v12258_v3  ;;  %5002 = vst [vmem:[#allocation3 + $0xc0] sm:$0xf] %v4993_v50  ;;  %5037 = vst [vmem:[#allocation3 + $0xa0] sm:$0xf0] %v5028_v27  ;;  %v12309_v16 = vld [vmem:[%s18957_s5 + $0x5d0] ss:$12 sps:$4 sm:$0xff]  }
 0x544   :  { %5066 = vst.msk [vmem:[#allocation3 + $0xa8] sm:$0xf0] %vm19274_vm14, %v5051_v59  ;;  %5413 = vrot.lane.b32.xlu1 %v16630_v1, %s12625_s17  ;;  %5409 = vrot.lane.b32.xlu0 %v19275_v60, %s12625_s17  ;;  %v12287_v1 = vld [vmem:[%s18957_s5 + $0x4b4] ss:$12 sps:$4 sm:$0xff]   ;;  %vm19277_vm14 = vcmask 1047812  }
 0x545   :  { %7374 = vmatprep.subr.bf16.mxu1 %v12266_v29  ;;  %7456 = vmatpush1.bf16.msra.mxu0 %v12273_v44  ;;  %v12300_v3 = vld [vmem:[%s18957_s5 + $0x438] ss:$12 sps:$4 sm:$0xff]   ;;  %v12317_v39 = vld [vmem:[%s18957_s5 + $0x5bc] ss:$12 sps:$4 sm:$0xff]   ;;  %v12306_v50 = vld [vmem:[%s18957_s5 + $0x420] ss:$12 sps:$4 sm:$0xff]  }
 0x546   :  { %v5025_v32 = vpop.permute.xlu1 %5024  ;;  %v5053_v58 = vpop.permute.xlu0 %5052  ;;  %7457 = vmatprep.subr.bf16.mxu0 %v12281_v5  ;;  %v12308_v29 = vld [vmem:[%s18957_s5 + $0x424] ss:$12 sps:$4 sm:$0xff]  }
 0x547   :  { %5040 = vst.msk [vmem:[#allocation3 + $0xe0] sm:$0x3f] %vm5039_vm2, %v5025_v32  ;;  %v5058_v40 = vsel %vm83_vm6, %v5051_v59, %v5053_v58  ;;  %7375 = vmatpush1.bf16.msra.mxu1 %v12264_v21  ;;  %v12315_v45 = vld [vmem:[%s18957_s5 + $0x5b8] ss:$12 sps:$4 sm:$0xff]  }
 0x548   :  { %5068 = vst.msk [vmem:[#allocation3 + $0xb8] sm:$0xf0] %vm19276_vm3, %v5053_v58  ;;  %5067 = vst [vmem:[#allocation3 + $0xb0] sm:$0xf0] %v5058_v40  ;;  %5475 = vrot.lane.b32.xlu1 %v19278_v0, %s12623_s22  ;;  %5505 = vrot.lane.b32.xlu0 %v16636_v26, %s12625_s17  ;;  %vm19279_vm3 = vcmask 261120  }
 0x549   :  { %5100 = vst.msk [vmem:[#allocation3 + $0xb8] sm:$0xf0] %vm19277_vm14, %v5087_v31  ;;  %7376 = vmatprep.subr.bf16.mxu1 %v12272_v24  ;;  %7458 = vmatpush1.bf16.msra.mxu0 %v12279_v30  ;;  %v12276_v26 = vld [vmem:[%s18957_s5 + $0x318] ss:$12 sps:$4 sm:$0xff]   ;;  %vm5042_vm14 = vcmask 521216  }
 0x54a   :  { %v5055_v20 = vpop.permute.xlu1 %5054  ;;  %v5089_v52 = vpop.permute.xlu0 %5088  ;;  %7459 = vmatprep.subr.bf16.mxu0 %v12287_v1  ;;  %v12323_v27 = vld [vmem:[%s18957_s5 + $0x5a4] ss:$12 sps:$4 sm:$0xff]   ;;  %v12314_v21 = vld [vmem:[%s18957_s5 + $0x40c] ss:$12 sps:$4 sm:$0xff]  }
 0x54b   :  { %v5094_v38 = vsel %vm19279_vm3, %v5087_v31, %v5089_v52  ;;  %7377 = vmatpush1.bf16.msra.mxu1 %v12270_v49  ;;  %vm19020_vm3 = vcmask 259072   ;;  %v5654_v30 = vld [vmem:[#allocation3 + $0xa8] sm:$0xff]  ;;  %v5653_v49 = vld [vmem:[#allocation3 + $0xa0] sm:$0xff] }
 0x54c   :  { %5101 = vst [vmem:[#allocation3 + $0xc0] sm:$0xf0] %v5094_v38  ;;  %5611 = vrot.lane.b32.xlu1 %v5605_v51, %s12625_s17  ;;  %5585 = vrot.lane.b32.xlu0 %v19280_v10, %s12623_s22  ;;  %v12299_v51 = vld [vmem:[%s18957_s5 + $0x484] ss:$12 sps:$4 sm:$0xff]   ;;  %v12321_v58 = vld [vmem:[%s18957_s5 + $0x5a0] ss:$12 sps:$4 sm:$0xff]  }
 0x54d   :  { %7378 = vmatprep.subr.bf16.mxu1 %v12278_v48  ;;  %7460 = vmatpush1.bf16.msra.mxu0 %v12285_v57  ;;  %v12329_v52 = vld [vmem:[%s18957_s5 + $0x58c] ss:$12 sps:$4 sm:$0xff]   ;;  %v12318_v10 = vld [vmem:[%s18957_s5 + $0x3f0] ss:$12 sps:$4 sm:$0xff]  }
 0x54e   :  { %v5027_v61 = vpop.permute.xlu1 %5026  ;;  %v5141_v7 = vpop.permute.xlu0 %5140  ;;  %7461 = vmatprep.subr.bf16.mxu0 %v12293_v37 }
 0x54f   :  { %v5029_v8 = vsel %vm55_vm1, %v5025_v32, %v5027_v61  ;;  %5043 = vst.msk [vmem:[#allocation3 + $0xf0] sm:$0x3f] %vm5042_vm14, %v5027_v61  ;;  %7379 = vmatpush1.bf16.msra.mxu1 %v12276_v26  ;;  %v12312_v32 = vld [vmem:[%s18957_s5 + $0x408] ss:$12 sps:$4 sm:$0xff]  }
 0x550   :  { %5157 = vst.msk [vmem:[#allocation3 + $0xe0] sm:$0xc0] %vm19023_vm13, %v5141_v7  ;;  %5041 = vst [vmem:[#allocation3 + $0xe8] sm:$0x3f] %v5029_v8  ;;  %5589 = vrot.lane.b32.xlu1 %v16681_v9, %s12623_s22  ;;  %5507 = vrot.lane.b32.xlu0 %v16674_v4, %s12625_s17  ;;  %v12305_v9 = vld [vmem:[%s18957_s5 + $0x5ec] ss:$12 sps:$4 sm:$0xff]  }
 0x551   :  { %5070 = vst.msk [vmem:[#allocation3 + $0xf0] sm:$0x3f] %vm5069_vm10, %v5055_v20  ;;  %7380 = vmatprep.subr.bf16.mxu1 %v12284_v18  ;;  %7462 = vmatpush1.bf16.msra.mxu0 %v12291_v43  ;;  %vm19024_vm13 = vcmask 261126   ;;  %v12327_v26 = vld [vmem:[%s18957_s5 + $0x588] ss:$12 sps:$4 sm:$0xff]  }
 0x552   :  { %v5057_v2 = vpop.permute.xlu1 %5056  ;;  %v5171_v14 = vpop.permute.xlu0 %5170  ;;  %7463 = vmatprep.subr.bf16.mxu0 %v12299_v51  ;;  %v12335_v18 = vld [vmem:[%s18957_s5 + $0x574] ss:$12 sps:$4 sm:$0xff]   ;;  %v12326_v43 = vld [vmem:[%s18957_s5 + $0x3dc] ss:$12 sps:$4 sm:$0xff]  }
 0x553   :  { %v5059_v4 = vsel %vm83_vm6, %v5055_v20, %v5057_v2  ;;  %5073 = vst.msk [vmem:[#allocation3 + $0x100] sm:$0x3f] %vm19020_vm3, %v5057_v2  ;;  %7381 = vmatpush1.bf16.msra.mxu1 %v12282_v13  ;;  %vm5159_vm3 = vcmask 523270   ;;  %v12320_v20 = vld [vmem:[%s18957_s5 + $0x3f4] ss:$12 sps:$4 sm:$0xff]  }
 0x554   :  { %5071 = vst [vmem:[#allocation3 + $0xf8] sm:$0x3f] %v5059_v4  ;;  %5509 = vrot.lane.b32.xlu1 %v16688_v11, %s12625_s17  ;;  %5615 = vrot.lane.b32.xlu0 %v16693_v56, %s12625_s17  ;;  %v12303_v11 = vld [vmem:[%s18957_s5 + $0x5e8] ss:$12 sps:$4 sm:$0xff]   ;;  %v12333_v51 = vld [vmem:[%s18957_s5 + $0x570] ss:$12 sps:$4 sm:$0xff]  }
 0x555   :  { %7382 = vmatprep.subr.bf16.mxu1 %v12290_v42  ;;  %7464 = vmatpush1.bf16.msra.mxu0 %v12297_v15  ;;  %v12324_v13 = vld [vmem:[%s18957_s5 + $0x3d8] ss:$12 sps:$4 sm:$0xff]   ;;  %v12338_v42 = vld [vmem:[%s18957_s5 + $0x55c] ss:$12 sps:$4 sm:$0xff]  }
 0x556   :  { %v5201_v33 = vpop.permute.xlu0 %5200  ;;  %v5091_v59 = vpop.permute.xlu1 %5090  ;;  %7465 = vmatprep.subr.bf16.mxu0 %v12305_v9  ;;  %v12332_v15 = vld [vmem:[%s18957_s5 + $0x3c4] ss:$12 sps:$4 sm:$0xff]  }
 0x557   :  { %v5661_v25 = vld [vmem:[#allocation3 + $0xe0] sm:$0xff]  ;;  %5103 = vst.msk [vmem:[#allocation3 + $0x100] sm:$0x3f] %vm19021_vm12, %v5091_v59  ;;  %7383 = vmatpush2.bf16.msra.mxu1 %v12288_v12  ;;  %vm19026_vm12 = vcmask 1048070  }
 0x558   :  { %v17057_v56 = vpack.c.bf16 %v5661_v25, %v5652_v53  ;;  %5617 = vrot.lane.b32.xlu1 %v16698_v63, %s12625_s17  ;;  %5613 = vrot.lane.b32.xlu0 %v19281_v28, %s12625_s17  ;;  %v5669_v2 = vld [vmem:[#allocation3 + $0x120] sm:$0xff] }
 0x559   :  { %7384 = vmatprep.subr.bf16.mxu1 %v12296_v23  ;;  %7466 = vmatpush2.bf16.msra.mxu0 %v12303_v11  ;;  %v12341_v53 = vld [vmem:[%s18957_s5 + $0x544] ss:$12 sps:$4 sm:$0xff]   ;;  %v12346_v11 = vld [vmem:[%s18957_s5 + $0x67c] ss:$12 sps:$4 sm:$0xff]   ;;  %v12339_v28 = vld [vmem:[%s18957_s5 + $0x540] ss:$12 sps:$4 sm:$0xff]  }
 0x55a   :  { %7242 = vmatprep.mubr.bf16.mxu1 %v17057_v56  ;;  %v5143_v31 = vpop.permute.xlu0 %5142  ;;  %v5093_v36 = vpop.permute.xlu1 %5092  ;;  %7467 = vmatprep.subr.bf16.mxu0 %v12311_v34 }
 0x55b   :  { %7243 = vmatmul.mubr.bf16.gmra.mxu1 %v17070_v47  ;;  %v5148_v63 = vsel %vm55_vm1, %v5141_v7, %v5143_v31  ;;  %5160 = vst.msk [vmem:[#allocation3 + $0xf0] sm:$0xc0] %vm5159_vm3, %v5143_v31  ;;  %v5095_v46 = vsel %vm19282_vm8, %v5091_v59, %v5093_v36  ;;  %vm19025_vm8 = vcmask 1047814   ;;  %v12330_v59 = vld [vmem:[%s18957_s5 + $0x3c0] ss:$12 sps:$4 sm:$0xff]  }
 0x55c   :  { %7385 = vmatpush2.bf16.msra.mxu1 %v12294_v6  ;;  %5158 = vst [vmem:[#allocation3 + $0xe8] sm:$0xc0] %v5148_v63  ;;  %5187 = vst.msk [vmem:[#allocation3 + $0xf0] sm:$0xc0] %vm19026_vm12, %v5171_v14  ;;  %v12342_v36 = vld [vmem:[%s18957_s5 + $0x170] ss:$12 sps:$4 sm:$0xff]  }
 0x55d   :  { %5104 = vst [vmem:[#allocation3 + $0x108] sm:$0x3f] %v5095_v46  ;;  %7386 = vmatprep.subr.bf16.mxu1 %v12302_v19  ;;  %7468 = vmatpush2.bf16.msra.mxu0 %v12309_v16  ;;  %vm19288_vm12 = vcmask 1047808  }
 0x55e   :  { %v5173_v44 = vpop.permute.xlu0 %5172  ;;  %v5145_v55 = vpop.permute.xlu1 %5144  ;;  %7469 = vmatprep.subr.bf16.mxu0 %v12317_v39 }
 0x55f   :  { %v5178_v5 = vsel %vm83_vm6, %v5171_v14, %v5173_v44  ;;  %5190 = vst.msk [vmem:[#allocation3 + $0x100] sm:$0xc0] %vm19024_vm13, %v5173_v44  ;;  %vm19283_vm13 = vcmask 261120   ;;  %v5678_v14 = vld [vmem:[#allocation3 + $0x168] sm:$0xff] }
 0x560   :  { %5161 = vst.msk [vmem:[#allocation3 + $0x128] sm:$0xff] %vm19027_vm5, %v5145_v55  ;;  %7387 = vmatpush2.bf16.msra.mxu1 %v12300_v3  ;;  %5188 = vst [vmem:[#allocation3 + $0xf8] sm:$0xc0] %v5178_v5  ;;  %v17170_v25 = vpack.c.bf16 %v5678_v14, %v5669_v2 }
 0x561   :  { %5215 = vst.msk [vmem:[#allocation3 + $0x100] sm:$0xc0] %vm19025_vm8, %v5201_v33  ;;  %7388 = vmatprep.subr.bf16.mxu1 %v12308_v29  ;;  %7470 = vmatpush2.bf16.msra.mxu0 %v12315_v45  ;;  %vm19285_vm8 = vcmask 261120  }
 0x562   :  { %v5203_v60 = vpop.permute.xlu0 %5202  ;;  %v5175_v24 = vpop.permute.xlu1 %5174  ;;  %7471 = vmatprep.subr.bf16.mxu0 %v12323_v27 }
 0x563   :  { %v5208_v1 = vsel %vm19283_vm13, %v5201_v33, %v5203_v60  ;;  %v5663_v40 = vld [vmem:[#allocation3 + $0xf0] sm:$0xff]  ;;  %v5662_v0 = vld [vmem:[#allocation3 + $0xe8] sm:$0xff]  ;;  %vm19284_vm13 = vcmask 1048064  }
 0x564   :  { %7389 = vmatpush2.bf16.msra.mxu1 %v12306_v50  ;;  %5216 = vst [vmem:[#allocation3 + $0x108] sm:$0xc0] %v5208_v1  ;;  %v17116_v48 = vpack.c.bf16 %v5663_v40, %v5654_v30  ;;  %v17118_v57 = vpack.c.bf16 %v5662_v0, %v5653_v49 }
 0x565   :  { %7390 = vmatprep.subr.bf16.mxu1 %v12314_v21  ;;  %7472 = vmatpush2.bf16.msra.mxu0 %v12321_v58 }
 0x566   :  { %7325 = vmatprep.mubr.bf16.mxu0 %v17116_v48  ;;  %v5205_v37 = vpop.permute.xlu1 %5204  ;;  %v5238_v38 = vpop.permute.xlu0 %5237  ;;  %7473 = vmatprep.subr.bf16.mxu0 %v12329_v52 }
 0x567   :  { %5253 = vst.msk [vmem:[#allocation3 + $0x170] sm:$0xff] %vm19027_vm5, %v5238_v38  ;;  %7326 = vmatmul.mubr.bf16.gmra.mxu0 %v17118_v57  ;;  %v5670_v12 = vld [vmem:[#allocation3 + $0x128] sm:$0xff]  ;;  %vm19289_vm5 = vmmov %vm19285_vm8 }
 0x568   :  { %7391 = vmatpush2.bf16.msra.mxu1 %v12312_v32 }
 0x569   :  { %7392 = vmatprep.subr.bf16.mxu1 %v12320_v20  ;;  %7474 = vmatpush2.bf16.msra.mxu0 %v12327_v26  ;;  %v5696_v26 = vld [vmem:[#allocation3 + $0x1f8] sm:$0xff] }
 0x56a   :  { %v5147_v61 = vpop.permute.xlu1 %5146  ;;  %v5266_v7 = vpop.permute.xlu0 %5265  ;;  %7475 = vmatprep.subr.bf16.mxu0 %v12335_v18 }
 0x56b   :  { %v5149_v8 = vsel %vm55_vm1, %v5145_v55, %v5147_v61  ;;  %5163 = vst.msk [vmem:[#allocation3 + $0x138] sm:$0xff] %vm83_vm6, %v5147_v61 }
 0x56c   :  { %7393 = vmatpush2.bf16.msra.mxu1 %v12318_v10  ;;  %5191 = vst.msk [vmem:[#allocation3 + $0x138] sm:$0xff] %vm19284_vm13, %v5175_v24  ;;  %vm19286_vm13 = vcmask 1047808  }
 0x56d   :  { %7394 = vmatprep.subr.bf16.mxu1 %v12326_v43  ;;  %7476 = vmatpush2.bf16.msra.mxu0 %v12333_v51 }
 0x56e   :  { %v5177_v9 = vpop.permute.xlu1 %5176  ;;  %v5294_v4 = vpop.permute.xlu0 %5293  ;;  %v5679_v54 = vld [vmem:[#allocation3 + $0x170] sm:$0xff]  ;;  %7477 = vmatprep.subr.bf16.mxu0 %v12338_v42 }
 0x56f   :  { %v5179_v23 = vsel %vm83_vm6, %v5175_v24, %v5177_v9  ;;  %5193 = vst.msk [vmem:[#allocation3 + $0x148] sm:$0xff] %vm19285_vm8, %v5177_v9  ;;  %v17161_v33 = vpack.c.bf16 %v5679_v54, %v5670_v12 }
 0x570   :  { %7395 = vmatpush2.bf16.msra.mxu1 %v12324_v13  ;;  %5217 = vst.msk [vmem:[#allocation3 + $0x148] sm:$0xff] %vm19286_vm13, %v5205_v37  ;;  %vm19287_vm13 = vcmask 1048064  }
 0x571   :  { %7396 = vmatprep.subr.bf16.mxu1 %v12332_v15  ;;  %7252 = vmatprep.mubr.bf16.mxu1 %v17161_v33 }
 0x572   :  { %v5207_v6 = vpop.permute.xlu1 %5206  ;;  %7253 = vmatmul.mubr.bf16.gmra.mxu1 %v17170_v25  ;;  %v5240_v34 = vpop.permute.xlu0 %5239  ;;  %7478 = vmatpush2.bf16.msra.mxu0 %v12336_v35 }
 0x573   :  { %v5209_v19 = vsel %vm19285_vm8, %v5205_v37, %v5207_v6  ;;  %v5245_v31 = vsel %vm55_vm1, %v5238_v38, %v5240_v34  ;;  %5255 = vst.msk [vmem:[#allocation3 + $0x180] sm:$0xff] %vm83_vm6, %v5240_v34  ;;  %7479 = vmatprep.subr.bf16.mxu0 %v12341_v53  ;;  %v5672_v55 = vld [vmem:[#allocation3 + $0x138] sm:$0xff]  ;;  %v5687_v38 = vld [vmem:[#allocation3 + $0x1b0] sm:$0xff]  ;;  %v5705_v34 = vld [vmem:[#allocation3 + $0x240] sm:$0xff] }
 0x574   :  { %7397 = vmatpush2.bf16.msra.mxu1 %v12330_v59  ;;  %5281 = vst.msk [vmem:[#allocation3 + $0x180] sm:$0xff] %vm19287_vm13, %v5266_v7  ;;  %v17200_v27 = vpack.c.bf16 %v5245_v31, %v5149_v8  ;;  %v17234_v8 = vpack.c.bf16 %v5696_v26, %v5687_v38  ;;  %v5637_v26 = vld [vmem:[#allocation3 + $0x20] sm:$0xff] }
 0x575   :  { %7536 = vmatprep.subr.bf16.mxu1 %v12346_v11 }
 0x576   :  { %v5242_v16 = vpop.permute.xlu1 %5241  ;;  %v5268_v63 = vpop.permute.xlu0 %5267  ;;  %7480 = vmatpush2.bf16.msra.mxu0 %v12339_v28  ;;  %v5714_v28 = vld [vmem:[#allocation3 + $0x288] sm:$0xff] }
 0x577   :  { %5256 = vst.msk [vmem:[#allocation3 + $0x1b8] sm:$0x3] %vm4818_vm0, %v5242_v16  ;;  %v5273_v46 = vsel %vm83_vm6, %v5266_v7, %v5268_v63  ;;  %11391 = vmatprep.subr.bf16.mxu0 %v12342_v36  ;;  %vm19291_vm0 = vcmask 519168  }
 0x578   :  { %5283 = vst.msk [vmem:[#allocation3 + $0x190] sm:$0xff] %vm19285_vm8, %v5268_v63  ;;  %v17191_v3 = vpack.c.bf16 %v5273_v46, %v5179_v23  ;;  %v5647_v63 = vld [vmem:[#allocation3 + $0x70] sm:$0xff]  ;;  %vm19303_vm8 = vcmask 1041664  }
 0x579   :  { %5307 = vst.msk [vmem:[#allocation3 + $0x190] sm:$0xff] %vm19288_vm12, %v5294_v4  ;;  %vm19298_vm12 = vcmask 1048070  }
 0x57a   :  { %v17193_v39 = vpop.permute.xlu1 %5269  ;;  %v5296_v29 = vpop.permute.xlu0 %5295 }
 0x57b   :  { %v5301_v44 = vsel %vm19289_vm5, %v5294_v4, %v5296_v29  ;;  %v5681_v45 = vld [vmem:[#allocation3 + $0x180] sm:$0xff]  ;;  %vm19290_vm5 = vcmask 1044224   ;;  %v17267_v29 = vpack.c.bf16 %v5714_v28, %v5705_v34  ;;  %v5655_v28 = vld [vmem:[#allocation3 + $0xb0] sm:$0xff] }
 0x57c   :  { %v17196_v5 = vpack.c.bf16 %v5681_v45, %v5672_v55  ;;  %v17198_v50 = vpack.c.bf16 %v5301_v44, %v5209_v19  ;;  %v5638_v44 = vld [vmem:[#allocation3 + $0x28] sm:$0xff] }
 0x57d   :  { %v17270_v55 = vpack.c.bf16 %v5647_v63, %v5638_v44  ;;  %v5674_v63 = vld [vmem:[#allocation3 + $0x148] sm:$0xff]  ;;  %v12343_v44 = vld [vmem:[%s18957_s5 + $0xb0] ss:$12 sps:$4 sm:$0xff]  }
 0x57e   :  { %v5244_v21 = vpop.permute.xlu1 %5243  ;;  %7335 = vmatprep.mubr.bf16.mxu0 %v17196_v5  ;;  %v17203_v60 = vpop.permute.xlu0 %5379 }
 0x57f   :  { %v5246_v24 = vsel %vm55_vm1, %v5242_v16, %v5244_v21  ;;  %5258 = vst.msk [vmem:[#allocation3 + $0x1c8] sm:$0x3] %vm4821_vm4, %v5244_v21  ;;  %7336 = vmatmul.mubr.bf16.gmra.mxu0 %v17200_v27  ;;  %vm19292_vm4 = vcmask 1048324  }
 0x580   :  { %5257 = vst [vmem:[#allocation3 + $0x1c0] sm:$0x3] %v5246_v24  ;;  %5284 = vst.msk [vmem:[#allocation3 + $0x1c8] sm:$0x3] %vm4849_vm9, %v17193_v39  ;;  %vm19293_vm9 = vcmask 1043968  }
 0x582   :  { %v5352_v30 = vpop.permute.xlu0 %5351  ;;  %v5356_v32 = vpop.permute.xlu1 %5355 }
 0x583   :  { %5367 = vst.msk [vmem:[#allocation3 + $0x1b8] sm:$0xfc] %vm4938_vm15, %v5352_v30  ;;  %vm19294_vm15 = vcmask 523268  }
 0x584   :  { %5370 = vst.msk [vmem:[#allocation3 + $0x200] sm:$0xf] %vm19290_vm5, %v5356_v32  ;;  %vm19304_vm5 = vcmask 261124  }
 0x586   :  { %v5354_v58 = vpop.permute.xlu0 %5353  ;;  %v17212_v1 = vpop.permute.xlu1 %5383 }
 0x587   :  { %v5359_v40 = vsel %vm55_vm1, %v5352_v30, %v5354_v58  ;;  %5369 = vst.msk [vmem:[#allocation3 + $0x1c8] sm:$0xfc] %vm4941_vm7, %v5354_v58  ;;  %vm19295_vm7 = vcmask 1048068   ;;  %v5640_v58 = vld [vmem:[#allocation3 + $0x38] sm:$0xff] }
 0x588   :  { %5368 = vst [vmem:[#allocation3 + $0x1c0] sm:$0xfc] %v5359_v40  ;;  %5395 = vst.msk [vmem:[#allocation3 + $0x1c8] sm:$0xfc] %vm4969_vm11, %v17203_v60  ;;  %vm19297_vm11 = vcmask 1048320  }
 0x58a   :  { %v5358_v49 = vpop.permute.xlu1 %5357  ;;  %v5442_v0 = vpop.permute.xlu0 %5441  ;;  %v5688_v43 = vld [vmem:[#allocation3 + $0x1b8] sm:$0xff] }
 0x58b   :  { %v5360_v20 = vsel %vm55_vm1, %v5356_v32, %v5358_v49  ;;  %5372 = vst.msk [vmem:[#allocation3 + $0x210] sm:$0xf] %vm19291_vm0, %v5358_v49  ;;  %v5646_v32 = vld [vmem:[#allocation3 + $0x68] sm:$0xff]  ;;  %vm19305_vm0 = vcmask 1043712  }
 0x58c   :  { %5457 = vst.msk [vmem:[#allocation3 + $0x200] sm:$0xf0] %vm19292_vm4, %v5442_v0  ;;  %5371 = vst [vmem:[#allocation3 + $0x208] sm:$0xf] %v5360_v20  ;;  %v5665_v20 = vld [vmem:[#allocation3 + $0x100] sm:$0xff]  ;;  %vm19306_vm4 = vcmask 1047810  }
 0x58d   :  { %5398 = vst.msk [vmem:[#allocation3 + $0x210] sm:$0xf] %vm19293_vm9, %v17212_v1  ;;  %vm19307_vm9 = vcmask 261120  }
 0x58e   :  { %v5446_v52 = vpop.permute.xlu1 %5445  ;;  %v17223_v37 = vpop.permute.xlu0 %5469 }
 0x58f   :  { %5460 = vst.msk [vmem:[#allocation3 + $0x248] sm:$0x3f] %vm5039_vm2, %v5446_v52  ;;  %v5690_v54 = vld [vmem:[#allocation3 + $0x1c8] sm:$0xff]  ;;  %vm19299_vm2 = vcmask 254976   ;;  %v5689_v59 = vld [vmem:[#allocation3 + $0x1c0] sm:$0xff] }
 0x592   :  { %v17226_v10 = vpop.permute.xlu1 %5473  ;;  %v5448_v18 = vpop.permute.xlu0 %5447 }
 0x593   :  { %v5697_v61 = vld [vmem:[#allocation3 + $0x200] sm:$0xff]  ;;  %v5450_v7 = vsel %vm55_vm1, %v5446_v52, %v5448_v18  ;;  %5462 = vst.msk [vmem:[#allocation3 + $0x258] sm:$0x3f] %vm5042_vm14, %v5448_v18  ;;  %vm19300_vm14 = vmmov %vm19287_vm13  ;;  %vm19302_vm13 = vcmask 261122  }
 0x594   :  { %v17230_v51 = vpack.c.bf16 %v5697_v61, %v5688_v43  ;;  %5461 = vst [vmem:[#allocation3 + $0x250] sm:$0x3f] %v5450_v7  ;;  %5488 = vst.msk [vmem:[#allocation3 + $0x258] sm:$0x3f] %vm5069_vm10, %v17226_v10  ;;  %vm19296_vm10 = vcmask 1048326   ;;  %v5649_v52 = vld [vmem:[#allocation3 + $0x80] sm:$0xff]  ;;  %v17286_v43 = vpack.c.bf16 %v5646_v32, %v5637_v26 }
 0x595   :  { %v5656_v61 = vld [vmem:[#allocation3 + $0xb8] sm:$0xff] }
 0x596   :  { %7262 = vmatprep.mubr.bf16.mxu1 %v17230_v51  ;;  %v5444_v13 = vpop.permute.xlu0 %5443  ;;  %v5558_v42 = vpop.permute.xlu1 %5557  ;;  %v12344_v7 = vld [vmem:[%s18957_s5 + $0x678] ss:$12 sps:$4 sm:$0xff]  }
 0x597   :  { %7263 = vmatmul.mubr.bf16.gmra.mxu1 %v17234_v8  ;;  %v5449_v15 = vsel %vm55_vm1, %v5442_v0, %v5444_v13  ;;  %5459 = vst.msk [vmem:[#allocation3 + $0x210] sm:$0xf0] %vm19294_vm15, %v5444_v13  ;;  %vm19308_vm15 = vcmask 1047812  }
 0x598   :  { %5573 = vst.msk [vmem:[#allocation3 + $0x258] sm:$0xc0] %vm5159_vm3, %v5558_v42  ;;  %5458 = vst [vmem:[#allocation3 + $0x208] sm:$0xf0] %v5449_v15  ;;  %vm19301_vm3 = vcmask 257024  }
 0x599   :  { %5485 = vst.msk [vmem:[#allocation3 + $0x210] sm:$0xf0] %vm19295_vm7, %v17223_v37  ;;  %vm19309_vm7 = vmmov %vm19307_vm9 }
 0x59a   :  { %v5556_v2 = vpop.permute.xlu0 %5555  ;;  %v5560_v14 = vpop.permute.xlu1 %5559 }
 0x59b   :  { %v5563_v9 = vsel %vm55_vm1, %v5556_v2, %v5558_v42  ;;  %5571 = vst.msk [vmem:[#allocation3 + $0x248] sm:$0xc0] %vm19296_vm10, %v5556_v2  ;;  %v17293_v42 = vpack.c.bf16 %v5665_v20, %v5656_v61  ;;  %vm19310_vm10 = vmmov %vm19309_vm7 }
 0x59c   :  { %5574 = vst.msk [vmem:[#allocation3 + $0x290] sm:$0xff] %vm19297_vm11, %v5560_v14  ;;  %5572 = vst [vmem:[#allocation3 + $0x250] sm:$0xc0] %v5563_v9  ;;  %v12349_v9 = vld [vmem:[%s18957_s5 + $0x660] ss:$12 sps:$4 sm:$0xff]   ;;  %vm19311_vm11 = vcmask 259072  }
 0x59e   :  { %v17246_v4 = vpop.permute.xlu0 %5583  ;;  %v5272_v12 = vpop.permute.xlu1 %5271 }
 0x59f   :  { %5599 = vst.msk [vmem:[#allocation3 + $0x258] sm:$0xc0] %vm19298_vm12, %v17246_v4  ;;  %v5274_v35 = vsel %vm83_vm6, %v17193_v39, %v5272_v12  ;;  %v5698_v53 = vld [vmem:[#allocation3 + $0x208] sm:$0xff]  ;;  %vm19312_vm12 = vmmov %vm19309_vm7 }
 0x5a0   :  { %5286 = vst.msk [vmem:[#allocation3 + $0x1d8] sm:$0x3] %vm19299_vm2, %v5272_v12  ;;  %v5699_v23 = vld [vmem:[#allocation3 + $0x210] sm:$0xff]  ;;  %5285 = vst [vmem:[#allocation3 + $0x1d0] sm:$0x3] %v5274_v35  ;;  %v17255_v6 = vpack.c.bf16 %v5698_v53, %v5689_v59  ;;  %v5664_v12 = vld [vmem:[#allocation3 + $0xf8] sm:$0xff] }
 0x5a1   :  { %v17253_v11 = vpack.c.bf16 %v5699_v23, %v5690_v54  ;;  %v12356_v54 = vld [vmem:[%s18957_s5 + $0x64c] ss:$12 sps:$4 sm:$0xff]   ;;  %v5683_v59 = vld [vmem:[#allocation3 + $0x190] sm:$0xff]  ;;  %vm19313_vm2 = vcmask 261126  }
 0x5a2   :  { %v17258_v19 = vpop.permute.xlu1 %5587  ;;  %v5562_v31 = vpop.permute.xlu0 %5561  ;;  %v5706_v36 = vld [vmem:[#allocation3 + $0x248] sm:$0xff]  ;;  %v5648_v53 = vld [vmem:[#allocation3 + $0x78] sm:$0xff] }
 0x5a3   :  { %7345 = vmatprep.mubr.bf16.mxu0 %v17253_v11  ;;  %v5715_v16 = vld [vmem:[#allocation3 + $0x290] sm:$0xff]  ;;  %v5564_v46 = vsel %vm55_vm1, %v5560_v14, %v5562_v31  ;;  %5576 = vst.msk [vmem:[#allocation3 + $0x2a0] sm:$0xff] %vm83_vm6, %v5562_v31  ;;  %v17300_v14 = vpack.c.bf16 %v5649_v52, %v5640_v58  ;;  %v5658_v31 = vld [vmem:[#allocation3 + $0xc8] sm:$0xff]  ;;  %v12348_v52 = vld [vmem:[%s18957_s5 + $0x98] ss:$12 sps:$4 sm:$0xff]  }
 0x5a4   :  { %7346 = vmatmul.mubr.bf16.gmra.mxu0 %v17255_v6  ;;  %v17263_v39 = vpack.c.bf16 %v5715_v16, %v5706_v36  ;;  %5602 = vst.msk [vmem:[#allocation3 + $0x2a0] sm:$0xff] %vm19300_vm14, %v17258_v19  ;;  %v5707_v0 = vld [vmem:[#allocation3 + $0x250] sm:$0xff]  ;;  %v17315_v16 = vpack.c.bf16 %v5664_v12, %v5655_v28  ;;  %v5685_v12 = vld [vmem:[#allocation3 + $0x1a0] sm:$0xff]  ;;  %vm19314_vm14 = vcmask 1047814  }
 0x5a5   :  { %v17291_v13 = vpack.c.bf16 %v5564_v46, %v5707_v0  ;;  %v5667_v36 = vld [vmem:[#allocation3 + $0x110] sm:$0xff] }
 0x5a6   :  { %7272 = vmatprep.mubr.bf16.mxu1 %v17263_v39  ;;  %v5386_v45 = vpop.permute.xlu1 %5385  ;;  %v5382_v21 = vpop.permute.xlu0 %5381  ;;  %v5639_v46 = vld [vmem:[#allocation3 + $0x30] sm:$0xff] }
 0x5a7   :  { %7273 = vmatmul.mubr.bf16.gmra.mxu1 %v17267_v29  ;;  %v5388_v24 = vsel %vm83_vm6, %v17212_v1, %v5386_v45  ;;  %5400 = vst.msk [vmem:[#allocation3 + $0x220] sm:$0xf] %vm19301_vm3, %v5386_v45  ;;  %v5387_v30 = vsel %vm83_vm6, %v17203_v60, %v5382_v21  ;;  %v5708_v60 = vld [vmem:[#allocation3 + $0x258] sm:$0xff]  ;;  %v17320_v45 = vpack.c.bf16 %v5683_v59, %v5674_v63  ;;  %v12353_v59 = vld [vmem:[%s18957_s5 + $0x80] ss:$12 sps:$4 sm:$0xff]   ;;  %vm19315_vm3 = vmmov %vm19309_vm7 }
 0x5a8   :  { %5397 = vst.msk [vmem:[#allocation3 + $0x1d8] sm:$0xfc] %vm19302_vm13, %v5382_v21  ;;  %7398 = vmatprep.mubr.bf16.mxu1 %v17270_v55  ;;  %5399 = vst [vmem:[#allocation3 + $0x218] sm:$0xf] %v5388_v24  ;;  %v17322_v21 = vpack.c.bf16 %v5648_v53, %v5639_v46  ;;  %v12347_v24 = vld [vmem:[%s18957_s5 + $0x158] ss:$12 sps:$4 sm:$0xff]  }
 0x5a9   :  { %5396 = vst [vmem:[#allocation3 + $0x1d0] sm:$0xfc] %v5387_v30  ;;  %v12354_v30 = vld [vmem:[%s18957_s5 + $0x648] ss:$12 sps:$4 sm:$0xff]   ;;  %v12371_v63 = vld [vmem:[%s18957_s5 + $0x604] ss:$12 sps:$4 sm:$0xff]  }
 0x5aa   :  { %v5298_v40 = vpop.permute.xlu1 %5297  ;;  %v5472_v49 = vpop.permute.xlu0 %5471  ;;  %vm19316_vm13 = vcmask 1045760  }
 0x5ab   :  { %5309 = vst.msk [vmem:[#allocation3 + $0x1d8] sm:$0x3] %vm19303_vm8, %v5298_v40  ;;  %v5477_v1 = vsel %vm83_vm6, %v17223_v37, %v5472_v49  ;;  %v5717_v38 = vld [vmem:[#allocation3 + $0x2a0] sm:$0xff]  ;;  %vm19317_vm8 = vmmov %vm19315_vm3 }
 0x5ac   :  { %5487 = vst.msk [vmem:[#allocation3 + $0x220] sm:$0xf0] %vm19304_vm5, %v5472_v49  ;;  %5486 = vst [vmem:[#allocation3 + $0x218] sm:$0xf0] %v5477_v1  ;;  %v17284_v18 = vpack.c.bf16 %v5717_v38, %v5708_v60  ;;  %v12351_v37 = vld [vmem:[%s18957_s5 + $0x664] ss:$12 sps:$4 sm:$0xff]  }
 0x5ad   :  { %v12361_v49 = vld [vmem:[%s18957_s5 + $0x634] ss:$12 sps:$4 sm:$0xff]   ;;  %v12359_v60 = vld [vmem:[%s18957_s5 + $0x630] ss:$12 sps:$4 sm:$0xff]   ;;  %vm19318_vm5 = vcmask 1047808  }
 0x5ae   :  { %v5412_v15 = vpop.permute.xlu1 %5411  ;;  %7355 = vmatprep.mubr.bf16.mxu0 %v17284_v18  ;;  %v5408_v2 = vpop.permute.xlu0 %5407  ;;  %v12352_v1 = vld [vmem:[%s18957_s5 + $0x140] ss:$12 sps:$4 sm:$0xff]  }
 0x5af   :  { %7399 = vmatmul.mubr.bf16.vlgmr.msra.gmra.mxu1 %v17286_v43  ;;  %5423 = vst.msk [vmem:[#allocation3 + $0x220] sm:$0xf] %vm19305_vm0, %v5412_v15  ;;  %7356 = vmatmul.mubr.bf16.gmra.mxu0 %v17291_v13  ;;  %vm19319_vm0 = vmmov %vm19315_vm3 }
 0x5b0   :  { %5421 = vst.msk [vmem:[#allocation3 + $0x1d8] sm:$0xfc] %vm19306_vm4, %v5408_v2  ;;  %7408 = vmatprep.mubr.bf16.mxu1 %v17293_v42  ;;  %7481 = vmatprep.mubr.bf16.mxu0 %v17300_v14  ;;  %vm19320_vm4 = vmmov %vm19319_vm0 }
 0x5b1   :  { %7537 = vmatpush1.bf16.msra.mxu1 %v12344_v7  ;;  %v5666_v7 = vld [vmem:[#allocation3 + $0x108] sm:$0xff] }
 0x5b2   :  { %7538 = vmatprep.subr.bf16.mxu1 %v12351_v37  ;;  %v5300_v35 = vpop.permute.xlu1 %5299  ;;  %v5504_v23 = vpop.permute.xlu0 %5503  ;;  %v12366_v37 = vld [vmem:[%s18957_s5 + $0x61c] ss:$12 sps:$4 sm:$0xff]  }
 0x5b3   :  { %v5302_v34 = vsel %vm19307_vm9, %v5298_v40, %v5300_v35  ;;  %5517 = vst.msk [vmem:[#allocation3 + $0x220] sm:$0xf0] %vm19308_vm15, %v5504_v23  ;;  %v17331_v40 = vpack.c.bf16 %v5667_v36, %v5658_v31  ;;  %v5657_v35 = vld [vmem:[#allocation3 + $0xc0] sm:$0xff]  ;;  %vm12628_vm9 = vmmov 0   ;;  %vm8901_vm15 = vcmask 654336  }
 0x5b4   :  { %5310 = vst [vmem:[#allocation3 + $0x1e0] sm:$0x3] %v5302_v34  ;;  %v17362_v34 = vpack.c.bf16 %v5666_v7, %v5657_v35 }
 0x5b5   :  { %7539 = vmatpush1.bf16.msra.mxu1 %v12349_v9  ;;  %v5676_v9 = vld [vmem:[#allocation3 + $0x158] sm:$0xff] }
 0x5b6   :  { %7540 = vmatprep.subr.bf16.mxu1 %v12356_v54  ;;  %v5414_v32 = vpop.permute.xlu1 %5413  ;;  %v5410_v58 = vpop.permute.xlu0 %5409  ;;  %v17371_v36 = vpack.c.bf16 %v5685_v12, %v5676_v9 }
 0x5b7   :  { %7409 = vmatmul.mubr.bf16.gmra.mxu1 %v17315_v16  ;;  %v5416_v0 = vsel %vm19309_vm7, %v5412_v15, %v5414_v32  ;;  %v5415_v20 = vsel %vm19310_vm10, %v5408_v2, %v5410_v58  ;;  %7482 = vmatmul.mubr.bf16.vlgmr.msra.gmra.mxu0 %v17322_v21  ;;  %v5692_v54 = vld [vmem:[#allocation3 + $0x1d8] sm:$0xff] }
 0x5b8   :  { %7418 = vmatprep.mubr.bf16.mxu1 %v17320_v45  ;;  %5424 = vst [vmem:[#allocation3 + $0x228] sm:$0xf] %v5416_v0  ;;  %5422 = vst [vmem:[#allocation3 + $0x1e0] sm:$0xfc] %v5415_v20  ;;  %7491 = vmatprep.mubr.bf16.mxu0 %v17331_v40  ;;  %v5691_v20 = vld [vmem:[#allocation3 + $0x1d0] sm:$0xff] }
 0x5b9   :  { %11392 = vmatpush3.bf16.msra.mxu0 %v12343_v44  ;;  %7541 = vmatpush1.bf16.msra.mxu1 %v12354_v30  ;;  %v12358_v44 = vld [vmem:[%s18957_s5 + $0x68] ss:$12 sps:$4 sm:$0xff]   ;;  %v12369_v30 = vld [vmem:[%s18957_s5 + $0x600] ss:$12 sps:$4 sm:$0xff]  }
 0x5ba   :  { %11393 = vmatprep.subr.bf16.mxu0 %v12347_v24  ;;  %v5476_v38 = vpop.permute.xlu1 %5475  ;;  %v5506_v26 = vpop.permute.xlu0 %5505  ;;  %v5701_v61 = vld [vmem:[#allocation3 + $0x220] sm:$0xff]  ;;  %7542 = vmatprep.subr.bf16.mxu1 %v12361_v49  ;;  %v5700_v24 = vld [vmem:[#allocation3 + $0x218] sm:$0xff] }
 0x5bb   :  { %v5478_v15 = vsel %vm83_vm6, %v17226_v10, %v5476_v38  ;;  %5490 = vst.msk [vmem:[#allocation3 + $0x268] sm:$0x3f] %vm19311_vm11, %v5476_v38  ;;  %v5511_v2 = vsel %vm19312_vm12, %v5504_v23, %v5506_v26  ;;  %v17360_v53 = vpack.c.bf16 %v5701_v61, %v5692_v54  ;;  %v12357_v10 = vld [vmem:[%s18957_s5 + $0x128] ss:$12 sps:$4 sm:$0xff]   ;;  %v12364_v23 = vld [vmem:[%s18957_s5 + $0x618] ss:$12 sps:$4 sm:$0xff]  }
 0x5bc   :  { %5489 = vst [vmem:[#allocation3 + $0x260] sm:$0x3f] %v5478_v15  ;;  %5518 = vst [vmem:[#allocation3 + $0x228] sm:$0xf0] %v5511_v2  ;;  %v12376_v49 = vld [vmem:[%s18957_s5 + $0x2f0] ss:$12 sps:$4 sm:$0xff]  }
 0x5bd   :  { %11394 = vmatpush3.bf16.msra.mxu0 %v12348_v52  ;;  %7543 = vmatpush1.bf16.msra.mxu1 %v12359_v60  ;;  %v5694_v52 = vld [vmem:[#allocation3 + $0x1e8] sm:$0xff]  ;;  %v17399_v60 = vpack.c.bf16 %v5700_v24, %v5691_v20  ;;  %v12363_v38 = vld [vmem:[%s18957_s5 + $0x50] ss:$12 sps:$4 sm:$0xff]   ;;  %v12367_v26 = vld [vmem:[%s18957_s5 + $0xf8] ss:$12 sps:$4 sm:$0xff]  }
 0x5be   :  { %11395 = vmatprep.subr.bf16.mxu0 %v12352_v1  ;;  %v5612_v28 = vpop.permute.xlu1 %5611  ;;  %v5586_v31 = vpop.permute.xlu0 %5585  ;;  %7544 = vmatprep.subr.bf16.mxu1 %v12366_v37  ;;  %v5703_v1 = vld [vmem:[#allocation3 + $0x230] sm:$0xff]  ;;  %v12368_v15 = vld [vmem:[%s18957_s5 + $0x38] ss:$12 sps:$4 sm:$0xff]   ;;  %v12372_v2 = vld [vmem:[%s18957_s5 + $0xe0] ss:$12 sps:$4 sm:$0xff]  }
 0x5bf   :  { %7419 = vmatmul.mubr.bf16.gmra.mxu1 %v17191_v3  ;;  %v5591_v46 = vsel %vm83_vm6, %v17246_v4, %v5586_v31  ;;  %5601 = vst.msk [vmem:[#allocation3 + $0x268] sm:$0xc0] %vm19313_vm2, %v5586_v31  ;;  %7492 = vmatmul.mubr.bf16.gmra.mxu0 %v17362_v34  ;;  %v12362_v4 = vld [vmem:[%s18957_s5 + $0x110] ss:$12 sps:$4 sm:$0xff]   ;;  %v17408_v7 = vpack.c.bf16 %v5703_v1, %v5694_v52  ;;  %v5693_v31 = vld [vmem:[#allocation3 + $0x1e0] sm:$0xff]  ;;  %v19030_v1 = vmov 0   ;;  %vm19407_vm2 = vmmov %vm19319_vm0 }
 0x5c0   :  { %7428 = vmatprep.mubr.bf16.mxu1 %v17360_v53  ;;  %5600 = vst [vmem:[#allocation3 + $0x260] sm:$0xc0] %v5591_v46  ;;  %5625 = vst.msk [vmem:[#allocation3 + $0x268] sm:$0xc0] %vm19314_vm14, %v5612_v28  ;;  %7501 = vmatprep.mubr.bf16.mxu0 %v17371_v36  ;;  %v12374_v24 = vld [vmem:[%s18957_s5 + $0xc8] ss:$12 sps:$4 sm:$0xff]  }
 0x5c1   :  { %11396 = vmatpush3.bf16.msra.mxu0 %v12353_v59  ;;  %7545 = vmatpush1.bf16.msra.mxu1 %v12364_v23  ;;  %v5721_v23 = vld [vmem:[#allocation3 + $0x2c0] sm:$0xff]  ;;  %v12380_v20 = vld [vmem:[%s18957_s5 + $0x470] ss:$12 sps:$4 sm:$0xff]   ;;  %vm19408_vm14 = vmmov %vm19319_vm0 }
 0x5c2   :  { %11397 = vmatprep.subr.bf16.mxu0 %v12357_v10  ;;  %v5590_v32 = vpop.permute.xlu1 %5589  ;;  %v5508_v58 = vpop.permute.xlu0 %5507  ;;  %7546 = vmatprep.subr.bf16.mxu1 %v12371_v63  ;;  %v5712_v10 = vld [vmem:[#allocation3 + $0x278] sm:$0xff]  ;;  %v12373_v63 = vld [vmem:[%s18957_s5 + $0x20] ss:$12 sps:$4 sm:$0xff]  }
 0x5c3   :  { %v5592_v0 = vsel %vm83_vm6, %v17258_v19, %v5590_v32  ;;  %5604 = vst.msk [vmem:[#allocation3 + $0x2b0] sm:$0xff] %vm19315_vm3, %v5590_v32  ;;  %v5702_v54 = vld [vmem:[#allocation3 + $0x228] sm:$0xff]  ;;  %vm19409_vm3 = vmmov %vm19319_vm0 }
 0x5c4   :  { %5519 = vst.msk [vmem:[#allocation3 + $0x268] sm:$0x3f] %vm19316_vm13, %v5508_v58  ;;  %v17425_v46 = vpack.c.bf16 %v5702_v54, %v5693_v31  ;;  %v12384_v54 = vld [vmem:[%s18957_s5 + $0x458] ss:$12 sps:$4 sm:$0xff]   ;;  %vm19410_vm13 = vmmov %vm19319_vm0 }
 0x5c5   :  { %11398 = vmatpush3.bf16.msra.mxu0 %v12358_v44  ;;  %7547 = vmatpush1.bf16.msra.mxu1 %v12369_v30  ;;  %v5677_v31 = vld [vmem:[#allocation3 + $0x160] sm:$0xff] }
 0x5c6   :  { %11399 = vmatprep.subr.bf16.mxu0 %v12362_v4  ;;  %v5510_v19 = vpop.permute.xlu1 %5509  ;;  %v5616_v61 = vpop.permute.xlu0 %5615  ;;  %11437 = vmatprep.subr.bf16.mxu1 %v12376_v49  ;;  %v17430_v4 = vpack.c.bf16 %v5721_v23, %v5712_v10  ;;  %v12375_v49 = vld [vmem:[%s18957_s5 + $0x8] ss:$12 sps:$4 sm:$0xff]   ;;  %v12385_v10 = vld [vmem:[%s18957_s5 + $0x398] ss:$12 sps:$4 sm:$0xff]  }
 0x5c7   :  { %7429 = vmatmul.mubr.bf16.gmra.mxu1 %v17399_v60  ;;  %v5512_v37 = vsel %vm19317_vm8, %v5508_v58, %v5510_v19  ;;  %5627 = vst.msk [vmem:[#allocation3 + $0x2b0] sm:$0xff] %vm19318_vm5, %v5616_v61  ;;  %7502 = vmatmul.mubr.bf16.gmra.mxu0 %v17198_v50  ;;  %v5709_v44 = vld [vmem:[#allocation3 + $0x260] sm:$0xff]  ;;  %v12377_v19 = vld [vmem:[%s18957_s5 + $0x230] ss:$12 sps:$4 sm:$0xff]   ;;  %v12386_v23 = vld [vmem:[%s18957_s5 + $0x2a8] ss:$12 sps:$4 sm:$0xff]  }
 0x5c8   :  { %5520 = vst [vmem:[#allocation3 + $0x270] sm:$0x3f] %v5512_v37  ;;  %7511 = vmatprep.mubr.bf16.mxu0 %v17408_v7  ;;  %v17436_v58 = vpack.c.bf16 %v5592_v0, %v5709_v44  ;;  %v12378_v37 = vld [vmem:[%s18957_s5 + $0x2d8] ss:$12 sps:$4 sm:$0xff]   ;;  %v5686_v44 = vld [vmem:[#allocation3 + $0x1a8] sm:$0xff]  ;;  %vm19411_vm8 = vmmov %vm19319_vm0 }
 0x5c9   :  { %11400 = vmatpush3.bf16.msra.mxu0 %v12363_v38  ;;  %v5641_v38 = vld [vmem:[#allocation3 + $0x40] sm:$0xff]  ;;  %vm19412_vm5 = vmmov %vm19319_vm0 }
 0x5ca   :  { %11401 = vmatprep.subr.bf16.mxu0 %v12367_v26  ;;  %v5618_v9 = vpop.permute.xlu1 %5617  ;;  %v5614_v12 = vpop.permute.xlu0 %5613  ;;  %v5650_v26 = vld [vmem:[#allocation3 + $0x88] sm:$0xff] }
 0x5cb   :  { %v5620_v35 = vsel %vm19319_vm0, %v5616_v61, %v5618_v9  ;;  %v5619_v59 = vsel %vm19320_vm4, %v5612_v28, %v5614_v12  ;;  %v5710_v28 = vld [vmem:[#allocation3 + $0x268] sm:$0xff]  ;;  %v17454_v61 = vpack.c.bf16 %v5650_v26, %v5641_v38  ;;  %v5668_v9 = vld [vmem:[#allocation3 + $0x118] sm:$0xff]  ;;  %v5695_v26 = vld [vmem:[#allocation3 + $0x1f0] sm:$0xff] }
 0x5cc   :  { %5626 = vst [vmem:[#allocation3 + $0x270] sm:$0xc0] %v5619_v59  ;;  %v12382_v12 = vld [vmem:[%s18957_s5 + $0x2c0] ss:$12 sps:$4 sm:$0xff]   ;;  %v12397_v38 = vld [vmem:[%s18957_s5 + $0x350] ss:$12 sps:$4 sm:$0xff]  }
 0x5cd   :  { %11402 = vmatpush3.bf16.msra.mxu0 %v12368_v15  ;;  %v12379_v15 = vld [vmem:[%s18957_s5 + $0x218] ss:$12 sps:$4 sm:$0xff]  }
 0x5ce   :  { %11403 = vmatprep.subr.bf16.mxu0 %v12372_v2  ;;  %v5719_v30 = vld [vmem:[#allocation3 + $0x2b0] sm:$0xff] }
 0x5cf   :  { %7512 = vmatmul.mubr.bf16.gmra.mxu0 %v17425_v46  ;;  %v17433_v32 = vpack.c.bf16 %v5719_v30, %v5710_v28  ;;  %v5659_v2 = vld [vmem:[#allocation3 + $0xd0] sm:$0xff] }
 0x5d0   :  { %7521 = vmatprep.mubr.bf16.mxu0 %v17430_v4  ;;  %v17479_v59 = vpack.c.bf16 %v5668_v9, %v5659_v2  ;;  %v12392_v28 = vld [vmem:[%s18957_s5 + $0x428] ss:$12 sps:$4 sm:$0xff]   ;;  %v12391_v30 = vld [vmem:[%s18957_s5 + $0x1d0] ss:$12 sps:$4 sm:$0xff]   ;;  %v12400_v2 = vld [vmem:[%s18957_s5 + $0x3f8] ss:$12 sps:$4 sm:$0xff]  }
 0x5d1   :  { %11404 = vmatpush3.bf16.msra.mxu0 %v12373_v63  ;;  %7438 = vmatprep.mubr.bf16.mxu1 %v17433_v32  ;;  %v12389_v63 = vld [vmem:[%s18957_s5 + $0x380] ss:$12 sps:$4 sm:$0xff]   ;;  %v12401_v9 = vld [vmem:[%s18957_s5 + $0x338] ss:$12 sps:$4 sm:$0xff]  }
 0x5d2   :  { %11405 = vmatprep.subr.bf16.mxu0 %v12374_v24  ;;  %7439 = vmatmul.mubr.bf16.gmra.mxu1 %v17436_v58  ;;  %v12390_v24 = vld [vmem:[%s18957_s5 + $0x290] ss:$12 sps:$4 sm:$0xff]  }
 0x5d3   :  { %v5711_v52 = vld [vmem:[#allocation3 + $0x270] sm:$0xff]  ;;  %7564 = vmatprep.mubr.bf16.mxu1 %v19030_v1 }
 0x5d4   :  { %v17447_v0 = vpack.c.bf16 %v5620_v35, %v5711_v52  ;;  %v12383_v35 = vld [vmem:[%s18957_s5 + $0x200] ss:$12 sps:$4 sm:$0xff]   ;;  %v12394_v52 = vld [vmem:[%s18957_s5 + $0x278] ss:$12 sps:$4 sm:$0xff]  }
 0x5d5   :  { %11406 = vmatpush3.bf16.msra.mxu0 %v12375_v49  ;;  %v17510_v49 = vpack.c.bf16 %v5686_v44, %v5677_v31  ;;  %v5722_v31 = vld [vmem:[#allocation3 + $0x2c8] sm:$0xff] }
 0x5d6   :  { %11483 = vmatprep.subr.bf16.mxu0 %v12380_v20  ;;  %v12393_v20 = vld [vmem:[%s18957_s5 + $0x368] ss:$12 sps:$4 sm:$0xff]  }
 0x5d7   :  { %7522 = vmatmul.mubr.bf16.gmra.mxu0 %v17447_v0 }
 0x5d8   :  { %7647 = vmatprep.mubr.bf16.mxu0 %v16876_v62  ;;  %v12381_v62 = vld [vmem:[%s18957_s5 + $0x3b0] ss:$12 sps:$4 sm:$0xff]  }
 0x5da   :  { %11164 = vmatmul.mubr.msk.bf16.vlgmr.msra.gmra.mxu1 %vm55_vm1, %v17454_v61 }
 0x5db   :  { %7574 = vmatprep.mubr.bf16.mxu1 %v19030_v1  ;;  %11438 = vmatpush3.bf16.msra.mxu1 %v12377_v19  ;;  %v5704_v19 = vld [vmem:[#allocation3 + $0x238] sm:$0xff] }
 0x5dc   :  { %11439 = vmatprep.subr.bf16.mxu1 %v12378_v37  ;;  %v12398_v37 = vld [vmem:[%s18957_s5 + $0x260] ss:$12 sps:$4 sm:$0xff]  }
 0x5df   :  { %7648 = vmatmul.mubr.bf16.vlgmr.msra.gmra.mxu0 %v16883_v17  ;;  %11440 = vmatpush3.bf16.msra.mxu1 %v12379_v15  ;;  %v12388_v17 = vld [vmem:[%s18957_s5 + $0x440] ss:$12 sps:$4 sm:$0xff]  }
 0x5e0   :  { %7655 = vmatprep.mubr.bf16.mxu0 %v17057_v56  ;;  %11484 = vmatpush3.bf16.msra.mxu0 %v12381_v62  ;;  %v12387_v56 = vld [vmem:[%s18957_s5 + $0x1e8] ss:$12 sps:$4 sm:$0xff]   ;;  %v12399_v15 = vld [vmem:[%s18957_s5 + $0x1a0] ss:$12 sps:$4 sm:$0xff]  }
 0x5e1   :  { %11441 = vmatprep.subr.bf16.mxu1 %v12382_v12  ;;  %11485 = vmatprep.subr.bf16.mxu0 %v12384_v54  ;;  %v6048_v62 = vld [vmem:[%s18959_s6] sm:$0x7]  ;;  %v12402_v12 = vld [vmem:[%s18957_s5 + $0x248] ss:$12 sps:$4 sm:$0xff]   ;;  %v17550_v54 = vpack.c.bf16 %v5704_v19, %v5695_v26 }
 0x5e2   :  { %11165 = vmatmul.mubr.msk.bf16.gmra.mxu1 %vm55_vm1, %v17479_v59 }
 0x5e3   :  { %7584 = vmatprep.mubr.bf16.mxu1 %v19030_v1  ;;  %11442 = vmatpush3.bf16.msra.mxu1 %v12383_v35  ;;  %v12403_v35 = vld [vmem:[%s18957_s5 + $0x188] ss:$12 sps:$4 sm:$0xff]  }
 0x5e4   :  { %11486 = vmatpush3.bf16.msra.mxu0 %v12385_v10  ;;  %11443 = vmatprep.subr.bf16.mxu1 %v12386_v23  ;;  %v12404_v10 = vld [vmem:[%s18957_s5 + $0x3e0] ss:$12 sps:$4 sm:$0xff]  }
 0x5e5   :  { %11487 = vmatprep.subr.bf16.mxu0 %v12388_v17 }
 0x5e7   :  { %7656 = vmatmul.mubr.bf16.gmra.mxu0 %v17070_v47  ;;  %11444 = vmatpush3.bf16.msra.mxu1 %v12387_v56  ;;  %v12395_v47 = vld [vmem:[%s18957_s5 + $0x1b8] ss:$12 sps:$4 sm:$0xff]  }
 0x5e8   :  { %7663 = vmatprep.mubr.bf16.mxu0 %v17161_v33  ;;  %11488 = vmatpush3.bf16.msra.mxu0 %v12389_v63  ;;  %v12396_v33 = vld [vmem:[%s18957_s5 + $0x410] ss:$12 sps:$4 sm:$0xff]   ;;  %v5713_v56 = vld [vmem:[#allocation3 + $0x280] sm:$0xff] }
 0x5e9   :  { %11445 = vmatprep.subr.bf16.mxu1 %v12390_v24  ;;  %11489 = vmatprep.subr.bf16.mxu0 %v12392_v28  ;;  %v12406_v24 = vld [vmem:[%s18957_s5 + $0x3c8] ss:$12 sps:$4 sm:$0xff]   ;;  %v12408_v28 = vld [vmem:[%s18957_s5 + $0x5f0] ss:$12 sps:$4 sm:$0xff]  }
 0x5ea   :  { %11166 = vmatmul.mubr.msk.bf16.gmra.mxu1 %vm55_vm1, %v17510_v49 }
 0x5eb   :  { %7594 = vmatprep.mubr.bf16.mxu1 %v19030_v1  ;;  %11446 = vmatpush3.bf16.msra.mxu1 %v12391_v30 }
 0x5ec   :  { %11490 = vmatpush3.bf16.msra.mxu0 %v12393_v20  ;;  %11447 = vmatprep.subr.bf16.mxu1 %v12394_v52  ;;  %v12407_v20 = vld [vmem:[%s18957_s5 + $0x308] ss:$12 sps:$4 sm:$0xff]  }
 0x5ed   :  { %11491 = vmatprep.subr.bf16.mxu0 %v12396_v33 }
 0x5ef   :  { %7664 = vmatmul.mubr.bf16.gmra.mxu0 %v17170_v25  ;;  %11448 = vmatpush3.bf16.msra.mxu1 %v12395_v47  ;;  %v12405_v25 = vld [vmem:[%s18957_s5 + $0x320] ss:$12 sps:$4 sm:$0xff]  }
 0x5f0   :  { %7671 = vmatprep.mubr.bf16.mxu0 %v17230_v51  ;;  %11492 = vmatpush3.bf16.msra.mxu0 %v12397_v38  ;;  %v19321_v51 = vld [vmem:[#allocation6_spill] sm:$0xff]  ;;  %v17584_v38 = vpack.c.bf16 %v5722_v31, %v5713_v56  ;;  %v12428_v56 = vld [vmem:[%s18957_s5 + $0x620] ss:$12 sps:$4 sm:$0xff]  }
 0x5f1   :  { %11449 = vmatprep.subr.bf16.mxu1 %v12398_v37  ;;  %11493 = vmatprep.subr.bf16.mxu0 %v12400_v2  ;;  %v19322_v23 = vsub.s32 0, %v19321_v51  ;;  %v19323_v63 = vsub.s32 1, %v19321_v51  ;;  %v12429_v31 = vld [vmem:[%s18957_s5 + $0x608] ss:$12 sps:$4 sm:$0xff]  }
 0x5f2   :  { %11167 = vmatmul.mubr.msk.bf16.gmra.mxu1 %vm55_vm1, %v17550_v54 }
 0x5f3   :  { %v17565_v17 = vrot.slane %v6048_v62, %v19322_v23  ;;  %7604 = vmatprep.mubr.bf16.mxu1 %v19030_v1  ;;  %11450 = vmatpush3.bf16.msra.mxu1 %v12399_v15  ;;  %v17570_v44 = vrot.slane %v6048_v62, %v19323_v63  ;;  %v12425_v23 = vld [vmem:[%s18957_s5 + $0x638] ss:$12 sps:$4 sm:$0xff]  }
 0x5f4   :  { %11494 = vmatpush3.bf16.msra.mxu0 %v12401_v9  ;;  %11451 = vmatprep.subr.bf16.mxu1 %v12402_v12  ;;  %v12409_v9 = vld [vmem:[%s18957_s5 + $0x530] ss:$12 sps:$4 sm:$0xff]   ;;  %v19028_v12 = vmov 0.0  }
 0x5f5   :  { %11495 = vmatprep.subr.bf16.mxu0 %v12404_v10  ;;  %v12412_v10 = vld [vmem:[%s18957_s5 + $0x5c0] ss:$12 sps:$4 sm:$0xff]  }
 0x5f6   :  { %v7234_v30 = vpop.f32.mrf.mxu1 }
 0x5f7   :  { %v7235_v52 = vadd.f32 %v7234_v30, %v17565_v17  ;;  %v7317_v47 = vpop.f32.mrf.mxu0  ;;  %7672 = vmatmul.mubr.bf16.gmra.mxu0 %v17234_v8  ;;  %11452 = vmatpush3.bf16.msra.mxu1 %v12403_v35  ;;  %v12410_v35 = vld [vmem:[%s18957_s5 + $0x5d8] ss:$12 sps:$4 sm:$0xff]  }
 0x5f8   :  { %v7236_v33 = vpop.f32.mrf.mxu1  ;;  %7679 = vmatprep.mubr.bf16.mxu0 %v17263_v39  ;;  %11496 = vmatpush3.bf16.msra.mxu0 %v12405_v25  ;;  %v12422_v25 = vld [vmem:[%s18957_s5 + $0x650] ss:$12 sps:$4 sm:$0xff]  }
 0x5f9   :  { %v17586_v26 = vadd.f32 %v7317_v47, %v7235_v52  ;;  %v7237_v19 = vadd.f32 %v7236_v33, %v17570_v44  ;;  %v7319_v37 = vpop.f32.mrf.mxu0  ;;  %11497 = vmatprep.subr.bf16.mxu0 %v12406_v24  ;;  %11529 = vmatprep.subr.bf16.mxu1 %v12408_v28 }
 0x5fa   :  { %v7238_v15 = vpop.f32.mrf.mxu1  ;;  %11168 = vmatmul.mubr.msk.bf16.gmra.mxu1 %vm55_vm1, %v17584_v38 }
 0x5fb   :  { %v17591_v2 = vadd.f32 %v7319_v37, %v7237_v19  ;;  %v7239_v8 = vadd.f32 %v7238_v15, %v17565_v17  ;;  %v7321_v62 = vpop.f32.mrf.mxu0  ;;  %7720 = vmatprep.mubr.bf16.mxu1 %v16885_v22  ;;  %v12411_v22 = vld [vmem:[%s18957_s5 + $0x518] ss:$12 sps:$4 sm:$0xff]   ;;  %v12433_v19 = vld [vmem:[%s18958_s7 + $0x60] ss:$8 sps:$4 sm:$0xff]   ;;  %v12438_v15 = vld [vmem:[%s18958_s7 + $0x54] ss:$8 sps:$4 sm:$0xff]  }
 0x5fc   :  { %11498 = vmatpush3.bf16.msra.mxu0 %v12407_v20  ;;  %v17685_v63 = vpop.f32.mrf.mxu1 }
 0x5fd   :  { %v17595_v39 = vadd.f32 %v7321_v62, %v7239_v8  ;;  %11673 = vmatprep.subr.bf16.mxu0 %v19028_v12  ;;  %v12444_v8 = vld [vmem:[%s18958_s7 + $0x34] ss:$8 sps:$4 sm:$0xff]  }
 0x5ff   :  { %7680 = vmatmul.mubr.bf16.gmra.mxu0 %v17267_v29  ;;  %v12413_v29 = vld [vmem:[%s18957_s5 + $0x500] ss:$12 sps:$4 sm:$0xff]  }
 0x600   :  { %7793 = vmatprep.mubr.bf16.mxu0 %v17270_v55  ;;  %v12416_v55 = vld [vmem:[%s18957_s5 + $0x680] ss:$12 sps:$4 sm:$0xff]  }
 0x602   :  { %7721 = vmatmul.mubr.bf16.vlgmr.msra.gmra.mxu1 %v16887_v41  ;;  %v12414_v41 = vld [vmem:[%s18957_s5 + $0x5a8] ss:$12 sps:$4 sm:$0xff]  }
 0x603   :  { %7728 = vmatprep.mubr.bf16.mxu1 %v17116_v48  ;;  %11530 = vmatpush3.bf16.msra.mxu1 %v12409_v9  ;;  %v12419_v48 = vld [vmem:[%s18957_s5 + $0x668] ss:$12 sps:$4 sm:$0xff]  }
 0x604   :  { %11531 = vmatprep.subr.bf16.mxu1 %v12410_v35 }
 0x607   :  { %7794 = vmatmul.mubr.bf16.vlgmr.msra.gmra.mxu0 %v17286_v43  ;;  %11532 = vmatpush3.bf16.msra.mxu1 %v12411_v22  ;;  %v12415_v43 = vld [vmem:[%s18957_s5 + $0x4e8] ss:$12 sps:$4 sm:$0xff]  }
 0x608   :  { %7801 = vmatprep.mubr.bf16.mxu0 %v17293_v42  ;;  %11533 = vmatprep.subr.bf16.mxu1 %v12412_v10  ;;  %v12417_v42 = vld [vmem:[%s18957_s5 + $0x590] ss:$12 sps:$4 sm:$0xff]  }
 0x609   :  { %11674 = vmatpush3.bf16.msra.mxu0 %v12416_v55  ;;  %v12450_v22 = vld [vmem:[%s18958_s7 + $0x14] ss:$8 sps:$4 sm:$0xff]  }
 0x60a   :  { %7729 = vmatmul.mubr.bf16.gmra.mxu1 %v17118_v57  ;;  %11675 = vmatprep.subr.bf16.mxu0 %v19028_v12  ;;  %v12418_v57 = vld [vmem:[%s18957_s5 + $0x4d0] ss:$12 sps:$4 sm:$0xff]  }
 0x60b   :  { %7736 = vmatprep.mubr.bf16.mxu1 %v17196_v5  ;;  %11534 = vmatpush3.bf16.msra.mxu1 %v12413_v29  ;;  %v12420_v5 = vld [vmem:[%s18957_s5 + $0x578] ss:$12 sps:$4 sm:$0xff]  }
 0x60c   :  { %11535 = vmatprep.subr.bf16.mxu1 %v12414_v41 }
 0x60d   :  { %11676 = vmatpush3.bf16.msra.mxu0 %v12419_v48 }
 0x60e   :  { %11677 = vmatprep.subr.bf16.mxu0 %v19028_v12 }
 0x60f   :  { %7802 = vmatmul.mubr.bf16.gmra.mxu0 %v17315_v16  ;;  %11536 = vmatpush3.bf16.msra.mxu1 %v12415_v43  ;;  %v12421_v16 = vld [vmem:[%s18957_s5 + $0x4b8] ss:$12 sps:$4 sm:$0xff]  }
 0x610   :  { %7809 = vmatprep.mubr.bf16.mxu0 %v17320_v45  ;;  %11537 = vmatprep.subr.bf16.mxu1 %v12417_v42  ;;  %v12423_v45 = vld [vmem:[%s18957_s5 + $0x560] ss:$12 sps:$4 sm:$0xff]  }
 0x611   :  { %11678 = vmatpush3.bf16.msra.mxu0 %v12422_v25  ;;  %v12453_v43 = vld [vmem:[%s18958_s7 + $0x4] ss:$8 sps:$4 sm:$0xff]  }
 0x612   :  { %7737 = vmatmul.mubr.bf16.gmra.mxu1 %v17200_v27  ;;  %11679 = vmatprep.subr.bf16.mxu0 %v19028_v12  ;;  %v12424_v27 = vld [vmem:[%s18957_s5 + $0x4a0] ss:$12 sps:$4 sm:$0xff]  }
 0x613   :  { %7744 = vmatprep.mubr.bf16.mxu1 %v17253_v11  ;;  %11538 = vmatpush3.bf16.msra.mxu1 %v12418_v57  ;;  %v12426_v11 = vld [vmem:[%s18957_s5 + $0x548] ss:$12 sps:$4 sm:$0xff]  }
 0x614   :  { %11539 = vmatprep.subr.bf16.mxu1 %v12420_v5  ;;  %v12451_v5 = vld [vmem:[%s18958_s7] ss:$8 sps:$4 sm:$0xff]  }
 0x615   :  { %11680 = vmatpush3.bf16.msra.mxu0 %v12425_v23 }
 0x616   :  { %11681 = vmatprep.subr.bf16.mxu0 %v19028_v12 }
 0x617   :  { %7810 = vmatmul.mubr.bf16.gmra.mxu0 %v17191_v3  ;;  %11540 = vmatpush3.bf16.msra.mxu1 %v12421_v16  ;;  %v12427_v3 = vld [vmem:[%s18957_s5 + $0x488] ss:$12 sps:$4 sm:$0xff]  }
 0x618   :  { %7817 = vmatprep.mubr.bf16.mxu0 %v17360_v53  ;;  %11541 = vmatprep.subr.bf16.mxu1 %v12423_v45  ;;  %v12432_v53 = vld [vmem:[%s18958_s7 + $0x74] ss:$8 sps:$4 sm:$0xff]  }
 0x619   :  { %11682 = vmatpush3.bf16.msra.mxu0 %v12428_v56  ;;  %v12456_v16 = vld [vmem:[%s18958_s7 + $0xf4] ss:$8 sps:$4 sm:$0xff]   ;;  %v12460_v56 = vld [vmem:[%s18958_s7 + $0xd0] ss:$8 sps:$4 sm:$0xff]  }
 0x61a   :  { %7745 = vmatmul.mubr.bf16.gmra.mxu1 %v17255_v6  ;;  %11683 = vmatprep.subr.bf16.mxu0 %v19028_v12  ;;  %v12462_v45 = vld [vmem:[%s18958_s7 + $0xd4] ss:$8 sps:$4 sm:$0xff]  }
 0x61b   :  { %7752 = vmatprep.mubr.bf16.mxu1 %v17284_v18  ;;  %11542 = vmatpush3.bf16.msra.mxu1 %v12424_v27  ;;  %v7244_v24 = vpop.f32.mrf.mxu1  ;;  %v17691_v18 = vpop.f32.mrf.mxu0  ;;  %v12463_v27 = vld [vmem:[%s18958_s7 + $0xc0] ss:$8 sps:$4 sm:$0xff]  }
 0x61c   :  { %11543 = vmatprep.subr.bf16.mxu1 %v12426_v11  ;;  %v7245_v28 = vadd.f32 %v7244_v24, %v17565_v17  ;;  %v12469_v24 = vld [vmem:[%s18958_s7 + $0xa0] ss:$8 sps:$4 sm:$0xff]  }
 0x61d   :  { %11684 = vmatpush3.bf16.msra.mxu0 %v12429_v31  ;;  %v7246_v6 = vpop.f32.mrf.mxu1  ;;  %v12466_v31 = vld [vmem:[%s18958_s7 + $0xb0] ss:$8 sps:$4 sm:$0xff]  }
 0x61f   :  { %7818 = vmatmul.mubr.bf16.gmra.mxu0 %v17399_v60  ;;  %11544 = vmatpush3.bf16.msra.mxu1 %v12427_v3  ;;  %v7248_v30 = vpop.f32.mrf.mxu1  ;;  %v12430_v60 = vld [vmem:[%s18958_s7 + $0x70] ss:$8 sps:$4 sm:$0xff]  }
 0x620   :  { %7825 = vmatprep.mubr.bf16.mxu0 %v17433_v32  ;;  %8280 = vmatprep.subr.bf16.mxu1 %v12432_v53  ;;  %v7247_v32 = vadd.f32 %v7246_v6, %v17570_v44  ;;  %v7249_v47 = vadd.f32 %v7248_v30, %v17565_v17  ;;  %v12471_v53 = vld [vmem:[%s18958_s7 + $0xa4] ss:$8 sps:$4 sm:$0xff]   ;;  %v12472_v30 = vld [vmem:[%s18958_s7 + $0x90] ss:$8 sps:$4 sm:$0xff]  }
 0x621   :  { %v17737_v62 = vpop.f32.mrf.mxu1 }
 0x622   :  { %7753 = vmatmul.mubr.bf16.gmra.mxu1 %v17291_v13  ;;  %v12435_v13 = vld [vmem:[%s18958_s7 + $0x64] ss:$8 sps:$4 sm:$0xff]  }
 0x623   :  { %7866 = vmatprep.mubr.bf16.mxu1 %v17300_v14 }
 0x627   :  { %v7327_v20 = vpop.f32.mrf.mxu0  ;;  %7826 = vmatmul.mubr.bf16.gmra.mxu0 %v17436_v58 }
 0x628   :  { %v17699_v52 = vadd.f32 %v7327_v20, %v7245_v28  ;;  %11685 = vmatprep.mubr.msk.bf16.mxu0 %vm12628_vm9, %v19028_v12  ;;  %v12474_v28 = vld [vmem:[%s18958_s7 + $0x94] ss:$8 sps:$4 sm:$0xff]  }
 0x629   :  { %v7329_v14 = vpop.f32.mrf.mxu0 }
 0x62a   :  { %v17707_v58 = vadd.f32 %v7329_v14, %v7247_v32  ;;  %7867 = vmatmul.mubr.bf16.vlgmr.msra.gmra.mxu1 %v17322_v21  ;;  %v12436_v21 = vld [vmem:[%s18958_s7 + $0x50] ss:$8 sps:$4 sm:$0xff]  }
 0x62b   :  { %v7331_v33 = vpop.f32.mrf.mxu0  ;;  %7874 = vmatprep.mubr.bf16.mxu1 %v17331_v40  ;;  %8281 = vmatpush1.bf16.msra.mxu1 %v12430_v60  ;;  %v12441_v40 = vld [vmem:[%s18958_s7 + $0x44] ss:$8 sps:$4 sm:$0xff]  }
 0x62c   :  { %v17714_v37 = vadd.f32 %v7331_v33, %v7249_v47  ;;  %8282 = vmatprep.subr.bf16.mxu1 %v12435_v13  ;;  %v12477_v60 = vld [vmem:[%s18958_s7 + $0x84] ss:$8 sps:$4 sm:$0xff]   ;;  %v12475_v47 = vld [vmem:[%s18958_s7 + $0x80] ss:$8 sps:$4 sm:$0xff]  }
 0x62d   :  { %v17757_v10 = vpop.f32.mrf.mxu0 }
 0x62f   :  { %11686 = vmatmul.mubr.msk.bf16.vlgmr.msra.gmra.mxu0 %vm55_vm1, %v17454_v61  ;;  %8283 = vmatpush1.bf16.msra.mxu1 %v12433_v19  ;;  %v12439_v61 = vld [vmem:[%s18958_s7 + $0x40] ss:$8 sps:$4 sm:$0xff]  }
 0x630   :  { %11689 = vmatprep.mubr.msk.bf16.mxu0 %vm12628_vm9, %v19028_v12  ;;  %8284 = vmatprep.subr.bf16.mxu1 %v12438_v15 }
 0x632   :  { %7875 = vmatmul.mubr.bf16.gmra.mxu1 %v17362_v34  ;;  %v7254_v9 = vpop.f32.mrf.mxu1  ;;  %v12442_v34 = vld [vmem:[%s18958_s7 + $0x30] ss:$8 sps:$4 sm:$0xff]  }
 0x633   :  { %7882 = vmatprep.mubr.bf16.mxu1 %v17371_v36  ;;  %8285 = vmatpush1.bf16.msra.mxu1 %v12436_v21  ;;  %v12447_v36 = vld [vmem:[%s18958_s7 + $0x24] ss:$8 sps:$4 sm:$0xff]   ;;  %v7255_v29 = vadd.f32 %v7254_v9, %v17565_v17 }
 0x634   :  { %8286 = vmatprep.subr.bf16.mxu1 %v12441_v40  ;;  %v7256_v35 = vpop.f32.mrf.mxu1 }
 0x636   :  { %v7258_v55 = vpop.f32.mrf.mxu1 }
 0x637   :  { %11690 = vmatmul.mubr.msk.bf16.gmra.mxu0 %vm55_vm1, %v17479_v59  ;;  %8287 = vmatpush1.bf16.msra.mxu1 %v12439_v61  ;;  %v12445_v59 = vld [vmem:[%s18958_s7 + $0x20] ss:$8 sps:$4 sm:$0xff]  }
 0x638   :  { %11693 = vmatprep.mubr.msk.bf16.mxu0 %vm12628_vm9, %v19028_v12  ;;  %8288 = vmatprep.subr.bf16.mxu1 %v12444_v8  ;;  %v17818_v11 = vpop.f32.mrf.mxu1 }
 0x63a   :  { %7883 = vmatmul.mubr.bf16.gmra.mxu1 %v17198_v50  ;;  %v12448_v50 = vld [vmem:[%s18958_s7 + $0x10] ss:$8 sps:$4 sm:$0xff]  }
 0x63b   :  { %7890 = vmatprep.mubr.bf16.mxu1 %v17408_v7  ;;  %8289 = vmatpush1.bf16.msra.mxu1 %v12442_v34  ;;  %v7257_v7 = vadd.f32 %v7256_v35, %v17570_v44 }
 0x63c   :  { %8290 = vmatprep.subr.bf16.mxu1 %v12447_v36 }
 0x63f   :  { %v7337_v41 = vpop.f32.mrf.mxu0  ;;  %11694 = vmatmul.mubr.msk.bf16.gmra.mxu0 %vm55_vm1, %v17510_v49  ;;  %8291 = vmatpush1.bf16.msra.mxu1 %v12445_v59  ;;  %v7259_v49 = vadd.f32 %v7258_v55, %v17565_v17 }
 0x640   :  { %v17766_v48 = vadd.f32 %v7337_v41, %v7255_v29  ;;  %11697 = vmatprep.mubr.msk.bf16.mxu0 %vm12628_vm9, %v19028_v12  ;;  %8292 = vmatprep.subr.bf16.mxu1 %v12450_v22  ;;  %v12478_v22 = vld [vmem:[%s18958_s7 + $0x130] ss:$8 sps:$4 sm:$0xff]   ;;  %v12480_v29 = vld [vmem:[%s18958_s7 + $0x134] ss:$8 sps:$4 sm:$0xff]  }
 0x641   :  { %v7339_v42 = vpop.f32.mrf.mxu0  ;;  %v12483_v41 = vld [vmem:[%s18958_s7 + $0x274] ss:$8 sps:$4 sm:$0xff]   ;;  %8371 = vmatprep.subr.bf16.mxu0 %v12480_v29 }
 0x642   :  { %v17774_v25 = vadd.f32 %v7339_v42, %v7257_v7  ;;  %7891 = vmatmul.mubr.bf16.gmra.mxu1 %v17425_v46  ;;  %v12454_v46 = vld [vmem:[%s18958_s7 + $0xf0] ss:$8 sps:$4 sm:$0xff]   ;;  %8372 = vmatpush1.bf16.msra.mxu0 %v12478_v22 }
 0x643   :  { %v7341_v57 = vpop.f32.mrf.mxu0  ;;  %7898 = vmatprep.mubr.bf16.mxu1 %v17430_v4  ;;  %8293 = vmatpush1.bf16.msra.mxu1 %v12448_v50  ;;  %v12459_v4 = vld [vmem:[%s18958_s7 + $0xe4] ss:$8 sps:$4 sm:$0xff]  }
 0x644   :  { %v17781_v23 = vadd.f32 %v7341_v57, %v7259_v49  ;;  %8294 = vmatprep.subr.bf16.mxu1 %v12453_v43 }
 0x645   :  { %v17838_v32 = vpop.f32.mrf.mxu0 }
 0x647   :  { %11698 = vmatmul.mubr.msk.bf16.gmra.mxu0 %vm55_vm1, %v17550_v54  ;;  %8295 = vmatpush1.bf16.msra.mxu1 %v12451_v5  ;;  %v12457_v54 = vld [vmem:[%s18958_s7 + $0xe0] ss:$8 sps:$4 sm:$0xff]  }
 0x648   :  { %11701 = vmatprep.mubr.msk.bf16.mxu0 %vm12628_vm9, %v19028_v12  ;;  %8296 = vmatprep.subr.bf16.mxu1 %v12456_v16  ;;  %v12484_v5 = vld [vmem:[%s18958_s7 + $0x120] ss:$8 sps:$4 sm:$0xff]   ;;  %v12486_v16 = vld [vmem:[%s18958_s7 + $0x124] ss:$8 sps:$4 sm:$0xff]   ;;  %v7241_v12 = vadd.f32 %v17685_v63, %v17570_v44 }
 0x649   :  { %8373 = vmatprep.subr.bf16.mxu0 %v12486_v16 }
 0x64a   :  { %7899 = vmatmul.mubr.bf16.gmra.mxu1 %v17447_v0  ;;  %v12465_v0 = vld [vmem:[%s18958_s7 + $0xc4] ss:$8 sps:$4 sm:$0xff]   ;;  %8374 = vmatpush1.bf16.msra.mxu0 %v12484_v5 }
 0x64b   :  { %8297 = vmatpush2.bf16.msra.mxu1 %v12454_v46 }
 0x64c   :  { %8298 = vmatprep.subr.bf16.mxu1 %v12459_v4 }
 0x64f   :  { %11702 = vmatmul.mubr.msk.bf16.gmra.mxu0 %vm55_vm1, %v17584_v38  ;;  %8299 = vmatpush2.bf16.msra.mxu1 %v12457_v54  ;;  %v12468_v38 = vld [vmem:[%s18958_s7 + $0xb4] ss:$8 sps:$4 sm:$0xff]  }
 0x650   :  { %8300 = vmatprep.subr.bf16.mxu1 %v12462_v45  ;;  %8395 = vmatprep.mubr.bf16.mxu0 %v19030_v1 }
 0x653   :  { %8301 = vmatpush2.bf16.msra.mxu1 %v12460_v56 }
 0x654   :  { %8302 = vmatprep.subr.bf16.mxu1 %v12465_v0  ;;  %v12490_v0 = vld [vmem:[%s18958_s7 + $0x110] ss:$8 sps:$4 sm:$0xff]  }
 0x657   :  { %8303 = vmatpush2.bf16.msra.mxu1 %v12463_v27  ;;  %v7264_v3 = vpop.f32.mrf.mxu1 }
 0x658   :  { %8304 = vmatprep.subr.bf16.mxu1 %v12468_v38  ;;  %v7265_v13 = vadd.f32 %v7264_v3, %v17565_v17 }
 0x659   :  { %v7266_v6 = vpop.f32.mrf.mxu1 }
 0x65a   :  { %v7267_v33 = vadd.f32 %v7266_v6, %v17570_v44 }
 0x65b   :  { %8305 = vmatpush2.bf16.msra.mxu1 %v12466_v31  ;;  %v7268_v20 = vpop.f32.mrf.mxu1  ;;  %v12492_v31 = vld [vmem:[%s18958_s7 + $0x114] ss:$8 sps:$4 sm:$0xff]  }
 0x65c   :  { %8306 = vmatprep.subr.bf16.mxu1 %v12471_v53  ;;  %v7269_v40 = vadd.f32 %v7268_v20, %v17565_v17  ;;  %8375 = vmatprep.subr.bf16.mxu0 %v12492_v31  ;;  %v12498_v20 = vld [vmem:[%s18958_s7 + $0x104] ss:$8 sps:$4 sm:$0xff]  }
 0x65d   :  { %v17845_v19 = vpop.f32.mrf.mxu1  ;;  %8376 = vmatpush1.bf16.msra.mxu0 %v12490_v0 }
 0x65e   :  { %8377 = vmatprep.subr.bf16.mxu0 %v12498_v20 }
 0x65f   :  { %8307 = vmatpush2.bf16.msra.mxu1 %v12469_v24 }
 0x660   :  { %8308 = vmatprep.subr.bf16.mxu1 %v12474_v28  ;;  %v12496_v28 = vld [vmem:[%s18958_s7 + $0x100] ss:$8 sps:$4 sm:$0xff]  }
 0x661   :  { %8378 = vmatpush1.bf16.msra.mxu0 %v12496_v28 }
 0x663   :  { %8309 = vmatpush2.bf16.msra.mxu1 %v12472_v30 }
 0x664   :  { %v7347_v14 = vpop.f32.mrf.mxu0  ;;  %8310 = vmatprep.subr.bf16.mxu1 %v12477_v60 }
 0x665   :  { %v17847_v15 = vadd.f32 %v7347_v14, %v7265_v13  ;;  %v12504_v14 = vld [vmem:[%s18958_s7 + $0x1b4] ss:$8 sps:$4 sm:$0xff]  }
 0x666   :  { %v7349_v21 = vpop.f32.mrf.mxu0  ;;  %8687 = vmatprep.subr.bf16.mxu0 %v12504_v14 }
 0x667   :  { %v17850_v61 = vadd.f32 %v7349_v21, %v7267_v33  ;;  %v7274_v8 = vpop.f32.mrf.mxu1  ;;  %8311 = vmatpush2.bf16.msra.mxu1 %v12475_v47 }
 0x668   :  { %v7351_v9 = vpop.f32.mrf.mxu0  ;;  %v7275_v50 = vadd.f32 %v7274_v8, %v17565_v17  ;;  %8778 = vmatprep.subr.bf16.mxu1 %v12483_v41 }
 0x669   :  { %v17852_v34 = vadd.f32 %v7351_v9, %v7269_v40  ;;  %v7276_v36 = vpop.f32.mrf.mxu1 }
 0x66a   :  { %v17862_v55 = vpop.f32.mrf.mxu0  ;;  %v7277_v42 = vadd.f32 %v7276_v36, %v17570_v44 }
 0x66b   :  { %v7278_v35 = vpop.f32.mrf.mxu1 }
 0x66c   :  { %v7279_v4 = vadd.f32 %v7278_v35, %v17565_v17 }
 0x66d   :  { %v17854_v59 = vpop.f32.mrf.mxu1 }
 0x66e   :  { %19324 = vst [vmem:[#allocation17_spill] sm:$0xff] %v17854_v59 }
 0x66f   :  { %v17868_v7 = vpop.f32.mrf.mxu1  ;;  %v7357_v43 = vpop.f32.mrf.mxu0 }
 0x670   :  { %v17871_v49 = vadd.f32 %v7357_v43, %v7275_v50 }
 0x671   :  { %v7402_v57 = vpop.f32.mrf.mxu1  ;;  %v7359_v46 = vpop.f32.mrf.mxu0 }
 0x672   :  { %19325 = vst [vmem:[#allocation60_spill] sm:$0xff] %v17871_v49  ;;  %v17880_v54 = vadd.f32 %v7359_v46, %v7277_v42 }
 0x673   :  { %v7404_v45 = vpop.f32.mrf.mxu1  ;;  %v7361_v56 = vpop.f32.mrf.mxu0 }
 0x674   :  { %19326 = vst [vmem:[#allocation18_spill] sm:$0xff] %v17880_v54  ;;  %v17885_v27 = vadd.f32 %v7361_v56, %v7279_v4  ;;  %v7405_v49 = vadd.f32 %v7404_v45, %v17595_v39 }
 0x675   :  { %v7406_v38 = vpop.f32.mrf.mxu1  ;;  %v17890_v3 = vpop.f32.mrf.mxu0 }
 0x676   :  { %19327 = vst [vmem:[#allocation61_spill] sm:$0xff] %v17885_v27  ;;  %19328 = vst [vmem:[#allocation19_spill] sm:$0xff] %v17890_v3  ;;  %v7401_v27 = vadd.f32 %v17868_v7, %v17586_v26 }
 0x677   :  { %v17892_v17 = vpop.f32.mrf.mxu1  ;;  %v7483_v53 = vpop.f32.mrf.mxu0 }
 0x678   :  { %v7411_v39 = vadd.f32 %v17892_v17, %v17699_v52 }
 0x679   :  { %v17894_v24 = vpop.f32.mrf.mxu1  ;;  %v7485_v6 = vpop.f32.mrf.mxu0 }
 0x67b   :  { %v17899_v30 = vpop.f32.mrf.mxu1  ;;  %v7487_v60 = vpop.f32.mrf.mxu0 }
 0x67d   :  { %v17904_v13 = vpop.f32.mrf.mxu1  ;;  %v7489_v47 = vpop.f32.mrf.mxu0 }
 0x67f   :  { %v17909_v33 = vpop.f32.mrf.mxu1  ;;  %v7493_v21 = vpop.f32.mrf.mxu0 }
 0x681   :  { %v17911_v40 = vpop.f32.mrf.mxu1  ;;  %v7495_v8 = vpop.f32.mrf.mxu0 }
 0x683   :  { %v17913_v9 = vpop.f32.mrf.mxu1  ;;  %v7497_v36 = vpop.f32.mrf.mxu0 }
 0x685   :  { %v17915_v35 = vpop.f32.mrf.mxu1  ;;  %v17917_v22 = vpop.f32.mrf.mxu0 }
 0x687   :  { %v17919_v29 = vpop.f32.mrf.mxu1  ;;  %v17921_v41 = vpop.f32.mrf.mxu0 }
 0x689   :  { %v17923_v50 = vpop.f32.mrf.mxu1  ;;  %v17925_v43 = vpop.f32.mrf.mxu0 }
 0x68b   :  { %v17927_v42 = vpop.f32.mrf.mxu0  ;;  %v17929_v5 = vpop.f32.mrf.mxu1 }
 0x68d   :  { %v17931_v16 = vpop.f32.mrf.mxu0  ;;  %v17935_v4 = vpop.f32.mrf.mxu1 }
 0x68e   :  { %19330 = vst [vmem:[#allocation87_spill] sm:$0xff] %v17935_v4 }
 0x68f   :  { %v17933_v46 = vpop.f32.mrf.mxu0 }
 0x690   :  { %19329 = vst [vmem:[#allocation63_spill] sm:$0xff] %v17933_v46 }
 0x691   :  { %v17937_v56 = vpop.f32.mrf.mxu0 }
 0x692   :  { %19331 = vst [vmem:[#allocation16_spill] sm:$0xff] %v17937_v56  ;;  %v17939_v0 = vpop.f32.mrf.mxu1 }
 0x693   :  { %19332 = vst [vmem:[#allocation58_spill] sm:$0xff] %v17939_v0  ;;  %v17941_v31 = vpop.f32.mrf.mxu0  ;;  %v7324_v0 = vadd.f32 %v17691_v18, %v7241_v12 }
 0x694   :  { %19333 = vst [vmem:[#allocation20_spill] sm:$0xff] %v17941_v31  ;;  %v17943_v28 = vpop.f32.mrf.mxu1  ;;  %v7488_v31 = vadd.f32 %v7487_v60, %v7405_v49 }
 0x695   :  { %19334 = vst [vmem:[#allocation64_spill] sm:$0xff] %v17943_v28  ;;  %v17945_v20 = vpop.f32.mrf.mxu0  ;;  %v7403_v28 = vadd.f32 %v7402_v57, %v17591_v2  ;;  %v7251_v2 = vadd.f32 %v17737_v62, %v17570_v44  ;;  %v7494_v62 = vadd.f32 %v7493_v21, %v7411_v39 }
 0x696   :  { %19335 = vst [vmem:[#allocation82_spill] sm:$0xff] %v17945_v20  ;;  %v17947_v14 = vpop.f32.mrf.mxu1  ;;  %v7407_v20 = vadd.f32 %v7406_v38, %v7324_v0  ;;  %v7413_v38 = vadd.f32 %v17894_v24, %v17707_v58 }
 0x697   :  { %19336 = vst [vmem:[#allocation15_spill] sm:$0xff] %v17947_v14  ;;  %v17951_v1 = vpop.f32.mrf.mxu0  ;;  %v7484_v14 = vadd.f32 %v7483_v53, %v7401_v27  ;;  %v7334_v49 = vadd.f32 %v17757_v10, %v7251_v2  ;;  %v7425_v2 = vadd.f32 %v17913_v9, %v17781_v23 }
 0x698   :  { %19337 = vst [vmem:[#allocation57_spill] sm:$0xff] %v17951_v1  ;;  %v17953_v51 = vpop.f32.mrf.mxu1  ;;  %v7486_v1 = vadd.f32 %v7485_v6, %v7403_v28  ;;  %v7490_v7 = vadd.f32 %v7489_v47, %v7407_v20  ;;  %v7496_v10 = vadd.f32 %v7495_v8, %v7413_v38  ;;  %v7421_v28 = vadd.f32 %v17909_v33, %v17766_v48  ;;  %v12495_v33 = vld [vmem:[%s18958_s7 + $0x254] ss:$8 sps:$4 sm:$0xff]  }
 0x699   :  { %19338 = vst [vmem:[#allocation77_spill] sm:$0xff] %v17953_v51  ;;  %v17957_v54 = vpop.f32.mrf.mxu0  ;;  %v7417_v17 = vadd.f32 %v17904_v13, %v7334_v49  ;;  %v7508_v9 = vadd.f32 %v17927_v42, %v7425_v2 }
 0x69a   :  { %19339 = vst [vmem:[#allocation14_spill] sm:$0xff] %v17957_v54  ;;  %v7566_v3 = vpop.f32.mrf.mxu1  ;;  %v7504_v39 = vadd.f32 %v17921_v41, %v7421_v28  ;;  %v12493_v41 = vld [vmem:[%s18958_s7 + $0x250] ss:$8 sps:$4 sm:$0xff]  }
 0x69b   :  { %v17962_v59 = vpop.f32.mrf.mxu0  ;;  %v7567_v51 = vadd.f32 %v7566_v3, %v7484_v14  ;;  %v7500_v21 = vadd.f32 %v17917_v22, %v7417_v17  ;;  %v12487_v22 = vld [vmem:[%s18958_s7 + $0x260] ss:$8 sps:$4 sm:$0xff]   ;;  %v7431_v17 = vadd.f32 %v17919_v29, %v17847_v15  ;;  %v19344_v29 = vld [vmem:[#allocation63_spill] sm:$0xff] }
 0x69c   :  { %v7568_v63 = vpop.f32.mrf.mxu1 }
 0x69d   :  { %v17964_v56 = vpop.f32.mrf.mxu0  ;;  %v7569_v54 = vadd.f32 %v7568_v63, %v7486_v1  ;;  %v7980_v18 = vmax.f32 %v7567_v51, 0.0  ;;  %v7415_v1 = vadd.f32 %v17899_v30, %v17714_v37  ;;  %v12481_v37 = vld [vmem:[%s18958_s7 + $0x270] ss:$8 sps:$4 sm:$0xff]   ;;  %v12489_v30 = vld [vmem:[%s18958_s7 + $0x264] ss:$8 sps:$4 sm:$0xff]  }
 0x69e   :  { %v7570_v26 = vpop.f32.mrf.mxu1 }
 0x69f   :  { %v7571_v4 = vadd.f32 %v7570_v26, %v7488_v31  ;;  %v11407_v46 = vpop.f32.mrf.mxu0  ;;  %v7981_v6 = vmax.f32 %v7569_v54, 0.0 }
 0x6a0   :  { %v7572_v12 = vpop.f32.mrf.mxu1 }
 0x6a1   :  { %v7983_v57 = vmax.f32 %v7571_v4, 0.0  ;;  %v7573_v45 = vadd.f32 %v7572_v12, %v7490_v7  ;;  %v11408_v27 = vpop.f32.mrf.mxu0  ;;  %v7498_v4 = vadd.f32 %v7497_v36, %v7415_v1  ;;  %v7261_v36 = vadd.f32 %v17818_v11, %v17570_v44 }
 0x6a2   :  { %v17975_v3 = vadd.f32 %v11408_v27, %v11407_v46  ;;  %v7576_v53 = vpop.f32.mrf.mxu1  ;;  %v7423_v11 = vadd.f32 %v17911_v40, %v17774_v25 }
 0x6a3   :  { %v17977_v60 = vpack.c.bf16 %v7983_v57, %v7980_v18  ;;  %v7984_v52 = vmax.f32 %v7573_v45, 0.0  ;;  %v17979_v51 = vpop.f32.mrf.mxu0  ;;  %v7577_v0 = vadd.f32 %v7576_v53, %v7494_v62  ;;  %v7344_v7 = vadd.f32 %v17838_v32, %v7261_v36 }
 0x6a4   :  { %v7578_v47 = vpop.f32.mrf.mxu1  ;;  %v7506_v23 = vadd.f32 %v17925_v43, %v7423_v11 }
 0x6a5   :  { %19340 = vst [vmem:[#allocation55_spill] sm:$0xff] %v17977_v60  ;;  %v17982_v58 = vpop.f32.mrf.mxu0  ;;  %v17984_v24 = vpack.c.bf16 %v7984_v52, %v7981_v6  ;;  %v7579_v13 = vadd.f32 %v7578_v47, %v7496_v10  ;;  %v7986_v20 = vmax.f32 %v7577_v0, 0.0  ;;  %v7427_v25 = vadd.f32 %v17915_v35, %v7344_v7  ;;  %v12501_v35 = vld [vmem:[%s18958_s7 + $0x244] ss:$8 sps:$4 sm:$0xff]  }
 0x6a6   :  { %v7580_v54 = vpop.f32.mrf.mxu1  ;;  %v7271_v6 = vadd.f32 %v17845_v19, %v17570_v44  ;;  %v7433_v19 = vadd.f32 %v17923_v50, %v17850_v61  ;;  %v19348_v50 = vld [vmem:[#allocation20_spill] sm:$0xff] }
 0x6a7   :  { %19341 = vst [vmem:[#allocation22_spill] sm:$0xff] %v17984_v24  ;;  %v7581_v46 = vadd.f32 %v7580_v54, %v7498_v4  ;;  %v11413_v8 = vpop.f32.mrf.mxu0  ;;  %8312 = vmatprep.mubr.bf16.mxu1 %v17984_v24  ;;  %v7987_v18 = vmax.f32 %v7579_v13, 0.0  ;;  %v7510_v43 = vadd.f32 %v17931_v16, %v7427_v25  ;;  %v12499_v16 = vld [vmem:[%s18958_s7 + $0x240] ss:$8 sps:$4 sm:$0xff]   ;;  %v7435_v54 = vadd.f32 %v17929_v5, %v17852_v34  ;;  %v19353_v25 = vld [vmem:[#allocation58_spill] sm:$0xff] }
 0x6a8   :  { %v7582_v31 = vpop.f32.mrf.mxu1  ;;  %8313 = vmatmul.mubr.bf16.vlgmr.msra.gmra.mxu1 %v17977_v60 }
 0x6a9   :  { %v7989_v14 = vmax.f32 %v7581_v46, 0.0  ;;  %v7583_v63 = vadd.f32 %v7582_v31, %v7500_v21  ;;  %v11414_v26 = vpop.f32.mrf.mxu0  ;;  %8779 = vmatpush1.bf16.msra.mxu1 %v12481_v37  ;;  %v7354_v37 = vadd.f32 %v17862_v55, %v7271_v6  ;;  %v7514_v21 = vadd.f32 %v19344_v29, %v7431_v17  ;;  %v19346_v31 = vld [vmem:[#allocation87_spill] sm:$0xff]  ;;  %v19362_v29 = vld [vmem:[#allocation14_spill] sm:$0xff] }
 0x6aa   :  { %v18007_v12 = vadd.f32 %v11414_v26, %v11413_v8  ;;  %v7586_v48 = vpop.f32.mrf.mxu1  ;;  %8780 = vmatprep.subr.bf16.mxu1 %v12489_v30  ;;  %v19358_v6 = vld [vmem:[#allocation15_spill] sm:$0xff] }
 0x6ab   :  { %v18013_v57 = vpack.c.bf16 %v7989_v14, %v7986_v20  ;;  %v7990_v32 = vmax.f32 %v7583_v63, 0.0  ;;  %v18015_v45 = vpop.f32.mrf.mxu0  ;;  %v7587_v27 = vadd.f32 %v7586_v48, %v7504_v39  ;;  %v7437_v55 = vadd.f32 %v19346_v31, %v7354_v37  ;;  %v19347_v20 = vld [vmem:[#allocation16_spill] sm:$0xff] }
 0x6ac   :  { %v7588_v40 = vpop.f32.mrf.mxu1  ;;  %v7516_v61 = vadd.f32 %v19347_v20, %v7433_v19  ;;  %v7518_v14 = vadd.f32 %v19348_v50, %v7435_v54  ;;  %v19361_v19 = vld [vmem:[#allocation77_spill] sm:$0xff] }
 0x6ad   :  { %19342 = vst [vmem:[#allocation66_spill] sm:$0xff] %v18013_v57  ;;  %v18020_v49 = vpop.f32.mrf.mxu0  ;;  %v18022_v38 = vpack.c.bf16 %v7990_v32, %v7987_v18  ;;  %8781 = vmatpush1.bf16.msra.mxu1 %v12487_v22  ;;  %v7589_v53 = vadd.f32 %v7588_v40, %v7506_v23  ;;  %v7992_v47 = vmax.f32 %v7587_v27, 0.0  ;;  %v19350_v22 = vld [vmem:[#allocation82_spill] sm:$0xff]  ;;  %v19352_v32 = vld [vmem:[#allocation60_spill] sm:$0xff] }
 0x6ae   :  { %v7590_v1 = vpop.f32.mrf.mxu1  ;;  %8782 = vmatprep.subr.bf16.mxu1 %v12495_v33  ;;  %v7520_v7 = vadd.f32 %v19350_v22, %v7437_v55  ;;  %v19351_v33 = vld [vmem:[#allocation17_spill] sm:$0xff]  ;;  %v7441_v40 = vadd.f32 %v19353_v25, %v19352_v32 }
 0x6af   :  { %19343 = vst [vmem:[#allocation72_spill] sm:$0xff] %v18022_v38  ;;  %v7591_v42 = vadd.f32 %v7590_v1, %v7508_v9  ;;  %v11419_v62 = vpop.f32.mrf.mxu0  ;;  %8322 = vmatprep.mubr.bf16.mxu1 %v18022_v38  ;;  %v7993_v13 = vmax.f32 %v7589_v53, 0.0  ;;  %v7281_v39 = vadd.f32 %v19351_v33, %v17570_v44  ;;  %v19354_v1 = vld [vmem:[#allocation19_spill] sm:$0xff]  ;;  %v19356_v53 = vld [vmem:[#allocation64_spill] sm:$0xff] }
 0x6b0   :  { %v7592_v52 = vpop.f32.mrf.mxu1  ;;  %8323 = vmatmul.mubr.bf16.gmra.mxu1 %v18013_v57 }
 0x6b1   :  { %v7995_v10 = vmax.f32 %v7591_v42, 0.0  ;;  %v7593_v4 = vadd.f32 %v7592_v52, %v7510_v43  ;;  %v11420_v0 = vpop.f32.mrf.mxu0  ;;  %8783 = vmatpush1.bf16.msra.mxu1 %v12493_v41  ;;  %v19355_v43 = vld [vmem:[#allocation18_spill] sm:$0xff] }
 0x6b2   :  { %v18045_v30 = vadd.f32 %v11420_v0, %v11419_v62  ;;  %v7596_v15 = vpop.f32.mrf.mxu1  ;;  %8784 = vmatprep.subr.bf16.mxu1 %v12501_v35  ;;  %v7364_v35 = vadd.f32 %v19354_v1, %v7281_v39  ;;  %v7443_v42 = vadd.f32 %v19356_v53, %v19355_v43  ;;  %v19357_v62 = vld [vmem:[#allocation61_spill] sm:$0xff] }
 0x6b3   :  { %v18048_v46 = vpack.c.bf16 %v7995_v10, %v7992_v47  ;;  %v7996_v8 = vmax.f32 %v7593_v4, 0.0  ;;  %v18050_v36 = vpop.f32.mrf.mxu0  ;;  %v7597_v34 = vadd.f32 %v7596_v15, %v7514_v21  ;;  %v7445_v52 = vadd.f32 %v19358_v6, %v19357_v62  ;;  %v19359_v47 = vld [vmem:[#allocation57_spill] sm:$0xff] }
 0x6b4   :  { %v7598_v28 = vpop.f32.mrf.mxu1  ;;  %v7524_v10 = vadd.f32 %v19359_v47, %v7441_v40  ;;  %v7447_v54 = vadd.f32 %v19361_v19, %v7364_v35  ;;  %v7526_v21 = vadd.f32 %v19362_v29, %v7443_v42  ;;  %v19367_v35 = vmov 0  }
 0x6b5   :  { %19345 = vst [vmem:[#allocation13_spill] sm:$0xff] %v18048_v46  ;;  %v18055_v5 = vpop.f32.mrf.mxu0  ;;  %v18057_v63 = vpack.c.bf16 %v7996_v8, %v7993_v13  ;;  %8785 = vmatpush1.bf16.msra.mxu1 %v12499_v16  ;;  %v7599_v11 = vadd.f32 %v7598_v28, %v7516_v61  ;;  %v7998_v23 = vmax.f32 %v7597_v34, 0.0  ;;  %v7528_v13 = vadd.f32 %v17962_v59, %v7445_v52 }
 0x6b6   :  { %v7600_v26 = vpop.f32.mrf.mxu1  ;;  %v7530_v61 = vadd.f32 %v17964_v56, %v7447_v54 }
 0x6b7   :  { %19349 = vst [vmem:[#allocation54_spill] sm:$0xff] %v18057_v63  ;;  %v7601_v2 = vadd.f32 %v7600_v26, %v7518_v14  ;;  %v11425_v48 = vpop.f32.mrf.mxu0  ;;  %8332 = vmatprep.mubr.bf16.mxu1 %v18057_v63  ;;  %v7999_v4 = vmax.f32 %v7599_v11, 0.0 }
 0x6b8   :  { %v7602_v18 = vpop.f32.mrf.mxu1  ;;  %8333 = vmatmul.mubr.bf16.gmra.mxu1 %v18048_v46 }
 0x6b9   :  { %v8001_v9 = vmax.f32 %v7601_v2, 0.0  ;;  %v7603_v27 = vadd.f32 %v7602_v18, %v7520_v7  ;;  %v11426_v41 = vpop.f32.mrf.mxu0 }
 0x6ba   :  { %v18071_v17 = vadd.f32 %v11426_v41, %v11425_v48  ;;  %v7606_v44 = vpop.f32.mrf.mxu1 }
 0x6bb   :  { %v18074_v0 = vpack.c.bf16 %v8001_v9, %v7998_v23  ;;  %v8002_v16 = vmax.f32 %v7603_v27, 0.0  ;;  %v11428_v37 = vpop.f32.mrf.mxu0  ;;  %v7607_v31 = vadd.f32 %v7606_v44, %v7524_v10 }
 0x6bc   :  { %v7608_v15 = vpop.f32.mrf.mxu1 }
 0x6bd   :  { %19360 = vst [vmem:[#allocation67_spill] sm:$0xff] %v18074_v0  ;;  %v18079_v8 = vpack.c.bf16 %v8002_v16, %v7999_v4  ;;  %v11429_v55 = vpop.f32.mrf.mxu0  ;;  %v7609_v50 = vadd.f32 %v7608_v15, %v7526_v21  ;;  %v8004_v22 = vmax.f32 %v7607_v31, 0.0 }
 0x6be   :  { %v18081_v28 = vadd.f32 %v11429_v55, %v11428_v37  ;;  %v7610_v20 = vpop.f32.mrf.mxu1 }
 0x6bf   :  { %19363 = vst [vmem:[#allocation12_spill] sm:$0xff] %v18079_v8  ;;  %v7611_v14 = vadd.f32 %v7610_v20, %v7528_v13  ;;  %v11431_v34 = vpop.f32.mrf.mxu0  ;;  %8342 = vmatprep.mubr.bf16.mxu1 %v18079_v8  ;;  %v8005_v33 = vmax.f32 %v7609_v50, 0.0  ;;  %v11412_v8 = vadd.f32 %v17982_v58, %v17979_v51 }
 0x6c0   :  { %v7612_v26 = vpop.f32.mrf.mxu1  ;;  %8343 = vmatmul.mubr.bf16.gmra.mxu1 %v18074_v0 }
 0x6c1   :  { %v8007_v7 = vmax.f32 %v7611_v14, 0.0  ;;  %v7613_v59 = vadd.f32 %v7612_v26, %v7530_v61  ;;  %v11432_v11 = vpop.f32.mrf.mxu0 }
 0x6c2   :  { %v18086_v2 = vadd.f32 %v11432_v11, %v11431_v34  ;;  %v11453_v48 = vpop.f32.mrf.mxu1 }
 0x6c3   :  { %v18088_v39 = vpack.c.bf16 %v8007_v7, %v8004_v22  ;;  %v8008_v18 = vmax.f32 %v7613_v59, 0.0  ;;  %v11434_v56 = vpop.f32.mrf.mxu0  ;;  %v12622_v7 = vld [vmem:[%s18959_s6] sm:$0x7]  ;;  %v19368_v59 = vld [vmem:[#allocation6_spill] sm:$0xff] }
 0x6c4   :  { %v11454_v32 = vpop.f32.mrf.mxu1  ;;  %v19369_v11 = vsub.s32 2, %v19368_v59 }
 0x6c5   :  { %19364 = vst [vmem:[#allocation52_spill] sm:$0xff] %v18088_v39  ;;  %v18090_v25 = vpack.c.bf16 %v8008_v18, %v8005_v33  ;;  %v11435_v40 = vpop.f32.mrf.mxu0 }
 0x6c6   :  { %v18092_v23 = vadd.f32 %v11435_v40, %v11434_v56  ;;  %v11456_v9 = vpop.f32.mrf.mxu1  ;;  %v18136_v33 = vrot.slane %v12622_v7, %v19369_v11  ;;  %v11455_v40 = vadd.f32 %v11454_v32, %v11453_v48 }
 0x6c7   :  { %19365 = vst [vmem:[#allocation62_spill] sm:$0xff] %v18090_v25  ;;  %v11499_v27 = vpop.f32.mrf.mxu0  ;;  %8352 = vmatprep.mubr.bf16.mxu1 %v18090_v25 }
 0x6c8   :  { %19366 = vst [vmem:[#allocation11_spill] sm:$0xff] %v18092_v23  ;;  %v11457_v41 = vpop.f32.mrf.mxu1  ;;  %8353 = vmatmul.mubr.bf16.gmra.mxu1 %v18088_v39  ;;  %v7650_v0 = vadd.f32 %v17975_v3, %v18136_v33  ;;  %v7653_v48 = vadd.f32 %v11412_v8, %v18136_v33 }
 0x6c9   :  { %v11500_v1 = vpop.f32.mrf.mxu0  ;;  %8802 = vmatprep.mubr.bf16.mxu1 %v19367_v35  ;;  %v11458_v59 = vadd.f32 %v11457_v41, %v11456_v9  ;;  %v7658_v9 = vadd.f32 %v18007_v12, %v18136_v33 }
 0x6ca   :  { %v11459_v43 = vpop.f32.mrf.mxu1  ;;  %v11501_v46 = vadd.f32 %v11500_v1, %v11499_v27  ;;  %v7723_v11 = vadd.f32 %v11455_v40, %v7650_v0  ;;  %v11418_v27 = vadd.f32 %v18020_v49, %v18015_v45 }
 0x6cb   :  { %v11502_v53 = vpop.f32.mrf.mxu0 }
 0x6cc   :  { %v11460_v42 = vpop.f32.mrf.mxu1  ;;  %v7796_v32 = vadd.f32 %v11501_v46, %v7723_v11 }
 0x6cd   :  { %v11503_v62 = vpop.f32.mrf.mxu0 }
 0x6ce   :  { %v11462_v6 = vpop.f32.mrf.mxu1  ;;  %v11504_v60 = vadd.f32 %v11503_v62, %v11502_v53 }
 0x6cf   :  { %v11505_v52 = vpop.f32.mrf.mxu0 }
 0x6d0   :  { %v11463_v44 = vpop.f32.mrf.mxu1 }
 0x6d1   :  { %v11506_v47 = vpop.f32.mrf.mxu0  ;;  %v11464_v62 = vadd.f32 %v11463_v44, %v11462_v6  ;;  %v7666_v44 = vadd.f32 %v18045_v30, %v18136_v33 }
 0x6d2   :  { %v18097_v10 = vpop.f32.mrf.mxu1  ;;  %v11507_v1 = vadd.f32 %v11506_v47, %v11505_v52 }
 0x6d3   :  { %v11508_v4 = vpop.f32.mrf.mxu0 }
 0x6d4   :  { %v18099_v16 = vpop.f32.mrf.mxu1 }
 0x6d5   :  { %v11509_v37 = vpop.f32.mrf.mxu0 }
 0x6d6   :  { %v18101_v19 = vpop.f32.mrf.mxu1  ;;  %v11510_v11 = vadd.f32 %v11509_v37, %v11508_v4 }
 0x6d7   :  { %v18103_v54 = vpop.f32.mrf.mxu0 }
 0x6d8   :  { %v18105_v15 = vpop.f32.mrf.mxu1 }
 0x6d9   :  { %v18107_v29 = vpop.f32.mrf.mxu0 }
 0x6da   :  { %v18109_v21 = vpop.f32.mrf.mxu1  ;;  %v11513_v4 = vadd.f32 %v18107_v29, %v18103_v54 }
 0x6db   :  { %v18111_v13 = vpop.f32.mrf.mxu0 }
 0x6dc   :  { %v18113_v31 = vpop.f32.mrf.mxu1 }
 0x6dd   :  { %v18115_v55 = vpop.f32.mrf.mxu0 }
 0x6de   :  { %v18117_v20 = vpop.f32.mrf.mxu1 }
 0x6df   :  { %v18119_v61 = vpop.f32.mrf.mxu0 }
 0x6e0   :  { %v18121_v50 = vpop.f32.mrf.mxu1 }
 0x6e1   :  { %v18123_v14 = vpop.f32.mrf.mxu0 }
 0x6e2   :  { %v18125_v34 = vpop.f32.mrf.mxu1 }
 0x6e3   :  { %v18127_v26 = vpop.f32.mrf.mxu0 }
 0x6e4   :  { %v18129_v22 = vpop.f32.mrf.mxu1 }
 0x6e5   :  { %v18138_v18 = vpop.f32.mrf.mxu0 }
 0x6e6   :  { %v18140_v56 = vpop.f32.mrf.mxu1 }
 0x6e7   :  { %19370 = vst [vmem:[#allocation50_spill] sm:$0xff] %v18140_v56  ;;  %v18142_v39 = vpop.f32.mrf.mxu0  ;;  %v11461_v56 = vadd.f32 %v11460_v42, %v11459_v43 }
 0x6e8   :  { %v18144_v25 = vpop.f32.mrf.mxu1 }
 0x6e9   :  { %19371 = vst [vmem:[#allocation59_spill] sm:$0xff] %v18144_v25  ;;  %v18150_v63 = vpop.f32.mrf.mxu0  ;;  %v7726_v25 = vadd.f32 %v11458_v59, %v7653_v48 }
 0x6ea   :  { %v11545_v7 = vpop.f32.mrf.mxu1 }
 0x6eb   :  { %v18152_v57 = vpop.f32.mrf.mxu0  ;;  %v7799_v41 = vadd.f32 %v11504_v60, %v7726_v25  ;;  %v11467_v60 = vadd.f32 %v18099_v16, %v18097_v10  ;;  %v12502_v10 = vld [vmem:[%s18958_s7 + $0x1b0] ss:$8 sps:$4 sm:$0xff]  }
 0x6ec   :  { %v11546_v38 = vpop.f32.mrf.mxu1 }
 0x6ed   :  { %v11547_v24 = vadd.f32 %v11546_v38, %v11545_v7  ;;  %v18155_v23 = vpop.f32.mrf.mxu0  ;;  %v7731_v38 = vadd.f32 %v11461_v56, %v7658_v9  ;;  %v7739_v30 = vadd.f32 %v11467_v60, %v7666_v44  ;;  %v12513_v60 = vld [vmem:[%s18958_s7 + $0x184] ss:$8 sps:$4 sm:$0xff]   ;;  %v12511_v44 = vld [vmem:[%s18958_s7 + $0x180] ss:$8 sps:$4 sm:$0xff]  }
 0x6ee   :  { %v11548_v3 = vpop.f32.mrf.mxu1 }
 0x6ef   :  { %v7869_v51 = vadd.f32 %v11547_v24, %v7796_v32  ;;  %v7941_v58 = vpop.f32.mrf.mxu0  ;;  %v7661_v24 = vadd.f32 %v11418_v27, %v18136_v33  ;;  %v7804_v42 = vadd.f32 %v11507_v1, %v7731_v38  ;;  %v11424_v32 = vadd.f32 %v18055_v5, %v18050_v36  ;;  %v12507_v27 = vld [vmem:[%s18958_s7 + $0x1a4] ss:$8 sps:$4 sm:$0xff]   ;;  %v12510_v38 = vld [vmem:[%s18958_s7 + $0x194] ss:$8 sps:$4 sm:$0xff]  }
 0x6f0   :  { %v11549_v0 = vpop.f32.mrf.mxu1  ;;  %v11470_v36 = vadd.f32 %v18105_v15, %v18101_v19  ;;  %v11516_v19 = vadd.f32 %v18115_v55, %v18111_v13  ;;  %v7674_v13 = vadd.f32 %v18071_v17, %v18136_v33  ;;  %v11519_v55 = vadd.f32 %v18123_v14, %v18119_v61 }
 0x6f1   :  { %v11550_v8 = vadd.f32 %v11549_v0, %v11548_v3  ;;  %v11687_v46 = vpop.f32.mrf.mxu0  ;;  %v7942_v40 = vadd.f32 %v7941_v58, %v7869_v51  ;;  %v7734_v25 = vadd.f32 %v11464_v62, %v7661_v24  ;;  %v7669_v9 = vadd.f32 %v11424_v32, %v18136_v33 }
 0x6f2   :  { %v11551_v53 = vpop.f32.mrf.mxu1  ;;  %v11473_v62 = vadd.f32 %v18113_v31, %v18109_v21  ;;  %v11476_v61 = vadd.f32 %v18121_v50, %v18117_v20  ;;  %v11522_v20 = vadd.f32 %v18138_v18, %v18127_v26  ;;  %v7682_v26 = vadd.f32 %v18086_v2, %v18136_v33 }
 0x6f3   :  { %v7872_v7 = vadd.f32 %v11550_v8, %v7799_v41  ;;  %v7944_v59 = vpop.f32.mrf.mxu0  ;;  %v7982_v52 = vmax.f32 %v7942_v40, 0.0  ;;  %v7807_v16 = vadd.f32 %v11510_v11, %v7734_v25  ;;  %v7812_v41 = vadd.f32 %v11513_v4, %v7739_v30  ;;  %v12505_v8 = vld [vmem:[%s18958_s7 + $0x1a0] ss:$8 sps:$4 sm:$0xff]  }
 0x6f4   :  { %v11552_v43 = vpop.f32.mrf.mxu1  ;;  %v11525_v18 = vadd.f32 %v18150_v63, %v18142_v39 }
 0x6f5   :  { %v7945_v45 = vadd.f32 %v7944_v59, %v7872_v7  ;;  %v11553_v49 = vadd.f32 %v11552_v43, %v11551_v53  ;;  %v11688_v48 = vpop.f32.mrf.mxu0  ;;  %v7742_v7 = vadd.f32 %v11470_v36, %v7669_v9  ;;  %v19372_v9 = vld [vmem:[#allocation50_spill] sm:$0xff] }
 0x6f6   :  { %v11554_v12 = vpop.f32.mrf.mxu1 }
 0x6f7   :  { %v7985_v47 = vmax.f32 %v7945_v45, 0.0  ;;  %v7877_v56 = vadd.f32 %v11553_v49, %v7804_v42  ;;  %v7949_v6 = vpop.f32.mrf.mxu0  ;;  %v12508_v45 = vld [vmem:[%s18958_s7 + $0x190] ss:$8 sps:$4 sm:$0xff]   ;;  %v7815_v49 = vadd.f32 %v11516_v19, %v7742_v7 }
 0x6f8   :  { %v11555_v37 = vpop.f32.mrf.mxu1  ;;  %v19374_v19 = vld [vmem:[#allocation11_spill] sm:$0xff] }
 0x6f9   :  { %v8012_v3 = vpack.c.bf16 %v7985_v47, %v7982_v52  ;;  %v11556_v51 = vadd.f32 %v11555_v37, %v11554_v12  ;;  %v11691_v58 = vpop.f32.mrf.mxu0  ;;  %v7950_v5 = vadd.f32 %v7949_v6, %v7877_v56  ;;  %v7747_v12 = vadd.f32 %v11473_v62, %v7674_v13 }
 0x6fa   :  { %v11557_v0 = vpop.f32.mrf.mxu1  ;;  %v7677_v47 = vadd.f32 %v18081_v28, %v18136_v33  ;;  %v12516_v28 = vld [vmem:[%s18958_s7 + $0x174] ss:$8 sps:$4 sm:$0xff]   ;;  %v11479_v37 = vadd.f32 %v18129_v22, %v18125_v34  ;;  %v11528_v62 = vadd.f32 %v18155_v23, %v18152_v57  ;;  %v12520_v57 = vld [vmem:[%s18958_s7 + $0x150] ss:$8 sps:$4 sm:$0xff]  }
 0x6fb   :  { %v7880_v54 = vadd.f32 %v11556_v51, %v7807_v16  ;;  %v7952_v29 = vpop.f32.mrf.mxu0  ;;  %11214 = vmatmul.mubr.msk.bf16.vlgmr.msra.gmra.mxu0 %vm83_vm6, %v8012_v3  ;;  %11299 = vmatmul.mubr.msk.bf16.vlgmr.msra.gmra.mxu1 %vm83_vm6, %v8012_v3  ;;  %v7988_v59 = vmax.f32 %v7950_v5, 0.0  ;;  %v7820_v56 = vadd.f32 %v11519_v55, %v7747_v12 }
 0x6fc   :  { %8688 = vmatpush1.bf16.msra.mxu0 %v12502_v10  ;;  %v11558_v1 = vpop.f32.mrf.mxu1  ;;  %8405 = vmatprep.mubr.bf16.mxu0 %v19367_v35  ;;  %v7750_v16 = vadd.f32 %v11476_v61, %v7677_v47  ;;  %v12523_v61 = vld [vmem:[%s18958_s7 + $0x140] ss:$8 sps:$4 sm:$0xff]  }
 0x6fd   :  { %v7953_v15 = vadd.f32 %v7952_v29, %v7880_v54  ;;  %v11559_v46 = vadd.f32 %v11558_v1, %v11557_v0  ;;  %v11692_v53 = vpop.f32.mrf.mxu0  ;;  %8689 = vmatprep.subr.bf16.mxu0 %v12507_v27  ;;  %8812 = vmatprep.mubr.bf16.mxu1 %v19367_v35  ;;  %v12514_v0 = vld [vmem:[%s18958_s7 + $0x170] ss:$8 sps:$4 sm:$0xff]   ;;  %v12519_v54 = vld [vmem:[%s18958_s7 + $0x164] ss:$8 sps:$4 sm:$0xff]   ;;  %v7755_v29 = vadd.f32 %v11479_v37, %v7682_v26 }
 0x6fe   :  { %v11560_v40 = vpop.f32.mrf.mxu1  ;;  %v7823_v36 = vadd.f32 %v11522_v20, %v7750_v16  ;;  %v12531_v20 = vld [vmem:[%s18958_s7 + $0x224] ss:$8 sps:$4 sm:$0xff]   ;;  %v12540_v16 = vld [vmem:[%s18958_s7 + $0x1f4] ss:$8 sps:$4 sm:$0xff]   ;;  %v12544_v26 = vld [vmem:[%s18958_s7 + $0x1d0] ss:$8 sps:$4 sm:$0xff]  }
 0x6ff   :  { %v7991_v24 = vmax.f32 %v7953_v15, 0.0  ;;  %v7885_v43 = vadd.f32 %v11559_v46, %v7812_v41  ;;  %v7957_v42 = vpop.f32.mrf.mxu0  ;;  %v19373_v41 = vld [vmem:[#allocation59_spill] sm:$0xff]  ;;  %v7685_v15 = vadd.f32 %v19374_v19, %v18136_v33  ;;  %v7828_v46 = vadd.f32 %v11525_v18, %v7755_v29  ;;  %v12537_v37 = vld [vmem:[%s18958_s7 + $0x204] ss:$8 sps:$4 sm:$0xff]  }
 0x700   :  { %8690 = vmatpush1.bf16.msra.mxu0 %v12505_v8  ;;  %v11561_v11 = vpop.f32.mrf.mxu1  ;;  %v11482_v63 = vadd.f32 %v19373_v41, %v19372_v9  ;;  %v12522_v33 = vld [vmem:[%s18958_s7 + $0x154] ss:$8 sps:$4 sm:$0xff]   ;;  %v12549_v18 = vld [vmem:[%s18958_s7 + $0x1c4] ss:$8 sps:$4 sm:$0xff]  }
 0x701   :  { %v8015_v21 = vpack.c.bf16 %v7991_v24, %v7988_v59  ;;  %v11562_v31 = vadd.f32 %v11561_v11, %v11560_v40  ;;  %v11695_v48 = vpop.f32.mrf.mxu0  ;;  %8691 = vmatprep.subr.bf16.mxu0 %v12510_v38  ;;  %v7958_v14 = vadd.f32 %v7957_v42, %v7885_v43  ;;  %v12517_v38 = vld [vmem:[%s18958_s7 + $0x160] ss:$8 sps:$4 sm:$0xff]   ;;  %v19382_v29 = vld [vmem:[#allocation67_spill] sm:$0xff] }
 0x702   :  { %v11563_v17 = vpop.f32.mrf.mxu1  ;;  %v7758_v43 = vadd.f32 %v11482_v63, %v7685_v15  ;;  %v12525_v48 = vld [vmem:[%s18958_s7 + $0x144] ss:$8 sps:$4 sm:$0xff]  }
 0x703   :  { %v7888_v25 = vadd.f32 %v11562_v31, %v7815_v49  ;;  %v7960_v52 = vpop.f32.mrf.mxu0  ;;  %11215 = vmatmul.mubr.msk.bf16.gmra.mxu0 %vm83_vm6, %v8015_v21  ;;  %11300 = vmatmul.mubr.msk.bf16.gmra.mxu1 %vm83_vm6, %v8015_v21  ;;  %v7994_v3 = vmax.f32 %v7958_v14, 0.0  ;;  %v19384_v9 = vld [vmem:[#allocation52_spill] sm:$0xff] }
 0x704   :  { %8692 = vmatpush1.bf16.msra.mxu0 %v12508_v45  ;;  %v11564_v6 = vpop.f32.mrf.mxu1  ;;  %8415 = vmatprep.mubr.bf16.mxu0 %v19367_v35  ;;  %v7831_v23 = vadd.f32 %v11528_v62, %v7758_v43 }
 0x705   :  { %v7961_v50 = vadd.f32 %v7960_v52, %v7888_v25  ;;  %v11565_v32 = vadd.f32 %v11564_v6, %v11563_v17  ;;  %v11696_v4 = vpop.f32.mrf.mxu0  ;;  %8693 = vmatprep.subr.bf16.mxu0 %v12513_v60  ;;  %8822 = vmatprep.mubr.bf16.mxu1 %v19367_v35  ;;  %v12528_v52 = vld [vmem:[%s18958_s7 + $0x234] ss:$8 sps:$4 sm:$0xff]   ;;  %v12526_v6 = vld [vmem:[%s18958_s7 + $0x230] ss:$8 sps:$4 sm:$0xff]  }
 0x706   :  { %v11566_v10 = vpop.f32.mrf.mxu1  ;;  %v12534_v4 = vld [vmem:[%s18958_s7 + $0x214] ss:$8 sps:$4 sm:$0xff]  }
 0x707   :  { %v7997_v51 = vmax.f32 %v7961_v50, 0.0  ;;  %v7893_v58 = vadd.f32 %v11565_v32, %v7820_v56  ;;  %v7965_v27 = vpop.f32.mrf.mxu0  ;;  %v19375_v50 = vld [vmem:[#allocation22_spill] sm:$0xff]  ;;  %v12529_v32 = vld [vmem:[%s18958_s7 + $0x220] ss:$8 sps:$4 sm:$0xff]  }
 0x708   :  { %8694 = vmatpush1.bf16.msra.mxu0 %v12511_v44  ;;  %v11567_v30 = vpop.f32.mrf.mxu1 }
 0x709   :  { %v8018_v34 = vpack.c.bf16 %v7997_v51, %v7994_v3  ;;  %v11568_v22 = vadd.f32 %v11567_v30, %v11566_v10  ;;  %v11699_v5 = vpop.f32.mrf.mxu0  ;;  %8695 = vmatprep.subr.bf16.mxu0 %v12516_v28  ;;  %v7966_v39 = vadd.f32 %v7965_v27, %v7893_v58  ;;  %v12532_v28 = vld [vmem:[%s18958_s7 + $0x210] ss:$8 sps:$4 sm:$0xff]   ;;  %v12535_v10 = vld [vmem:[%s18958_s7 + $0x200] ss:$8 sps:$4 sm:$0xff]   ;;  %v12543_v51 = vld [vmem:[%s18958_s7 + $0x1e4] ss:$8 sps:$4 sm:$0xff]  }
 0x70a   :  { %v11569_v2 = vpop.f32.mrf.mxu1  ;;  %v12538_v3 = vld [vmem:[%s18958_s7 + $0x1f0] ss:$8 sps:$4 sm:$0xff]   ;;  %v12541_v58 = vld [vmem:[%s18958_s7 + $0x1e0] ss:$8 sps:$4 sm:$0xff]   ;;  %v12546_v27 = vld [vmem:[%s18958_s7 + $0x1d4] ss:$8 sps:$4 sm:$0xff]  }
 0x70b   :  { %v7896_v1 = vadd.f32 %v11568_v22, %v7823_v36  ;;  %v7968_v8 = vpop.f32.mrf.mxu0  ;;  %11216 = vmatmul.mubr.msk.bf16.gmra.mxu0 %vm83_vm6, %v8018_v34  ;;  %11301 = vmatmul.mubr.msk.bf16.gmra.mxu1 %vm83_vm6, %v8018_v34  ;;  %v8000_v42 = vmax.f32 %v7966_v39, 0.0  ;;  %v12547_v30 = vld [vmem:[%s18958_s7 + $0x1c0] ss:$8 sps:$4 sm:$0xff]   ;;  %v19378_v34 = vld [vmem:[#allocation66_spill] sm:$0xff] }
 0x70c   :  { %8696 = vmatpush1.bf16.msra.mxu0 %v12514_v0  ;;  %v11570_v53 = vpop.f32.mrf.mxu1  ;;  %8425 = vmatprep.mubr.bf16.mxu0 %v19367_v35  ;;  %v19376_v0 = vld [vmem:[#allocation55_spill] sm:$0xff]  ;;  %v19377_v36 = vld [vmem:[#allocation72_spill] sm:$0xff]  ;;  %v19379_v22 = vld [vmem:[#allocation54_spill] sm:$0xff] }
 0x70d   :  { %v7969_v40 = vadd.f32 %v7968_v8, %v7896_v1  ;;  %v11571_v7 = vadd.f32 %v11570_v53, %v11569_v2  ;;  %v11700_v59 = vpop.f32.mrf.mxu0  ;;  %8697 = vmatprep.subr.bf16.mxu0 %v12519_v54  ;;  %8832 = vmatprep.mubr.bf16.mxu1 %v19367_v35  ;;  %v19380_v5 = vld [vmem:[#allocation13_spill] sm:$0xff]  ;;  %v19381_v54 = vld [vmem:[#allocation12_spill] sm:$0xff]  ;;  %v19383_v2 = vld [vmem:[#allocation62_spill] sm:$0xff] }
 0x70e   :  { %v11572_v24 = vpop.f32.mrf.mxu1 }
 0x70f   :  { %v8003_v13 = vmax.f32 %v7969_v40, 0.0  ;;  %v7901_v55 = vadd.f32 %v11571_v7, %v7828_v46  ;;  %v7973_v11 = vpop.f32.mrf.mxu0 }
 0x710   :  { %8698 = vmatpush1.bf16.msra.mxu0 %v12517_v38  ;;  %v11573_v45 = vpop.f32.mrf.mxu1 }
 0x711   :  { %v8021_v49 = vpack.c.bf16 %v8003_v13, %v8000_v42  ;;  %v11574_v21 = vadd.f32 %v11573_v45, %v11572_v24  ;;  %v11703_v31 = vpop.f32.mrf.mxu0  ;;  %8699 = vmatprep.subr.bf16.mxu0 %v12522_v33  ;;  %v7974_v60 = vadd.f32 %v7973_v11, %v7901_v55 }
 0x713   :  { %v7904_v12 = vadd.f32 %v11574_v21, %v7831_v23  ;;  %v7976_v17 = vpop.f32.mrf.mxu0  ;;  %11217 = vmatmul.mubr.msk.bf16.gmra.mxu0 %vm83_vm6, %v8021_v49  ;;  %11302 = vmatmul.mubr.msk.bf16.gmra.mxu1 %vm83_vm6, %v8021_v49  ;;  %v8006_v47 = vmax.f32 %v7974_v60, 0.0 }
 0x714   :  { %8700 = vmatpush1.bf16.msra.mxu0 %v12520_v57  ;;  %8435 = vmatprep.mubr.bf16.mxu0 %v19367_v35 }
 0x715   :  { %v7977_v14 = vadd.f32 %v7976_v17, %v7904_v12  ;;  %v11704_v25 = vpop.f32.mrf.mxu0  ;;  %8701 = vmatprep.subr.bf16.mxu0 %v12525_v48  ;;  %8842 = vmatprep.mubr.bf16.mxu1 %v19367_v35 }
 0x717   :  { %v8009_v56 = vmax.f32 %v7977_v14, 0.0 }
 0x718   :  { %8702 = vmatpush1.bf16.msra.mxu0 %v12523_v61 }
 0x719   :  { %v8024_v44 = vpack.c.bf16 %v8009_v56, %v8006_v47  ;;  %8703 = vmatprep.subr.bf16.mxu0 %v12528_v52 }
 0x71b   :  { %11218 = vmatmul.mubr.msk.bf16.gmra.mxu0 %vm83_vm6, %v8024_v44  ;;  %11303 = vmatmul.mubr.msk.bf16.gmra.mxu1 %vm83_vm6, %v8024_v44 }
 0x71c   :  { %8704 = vmatpush2.bf16.msra.mxu0 %v12526_v6  ;;  %8719 = vmatprep.mubr.bf16.mxu0 %v19375_v50 }
 0x71d   :  { %8705 = vmatprep.subr.bf16.mxu0 %v12531_v20  ;;  %8943 = vmatprep.mubr.bf16.mxu1 %v19367_v35 }
 0x720   :  { %8706 = vmatpush2.bf16.msra.mxu0 %v12529_v32 }
 0x721   :  { %8707 = vmatprep.subr.bf16.mxu0 %v12534_v4 }
 0x724   :  { %8708 = vmatpush2.bf16.msra.mxu0 %v12532_v28 }
 0x725   :  { %8709 = vmatprep.subr.bf16.mxu0 %v12537_v37 }
 0x728   :  { %8710 = vmatpush2.bf16.msra.mxu0 %v12535_v10 }
 0x729   :  { %8711 = vmatprep.subr.bf16.mxu0 %v12540_v16 }
 0x72c   :  { %8712 = vmatpush2.bf16.msra.mxu0 %v12538_v3 }
 0x72d   :  { %8713 = vmatprep.subr.bf16.mxu0 %v12543_v51 }
 0x730   :  { %8714 = vmatpush2.bf16.msra.mxu0 %v12541_v58 }
 0x731   :  { %8715 = vmatprep.subr.bf16.mxu0 %v12546_v27 }
 0x734   :  { %8716 = vmatpush2.bf16.msra.mxu0 %v12544_v26 }
 0x735   :  { %8717 = vmatprep.subr.bf16.mxu0 %v12549_v18 }
 0x738   :  { %8718 = vmatpush2.bf16.msra.mxu0 %v12547_v30 }
 0x73b   :  { %8720 = vmatmul.mubr.bf16.vlgmr.msra.gmra.mxu0 %v19376_v0 }
 0x73c   :  { %8729 = vmatprep.mubr.bf16.mxu0 %v19377_v36 }
 0x743   :  { %8730 = vmatmul.mubr.bf16.gmra.mxu0 %v19378_v34 }
 0x744   :  { %8739 = vmatprep.mubr.bf16.mxu0 %v19379_v22 }
 0x74b   :  { %8740 = vmatmul.mubr.bf16.gmra.mxu0 %v19380_v5 }
 0x74c   :  { %8749 = vmatprep.mubr.bf16.mxu0 %v19381_v54 }
 0x753   :  { %8750 = vmatmul.mubr.bf16.gmra.mxu0 %v19382_v29 }
 0x754   :  { %8759 = vmatprep.mubr.bf16.mxu0 %v19383_v2 }
 0x75b   :  { %8760 = vmatmul.mubr.bf16.gmra.mxu0 %v19384_v9 }
 0x75c   :  { %9032 = vmatprep.mubr.bf16.mxu0 %v19367_v35 }
 0x768   :  { %v8314_v41 = vpop.f32.mrf.mxu1 }
 0x76a   :  { %v8316_v63 = vpop.f32.mrf.mxu1 }
 0x76c   :  { %v8318_v39 = vpop.f32.mrf.mxu1 }
 0x76e   :  { %v8320_v1 = vpop.f32.mrf.mxu1 }
 0x770   :  { %v18322_v8 = vpop.f32.mrf.mxu1 }
 0x772   :  { %v18324_v19 = vpop.f32.mrf.mxu1 }
 0x774   :  { %v18326_v15 = vpop.f32.mrf.mxu1 }
 0x776   :  { %v18328_v46 = vpop.f32.mrf.mxu1 }
 0x778   :  { %v18330_v53 = vpop.f32.mrf.mxu1 }
 0x77a   :  { %v18332_v38 = vpop.f32.mrf.mxu1 }
 0x77b   :  { %19385 = vst [vmem:[#allocation10_spill] sm:$0xff] %v18332_v38 }
 0x77c   :  { %v18334_v62 = vpop.f32.mrf.mxu1 }
 0x77e   :  { %v18336_v40 = vpop.f32.mrf.mxu1 }
 0x77f   :  { %19386 = vst [vmem:[#allocation49_spill] sm:$0xff] %v18336_v40 }
 0x780   :  { %v18338_v7 = vpop.f32.mrf.mxu1 }
 0x781   :  { %19387 = vst [vmem:[#allocation24_spill] sm:$0xff] %v18338_v7 }
 0x782   :  { %v18340_v59 = vpop.f32.mrf.mxu1 }
 0x784   :  { %v18342_v43 = vpop.f32.mrf.mxu1 }
 0x786   :  { %v18344_v55 = vpop.f32.mrf.mxu1 }
 0x788   :  { %v18346_v57 = vpop.f32.mrf.mxu1 }
 0x78a   :  { %v18348_v21 = vpop.f32.mrf.mxu1 }
 0x78c   :  { %v18352_v48 = vpop.f32.mrf.mxu1 }
 0x78e   :  { %v18356_v12 = vpop.f32.mrf.mxu1 }
 0x7bb   :  { %v8397_v33 = vpop.f32.mrf.mxu0  ;;  %v8804_v17 = vpop.f32.mrf.mxu1 }
 0x7bc   :  { %v8398_v36 = vadd.f32 %v8397_v33, %v8314_v41 }
 0x7bd   :  { %v8399_v24 = vpop.f32.mrf.mxu0  ;;  %v8806_v14 = vpop.f32.mrf.mxu1 }
 0x7be   :  { %v8400_v54 = vadd.f32 %v8399_v24, %v8316_v63 }
 0x7bf   :  { %v8401_v42 = vpop.f32.mrf.mxu0  ;;  %v8808_v52 = vpop.f32.mrf.mxu1 }
 0x7c0   :  { %v8402_v34 = vadd.f32 %v8401_v42, %v8318_v39 }
 0x7c1   :  { %v8403_v13 = vpop.f32.mrf.mxu0  ;;  %v8810_v56 = vpop.f32.mrf.mxu1 }
 0x7c2   :  { %v8404_v9 = vadd.f32 %v8403_v13, %v8320_v1 }
 0x7c3   :  { %v8407_v11 = vpop.f32.mrf.mxu0  ;;  %v8814_v44 = vpop.f32.mrf.mxu1 }
 0x7c4   :  { %v8408_v63 = vadd.f32 %v8407_v11, %v18322_v8 }
 0x7c5   :  { %v8409_v45 = vpop.f32.mrf.mxu0  ;;  %v8816_v50 = vpop.f32.mrf.mxu1 }
 0x7c6   :  { %v8410_v13 = vadd.f32 %v8409_v45, %v18324_v19 }
 0x7c7   :  { %v8411_v23 = vpop.f32.mrf.mxu0  ;;  %v8818_v4 = vpop.f32.mrf.mxu1 }
 0x7c8   :  { %v8412_v24 = vadd.f32 %v8411_v23, %v18326_v15 }
 0x7c9   :  { %v8413_v49 = vpop.f32.mrf.mxu0  ;;  %v8820_v37 = vpop.f32.mrf.mxu1 }
 0x7cb   :  { %v18350_v31 = vpop.f32.mrf.mxu0  ;;  %v8824_v16 = vpop.f32.mrf.mxu1 }
 0x7cc   :  { %v8418_v19 = vadd.f32 %v18350_v31, %v18330_v53 }
 0x7cd   :  { %v18354_v60 = vpop.f32.mrf.mxu0  ;;  %v18376_v51 = vpop.f32.mrf.mxu1 }
 0x7ce   :  { %19388 = vst [vmem:[#allocation69_spill] sm:$0xff] %v18354_v60  ;;  %19391 = vst [vmem:[#allocation56_spill] sm:$0xff] %v18376_v51 }
 0x7cf   :  { %v18358_v61 = vpop.f32.mrf.mxu0  ;;  %v8828_v26 = vpop.f32.mrf.mxu1 }
 0x7d1   :  { %v18360_v25 = vpop.f32.mrf.mxu0  ;;  %v18380_v29 = vpop.f32.mrf.mxu1 }
 0x7d2   :  { %19389 = vst [vmem:[#allocation26_spill] sm:$0xff] %v18360_v25 }
 0x7d3   :  { %v18362_v47 = vpop.f32.mrf.mxu0  ;;  %v18384_v40 = vpop.f32.mrf.mxu1 }
 0x7d4   :  { %19390 = vst [vmem:[#allocation71_spill] sm:$0xff] %v18362_v47 }
 0x7d5   :  { %v18364_v6 = vpop.f32.mrf.mxu0 }
 0x7d7   :  { %v18366_v20 = vpop.f32.mrf.mxu0 }
 0x7d9   :  { %v18368_v32 = vpop.f32.mrf.mxu0 }
 0x7db   :  { %v18370_v28 = vpop.f32.mrf.mxu0 }
 0x7dd   :  { %v18372_v10 = vpop.f32.mrf.mxu0 }
 0x7df   :  { %v18374_v3 = vpop.f32.mrf.mxu0 }
 0x7e1   :  { %v18378_v58 = vpop.f32.mrf.mxu0 }
 0x7fb   :  { %v8721_v27 = vpop.f32.mrf.mxu0 }
 0x7fc   :  { %v8805_v30 = vadd.f32 %v8804_v17, %v8721_v27 }
 0x7fd   :  { %v8723_v18 = vpop.f32.mrf.mxu0 }
 0x7fe   :  { %v8807_v22 = vadd.f32 %v8806_v14, %v8723_v18  ;;  %v8853_v35 = vmax.f32 %v8398_v36, %v8805_v30  ;;  %v8836_v14 = vpop.f32.mrf.mxu1 }
 0x7ff   :  { %v8725_v0 = vpop.f32.mrf.mxu0 }
 0x800   :  { %v8809_v5 = vadd.f32 %v8808_v52, %v8725_v0  ;;  %v8854_v7 = vmax.f32 %v8400_v54, %v8807_v22 }
 0x801   :  { %v8727_v2 = vpop.f32.mrf.mxu0 }
 0x802   :  { %v8855_v60 = vmax.f32 %v8402_v34, %v8809_v5  ;;  %v8811_v38 = vadd.f32 %v8810_v56, %v8727_v2 }
 0x803   :  { %v8731_v47 = vpop.f32.mrf.mxu0 }
 0x804   :  { %v18382_v51 = vpack.c.bf16 %v8855_v60, %v8853_v35  ;;  %v8856_v25 = vmax.f32 %v8404_v9, %v8811_v38  ;;  %v8815_v41 = vadd.f32 %v8814_v44, %v8731_v47  ;;  %v8414_v35 = vadd.f32 %v8413_v49, %v18328_v46  ;;  %v8838_v44 = vpop.f32.mrf.mxu1 }
 0x805   :  { %v8733_v17 = vpop.f32.mrf.mxu0  ;;  %v8422_v46 = vadd.f32 %v18358_v61, %v18334_v62  ;;  %v8434_v62 = vadd.f32 %v18368_v32, %v18344_v55  ;;  %v8442_v61 = vadd.f32 %v18374_v3, %v18352_v48  ;;  %v8438_v55 = vadd.f32 %v18370_v28, %v18346_v57  ;;  %v19395_v28 = vld [vmem:[#allocation24_spill] sm:$0xff] }
 0x806   :  { %v18386_v39 = vpack.c.bf16 %v8856_v25, %v8854_v7  ;;  %v8817_v1 = vadd.f32 %v8816_v50, %v8733_v17  ;;  %v8857_v38 = vmax.f32 %v8408_v63, %v8815_v41  ;;  %v8840_v49 = vpop.f32.mrf.mxu1  ;;  %v8440_v63 = vadd.f32 %v18372_v10, %v18348_v21 }
 0x807   :  { %v8735_v33 = vpop.f32.mrf.mxu0  ;;  %v8432_v21 = vadd.f32 %v18366_v20, %v18342_v43 }
 0x808   :  { %v8819_v42 = vadd.f32 %v8818_v4, %v8735_v33  ;;  %v8858_v47 = vmax.f32 %v8410_v13, %v8817_v1  ;;  %v8844_v0 = vpop.f32.mrf.mxu1  ;;  %v8430_v13 = vadd.f32 %v18364_v6, %v18340_v59  ;;  %v19394_v59 = vld [vmem:[#allocation56_spill] sm:$0xff] }
 0x809   :  { %v8737_v52 = vpop.f32.mrf.mxu0 }
 0x80a   :  { %v8859_v60 = vmax.f32 %v8412_v24, %v8819_v42  ;;  %v8821_v56 = vadd.f32 %v8820_v37, %v8737_v52  ;;  %v8444_v24 = vadd.f32 %v18378_v58, %v18356_v12  ;;  %v19392_v58 = vld [vmem:[#allocation49_spill] sm:$0xff] }
 0x80b   :  { %v8741_v27 = vpop.f32.mrf.mxu0 }
 0x80c   :  { %v18392_v7 = vpack.c.bf16 %v8859_v60, %v8857_v38  ;;  %v8860_v25 = vmax.f32 %v8414_v35, %v8821_v56  ;;  %v8825_v11 = vadd.f32 %v8824_v16, %v8741_v27  ;;  %v8846_v16 = vpop.f32.mrf.mxu1  ;;  %v19396_v27 = vld [vmem:[#allocation71_spill] sm:$0xff] }
 0x80d   :  { %v8743_v8 = vpop.f32.mrf.mxu0 }
 0x80e   :  { %v18394_v15 = vpack.c.bf16 %v8860_v25, %v8858_v47  ;;  %v8861_v4 = vmax.f32 %v8418_v19, %v8825_v11  ;;  %v8848_v54 = vpop.f32.mrf.mxu1  ;;  %v8827_v6 = vadd.f32 %v19394_v59, %v8743_v8  ;;  %v8428_v47 = vadd.f32 %v19396_v27, %v19395_v28  ;;  %v19398_v11 = vld [vmem:[#allocation69_spill] sm:$0xff] }
 0x80f   :  { %v8745_v23 = vpop.f32.mrf.mxu0 }
 0x810   :  { %v8829_v45 = vadd.f32 %v8828_v26, %v8745_v23  ;;  %v8850_v26 = vpop.f32.mrf.mxu1 }
 0x811   :  { %v8747_v50 = vpop.f32.mrf.mxu0 }
 0x812   :  { %v8863_v37 = vmax.f32 %v8422_v46, %v8829_v45  ;;  %v8831_v48 = vadd.f32 %v18380_v29, %v8747_v50  ;;  %v12550_v45 = vld [vmem:[%s18960_s8] sm:$0xff]  }
 0x813   :  { %v8751_v18 = vpop.f32.mrf.mxu0  ;;  %v12555_v50 = vld [vmem:[%s18960_s8 + $0x24] ss:$0 sps:$4 sm:$0xff]  }
 0x814   :  { %v8877_v30 = vpack.c.bf16 %v8863_v37, %v8861_v4  ;;  %v8835_v12 = vadd.f32 %v18384_v40, %v8751_v18  ;;  %v12556_v4 = vld [vmem:[%s18961_s9 + $0x78] sm:$0xff]   ;;  %v12558_v18 = vld [vmem:[%s18961_s9 + $0x70] sm:$0xff]  }
 0x815   :  { %v8753_v36 = vpop.f32.mrf.mxu0  ;;  %v12557_v37 = vld [vmem:[%s18961_s9 + $0x38] sm:$0xff]  }
 0x816   :  { %v8837_v1 = vadd.f32 %v8836_v14, %v8753_v36  ;;  %v19393_v14 = vld [vmem:[#allocation26_spill] sm:$0xff]  ;;  %v8865_v43 = vmax.f32 %v8428_v47, %v8835_v12 }
 0x817   :  { %v8755_v34 = vpop.f32.mrf.mxu0  ;;  %v8424_v60 = vadd.f32 %v19393_v14, %v19392_v58 }
 0x818   :  { %v8839_v32 = vadd.f32 %v8838_v44, %v8755_v34  ;;  %v8866_v56 = vmax.f32 %v8430_v13, %v8837_v1  ;;  %v19397_v44 = vld [vmem:[#allocation10_spill] sm:$0xff] }
 0x819   :  { %v8757_v22 = vpop.f32.mrf.mxu0  ;;  %v8420_v23 = vadd.f32 %v19398_v11, %v19397_v44  ;;  %v8864_v19 = vmax.f32 %v8424_v60, %v8831_v48 }
 0x81a   :  { %v8841_v53 = vadd.f32 %v8840_v49, %v8757_v22  ;;  %v8867_v29 = vmax.f32 %v8432_v21, %v8839_v32  ;;  %v12551_v49 = vld [vmem:[%s18960_s8 + $0x14] sm:$0xff]  }
 0x81b   :  { %v8761_v5 = vpop.f32.mrf.mxu0  ;;  %v8862_v20 = vmax.f32 %v8420_v23, %v8827_v6  ;;  %v12562_v6 = vld [vmem:[%s18961_s9 + $0x60] sm:$0xff]   ;;  %v12577_v32 = vld [vmem:[%s18961_s9 + $0xf0] sm:$0xff]  }
 0x81c   :  { %v8845_v41 = vadd.f32 %v8844_v0, %v8761_v5  ;;  %v8868_v3 = vmax.f32 %v8434_v62, %v8841_v53  ;;  %v8879_v8 = vpack.c.bf16 %v8867_v29, %v8865_v43  ;;  %v12629_v0 = vmov 1966171168   ;;  %v12561_v62 = vld [vmem:[%s18961_s9 + $0x28] sm:$0xff]  }
 0x81d   :  { %v8763_v2 = vpop.f32.mrf.mxu0  ;;  %v8878_v46 = vpack.c.bf16 %v8864_v19, %v8862_v20  ;;  %v9075_v36 = vunpack.c.l.s4 %v12629_v0 }
 0x81e   :  { %v8847_v31 = vadd.f32 %v8846_v16, %v8763_v2  ;;  %v8869_v10 = vmax.f32 %v8438_v55, %v8845_v41  ;;  %v8880_v40 = vpack.c.bf16 %v8868_v3, %v8866_v56  ;;  %v19400_v2 = vld [vmem:[#allocation6_spill] sm:$0xff]  ;;  %v19401_v55 = vlaneseq  ;;  %v12563_v56 = vld [vmem:[%s18961_s9 + $0x20] sm:$0xff]  }
 0x81f   :  { %v8765_v9 = vpop.f32.mrf.mxu0  ;;  %v9076_v34 = vunpack.c.0.s8 %v9075_v36 }
 0x820   :  { %v8849_v17 = vadd.f32 %v8848_v54, %v8765_v9  ;;  %v8870_v35 = vmax.f32 %v8440_v63, %v8847_v31  ;;  %vm18477_vm7 = vcmp.lt.s32.totalorder %v19401_v55, 160  ;;  %vm9108_vm10 = vcmp.ge.s32.totalorder %v19401_v55, 32 }
 0x821   :  { %v8767_v33 = vpop.f32.mrf.mxu0  ;;  %v18466_v9 = vsub.s32 %v9076_v34, %v19400_v2  ;;  %vm9109_vm11 = vcmp.lt.s32.totalorder %v19401_v55, 192  ;;  %vm9120_vm0 = vcmp.ge.s32.totalorder %v19401_v55, 64  ;;  %vm9121_vm4 = vcmp.lt.s32.totalorder %v19401_v55, 224 }
 0x822   :  { %v8851_v42 = vadd.f32 %v8850_v26, %v8767_v33  ;;  %v8871_v52 = vmax.f32 %v8442_v61, %v8849_v17  ;;  %v12560_v17 = vld [vmem:[%s18961_s9 + $0x68] sm:$0xff]   ;;  %vm18729_vm12 = vmand %vm9108_vm10, %vm9109_vm11  ;;  %vm9132_vm11 = vcmp.ge.s32.totalorder %v19401_v55, 96 }
 0x823   :  { %vm18757_vm10 = vmand %vm9120_vm0, %vm9121_vm4 }
 0x824   :  { %v8872_v38 = vmax.f32 %v8444_v24, %v8851_v42  ;;  %v8881_v25 = vpack.c.bf16 %v8871_v52, %v8869_v10 }
 0x826   :  { %v8882_v57 = vpack.c.bf16 %v8872_v38, %v8870_v35 }
 0x828   :  { %8917 = vmatprep.subr.bf16.mxu1 %v8882_v57  ;;  %9006 = vmatprep.subr.bf16.mxu0 %v8882_v57 }
 0x829   :  { %8918 = vmatpush1.bf16.msra.mxu1 %v8881_v25  ;;  %9007 = vmatpush1.bf16.msra.mxu0 %v8881_v25 }
 0x82a   :  { %8919 = vmatprep.subr.bf16.mxu1 %v8880_v40  ;;  %9008 = vmatprep.subr.bf16.mxu0 %v8880_v40 }
 0x82d   :  { %8920 = vmatpush1.bf16.msra.mxu1 %v8879_v8  ;;  %9009 = vmatpush1.bf16.msra.mxu0 %v8879_v8 }
 0x82e   :  { %8921 = vmatprep.subr.bf16.mxu1 %v8878_v46  ;;  %9010 = vmatprep.subr.bf16.mxu0 %v8878_v46 }
 0x831   :  { %8922 = vmatpush1.bf16.msra.mxu1 %v8877_v30  ;;  %9011 = vmatpush1.bf16.msra.mxu0 %v8877_v30  ;;  %v12559_v30 = vld [vmem:[%s18961_s9 + $0x30] sm:$0xff]  }
 0x832   :  { %8923 = vmatprep.subr.bf16.mxu1 %v18394_v15  ;;  %9012 = vmatprep.subr.bf16.mxu0 %v18394_v15  ;;  %v12553_v15 = vld [vmem:[%s18960_s8 + $0x1c] sm:$0xff]  }
 0x835   :  { %8924 = vmatpush1.bf16.msra.mxu1 %v18392_v7  ;;  %9013 = vmatpush1.bf16.msra.mxu0 %v18392_v7  ;;  %v19399_v7 = vmov 0  }
 0x836   :  { %8925 = vmatprep.subr.bf16.mxu1 %v18386_v39  ;;  %9014 = vmatprep.subr.bf16.mxu0 %v18386_v39  ;;  %v12552_v39 = vld [vmem:[%s18960_s8 + $0x8] sm:$0xff]  }
 0x839   :  { %8926 = vmatpush1.bf16.msra.mxu1 %v18382_v51  ;;  %9015 = vmatpush1.bf16.msra.mxu0 %v18382_v51  ;;  %v12554_v51 = vld [vmem:[%s18960_s8 + $0x10] ss:$0 sps:$4 sm:$0xff]  }
 0x83a   :  { %11586 = vmatprep.subr.bf16.mxu1 %v12556_v4 }
 0x83c   :  { %11307 = vmatmul.mubr.msk.bf16.vlgmr.msra.gmra.mxu1 %vm8901_vm15, %v12550_v45  ;;  %11318 = vmatmul.mubr.msk.bf16.vlgmr.msra.gmra.mxu0 %vm8901_vm15, %v12551_v49 }
 0x83d   :  { %8953 = vmatprep.mubr.bf16.mxu1 %v19399_v7  ;;  %9042 = vmatprep.mubr.bf16.mxu0 %v19399_v7 }
 0x83e   :  { %11587 = vmatpush3.bf16.msra.mxu1 %v12557_v37 }
 0x83f   :  { %11588 = vmatprep.subr.bf16.mxu1 %v12558_v18  ;;  %v12564_v18 = vld [vmem:[%s18961_s9 + $0x58] sm:$0xff]  }
 0x842   :  { %11589 = vmatpush3.bf16.msra.mxu1 %v12559_v30 }
 0x843   :  { %11590 = vmatprep.subr.bf16.mxu1 %v12560_v17 }
 0x844   :  { %11308 = vmatmul.mubr.msk.bf16.gmra.mxu1 %vm8901_vm15, %v12552_v39  ;;  %11319 = vmatmul.mubr.msk.bf16.gmra.mxu0 %vm8901_vm15, %v12553_v15 }
 0x845   :  { %8963 = vmatprep.mubr.bf16.mxu1 %v19399_v7  ;;  %9052 = vmatprep.mubr.bf16.mxu0 %v19399_v7 }
 0x846   :  { %11591 = vmatpush3.bf16.msra.mxu1 %v12561_v62 }
 0x847   :  { %11592 = vmatprep.subr.bf16.mxu1 %v12562_v6 }
 0x84a   :  { %11593 = vmatpush3.bf16.msra.mxu1 %v12563_v56 }
 0x84b   :  { %11594 = vmatprep.subr.bf16.mxu1 %v12564_v18 }
 0x84c   :  { %11309 = vmatmul.mubr.msk.bf16.gmra.mxu1 %vm8901_vm15, %v12554_v51  ;;  %11320 = vmatmul.mubr.msk.bf16.gmra.mxu0 %vm8901_vm15, %v12555_v50  ;;  %vm19413_vm15 = vmmov %vm19407_vm2 }
 0x8fc   :  { %v8945_v16 = vpop.f32.mrf.mxu1  ;;  %v9034_v22 = vpop.f32.mrf.mxu0 }
 0x8fd   :  { %v9061_v53 = vmax.f32 %v8945_v16, %v9034_v22  ;;  %v12565_v16 = vld [vmem:[%s18961_s9 + $0x18] sm:$0xff]  }
 0x8fe   :  { %v8947_v5 = vpop.f32.mrf.mxu1  ;;  %v9036_v54 = vpop.f32.mrf.mxu0  ;;  %11595 = vmatpush3.bf16.msra.mxu1 %v12565_v16  ;;  %v12585_v16 = vld [vmem:[%s18961_s9 + $0xe0] sm:$0xff]  }
 0x8ff   :  { %v9062_v31 = vmax.f32 %v8947_v5, %v9036_v54 }
 0x900   :  { %v8949_v61 = vpop.f32.mrf.mxu1  ;;  %v9038_v26 = vpop.f32.mrf.mxu0 }
 0x901   :  { %v9073_v41 = vcombine.low %v9061_v53, %v9062_v31  ;;  %v9138_v33 = vcombine.high %v9061_v53, %v9062_v31  ;;  %v9063_v52 = vmax.f32 %v8949_v61, %v9038_v26 }
 0x902   :  { %v8951_v63 = vpop.f32.mrf.mxu1  ;;  %v9040_v24 = vpop.f32.mrf.mxu0 }
 0x903   :  { %v9080_v1 = vrot.slane %v9073_v41, %v18466_v9  ;;  %v9145_v42 = vrot.slane %v9138_v33, %v18466_v9  ;;  %v9064_v13 = vmax.f32 %v8951_v63, %v9040_v24 }
 0x904   :  { %v8955_v48 = vpop.f32.mrf.mxu1  ;;  %v9044_v3 = vpop.f32.mrf.mxu0 }
 0x905   :  { %v18482_v35 = vrot.slane %v9080_v1, %v18466_v9  ;;  %v9095_v38 = vcombine.high %v9080_v1, %v9080_v1  ;;  %v9152_v21 = vrot.slane %v9145_v42, %v18466_v9  ;;  %v9157_v12 = vcombine.high %v9145_v42, %v9145_v42  ;;  %v12566_v1 = vld [vmem:[%s18961_s9 + $0x50] sm:$0xff]  }
 0x906   :  { %v9189_v10 = vcombine.low %v9063_v52, %v9064_v13  ;;  %v9238_v58 = vcombine.high %v9063_v52, %v9064_v13  ;;  %v9065_v14 = vmax.f32 %v8955_v48, %v9044_v3  ;;  %v8957_v60 = vpop.f32.mrf.mxu1  ;;  %v9046_v59 = vpop.f32.mrf.mxu0  ;;  %v12567_v3 = vld [vmem:[%s18961_s9 + $0x10] sm:$0xff]   ;;  %11596 = vmatprep.subr.bf16.mxu1 %v12566_v1 }
 0x907   :  { %9155 = vst.msk [vmem:[#allocation4 + $0x28] ss:$8 sm:$0x3] %vm18477_vm7, %v9152_v21  ;;  %v18494_v57 = vrot.slane %v9157_v12, %v18466_v9  ;;  %9093 = vst.msk [vmem:[#allocation4] ss:$8 sm:$0x3] %vm18477_vm7, %v18482_v35  ;;  %v9066_v28 = vmax.f32 %v8957_v60, %v9046_v59  ;;  %v9169_v27 = vcombine.high %v9152_v21, %v9152_v21  ;;  %11597 = vmatpush3.bf16.msra.mxu1 %v12567_v3 }
 0x908   :  { %v18500_v47 = vrot.slane %v9095_v38, %v18466_v9  ;;  %v9196_v29 = vrot.slane %v9189_v10, %v18466_v9  ;;  %v9245_v25 = vrot.slane %v9238_v58, %v18466_v9  ;;  %v8959_v44 = vpop.f32.mrf.mxu1  ;;  %v9048_v11 = vpop.f32.mrf.mxu0 }
 0x909   :  { %9167 = vst.msk [vmem:[#allocation4 + $0x1] ss:$8 sm:$0x3] %vm18477_vm7, %v18494_v57  ;;  %v9289_v23 = vcombine.low %v9065_v14, %v9066_v28  ;;  %v9342_v19 = vcombine.high %v9065_v14, %v9066_v28  ;;  %9170 = vrot.lane.b32.xlu1 %v9169_v27, %s12625_s17  ;;  %v9067_v50 = vmax.f32 %v8959_v44, %v9048_v11 }
 0x90a   :  { %9103 = vrot.lane.b32.xlu0 %v18500_v47, %s12625_s17  ;;  %v9212_v40 = vcombine.high %v9196_v29, %v9196_v29  ;;  %v18511_v43 = vrot.slane %v9245_v25, %v18466_v9  ;;  %v8961_v20 = vpop.f32.mrf.mxu1  ;;  %v9050_v8 = vpop.f32.mrf.mxu0  ;;  %v9261_v46 = vcombine.high %v9245_v25, %v9245_v25  ;;  %v18516_v39 = vrot.slane %v9196_v29, %v18466_v9  ;;  %v12568_v25 = vld [vmem:[%s18961_s9 + $0x48] sm:$0xff]  }
 0x90b   :  { %v9296_v45 = vrot.slane %v9289_v23, %v18466_v9  ;;  %v9349_v49 = vrot.slane %v9342_v19, %v18466_v9  ;;  %v9068_v7 = vmax.f32 %v8961_v20, %v9050_v8  ;;  %v12569_v19 = vld [vmem:[%s18961_s9 + $0x8] sm:$0xff]   ;;  %11598 = vmatprep.subr.bf16.mxu1 %v12568_v25 }
 0x90c   :  { %v9219_v15 = vrot.slane %v9212_v40, %v18466_v9  ;;  %v9277_v51 = vcombine.high %v18511_v43, %v18511_v43  ;;  %v8965_v4 = vpop.f32.mrf.mxu1  ;;  %v9054_v37 = vpop.f32.mrf.mxu0  ;;  %v18546_v61 = vrot.slane %v9261_v46, %v18466_v9  ;;  %v9224_v24 = vcombine.high %v18516_v39, %v18516_v39  ;;  %11599 = vmatpush3.bf16.msra.mxu1 %v12569_v19 }
 0x90d   :  { %v18525_v30 = vrot.slane %v9296_v45, %v18466_v9  ;;  %v9312_v0 = vcombine.high %v9296_v45, %v9296_v45  ;;  %v18528_v36 = vrot.slane %v9349_v49, %v18466_v9  ;;  %v9361_v34 = vcombine.high %v9349_v49, %v9349_v49  ;;  %v12570_v49 = vld [vmem:[%s18961_s9 + $0x40] sm:$0xff]  }
 0x90e   :  { %9222 = vst.msk [vmem:[#allocation4 + $0x29] ss:$8 sm:$0x3] %vm18477_vm7, %v9219_v15  ;;  %9280 = vst.msk [vmem:[#allocation4 + $0x2a] ss:$8 sm:$0x3] %vm18477_vm7, %v9277_v51  ;;  %v9397_v22 = vcombine.low %v9067_v50, %v9068_v7  ;;  %v9446_v5 = vcombine.high %v9067_v50, %v9068_v7  ;;  %v9069_v54 = vmax.f32 %v8965_v4, %v9054_v37  ;;  %v8967_v2 = vpop.f32.mrf.mxu1  ;;  %v9056_v53 = vpop.f32.mrf.mxu0  ;;  %11600 = vmatprep.subr.bf16.mxu1 %v12570_v49 }
 0x90f   :  { %v9229_v31 = vcombine.high %v9219_v15, %v9219_v15  ;;  %9359 = vst.msk [vmem:[#allocation4 + $0x4] ss:$8 sm:$0x3] %vm18477_vm7, %v18528_v36  ;;  %v9070_v17 = vmax.f32 %v8967_v2, %v9056_v53  ;;  %9304 = vrot.lane.b32.xlu1 %v18525_v30, %s12625_s17  ;;  %v18543_v62 = vrot.slane %v9312_v0, %v18466_v9  ;;  %9227 = vst.msk [vmem:[#allocation4 + $0x2] ss:$8 sm:$0x3] %vm18477_vm7, %v9224_v24 }
 0x910   :  { %v9404_v26 = vrot.slane %v9397_v22, %v18466_v9  ;;  %v9453_v41 = vrot.slane %v9446_v5, %v18466_v9  ;;  %v9058_v33 = vpop.f32.mrf.mxu0  ;;  %v8969_v63 = vpop.f32.mrf.mxu1  ;;  %v18557_v52 = vrot.slane %v9361_v34, %v18466_v9  ;;  %v9282_v6 = vcombine.high %v18546_v61, %v18546_v61  ;;  %v12572_v4 = vld [vmem:[%s18961_s9 + $0x178] sm:$0xff]   ;;  %v12583_v0 = vld [vmem:[%s18961_s9 + $0xa8] sm:$0xff]   ;;  %v12587_v22 = vld [vmem:[%s18961_s9 + $0xa0] sm:$0xff]  }
 0x911   :  { %9230 = vrot.lane.b32.xlu0 %v9229_v31, %s12625_s17  ;;  %v9497_v42 = vcombine.low %v9069_v54, %v9070_v17  ;;  %v9546_v13 = vcombine.high %v9069_v54, %v9070_v17  ;;  %v9337_v48 = vcombine.high %v18543_v62, %v18543_v62  ;;  %v9114_v51 = vcombine.high %v18482_v35, %v18482_v35  ;;  %v12573_v35 = vld [vmem:[%s18961_s9 + $0xf8] sm:$0xff]   ;;  %v12593_v54 = vld [vmem:[%s18961_s9 + $0xd0] sm:$0xff]   ;;  %v12597_v53 = vld [vmem:[%s18961_s9 + $0xc8] sm:$0xff]  }
 0x912   :  { %v9411_v38 = vrot.slane %v9404_v26, %v18466_v9  ;;  %v9416_v21 = vcombine.high %v9404_v26, %v9404_v26  ;;  %v18566_v12 = vrot.slane %v9453_v41, %v18466_v9  ;;  %v9469_v10 = vcombine.high %v9453_v41, %v9453_v41  ;;  %v8970_v58 = vpop.f32.mrf.mxu1  ;;  %v9059_v14 = vpop.f32.mrf.mxu0  ;;  %9285 = vst.msk [vmem:[#allocation4 + $0x3] ss:$8 sm:$0x3] %vm18477_vm7, %v9282_v6  ;;  %v12575_v37 = vld [vmem:[%s18961_s9 + $0xb8] sm:$0xff]   ;;  %v12595_v2 = vld [vmem:[%s18961_s9 + $0x90] sm:$0xff]   ;;  %v12599_v31 = vld [vmem:[%s18961_s9 + $0x88] sm:$0xff]  }
 0x913   :  { %v9504_v60 = vrot.slane %v9497_v42, %v18466_v9  ;;  %v9553_v59 = vrot.slane %v9546_v13, %v18466_v9  ;;  %9340 = vst.msk [vmem:[#allocation4 + $0x2b] ss:$8 sm:$0x3] %vm18477_vm7, %v9337_v48  ;;  %v9178_v50 = vcombine.high %v18494_v57, %v18494_v57  ;;  %11608 = vmatprep.subr.bf16.mxu0 %v12573_v35  ;;  %v12579_v57 = vld [vmem:[%s18961_s9 + $0xb0] sm:$0xff]   ;;  %v12601_v17 = vld [vmem:[%s18961_s9 + $0xc0] sm:$0xff]   ;;  %v19404_v26 = vmov 0.0  }
 0x914   :  { %9414 = vst.msk [vmem:[#allocation4 + $0x2c] ss:$8 sm:$0x3] %vm18477_vm7, %v9411_v38  ;;  %v18579_v56 = vrot.slane %v9416_v21, %v18466_v9  ;;  %v9476_v28 = vrot.slane %v9469_v10, %v18466_v9  ;;  %v9428_v27 = vcombine.high %v9411_v38, %v9411_v38  ;;  %v9481_v29 = vcombine.high %v18566_v12, %v18566_v12 }
 0x915   :  { %9369 = vrot.lane.b32.xlu0 %v18557_v52, %s12625_s17  ;;  %v18590_v44 = vrot.slane %v9504_v60, %v18466_v9  ;;  %v9520_v11 = vcombine.high %v9504_v60, %v9504_v60  ;;  %v9569_v23 = vcombine.high %v9553_v59, %v9553_v59  ;;  %v18614_v45 = vrot.slane %v9553_v59, %v18466_v9 }
 0x916   :  { %9479 = vst.msk [vmem:[#allocation4 + $0x2d] ss:$8 sm:$0x3] %vm18477_vm7, %v9476_v28  ;;  %9426 = vst.msk [vmem:[#allocation4 + $0x5] ss:$8 sm:$0x3] %vm18477_vm7, %v18579_v56  ;;  %9429 = vrot.lane.b32.xlu1 %v9428_v27, %s12625_s17  ;;  %v9486_v40 = vcombine.high %v9476_v28, %v9476_v28  ;;  %11609 = vmatpush3.bf16.msra.mxu0 %v12575_v37  ;;  %v9377_v18 = vcombine.high %v18528_v36, %v18528_v36 }
 0x917   :  { %9484 = vst.msk [vmem:[#allocation4 + $0x6] ss:$8 sm:$0x3] %vm18477_vm7, %v9481_v29  ;;  %v9536_v20 = vcombine.high %v18590_v44, %v18590_v44  ;;  %v18608_v8 = vrot.slane %v9569_v23, %v18466_v9  ;;  %v18611_v46 = vrot.slane %v9520_v11, %v18466_v9  ;;  %v12571_v9 = vld [vmem:[%s18961_s9] sm:$0xff]   ;;  %11610 = vmatprep.subr.bf16.mxu0 %v12577_v32 }
 0x918   :  { %11601 = vmatpush3.bf16.msra.mxu1 %v12571_v9  ;;  %v9126_v34 = vcombine.high %v18500_v47, %v18500_v47  ;;  %v9328_v36 = vcombine.high %v18525_v30, %v18525_v30  ;;  %v12589_v47 = vld [vmem:[%s18961_s9 + $0xd8] sm:$0xff]   ;;  %v9386_v30 = vcombine.high %v18557_v52, %v18557_v52  ;;  %v9437_v5 = vcombine.high %v18579_v56, %v18579_v56 }
 0x919   :  { %9487 = vrot.lane.b32.xlu0 %v9486_v40, %s12625_s17  ;;  %9539 = vst.msk [vmem:[#allocation4 + $0x2e] ss:$8 sm:$0x3] %vm18477_vm7, %v9536_v20  ;;  %v9594_v7 = vcombine.high %v18608_v8, %v18608_v8  ;;  %v9541_v15 = vcombine.high %v18611_v46, %v18611_v46  ;;  %11630 = vmatprep.subr.bf16.mxu1 %v12572_v4 }
 0x91a   :  { %9561 = vrot.lane.b32.xlu1 %v18614_v45, %s12625_s17  ;;  %11611 = vmatpush3.bf16.msra.mxu0 %v12579_v57 }
 0x91b   :  { %9597 = vst.msk [vmem:[#allocation4 + $0x2f] ss:$8 sm:$0x3] %vm18477_vm7, %v9594_v7  ;;  %9544 = vst.msk [vmem:[#allocation4 + $0x7] ss:$8 sm:$0x3] %vm18477_vm7, %v9541_v15 }
 0x91c   :  { %vm19414_vm7 = vmmov %vm19407_vm2 }
 0x91d   :  { %9115 = vrot.lane.b32.xlu0 %v9114_v51, %s12623_s22 }
 0x91e   :  { %9179 = vrot.lane.b32.xlu1 %v9178_v50, %s12623_s22 }
 0x921   :  { %9253 = vrot.lane.b32.xlu0 %v18511_v43, %s12623_s22  ;;  %v12581_v43 = vld [vmem:[%s18961_s9 + $0xe8] sm:$0xff]  }
 0x922   :  { %9320 = vrot.lane.b32.xlu1 %v18543_v62, %s12623_s22  ;;  %11612 = vmatprep.subr.bf16.mxu0 %v12581_v43  ;;  %v9585_v62 = vcombine.high %v18614_v45, %v18614_v45  ;;  %v9599_v50 = vld [vmem:[#allocation4] sm:$0xff]  ;;  %v9604_v32 = vld [vmem:[#allocation4 + $0x28] sm:$0xff] }
 0x923   :  { %11613 = vmatpush3.bf16.msra.mxu0 %v12583_v0  ;;  %v12574_v43 = vld [vmem:[%s18961_s9 + $0x138] sm:$0xff]  }
 0x924   :  { %11614 = vmatprep.subr.bf16.mxu0 %v12585_v16  ;;  %v12576_v16 = vld [vmem:[%s18961_s9 + $0x170] sm:$0xff]  }
 0x925   :  { %9378 = vrot.lane.b32.xlu0 %v9377_v18, %s12623_s22 }
 0x926   :  { %9204 = vrot.lane.b32.xlu1 %v18516_v39, %s12624_s23  ;;  %v12591_v39 = vld [vmem:[%s18961_s9 + $0x98] sm:$0xff]  }
 0x927   :  { %11615 = vmatpush3.bf16.msra.mxu0 %v12587_v22 }
 0x928   :  { %11616 = vmatprep.subr.bf16.mxu0 %v12589_v47  ;;  %v9611_v47 = vpack.c.bf16 %v9604_v32, %v9604_v32 }
 0x929   :  { %9127 = vrot.lane.b32.xlu0 %v9126_v34, %s12624_s23  ;;  %v12610_v34 = vld [vmem:[%s18962_s11 + $0x18] sm:$0xff]  }
 0x92a   :  { %9329 = vrot.lane.b32.xlu1 %v9328_v36, %s12624_s23  ;;  %v9606_v36 = vpack.c.bf16 %v9599_v50, %v9599_v50  ;;  %v12604_v50 = vld [vmem:[%s18961_s9 + $0x188] sm:$0xff]  }
 0x92b   :  { %11617 = vmatpush3.bf16.msra.mxu0 %v12591_v39 }
 0x92c   :  { %11618 = vmatprep.subr.bf16.mxu0 %v12593_v54  ;;  %v12578_v54 = vld [vmem:[%s18961_s9 + $0x130] sm:$0xff]  }
 0x92d   :  { %9269 = vrot.lane.b32.xlu0 %v18546_v61, %s12624_s23  ;;  %v12603_v61 = vld [vmem:[%s18961_s9 + $0x80] sm:$0xff]  }
 0x92e   :  { %9461 = vrot.lane.b32.xlu1 %v18566_v12, %s12624_s23 }
 0x92f   :  { %11619 = vmatpush3.bf16.msra.mxu0 %v12595_v2 }
 0x930   :  { %11620 = vmatprep.subr.bf16.mxu0 %v12597_v53 }
 0x931   :  { %9387 = vrot.lane.b32.xlu0 %v9386_v30, %s12624_s23 }
 0x932   :  { %9438 = vrot.lane.b32.xlu1 %v9437_v5, %s12623_s22 }
 0x933   :  { %11621 = vmatpush3.bf16.msra.mxu0 %v12599_v31  ;;  %v12580_v31 = vld [vmem:[%s18961_s9 + $0x168] sm:$0xff]  }
 0x934   :  { %11622 = vmatprep.subr.bf16.mxu0 %v12601_v17 }
 0x935   :  { %9512 = vrot.lane.b32.xlu0 %v18590_v44, %s12623_s22 }
 0x936   :  { %9577 = vrot.lane.b32.xlu1 %v18608_v8, %s12623_s22 }
 0x937   :  { %11623 = vmatpush3.bf16.msra.mxu0 %v12603_v61 }
 0x938   :  { %11705 = vmatprep.subr.bf16.mxu0 %v19404_v26 }
 0x939   :  { %9528 = vrot.lane.b32.xlu0 %v18611_v46, %s12624_s23 }
 0x93a   :  { %9586 = vrot.lane.b32.xlu1 %v9585_v62, %s12624_s23 }
 0x97b   :  { %v9171_v41 = vpop.permute.xlu1 %9170 }
 0x97c   :  { %v9104_v33 = vpop.permute.xlu0 %9103  ;;  %v9172_v24 = vrot.slane %v9171_v41, 7 }
 0x97d   :  { %v9105_v1 = vrot.slane %v9104_v33, 7 }
 0x97e   :  { %v9173_v42 = vsel %vm19407_vm2, %v9172_v24, %v9171_v41  ;;  %v12584_v24 = vld [vmem:[%s18961_s9 + $0x160] sm:$0xff]  }
 0x97f   :  { %v9106_v13 = vsel %vm19408_vm14, %v9105_v1, %v9104_v33  ;;  %9176 = vst.msk [vmem:[#allocation4 + $0x9] ss:$8 sm:$0x3] %vm18729_vm12, %v9173_v42  ;;  %v12582_v33 = vld [vmem:[%s18961_s9 + $0x128] sm:$0xff]  }
 0x980   :  { %9112 = vst.msk [vmem:[#allocation4 + $0x8] ss:$8 sm:$0x3] %vm18729_vm12, %v9106_v13 }
 0x981   :  { %v9305_v52 = vpop.permute.xlu1 %9304 }
 0x982   :  { %v9306_v3 = vrot.slane %v9305_v52, 7 }
 0x983   :  { %v9231_v48 = vpop.permute.xlu0 %9230 }
 0x984   :  { %v9232_v38 = vrot.slane %v9231_v48, 7  ;;  %v9307_v21 = vsel %vm19409_vm3, %v9306_v3, %v9305_v52 }
 0x985   :  { %9310 = vst.msk [vmem:[#allocation4 + $0xb] ss:$8 sm:$0x3] %vm18729_vm12, %v9307_v21  ;;  %v12588_v21 = vld [vmem:[%s18961_s9 + $0x158] sm:$0xff]  }
 0x986   :  { %v9233_v12 = vsel %vm19410_vm13, %v9232_v38, %v9231_v48  ;;  %v12586_v48 = vld [vmem:[%s18961_s9 + $0x120] sm:$0xff]  }
 0x987   :  { %9236 = vst.msk [vmem:[#allocation4 + $0xa] ss:$8 sm:$0x3] %vm18729_vm12, %v9233_v12  ;;  %v9370_v10 = vpop.permute.xlu0 %9369 }
 0x988   :  { %v9371_v58 = vrot.slane %v9370_v10, 7  ;;  %v9430_v14 = vpop.permute.xlu1 %9429 }
 0x989   :  { %v9431_v59 = vrot.slane %v9430_v14, 7 }
 0x98a   :  { %v9372_v60 = vsel %vm19411_vm8, %v9371_v58, %v9370_v10 }
 0x98b   :  { %9375 = vst.msk [vmem:[#allocation4 + $0xc] ss:$8 sm:$0x3] %vm18729_vm12, %v9372_v60  ;;  %v9488_v6 = vpop.permute.xlu0 %9487  ;;  %v9432_v56 = vsel %vm19412_vm5, %v9431_v59, %v9430_v14  ;;  %v12590_v59 = vld [vmem:[%s18961_s9 + $0x118] sm:$0xff]  }
 0x98c   :  { %v9489_v28 = vrot.slane %v9488_v6, 7  ;;  %9435 = vst.msk [vmem:[#allocation4 + $0xd] ss:$8 sm:$0x3] %vm18729_vm12, %v9432_v56  ;;  %v9562_v27 = vpop.permute.xlu1 %9561 }
 0x98d   :  { %v9563_v25 = vrot.slane %v9562_v27, 7 }
 0x98e   :  { %v9490_v29 = vsel %vm19413_vm15, %v9489_v28, %v9488_v6  ;;  %v12592_v28 = vld [vmem:[%s18961_s9 + $0x150] sm:$0xff]  }
 0x98f   :  { %9493 = vst.msk [vmem:[#allocation4 + $0xe] ss:$8 sm:$0x3] %vm18729_vm12, %v9490_v29  ;;  %v9116_v44 = vpop.permute.xlu0 %9115  ;;  %v9564_v11 = vsel %vm19414_vm7, %v9563_v25, %v9562_v27 }
 0x990   :  { %v9117_v19 = vrot.slane %v9116_v44, 7  ;;  %9567 = vst.msk [vmem:[#allocation4 + $0xf] ss:$8 sm:$0x3] %vm18729_vm12, %v9564_v11  ;;  %v9180_v40 = vpop.permute.xlu1 %9179  ;;  %vm9133_vm12 = vcmp.lt.s32.totalorder %v19401_v55, 256  ;;  %v12594_v11 = vld [vmem:[%s18961_s9 + $0x110] sm:$0xff]  }
 0x991   :  { %v9181_v8 = vrot.slane %v9180_v40, 7  ;;  %vm18781_vm2 = vmand %vm9132_vm11, %vm9133_vm12 }
 0x992   :  { %v9118_v20 = vsel %vm83_vm6, %v9117_v19, %v9116_v44 }
 0x993   :  { %9124 = vst.msk [vmem:[#allocation4 + $0x10] ss:$8 sm:$0x3] %vm18757_vm10, %v9118_v20  ;;  %v9254_v46 = vpop.permute.xlu0 %9253  ;;  %v9182_v45 = vsel %vm83_vm6, %v9181_v8, %v9180_v40  ;;  %v12596_v20 = vld [vmem:[%s18961_s9 + $0x148] sm:$0xff]  }
 0x994   :  { %v9255_v49 = vrot.slane %v9254_v46, 7  ;;  %9185 = vst.msk [vmem:[#allocation4 + $0x11] ss:$8 sm:$0x3] %vm18757_vm10, %v9182_v45  ;;  %v9321_v7 = vpop.permute.xlu1 %9320  ;;  %v12598_v8 = vld [vmem:[%s18961_s9 + $0x108] sm:$0xff]   ;;  %v12602_v45 = vld [vmem:[%s18961_s9 + $0x100] sm:$0xff]  }
 0x995   :  { %v9322_v9 = vrot.slane %v9321_v7, 7 }
 0x996   :  { %v9256_v15 = vsel %vm83_vm6, %v9255_v49, %v9254_v46  ;;  %v12600_v46 = vld [vmem:[%s18961_s9 + $0x140] sm:$0xff]  }
 0x997   :  { %9259 = vst.msk [vmem:[#allocation4 + $0x12] ss:$8 sm:$0x3] %vm18757_vm10, %v9256_v15  ;;  %v9379_v51 = vpop.permute.xlu0 %9378  ;;  %v9323_v4 = vsel %vm83_vm6, %v9322_v9, %v9321_v7  ;;  %v9600_v37 = vld [vmem:[#allocation4 + $0x8] sm:$0xff] }
 0x998   :  { %v9380_v35 = vrot.slane %v9379_v51, 7  ;;  %9326 = vst.msk [vmem:[#allocation4 + $0x13] ss:$8 sm:$0x3] %vm18757_vm10, %v9323_v4  ;;  %v9205_v57 = vpop.permute.xlu1 %9204  ;;  %v9607_v18 = vpack.c.bf16 %v9600_v37, %v9600_v37  ;;  %v9605_v37 = vld [vmem:[#allocation4 + $0x30] sm:$0xff] }
 0x999   :  { %v9206_v55 = vrot.slane %v9205_v57, 7  ;;  %v9612_v32 = vpack.c.bf16 %v9605_v37, %v9605_v37 }
 0x99a   :  { %v9381_v0 = vsel %vm83_vm6, %v9380_v35, %v9379_v51  ;;  %10055 = vmatprep.mubr.bf16.mxu1 %v9607_v18  ;;  %v12605_v35 = vld [vmem:[%s18961_s9 + $0x180] sm:$0xff]   ;;  %v12607_v18 = vld [vmem:[%s18962_s11 + $0x30] sm:$0xff]  }
 0x99b   :  { %9384 = vst.msk [vmem:[#allocation4 + $0x14] ss:$8 sm:$0x3] %vm18757_vm10, %v9381_v0  ;;  %v9128_v22 = vpop.permute.xlu0 %9127  ;;  %v9207_v39 = vsel %vm55_vm1, %v9206_v55, %v9205_v57  ;;  %10056 = vmatmul.mubr.bf16.vlgmr.msra.gmra.mxu1 %v9606_v36  ;;  %v12606_v57 = vld [vmem:[%s18962_s11 + $0x38] sm:$0xff]   ;;  %v12609_v0 = vld [vmem:[%s18962_s11 + $0x20] sm:$0xff]   ;;  %v12611_v55 = vld [vmem:[%s18962_s11 + $0x10] sm:$0xff]  }
 0x99c   :  { %v9129_v30 = vrot.slane %v9128_v22, 7  ;;  %9210 = vst.msk [vmem:[#allocation4 + $0x19] ss:$8 sm:$0x3] %vm18781_vm2, %v9207_v39  ;;  %11631 = vmatpush3.bf16.msra.mxu1 %v12574_v43  ;;  %v9330_v5 = vpop.permute.xlu1 %9329  ;;  %10135 = vmatprep.mubr.bf16.mxu1 %v9611_v47  ;;  %v12608_v43 = vld [vmem:[%s18962_s11 + $0x28] sm:$0xff]   ;;  %v12615_v47 = vld [vmem:[%s18963_s13 + $0x30] sm:$0xff]  }
 0x99d   :  { %v9331_v53 = vrot.slane %v9330_v5, 7  ;;  %11632 = vmatprep.subr.bf16.mxu1 %v12576_v16  ;;  %v12612_v36 = vld [vmem:[%s18962_s11 + $0x8] sm:$0xff]   ;;  %v12613_v16 = vld [vmem:[%s18962_s11] sm:$0xff]  }
 0x99e   :  { %v9130_v2 = vsel %vm55_vm1, %v9129_v30, %v9128_v22  ;;  %v12614_v22 = vld [vmem:[%s18963_s13 + $0x38] sm:$0xff]   ;;  %v12616_v39 = vld [vmem:[%s18963_s13 + $0x28] sm:$0xff]   ;;  %v12617_v30 = vld [vmem:[%s18963_s13 + $0x20] sm:$0xff]  }
 0x99f   :  { %9136 = vst.msk [vmem:[#allocation4 + $0x18] ss:$8 sm:$0x3] %vm18781_vm2, %v9130_v2  ;;  %v9270_v17 = vpop.permute.xlu0 %9269  ;;  %v9332_v62 = vsel %vm55_vm1, %v9331_v53, %v9330_v5  ;;  %v12618_v5 = vld [vmem:[%s18963_s13 + $0x18] sm:$0xff]  }
 0x9a0   :  { %v9271_v61 = vrot.slane %v9270_v17, 7  ;;  %9335 = vst.msk [vmem:[#allocation4 + $0x1b] ss:$8 sm:$0x3] %vm18781_vm2, %v9332_v62  ;;  %11633 = vmatpush3.bf16.msra.mxu1 %v12578_v54  ;;  %v9462_v41 = vpop.permute.xlu1 %9461  ;;  %v12619_v54 = vld [vmem:[%s18963_s13 + $0x10] sm:$0xff]  }
 0x9a1   :  { %11634 = vmatprep.subr.bf16.mxu1 %v12580_v31  ;;  %v9463_v13 = vrot.slane %v9462_v41, 7 }
 0x9a2   :  { %v9272_v63 = vsel %vm55_vm1, %v9271_v61, %v9270_v17  ;;  %v11321_v61 = vld [vmem:[%s18964_s10] ss:$0 sm:$0xff] }
 0x9a3   :  { %9275 = vst.msk [vmem:[#allocation4 + $0x1a] ss:$8 sm:$0x3] %vm18781_vm2, %v9272_v63  ;;  %v9388_v1 = vpop.permute.xlu0 %9387  ;;  %v9464_v14 = vsel %vm55_vm1, %v9463_v13, %v9462_v41 }
 0x9a4   :  { %v9389_v42 = vrot.slane %v9388_v1, 7  ;;  %11635 = vmatpush3.bf16.msra.mxu1 %v12582_v33  ;;  %v9439_v52 = vpop.permute.xlu1 %9438 }
 0x9a5   :  { %v9440_v38 = vrot.slane %v9439_v52, 7  ;;  %11636 = vmatprep.subr.bf16.mxu1 %v12584_v24 }
 0x9a6   :  { %v9390_v3 = vsel %vm55_vm1, %v9389_v42, %v9388_v1 }
 0x9a7   :  { %9393 = vst.msk [vmem:[#allocation4 + $0x1c] ss:$8 sm:$0x3] %vm18781_vm2, %v9390_v3  ;;  %v9513_v12 = vpop.permute.xlu0 %9512  ;;  %v9441_v10 = vsel %vm83_vm6, %v9440_v38, %v9439_v52 }
 0x9a8   :  { %v9514_v58 = vrot.slane %v9513_v12, 7  ;;  %9444 = vst.msk [vmem:[#allocation4 + $0x15] ss:$8 sm:$0x3] %vm18757_vm10, %v9441_v10  ;;  %11637 = vmatpush3.bf16.msra.mxu1 %v12586_v48  ;;  %v9578_v60 = vpop.permute.xlu1 %9577 }
 0x9a9   :  { %9467 = vst.msk [vmem:[#allocation4 + $0x1d] ss:$8 sm:$0x3] %vm18781_vm2, %v9464_v14  ;;  %v9579_v6 = vrot.slane %v9578_v60, 7  ;;  %11638 = vmatprep.subr.bf16.mxu1 %v12588_v21 }
 0x9aa   :  { %v9515_v56 = vsel %vm83_vm6, %v9514_v58, %v9513_v12 }
 0x9ab   :  { %9518 = vst.msk [vmem:[#allocation4 + $0x16] ss:$8 sm:$0x3] %vm18757_vm10, %v9515_v56  ;;  %v9529_v27 = vpop.permute.xlu0 %9528  ;;  %v9580_v29 = vsel %vm83_vm6, %v9579_v6, %v9578_v60 }
 0x9ac   :  { %v9530_v25 = vrot.slane %v9529_v27, 7  ;;  %9583 = vst.msk [vmem:[#allocation4 + $0x17] ss:$8 sm:$0x3] %vm18757_vm10, %v9580_v29  ;;  %11639 = vmatpush3.bf16.msra.mxu1 %v12590_v59  ;;  %v9587_v44 = vpop.permute.xlu1 %9586  ;;  %v11373_v29 = vld [vmem:[%s18965_s12] ss:$0 sm:$0xff] }
 0x9ad   :  { %v9588_v19 = vrot.slane %v9587_v44, 7  ;;  %11640 = vmatprep.subr.bf16.mxu1 %v12592_v28  ;;  %v12620_v28 = vld [vmem:[%s18963_s13 + $0x8] sm:$0xff]  }
 0x9ae   :  { %v9531_v40 = vsel %vm55_vm1, %v9530_v25, %v9529_v27  ;;  %v12621_v27 = vld [vmem:[%s18963_s13] sm:$0xff]  }
 0x9af   :  { %9534 = vst.msk [vmem:[#allocation4 + $0x1e] ss:$8 sm:$0x3] %vm18781_vm2, %v9531_v40  ;;  %v9589_v23 = vsel %vm55_vm1, %v9588_v19, %v9587_v44  ;;  %vm19419_vm1 = vmmov %vm19409_vm3 }
 0x9b0   :  { %9592 = vst.msk [vmem:[#allocation4 + $0x1f] ss:$8 sm:$0x3] %vm18781_vm2, %v9589_v23  ;;  %11641 = vmatpush3.bf16.msra.mxu1 %v12594_v11 }
 0x9b1   :  { %11642 = vmatprep.subr.bf16.mxu1 %v12596_v20 }
 0x9b3   :  { %v9601_v49 = vld [vmem:[#allocation4 + $0x10] sm:$0xff] }
 0x9b4   :  { %11643 = vmatpush3.bf16.msra.mxu1 %v12598_v8  ;;  %v9608_v4 = vpack.c.bf16 %v9601_v49, %v9601_v49  ;;  %v11382_v8 = vld [vmem:[%s18966_s14] ss:$0 sm:$0xff] }
 0x9b5   :  { %11644 = vmatprep.subr.bf16.mxu1 %v12600_v46 }
 0x9b7   :  { %v9602_v7 = vld [vmem:[#allocation4 + $0x18] sm:$0xff]  ;;  %v9603_v15 = vld [vmem:[#allocation4 + $0x20] sm:$0xff] }
 0x9b8   :  { %11645 = vmatpush3.bf16.msra.mxu1 %v12602_v45  ;;  %v9609_v9 = vpack.c.bf16 %v9602_v7, %v9602_v7  ;;  %v9610_v51 = vpack.c.bf16 %v9603_v15, %v9603_v15 }
 0x9b9   :  { %11733 = vmatprep.subr.bf16.mxu1 %v19404_v26 }
 0x9ba   :  { %10095 = vmatprep.mubr.bf16.mxu0 %v9609_v9 }
 0x9bb   :  { %10136 = vmatmul.mubr.bf16.vlgmr.msra.gmra.mxu1 %v9610_v51  ;;  %10096 = vmatmul.mubr.bf16.vlgmr.msra.gmra.mxu0 %v9608_v4 }
 0x9bc   :  { %11706 = vmatpush3.bf16.msra.mxu0 %v12604_v50  ;;  %11709 = vmatprep.mubr.msk.bf16.mxu0 %vm12628_vm9, %v19404_v26 }
 0x9bd   :  { %11707 = vmatprep.subr.bf16.mxu0 %v19404_v26  ;;  %11749 = vmatprep.mubr.msk.bf16.mxu1 %vm12628_vm9, %v19404_v26 }
 0x9be   :  { %11734 = vmatpush3.bf16.msra.mxu1 %v12614_v22 }
 0x9bf   :  { %11735 = vmatprep.subr.bf16.mxu1 %v19404_v26 }
 0x9c0   :  { %11708 = vmatpush3.bf16.msra.mxu0 %v12605_v35 }
 0x9c1   :  { %11713 = vmatprep.subr.bf16.mxu0 %v19404_v26 }
 0x9c2   :  { %11736 = vmatpush3.bf16.msra.mxu1 %v12615_v47 }
 0x9c3   :  { %11710 = vmatmul.mubr.msk.bf16.vlgmr.msra.gmra.mxu0 %vm19419_vm1, %v9612_v32  ;;  %11737 = vmatprep.subr.bf16.mxu1 %v19404_v26 }
 0x9c4   :  { %11729 = vmatprep.mubr.msk.bf16.mxu0 %vm12628_vm9, %v19404_v26  ;;  %11714 = vmatpush3.bf16.msra.mxu0 %v12606_v57 }
 0x9c5   :  { %11715 = vmatprep.subr.bf16.mxu0 %v19404_v26 }
 0x9c6   :  { %11738 = vmatpush3.bf16.msra.mxu1 %v12616_v39 }
 0x9c7   :  { %11739 = vmatprep.subr.bf16.mxu1 %v19404_v26 }
 0x9c8   :  { %11716 = vmatpush3.bf16.msra.mxu0 %v12607_v18 }
 0x9c9   :  { %11717 = vmatprep.subr.bf16.mxu0 %v19404_v26 }
 0x9ca   :  { %11740 = vmatpush3.bf16.msra.mxu1 %v12617_v30 }
 0x9cb   :  { %11741 = vmatprep.subr.bf16.mxu1 %v19404_v26 }
 0x9cc   :  { %11718 = vmatpush3.bf16.msra.mxu0 %v12608_v43 }
 0x9cd   :  { %11719 = vmatprep.subr.bf16.mxu0 %v19404_v26 }
 0x9ce   :  { %11742 = vmatpush3.bf16.msra.mxu1 %v12618_v5 }
 0x9cf   :  { %11743 = vmatprep.subr.bf16.mxu1 %v19404_v26 }
 0x9d0   :  { %11720 = vmatpush3.bf16.msra.mxu0 %v12609_v0 }
 0x9d1   :  { %11721 = vmatprep.subr.bf16.mxu0 %v19404_v26 }
 0x9d2   :  { %11744 = vmatpush3.bf16.msra.mxu1 %v12619_v54 }
 0x9d3   :  { %11745 = vmatprep.subr.bf16.mxu1 %v19404_v26 }
 0x9d4   :  { %11722 = vmatpush3.bf16.msra.mxu0 %v12610_v34 }
 0x9d5   :  { %11723 = vmatprep.subr.bf16.mxu0 %v19404_v26 }
 0x9d6   :  { %11746 = vmatpush3.bf16.msra.mxu1 %v12620_v28 }
 0x9d7   :  { %11747 = vmatprep.subr.bf16.mxu1 %v19404_v26 }
 0x9d8   :  { %11724 = vmatpush3.bf16.msra.mxu0 %v12611_v55 }
 0x9d9   :  { %11725 = vmatprep.subr.bf16.mxu0 %v19404_v26 }
 0x9da   :  { %11748 = vmatpush3.bf16.msra.mxu1 %v12621_v27 }
 0x9dc   :  { %11726 = vmatpush3.bf16.msra.mxu0 %v12612_v36 }
 0x9dd   :  { %11727 = vmatprep.subr.bf16.mxu0 %v19404_v26 }
 0x9e0   :  { %11728 = vmatpush3.bf16.msra.mxu0 %v12613_v16 }
 0xa5b   :  { %v11602_v2 = vpop.f32.mrf.mxu1 }
 0xa5d   :  { %v11603_v53 = vpop.f32.mrf.mxu1 }
 0xa5e   :  { %v11604_v62 = vadd.f32 %v11603_v53, %v11602_v2 }
 0xa5f   :  { %v11605_v31 = vpop.f32.mrf.mxu1 }
 0xa60   :  { %v10058_v1 = vadd.f32 %v11604_v62, %v11321_v61 }
 0xa61   :  { %v11606_v17 = vpop.f32.mrf.mxu1 }
 0xa7b   :  { %v11646_v41 = vpop.f32.mrf.mxu1  ;;  %v11624_v33 = vpop.f32.mrf.mxu0 }
 0xa7d   :  { %v11647_v63 = vpop.f32.mrf.mxu1  ;;  %v11625_v24 = vpop.f32.mrf.mxu0 }
 0xa7e   :  { %v11626_v42 = vadd.f32 %v11625_v24, %v11624_v33  ;;  %v11648_v48 = vadd.f32 %v11647_v63, %v11646_v41 }
 0xa7f   :  { %v11649_v13 = vpop.f32.mrf.mxu1  ;;  %v11627_v52 = vpop.f32.mrf.mxu0 }
 0xa80   :  { %v10098_v3 = vadd.f32 %v11626_v42, %v10058_v1 }
 0xa81   :  { %v11650_v38 = vpop.f32.mrf.mxu1  ;;  %v11628_v21 = vpop.f32.mrf.mxu0 }
 0xa82   :  { %v10138_v12 = vadd.f32 %v11648_v48, %v10098_v3 }
 0xa83   :  { %v10177_v10 = vpop.f32.mrf.mxu0 }
 0xa84   :  { %v10178_v58 = vadd.f32 %v10177_v10, %v10138_v12 }
 0xa85   :  { %v11711_v14 = vpop.f32.mrf.mxu0 }
 0xa86   :  { %v10183_v60 = vmax.f32 %v10178_v58, 0.0 }
 0xa87   :  { %v10180_v59 = vpop.f32.mrf.mxu0 }
 0xa88   :  { %v10184_v6 = vpack.c.bf16 %v10183_v60, %v10183_v60 }
 0xa89   :  { %v11712_v56 = vpop.f32.mrf.mxu0 }
 0xa8a   :  { %11730 = vmatmul.mubr.bf16.vlgmr.msra.gmra.mxu0 %v10184_v6 }
 0xb4a   :  { %v10290_v25 = vpop.f32.mrf.mxu0 }
 0xb4b   :  { %v10291_v44 = vadd.f32 %v11373_v29, %v10290_v25 }
 0xb4c   :  { %v11731_v11 = vpop.f32.mrf.mxu0 }
 0xb4d   :  { %v10296_v19 = vmax.f32 %v10291_v44, 0.0 }
 0xb4e   :  { %v10293_v40 = vpop.f32.mrf.mxu0 }
 0xb4f   :  { %v10297_v20 = vpack.c.bf16 %v10296_v19, %v10296_v19 }
 0xb50   :  { %v11732_v23 = vpop.f32.mrf.mxu0 }
 0xb51   :  { %11750 = vmatmul.mubr.bf16.vlgmr.msra.gmra.mxu1 %v10297_v20 }
 0xc11   :  { %v10403_v46 = vpop.f32.mrf.mxu1 }
 0xc12   :  { %v10404_v45 = vadd.f32 %v11382_v8, %v10403_v46 }
 0xc13   :  { %v11751_v26 = vpop.f32.mrf.mxu1 }
 0xc14   :  { %10409 = vst [vmem:[%s18967_s15] sm:$0xff] %v10404_v45 }
 0xc15   :  { %v10406_v49 = vpop.f32.mrf.mxu1 }
 0xc17   :  { %v11752_v7 = vpop.f32.mrf.mxu1 }

</bundles_post_ra>
